<compile_context>
chip_gen: v5e
topology: v5e:2x2
jax: 0.10.0
libtpu: 0.0.40
codegen_flags: <defaults>
</compile_context>

<pallas_src>
import numpy as np
import jax
import jax.numpy as jnp
from jax.experimental import pallas as pl
from jax.experimental.pallas import tpu as pltpu

EMBEDDING_DIM = 100
GENERATOR_OUTPUT_IMAGE_SHAPE = 33 * 3   # 99
N_CLASSES = 3
LEAKY_SLOPE = 0.25
K_IN = 128                              # fused layer-1 contraction (99 + 3 + 25 pad)


def _leaky_relu(x, slope=LEAKY_SLOPE):
    return jnp.where(x > 0, x, slope * x)


def _round_up(x, m):
    return ((x + m - 1) // m) * m


# ---------------------------------------------------------------------------
# Kernel
# ---------------------------------------------------------------------------
def _disc_kernel(x_ref,
                 w1_ref, b1_ref,
                 w2_ref, b2_ref,
                 w3_ref, b3_ref,
                 w4_ref, b4_ref,
                 out_ref):
    # Layer 1: fused Linear(198 -> 1024) (coords + label branch) as a single
    # K=128 bf16 MXU matmul with f32 accumulation; b1 added in f32 (exact).
    h = jnp.dot(x_ref[...], w1_ref[...],
                preferred_element_type=jnp.float32) + b1_ref[...]
    h = _leaky_relu(h)

    # Layer 2: Linear(1024 -> 512)
    h = jnp.dot(h.astype(jnp.bfloat16), w2_ref[...],
                preferred_element_type=jnp.float32) + b2_ref[...]
    h = _leaky_relu(h)

    # Layer 3: Linear(512 -> 256)
    h = jnp.dot(h.astype(jnp.bfloat16), w3_ref[...],
                preferred_element_type=jnp.float32) + b3_ref[...]
    h = _leaky_relu(h)

    # Layer 4: Linear(256 -> 1) + Sigmoid, producing a lane-dense (1, TB) row:
    # w4 (1, 256) f32 @ h.T (256, TB) f32 -> (1, TB), then sigmoid on dense vregs.
    logit = jnp.dot(w4_ref[...], h.T,
                    preferred_element_type=jnp.float32) + b4_ref[...]
    out_ref[...] = jax.nn.sigmoid(logit)


# ---------------------------------------------------------------------------
# Parameters
# ---------------------------------------------------------------------------
def init_params(key):
    """Deterministic synthetic parameters (PyTorch-like uniform fan-in init)."""
    ks = jax.random.split(key, 12)

    def lin(kw, kb, fan_in, fan_out):
        bound = 1.0 / np.sqrt(fan_in)
        w = jax.random.uniform(kw, (fan_in, fan_out), jnp.float32, -bound, bound)
        b = jax.random.uniform(kb, (1, fan_out), jnp.float32, -bound, bound)
        return w, b

    params = {}
    params["emb_table"] = jax.random.normal(ks[0], (N_CLASSES, EMBEDDING_DIM),
                                            jnp.float32)
    params["w_lab"], params["b_lab"] = lin(ks[1], ks[2], EMBEDDING_DIM,
                                           GENERATOR_OUTPUT_IMAGE_SHAPE)
    params["w1"], params["b1"] = lin(ks[3], ks[4],
                                     GENERATOR_OUTPUT_IMAGE_SHAPE * 2, 1024)
    params["w2"], params["b2"] = lin(ks[5], ks[6], 1024, 512)
    params["w3"], params["b3"] = lin(ks[7], ks[8], 512, 256)
    params["w4"], params["b4"] = lin(ks[9], ks[10], 256, 1)
    return params


def prepare_params(params):
    """One-time (per weight update) preprocessing, hoisted out of the forward.

    * Row-permute W1 to undo the cat+flatten interleave (exact) and split it
      into coordinate / label halves.
    * Fold Embedding + Linear(100->99) + W1_label into a (3, 1024) per-class
      contribution (exact in f32, then quantized to bf16 like the rest of W1).
    * Pack [W1_coord(99); T_label(3); zeros(26)] into a single (128, 1024)
      bf16 layer-1 weight; keep b1 as a separate f32 bias.
    * Cast the large matmul weights to bf16; keep w4 (256 values) in f32.
    """
    w1 = params["w1"]                                             # (198, 1024)
    coord_idx = (np.arange(33)[:, None] * 6 + np.arange(3)[None, :]).reshape(-1)
    label_idx = coord_idx + 3
    w1c = w1[coord_idx]                                           # (99, 1024)
    w1l = w1[label_idx]                                           # (99, 1024)

    lab_out = params["emb_table"] @ params["w_lab"] + params["b_lab"]   # (3, 99)
    t_label = lab_out @ w1l                                             # (3, 1024)

    w1_fused = jnp.concatenate(
        [w1c, t_label,
         jnp.zeros((K_IN - GENERATOR_OUTPUT_IMAGE_SHAPE - N_CLASSES, 1024),
                   jnp.float32)],
        axis=0)                                                   # (128, 1024)

    return {
        "w1": w1_fused.astype(jnp.bfloat16),             # (128, 1024)
        "b1": params["b1"],                              # (1, 1024) f32
        "w2": params["w2"].astype(jnp.bfloat16),         # (1024, 512)
        "b2": params["b2"],                              # (1, 512) f32
        "w3": params["w3"].astype(jnp.bfloat16),         # (512, 256)
        "b3": params["b3"],                              # (1, 256) f32
        "w4_row": params["w4"].T.astype(jnp.float32),    # (1, 256) f32
        "b4": params["b4"],                              # (1, 1) f32
    }


# ---------------------------------------------------------------------------
# Forward
# ---------------------------------------------------------------------------
@jax.jit
def discriminator_forward(coordinates, label, prepared):
    """coordinates: (B, 33, 3) float, label: (B,) int -> (B, 1) float32."""
    B = coordinates.shape[0]
    coord = coordinates.reshape(B, GENERATOR_OUTPUT_IMAGE_SHAPE).astype(jnp.float32)
    onehot = jax.nn.one_hot(label, N_CLASSES, dtype=jnp.float32)      # (B, 3)
    x = jnp.concatenate([coord, onehot], axis=1)                      # (B, 102)

    # Batch tile: multiple of 128 (MXU M / lane-dense output / native
    # transposes), capped at 512 (amortize per-step overhead on v5e/v6e),
    # ~ceil(B/2) so B > 128 gives >= 2 "parallel" tiles for v7x's 2 TCs.
    TB = max(128, min(512, _round_up((B + 1) // 2, 128)))
    B_pad = _round_up(B, TB)
    x = jnp.pad(x, ((0, B_pad - B), (0, K_IN - x.shape[1]))).astype(jnp.bfloat16)
    n_tiles = B_pad // TB

    def wspec(shape):
        # Weights / biases: DMA'd once, resident across all batch tiles.
        return pl.BlockSpec(shape, lambda i: (0, 0))

    grid_spec = pltpu.PrefetchScalarGridSpec(
        num_scalar_prefetch=0,
        grid=(n_tiles,),
        in_specs=[
            pl.BlockSpec((TB, K_IN), lambda i: (i, 0)),    # fused input (bf16)
            wspec((K_IN, 1024)),                           # w1 fused (bf16)
            wspec((1, 1024)),                              # b1 (f32)
            wspec((1024, 512)),                            # w2 (bf16)
            wspec((1, 512)),                               # b2
            wspec((512, 256)),                             # w3 (bf16)
            wspec((1, 256)),                               # b3
            wspec((1, 256)),                               # w4 row (f32)
            wspec((1, 1)),                                 # b4
        ],
        out_specs=pl.BlockSpec((1, TB), lambda i: (0, i)), # lane-dense row
    )

    out = pl.pallas_call(
        _disc_kernel,
        out_shape=jax.ShapeDtypeStruct((1, B_pad), jnp.float32),
        grid_spec=grid_spec,
        compiler_params=pltpu.CompilerParams(
            dimension_semantics=("parallel",),          # dual-TC split on v7x
            vmem_limit_bytes=32 * 1024 * 1024,          # explicit, v7x-safe
        ),
    )(x,
      prepared["w1"], prepared["b1"],
      prepared["w2"], prepared["b2"],
      prepared["w3"], prepared["b3"],
      prepared["w4_row"], prepared["b4"])

    # Padded batch rows carry bias-derived garbage; keep this slice.
    return out[0, :B].reshape(B, 1)


# ---------------------------------------------------------------------------
# References
# ---------------------------------------------------------------------------
def _reference_forward(coordinates, label, params):
    """Pure-JAX f32 reference mirroring the PyTorch forward exactly."""
    B = coordinates.shape[0]
    lab_emb = jnp.take(params["emb_table"], label, axis=0)
    lab_out = lab_emb @ params["w_lab"] + params["b_lab"]
    lab_out = lab_out.reshape(B, 33, 3)
    concat = jnp.concatenate([coordinates.astype(jnp.float32), lab_out], axis=2)
    x = concat.reshape(B, -1)
    x = _leaky_relu(x @ params["w1"] + params["b1"])
    x = _leaky_relu(x @ params["w2"] + params["b2"])
    x = _leaky_relu(x @ params["w3"] + params["b3"])
    return jax.nn.sigmoid(x @ params["w4"] + params["b4"])


def _bf16_reference(coordinates, label, prepared):
    """Pure-JAX reference using the same bf16 folding / fusion as the kernel."""
    B = coordinates.shape[0]
    coord = coordinates.reshape(B, GENERATOR_OUTPUT_IMAGE_SHAPE).astype(jnp.float32)
    oh = jax.nn.one_hot(label, N_CLASSES, dtype=jnp.float32)
    x = jnp.pad(jnp.concatenate([coord, oh], axis=1),
                ((0, 0), (0, K_IN - GENERATOR_OUTPUT_IMAGE_SHAPE - N_CLASSES)))
    x = x.astype(jnp.bfloat16)
    h = jnp.dot(x, prepared["w1"],
                preferred_element_type=jnp.float32) + prepared["b1"]
    h = _leaky_relu(h)
    h = jnp.dot(h.astype(jnp.bfloat16), prepared["w2"],
                preferred_element_type=jnp.float32) + prepared["b2"]
    h = _leaky_relu(h)
    h = jnp.dot(h.astype(jnp.bfloat16), prepared["w3"],
                preferred_element_type=jnp.float32) + prepared["b3"]
    h = _leaky_relu(h)
    logit = jnp.sum(h * prepared["w4_row"], axis=-1, keepdims=True) + prepared["b4"]
    return jax.nn.sigmoid(logit)


if __name__ == "__main__":
    key = jax.random.PRNGKey(0)
    k_coord, k_label, k_params = jax.random.split(key, 3)

    B = 4
    coordinates = jax.random.normal(k_coord, (B, 33, 3), jnp.float32)
    label = jax.random.randint(k_label, (B,), 0, N_CLASSES, dtype=jnp.int32)

    params = init_params(k_params)
    prepared = prepare_params(params)   # hoisted: runs once, not per forward

    out = jax.block_until_ready(discriminator_forward(coordinates, label, prepared))
    assert out.shape == (B, 1)

    ref_bf16 = jax.block_until_ready(_bf16_reference(coordinates, label, prepared))
    ref_f32 = jax.block_until_ready(_reference_forward(coordinates, label, params))

    # Tight check against a bf16-matched reference (validates kernel plumbing;
    # slack covers MXU-vs-XLA accumulation order and the f32 final matmul),
    # looser check against the exact f32 PyTorch-equivalent reference
    # (validates semantics; slack is the bf16 weight quantization).
    assert np.allclose(np.asarray(out), np.asarray(ref_bf16), atol=2e-3, rtol=2e-3)
    assert np.allclose(np.asarray(out), np.asarray(ref_f32), atol=5e-2, rtol=5e-2)

    print("KERNEL_OK")
</pallas_src>

<mosaic_0001>
module attributes {stable_mosaic.version = 11 : i64} {
  func.func @_disc_kernel(%arg0: i32, %arg1: memref<128x128xbf16, #tpu.memory_space<vmem>>, %arg2: memref<128x1024xbf16, #tpu.memory_space<vmem>>, %arg3: memref<1x1024xf32, #tpu.memory_space<vmem>>, %arg4: memref<1024x512xbf16, #tpu.memory_space<vmem>>, %arg5: memref<1x512xf32, #tpu.memory_space<vmem>>, %arg6: memref<512x256xbf16, #tpu.memory_space<vmem>>, %arg7: memref<1x256xf32, #tpu.memory_space<vmem>>, %arg8: memref<1x256xf32, #tpu.memory_space<vmem>>, %arg9: memref<1x1xf32, #tpu.memory_space<vmem>>, %arg10: memref<1x128xf32, #tpu.memory_space<vmem>>) attributes {dimension_semantics = [#tpu.dimension_semantics<parallel>], iteration_bounds = array<i64: 1>, scalar_prefetch = 0 : i64, scratch_operands = 0 : i64, tpu.core_type = #tpu.core_type<tc>, window_params = [{transform_indices = @transform_0, window_bounds = array<i64: 128, 128>}, {pipeline_mode = #tpu.pipeline_mode<synchronous>, transform_indices = @transform_1, window_bounds = array<i64: 128, 1024>}, {pipeline_mode = #tpu.pipeline_mode<synchronous>, transform_indices = @transform_2, window_bounds = array<i64: 1, 1024>}, {pipeline_mode = #tpu.pipeline_mode<synchronous>, transform_indices = @transform_3, window_bounds = array<i64: 1024, 512>}, {pipeline_mode = #tpu.pipeline_mode<synchronous>, transform_indices = @transform_4, window_bounds = array<i64: 1, 512>}, {pipeline_mode = #tpu.pipeline_mode<synchronous>, transform_indices = @transform_5, window_bounds = array<i64: 512, 256>}, {pipeline_mode = #tpu.pipeline_mode<synchronous>, transform_indices = @transform_6, window_bounds = array<i64: 1, 256>}, {pipeline_mode = #tpu.pipeline_mode<synchronous>, transform_indices = @transform_7, window_bounds = array<i64: 1, 256>}, {pipeline_mode = #tpu.pipeline_mode<synchronous>, transform_indices = @transform_8, window_bounds = array<i64: 1, 1>}, {transform_indices = @transform_9, window_bounds = array<i64: 1, 128>}]} {
    %c0 = arith.constant 0 : index
    %c0_0 = arith.constant 0 : index
    %0 = vector.load %arg1[%c0, %c0_0] : memref<128x128xbf16, #tpu.memory_space<vmem>>, vector<128x128xbf16>
    %c0_1 = arith.constant 0 : index
    %c0_2 = arith.constant 0 : index
    %1 = vector.load %arg2[%c0_1, %c0_2] : memref<128x1024xbf16, #tpu.memory_space<vmem>>, vector<128x1024xbf16>
    %cst = arith.constant dense<0.000000e+00> : vector<128x1024xf32>
    %2 = tpu.matmul %0, %1, %cst {dimension_numbers = #tpu.dot_dimension_numbers<[1], [0], [0], [1], [0, 0, 1, 1], [], []>} : vector<128x128xbf16>, vector<128x1024xbf16>, vector<128x1024xf32> -> vector<128x1024xf32>
    %c0_3 = arith.constant 0 : index
    %c0_4 = arith.constant 0 : index
    %3 = vector.load %arg3[%c0_3, %c0_4] : memref<1x1024xf32, #tpu.memory_space<vmem>>, vector<1x1024xf32>
    %4 = vector.broadcast %3 : vector<1x1024xf32> to vector<128x1024xf32>
    %5 = arith.addf %2, %4 : vector<128x1024xf32>
    %cst_5 = arith.constant 0.000000e+00 : f32
    %6 = vector.broadcast %cst_5 : f32 to vector<128x1024xf32>
    %7 = arith.cmpf ogt, %5, %6 : vector<128x1024xf32>
    %cst_6 = arith.constant 2.500000e-01 : f32
    %8 = vector.broadcast %cst_6 : f32 to vector<128x1024xf32>
    %9 = arith.mulf %8, %5 : vector<128x1024xf32>
    %10 = arith.select %7, %5, %9 : vector<128x1024xi1>, vector<128x1024xf32>
    %11 = arith.truncf %10 : vector<128x1024xf32> to vector<128x1024xbf16>
    %c0_7 = arith.constant 0 : index
    %c0_8 = arith.constant 0 : index
    %12 = vector.load %arg4[%c0_7, %c0_8] : memref<1024x512xbf16, #tpu.memory_space<vmem>>, vector<1024x512xbf16>
    %cst_9 = arith.constant dense<0.000000e+00> : vector<128x512xf32>
    %13 = tpu.matmul %11, %12, %cst_9 {dimension_numbers = #tpu.dot_dimension_numbers<[1], [0], [0], [1], [0, 0, 1, 1], [], []>} : vector<128x1024xbf16>, vector<1024x512xbf16>, vector<128x512xf32> -> vector<128x512xf32>
    %c0_10 = arith.constant 0 : index
    %c0_11 = arith.constant 0 : index
    %14 = vector.load %arg5[%c0_10, %c0_11] : memref<1x512xf32, #tpu.memory_space<vmem>>, vector<1x512xf32>
    %15 = vector.broadcast %14 : vector<1x512xf32> to vector<128x512xf32>
    %16 = arith.addf %13, %15 : vector<128x512xf32>
    %cst_12 = arith.constant 0.000000e+00 : f32
    %17 = vector.broadcast %cst_12 : f32 to vector<128x512xf32>
    %18 = arith.cmpf ogt, %16, %17 : vector<128x512xf32>
    %cst_13 = arith.constant 2.500000e-01 : f32
    %19 = vector.broadcast %cst_13 : f32 to vector<128x512xf32>
    %20 = arith.mulf %19, %16 : vector<128x512xf32>
    %21 = arith.select %18, %16, %20 : vector<128x512xi1>, vector<128x512xf32>
    %22 = arith.truncf %21 : vector<128x512xf32> to vector<128x512xbf16>
    %c0_14 = arith.constant 0 : index
    %c0_15 = arith.constant 0 : index
    %23 = vector.load %arg6[%c0_14, %c0_15] : memref<512x256xbf16, #tpu.memory_space<vmem>>, vector<512x256xbf16>
    %cst_16 = arith.constant dense<0.000000e+00> : vector<128x256xf32>
    %24 = tpu.matmul %22, %23, %cst_16 {dimension_numbers = #tpu.dot_dimension_numbers<[1], [0], [0], [1], [0, 0, 1, 1], [], []>} : vector<128x512xbf16>, vector<512x256xbf16>, vector<128x256xf32> -> vector<128x256xf32>
    %c0_17 = arith.constant 0 : index
    %c0_18 = arith.constant 0 : index
    %25 = vector.load %arg7[%c0_17, %c0_18] : memref<1x256xf32, #tpu.memory_space<vmem>>, vector<1x256xf32>
    %26 = vector.broadcast %25 : vector<1x256xf32> to vector<128x256xf32>
    %27 = arith.addf %24, %26 : vector<128x256xf32>
    %cst_19 = arith.constant 0.000000e+00 : f32
    %28 = vector.broadcast %cst_19 : f32 to vector<128x256xf32>
    %29 = arith.cmpf ogt, %27, %28 : vector<128x256xf32>
    %cst_20 = arith.constant 2.500000e-01 : f32
    %30 = vector.broadcast %cst_20 : f32 to vector<128x256xf32>
    %31 = arith.mulf %30, %27 : vector<128x256xf32>
    %32 = arith.select %29, %27, %31 : vector<128x256xi1>, vector<128x256xf32>
    %c0_21 = arith.constant 0 : index
    %c0_22 = arith.constant 0 : index
    %33 = vector.load %arg8[%c0_21, %c0_22] : memref<1x256xf32, #tpu.memory_space<vmem>>, vector<1x256xf32>
    %34 = tpu.transpose %32, [1, 0] : vector<128x256xf32> -> vector<256x128xf32>
    %cst_23 = arith.constant dense<0.000000e+00> : vector<1x128xf32>
    %35 = tpu.matmul %33, %34, %cst_23 {dimension_numbers = #tpu.dot_dimension_numbers<[1], [0], [0], [1], [0, 0, 1, 1], [], []>} : vector<1x256xf32>, vector<256x128xf32>, vector<1x128xf32> -> vector<1x128xf32>
    %c0_24 = arith.constant 0 : index
    %c0_25 = arith.constant 0 : index
    %36 = vector.load %arg9[%c0_24, %c0_25] : memref<1x1xf32, #tpu.memory_space<vmem>>, vector<1x1xf32>
    %37 = vector.broadcast %36 : vector<1x1xf32> to vector<1x128xf32>
    %38 = arith.addf %35, %37 : vector<1x128xf32>
    %39 = arith.negf %38 : vector<1x128xf32>
    %40 = math.exp %39 : vector<1x128xf32>
    %cst_26 = arith.constant 1.000000e+00 : f32
    %41 = vector.broadcast %cst_26 : f32 to vector<1x128xf32>
    %42 = arith.addf %41, %40 : vector<1x128xf32>
    %43 = arith.divf %41, %42 : vector<1x128xf32>
    %c0_27 = arith.constant 0 : index
    %c0_28 = arith.constant 0 : index
    %44 = vector.load %arg10[%c0_27, %c0_28] : memref<1x128xf32, #tpu.memory_space<vmem>>, vector<1x128xf32>
    tpu.vector_store %arg10[%c0_27, %c0_28], %43 {strides = array<i32>} : memref<1x128xf32, #tpu.memory_space<vmem>>, vector<1x128xf32>,
    return
  }
  func.func @transform_0(%arg0: i32) -> (i32, i32) {
    %c0_i32 = arith.constant 0 : i32
    %c0_i32_0 = arith.constant 0 : i32
    return %arg0, %c0_i32 : i32, i32
  }
  func.func @transform_1(%arg0: i32) -> (i32, i32) {
    %c0_i32 = arith.constant 0 : i32
    %c0_i32_0 = arith.constant 0 : i32
    %c0_i32_1 = arith.constant 0 : i32
    return %c0_i32, %c0_i32_0 : i32, i32
  }
  func.func @transform_2(%arg0: i32) -> (i32, i32) {
    %c0_i32 = arith.constant 0 : i32
    %c0_i32_0 = arith.constant 0 : i32
    %c0_i32_1 = arith.constant 0 : i32
    return %c0_i32, %c0_i32_0 : i32, i32
  }
  func.func @transform_3(%arg0: i32) -> (i32, i32) {
    %c0_i32 = arith.constant 0 : i32
    %c0_i32_0 = arith.constant 0 : i32
    %c0_i32_1 = arith.constant 0 : i32
    return %c0_i32, %c0_i32_0 : i32, i32
  }
  func.func @transform_4(%arg0: i32) -> (i32, i32) {
    %c0_i32 = arith.constant 0 : i32
    %c0_i32_0 = arith.constant 0 : i32
    %c0_i32_1 = arith.constant 0 : i32
    return %c0_i32, %c0_i32_0 : i32, i32
  }
  func.func @transform_5(%arg0: i32) -> (i32, i32) {
    %c0_i32 = arith.constant 0 : i32
    %c0_i32_0 = arith.constant 0 : i32
    %c0_i32_1 = arith.constant 0 : i32
    return %c0_i32, %c0_i32_0 : i32, i32
  }
  func.func @transform_6(%arg0: i32) -> (i32, i32) {
    %c0_i32 = arith.constant 0 : i32
    %c0_i32_0 = arith.constant 0 : i32
    %c0_i32_1 = arith.constant 0 : i32
    return %c0_i32, %c0_i32_0 : i32, i32
  }
  func.func @transform_7(%arg0: i32) -> (i32, i32) {
    %c0_i32 = arith.constant 0 : i32
    %c0_i32_0 = arith.constant 0 : i32
    %c0_i32_1 = arith.constant 0 : i32
    return %c0_i32, %c0_i32_0 : i32, i32
  }
  func.func @transform_8(%arg0: i32) -> (i32, i32) {
    %c0_i32 = arith.constant 0 : i32
    %c0_i32_0 = arith.constant 0 : i32
    %c0_i32_1 = arith.constant 0 : i32
    return %c0_i32, %c0_i32_0 : i32, i32
  }
  func.func @transform_9(%arg0: i32) -> (i32, i32) {
    %c0_i32 = arith.constant 0 : i32
    %c0_i32_0 = arith.constant 0 : i32
    return %c0_i32, %arg0 : i32, i32
  }
}

</mosaic_0001>

<bundles_post_ra>
// kernel: discriminator_forward.1
= control target key start
LH: loop header
LB: loop body
LE: loop exit
PB: predicated region body
PF: predicated region fallthrough
CT: control target
= control target key end

     0   :  { %s9110_s0 = inlined_call_operand.vmem [shape: bf16[128,128], index: 0, kind: input, shape index: {}]   ;;  %s9111_s1 = inlined_call_operand.hbm [shape: bf16[128,1024], index: 1, kind: input, shape index: {}]   ;;  %s9112_s2 = inlined_call_operand.vmem [shape: f32[1,1024], index: 2, kind: input, shape index: {}]   ;;  %s9113_s3 = inlined_call_operand.hbm [shape: bf16[1024,512], index: 3, kind: input, shape index: {}]   ;;  %s9114_s4 = inlined_call_operand.vmem [shape: f32[1,512], index: 4, kind: input, shape index: {}]   ;;  %s9115_s5 = inlined_call_operand.hbm [shape: bf16[512,256], index: 5, kind: input, shape index: {}]   ;;  %s9116_s6 = inlined_call_operand.vmem [shape: f32[1,256], index: 6, kind: input, shape index: {}]   ;;  %s9117_s7 = inlined_call_operand.vmem [shape: f32[1,256], index: 7, kind: input, shape index: {}]   ;;  %s9118_s8 = inlined_call_operand.<no memory space> [shape: f32[1,1], index: 8, kind: input, shape index: {}]   ;;  %s9119_s9 = inlined_call_operand.vmem [shape: f32[1,128], index: 9, kind: output, shape index: {}]  }
   0x1   :  { %v14_v0 = vstv %s9118_s8 }
   0x2   :  { %15 = vst [vmem:[#allocation2] sm:$0x1] %v14_v0 }
   0x3   :  { %16 = vsyncpa [#allocation4], 0 }
   0x4   :  { %17 = vsyncpa [#allocation6], 0  ;;  %s39_s13 = sshll.u32 %s9113_s3, 4  ;;  %s7738_s14 = smov [#allocation5]   ;;  %s40_s13 = int_to_ptr.hbm [resolvable:$true] %s39_s13 }
   0x5   :  { %s41_s15 = sshll.u32 %s7738_s14, 4  ;;  %s24_s18 = sshll.u32 %s9111_s1, 4  ;;  %s42_s15 = int_to_ptr.vmem [resolvable:$true] %s41_s15  ;;  %s25_s18 = int_to_ptr.hbm [resolvable:$true] %s24_s18 }
   0x6   :  { %s7739_s19 = smov 256   ;;  %s7740_s20 = smov 16  }
   0x7   :  { %47 = dma.hbm_to_vmem [thread:$0]  %s40_s13, 32768, %s42_s15, [#allocation6], %s7739_s19, %s7739_s19, %s7740_s20  }
   0x8   :  { %s7741_s8 = smov [#allocation3]   ;;  %s7742_s22 = smov 512  }
   0x9   :  { %s26_s21 = sshll.u32 %s7741_s8, 4  ;;  %s7743_s23 = smov 32   ;;  %s27_s21 = int_to_ptr.vmem [resolvable:$true] %s26_s21 }
   0xa   :  { %32 = dma.hbm_to_vmem [thread:$0]  %s25_s18, 8192, %s27_s21, [#allocation4], %s7742_s22, %s7742_s22, %s7743_s23  }
   0xb   :  { %s54_s25 = sshll.u32 %s9115_s5, 4  ;;  %s7744_s26 = smov [#allocation7]   ;;  %s55_s25 = int_to_ptr.hbm [resolvable:$true] %s54_s25 }
   0xc   :  { %s56_s27 = sshll.u32 %s7744_s26, 4  ;;  %s7745_s28 = smov 128   ;;  %s57_s27 = int_to_ptr.vmem [resolvable:$true] %s56_s27 }
   0xd   :  { %s7746_s1 = smov 8  }
   0xe   :  { %62 = dma.hbm_to_vmem [thread:$0]  %s55_s25, 8192, %s57_s27, [#allocation6], %s7745_s28, %s7745_s28, %s7746_s1  }
   0xf   :  { %7734 = dma.done.wait [#allocation4], 8192  }
  0x10   :  { %7735 = vsyncadd [#allocation4], 4294959104 }
  0x11   :  { %7736 = dma.done.wait [#allocation6], 40960  }
  0x12   :  { %7737 = vsyncadd [#allocation6], 4294926336  ;;  %v5940_v1 = vld [vmem:[#allocation3 + $0x1c0] sm:$0xf]  ;;  %v7315_v3 = vld [vmem:[#allocation3 + $0x1c4] sm:$0xf] }
  0x13   :  { %v7319_v2 = vld [vmem:[#allocation3 + $0x1dc] sm:$0xf0]  ;;  %v5942_v5 = vld [vmem:[#allocation3 + $0x1e0] sm:$0xf0]  ;;  %v5948_v6 = vld [vmem:[#allocation3 + $0x1c8] sm:$0xf] }
  0x14   :  { %v5941_v4 = vor.u32 %v7319_v2, %v5940_v1  ;;  %v7320_v7 = vld [vmem:[#allocation3 + $0x1e4] sm:$0xf0]  ;;  %v5945_v8 = vor.u32 %v7315_v3, %v5942_v5  ;;  %v7316_v10 = vld [vmem:[#allocation3 + $0x1cc] sm:$0xf]  ;;  %v5908_v12 = vld [vmem:[#allocation3 + $0x180] sm:$0xf] }
  0x15   :  { %v5949_v9 = vor.u32 %v7320_v7, %v5948_v6  ;;  %v5950_v11 = vld [vmem:[#allocation3 + $0x1e8] sm:$0xf0]  ;;  %v7311_v14 = vld [vmem:[#allocation3 + $0x19c] sm:$0xf0]  ;;  %v7307_v15 = vld [vmem:[#allocation3 + $0x184] sm:$0xf] }
  0x16   :  { %547 = vmatpush.bf16.msra.mxu0 %v5941_v4  ;;  %v5953_v13 = vor.u32 %v7316_v10, %v5950_v11  ;;  %v5910_v16 = vld [vmem:[#allocation3 + $0x1a0] sm:$0xf0]  ;;  %596 = vmatpush.bf16.msra.mxu1 %v5945_v8  ;;  %v5909_v17 = vor.u32 %v7311_v14, %v5908_v12  ;;  %v5916_v19 = vld [vmem:[#allocation3 + $0x188] sm:$0xf]  ;;  %v7308_v21 = vld [vmem:[#allocation3 + $0x18c] sm:$0xf] }
  0x17   :  { %645 = vmatpush.bf16.msra.mxu2 %v5949_v9  ;;  %v5913_v18 = vor.u32 %v7307_v15, %v5910_v16  ;;  %v7312_v20 = vld [vmem:[#allocation3 + $0x1a4] sm:$0xf0]  ;;  %v5918_v23 = vld [vmem:[#allocation3 + $0x1a8] sm:$0xf0]  ;;  %v5876_v24 = vld [vmem:[#allocation3 + $0x140] sm:$0xf] }
  0x18   :  { %694 = vmatpush.bf16.msra.mxu3 %v5953_v13  ;;  %v5917_v22 = vor.u32 %v7312_v20, %v5916_v19  ;;  %v7303_v25 = vld [vmem:[#allocation3 + $0x15c] sm:$0xf0]  ;;  %v5921_v26 = vor.u32 %v7308_v21, %v5918_v23  ;;  %v7299_v27 = vld [vmem:[#allocation3 + $0x144] sm:$0xf]  ;;  %v5884_v29 = vld [vmem:[#allocation3 + $0x148] sm:$0xf] }
  0x19   :  { %v5878_v28 = vld [vmem:[#allocation3 + $0x160] sm:$0xf0]  ;;  %v5877_v30 = vor.u32 %v7303_v25, %v5876_v24  ;;  %v7304_v31 = vld [vmem:[#allocation3 + $0x164] sm:$0xf0]  ;;  %v7300_v32 = vld [vmem:[#allocation3 + $0x14c] sm:$0xf] }
  0x1a   :  { %548 = vmatpush.bf16.msra.mxu0 %v5909_v17  ;;  %v5886_v33 = vld [vmem:[#allocation3 + $0x168] sm:$0xf0]  ;;  %597 = vmatpush.bf16.msra.mxu1 %v5913_v18  ;;  %v5881_v34 = vor.u32 %v7299_v27, %v5878_v28  ;;  %v5885_v35 = vor.u32 %v7304_v31, %v5884_v29  ;;  %v5844_v36 = vld [vmem:[#allocation3 + $0x100] sm:$0xf]  ;;  %v7291_v38 = vld [vmem:[#allocation3 + $0x104] sm:$0xf] }
  0x1b   :  { %646 = vmatpush.bf16.msra.mxu2 %v5917_v22  ;;  %v7295_v37 = vld [vmem:[#allocation3 + $0x11c] sm:$0xf0]  ;;  %v5889_v39 = vor.u32 %v7300_v32, %v5886_v33  ;;  %v5846_v40 = vld [vmem:[#allocation3 + $0x120] sm:$0xf0]  ;;  %v5852_v41 = vld [vmem:[#allocation3 + $0x108] sm:$0xf] }
  0x1c   :  { %695 = vmatpush.bf16.msra.mxu3 %v5921_v26  ;;  %v7296_v42 = vld [vmem:[#allocation3 + $0x124] sm:$0xf0]  ;;  %v7292_v43 = vld [vmem:[#allocation3 + $0x10c] sm:$0xf]  ;;  %v5845_v45 = vor.u32 %v7295_v37, %v5844_v36  ;;  %v5849_v46 = vor.u32 %v7291_v38, %v5846_v40  ;;  %v5812_v48 = vld [vmem:[#allocation3 + $0xc0] sm:$0xf] }
  0x1d   :  { %v5854_v44 = vld [vmem:[#allocation3 + $0x128] sm:$0xf0]  ;;  %v5853_v47 = vor.u32 %v7296_v42, %v5852_v41  ;;  %v7287_v49 = vld [vmem:[#allocation3 + $0xdc] sm:$0xf0]  ;;  %v7283_v50 = vld [vmem:[#allocation3 + $0xc4] sm:$0xf] }
  0x1e   :  { %549 = vmatpush.bf16.msra.mxu0 %v5877_v30  ;;  %598 = vmatpush.bf16.msra.mxu1 %v5881_v34  ;;  %v5857_v51 = vor.u32 %v7292_v43, %v5854_v44  ;;  %v5814_v52 = vld [vmem:[#allocation3 + $0xe0] sm:$0xf0]  ;;  %v5820_v53 = vld [vmem:[#allocation3 + $0xc8] sm:$0xf]  ;;  %v7284_v55 = vld [vmem:[#allocation3 + $0xcc] sm:$0xf]  ;;  %v5813_v57 = vor.u32 %v7287_v49, %v5812_v48 }
  0x1f   :  { %647 = vmatpush.bf16.msra.mxu2 %v5885_v35  ;;  %v7288_v54 = vld [vmem:[#allocation3 + $0xe4] sm:$0xf0]  ;;  %v5822_v56 = vld [vmem:[#allocation3 + $0xe8] sm:$0xf0]  ;;  %v5817_v58 = vor.u32 %v7283_v50, %v5814_v52  ;;  %v5780_v60 = vld [vmem:[#allocation3 + $0x80] sm:$0xf] }
  0x20   :  { %696 = vmatpush.bf16.msra.mxu3 %v5889_v39  ;;  %v5821_v59 = vor.u32 %v7288_v54, %v5820_v53  ;;  %v7279_v61 = vld [vmem:[#allocation3 + $0x9c] sm:$0xf0]  ;;  %v7275_v62 = vld [vmem:[#allocation3 + $0x84] sm:$0xf]  ;;  %v5825_v63 = vor.u32 %v7284_v55, %v5822_v56  ;;  %v5788_v1 = vld [vmem:[#allocation3 + $0x88] sm:$0xf] }
  0x21   :  { %v5782_v0 = vld [vmem:[#allocation3 + $0xa0] sm:$0xf0]  ;;  %v7280_v2 = vld [vmem:[#allocation3 + $0xa4] sm:$0xf0]  ;;  %v7276_v3 = vld [vmem:[#allocation3 + $0x8c] sm:$0xf]  ;;  %v5781_v5 = vor.u32 %v7279_v61, %v5780_v60 }
  0x22   :  { %550 = vmatpush.bf16.msra.mxu0 %v5845_v45  ;;  %599 = vmatpush.bf16.msra.mxu1 %v5849_v46  ;;  %v5790_v4 = vld [vmem:[#allocation3 + $0xa8] sm:$0xf0]  ;;  %v5785_v6 = vor.u32 %v7275_v62, %v5782_v0  ;;  %v5789_v7 = vor.u32 %v7280_v2, %v5788_v1  ;;  %v5748_v8 = vld [vmem:[#allocation3 + $0x40] sm:$0xf]  ;;  %v7267_v10 = vld [vmem:[#allocation3 + $0x44] sm:$0xf] }
  0x23   :  { %648 = vmatpush.bf16.msra.mxu2 %v5853_v47  ;;  %v7271_v9 = vld [vmem:[#allocation3 + $0x5c] sm:$0xf0]  ;;  %v5793_v11 = vor.u32 %v7276_v3, %v5790_v4  ;;  %v5750_v12 = vld [vmem:[#allocation3 + $0x60] sm:$0xf0]  ;;  %v5756_v13 = vld [vmem:[#allocation3 + $0x48] sm:$0xf] }
  0x24   :  { %697 = vmatpush.bf16.msra.mxu3 %v5857_v51  ;;  %v7272_v14 = vld [vmem:[#allocation3 + $0x64] sm:$0xf0]  ;;  %v7268_v15 = vld [vmem:[#allocation3 + $0x4c] sm:$0xf]  ;;  %v5749_v17 = vor.u32 %v7271_v9, %v5748_v8  ;;  %v5753_v18 = vor.u32 %v7267_v10, %v5750_v12  ;;  %v5716_v20 = vld [vmem:[#allocation3] sm:$0xf] }
  0x25   :  { %v5758_v16 = vld [vmem:[#allocation3 + $0x68] sm:$0xf0]  ;;  %v5757_v19 = vor.u32 %v7272_v14, %v5756_v13  ;;  %v7263_v21 = vld [vmem:[#allocation3 + $0x1c] sm:$0xf0]  ;;  %v7259_v22 = vld [vmem:[#allocation3 + $0x4] sm:$0xf] }
  0x26   :  { %551 = vmatpush.bf16.msra.mxu0 %v5813_v57  ;;  %600 = vmatpush.bf16.msra.mxu1 %v5817_v58  ;;  %v5761_v23 = vor.u32 %v7268_v15, %v5758_v16  ;;  %v5718_v24 = vld [vmem:[#allocation3 + $0x20] sm:$0xf0]  ;;  %v5724_v25 = vld [vmem:[#allocation3 + $0x8] sm:$0xf]  ;;  %v7260_v27 = vld [vmem:[#allocation3 + $0xc] sm:$0xf]  ;;  %v5717_v29 = vor.u32 %v7263_v21, %v5716_v20 }
  0x27   :  { %649 = vmatpush.bf16.msra.mxu2 %v5821_v59  ;;  %v7264_v26 = vld [vmem:[#allocation3 + $0x24] sm:$0xf0]  ;;  %v5726_v28 = vld [vmem:[#allocation3 + $0x28] sm:$0xf0]  ;;  %v5721_v30 = vor.u32 %v7259_v22, %v5718_v24  ;;  %v7813_v33 = vld [vmem:[%s9110_s0] sm:$0xff] }
  0x28   :  { %698 = vmatpush.bf16.msra.mxu3 %v5825_v63  ;;  %v5725_v31 = vor.u32 %v7264_v26, %v5724_v25  ;;  %v5729_v32 = vor.u32 %v7260_v27, %v5726_v28  ;;  %v7822_v34 = vld [vmem:[%s9110_s0 + $0x8] sm:$0xff]  ;;  %v7831_v35 = vld [vmem:[%s9110_s0 + $0x10] sm:$0xff]  ;;  %v5964_v36 = vld [vmem:[#allocation3 + $0x1d8] sm:$0xf] }
  0x29   :  { %v7322_v37 = vld [vmem:[#allocation3 + $0x1f4] sm:$0xf0]  ;;  %v5956_v38 = vld [vmem:[#allocation3 + $0x1d0] sm:$0xf]  ;;  %v7318_v41 = vld [vmem:[#allocation3 + $0x1dc] sm:$0xf] }
  0x2a   :  { %552 = vmatpush.bf16.msra.mxu0 %v5781_v5  ;;  %601 = vmatpush.bf16.msra.mxu1 %v5785_v6  ;;  %v5965_v39 = vor.u32 %v7322_v37, %v5964_v36  ;;  %v7321_v40 = vld [vmem:[#allocation3 + $0x1ec] sm:$0xf0]  ;;  %v5966_v42 = vld [vmem:[#allocation3 + $0x1f8] sm:$0xf0]  ;;  %v7317_v45 = vld [vmem:[#allocation3 + $0x1d4] sm:$0xf] }
  0x2b   :  { %650 = vmatpush.bf16.msra.mxu2 %v5789_v7  ;;  %v5957_v43 = vor.u32 %v7321_v40, %v5956_v38  ;;  %v5969_v44 = vor.u32 %v7318_v41, %v5966_v42  ;;  %v5958_v46 = vld [vmem:[#allocation3 + $0x1f0] sm:$0xf0]  ;;  %v5932_v49 = vld [vmem:[#allocation3 + $0x198] sm:$0xf]  ;;  %v5924_v51 = vld [vmem:[#allocation3 + $0x190] sm:$0xf] }
  0x2c   :  { %699 = vmatpush.bf16.msra.mxu3 %v5793_v11  ;;  %v5961_v47 = vor.u32 %v7317_v45, %v5958_v46  ;;  %v7840_v48 = vld [vmem:[%s9110_s0 + $0x18] sm:$0xff]  ;;  %v7313_v53 = vld [vmem:[#allocation3 + $0x1ac] sm:$0xf0]  ;;  %v7849_v61 = vld [vmem:[%s9110_s0 + $0x20] sm:$0xff] }
  0x2d   :  { %v7314_v50 = vld [vmem:[#allocation3 + $0x1b4] sm:$0xf0]  ;;  %v7310_v54 = vld [vmem:[#allocation3 + $0x19c] sm:$0xf]  ;;  %v5925_v56 = vor.u32 %v7313_v53, %v5924_v51  ;;  %v7309_v58 = vld [vmem:[#allocation3 + $0x194] sm:$0xf] }
  0x2e   :  { %553 = vmatpush.bf16.msra.mxu0 %v5749_v17  ;;  %602 = vmatpush.bf16.msra.mxu1 %v5753_v18  ;;  %v5933_v52 = vor.u32 %v7314_v50, %v5932_v49  ;;  %v5934_v55 = vld [vmem:[#allocation3 + $0x1b8] sm:$0xf0]  ;;  %v5926_v59 = vld [vmem:[#allocation3 + $0x1b0] sm:$0xf0]  ;;  %v5900_v62 = vld [vmem:[#allocation3 + $0x158] sm:$0xf] }
  0x2f   :  { %651 = vmatpush.bf16.msra.mxu2 %v5757_v19  ;;  %v5937_v57 = vor.u32 %v7310_v54, %v5934_v55  ;;  %v5929_v60 = vor.u32 %v7309_v58, %v5926_v59  ;;  %v7306_v63 = vld [vmem:[#allocation3 + $0x174] sm:$0xf0]  ;;  %v5892_v0 = vld [vmem:[#allocation3 + $0x150] sm:$0xf]  ;;  %v7302_v3 = vld [vmem:[#allocation3 + $0x15c] sm:$0xf] }
  0x30   :  { %700 = vmatpush.bf16.msra.mxu3 %v5761_v23  ;;  %v5901_v1 = vor.u32 %v7306_v63, %v5900_v62  ;;  %v7305_v2 = vld [vmem:[#allocation3 + $0x16c] sm:$0xf0]  ;;  %v5902_v4 = vld [vmem:[#allocation3 + $0x178] sm:$0xf0]  ;;  %v7301_v7 = vld [vmem:[#allocation3 + $0x154] sm:$0xf] }
  0x31   :  { %v5893_v5 = vor.u32 %v7305_v2, %v5892_v0  ;;  %v5905_v6 = vor.u32 %v7302_v3, %v5902_v4  ;;  %v5894_v8 = vld [vmem:[#allocation3 + $0x170] sm:$0xf0]  ;;  %v5860_v9 = vld [vmem:[#allocation3 + $0x110] sm:$0xf]  ;;  %v5868_v15 = vld [vmem:[#allocation3 + $0x118] sm:$0xf] }
  0x32   :  { %554 = vmatpush.bf16.msra.mxu0 %v5717_v29  ;;  %603 = vmatpush.bf16.msra.mxu1 %v5721_v30  ;;  %v5897_v10 = vor.u32 %v7301_v7, %v5894_v8  ;;  %v7297_v11 = vld [vmem:[#allocation3 + $0x12c] sm:$0xf0]  ;;  %v7293_v12 = vld [vmem:[#allocation3 + $0x114] sm:$0xf]  ;;  %v7298_v16 = vld [vmem:[#allocation3 + $0x134] sm:$0xf0] }
  0x33   :  { %652 = vmatpush.bf16.msra.mxu2 %v5725_v31  ;;  %v5862_v13 = vld [vmem:[#allocation3 + $0x130] sm:$0xf0]  ;;  %v5861_v14 = vor.u32 %v7297_v11, %v5860_v9  ;;  %v7294_v17 = vld [vmem:[#allocation3 + $0x11c] sm:$0xf]  ;;  %v5869_v19 = vor.u32 %v7298_v16, %v5868_v15  ;;  %v7858_v22 = vld [vmem:[%s9110_s0 + $0x28] sm:$0xff] }
  0x34   :  { %701 = vmatpush.bf16.msra.mxu3 %v5729_v32  ;;  %v5865_v18 = vor.u32 %v7293_v12, %v5862_v13  ;;  %v5870_v20 = vld [vmem:[#allocation3 + $0x138] sm:$0xf0]  ;;  %v5828_v23 = vld [vmem:[#allocation3 + $0xd0] sm:$0xf]  ;;  %v7285_v25 = vld [vmem:[#allocation3 + $0xd4] sm:$0xf] }
  0x35   :  { %555 = vmatmul.bf16.vlgmr.msra.gmra.mxu0 %v7813_v33  ;;  %604 = vmatmul.bf16.vlgmr.msra.gmra.mxu1 %v7813_v33  ;;  %v5873_v21 = vor.u32 %v7294_v17, %v5870_v20  ;;  %v7289_v24 = vld [vmem:[#allocation3 + $0xec] sm:$0xf0]  ;;  %v5830_v27 = vld [vmem:[#allocation3 + $0xf0] sm:$0xf0]  ;;  %v5836_v28 = vld [vmem:[#allocation3 + $0xd8] sm:$0xf] }
  0x36   :  { %653 = vmatmul.bf16.vlgmr.msra.gmra.mxu2 %v7813_v33  ;;  %743 = vmatpush.bf16.msrb.mxu0 %v5957_v43  ;;  %v5829_v26 = vor.u32 %v7289_v24, %v5828_v23  ;;  %v7290_v29 = vld [vmem:[#allocation3 + $0xf4] sm:$0xf0]  ;;  %v5833_v30 = vor.u32 %v7285_v25, %v5830_v27  ;;  %v7286_v32 = vld [vmem:[#allocation3 + $0xdc] sm:$0xf]  ;;  %v5796_v37 = vld [vmem:[#allocation3 + $0x90] sm:$0xf] }
  0x37   :  { %702 = vmatmul.bf16.vlgmr.msra.gmra.mxu3 %v7813_v33  ;;  %841 = vmatpush.bf16.msrb.mxu2 %v5965_v39  ;;  %v5837_v31 = vor.u32 %v7290_v29, %v5836_v28  ;;  %v5838_v36 = vld [vmem:[#allocation3 + $0xf8] sm:$0xf0]  ;;  %v7281_v39 = vld [vmem:[#allocation3 + $0xac] sm:$0xf0]  ;;  %v7277_v40 = vld [vmem:[#allocation3 + $0x94] sm:$0xf] }
  0x38   :  { %890 = vmatpush.bf16.msrb.mxu3 %v5969_v44  ;;  %792 = vmatpush.bf16.msrb.mxu1 %v5961_v47  ;;  %v5841_v38 = vor.u32 %v7286_v32, %v5838_v36  ;;  %v5798_v41 = vld [vmem:[#allocation3 + $0xb0] sm:$0xf0]  ;;  %v5797_v42 = vor.u32 %v7281_v39, %v5796_v37  ;;  %v5804_v44 = vld [vmem:[#allocation3 + $0x98] sm:$0xf]  ;;  %v7278_v46 = vld [vmem:[#allocation3 + $0x9c] sm:$0xf] }
  0x39   :  { %v5801_v43 = vor.u32 %v7277_v40, %v5798_v41  ;;  %v7282_v45 = vld [vmem:[#allocation3 + $0xb4] sm:$0xf0]  ;;  %v5806_v49 = vld [vmem:[#allocation3 + $0xb8] sm:$0xf0]  ;;  %v5764_v50 = vld [vmem:[#allocation3 + $0x50] sm:$0xf] }
  0x3a   :  { %744 = vmatpush.bf16.msrb.mxu0 %v5925_v56  ;;  %v5805_v47 = vor.u32 %v7282_v45, %v5804_v44  ;;  %v7273_v51 = vld [vmem:[#allocation3 + $0x6c] sm:$0xf0]  ;;  %v7269_v53 = vld [vmem:[#allocation3 + $0x54] sm:$0xf]  ;;  %v5772_v55 = vld [vmem:[#allocation3 + $0x58] sm:$0xf] }
  0x3b   :  { %842 = vmatpush.bf16.msrb.mxu2 %v5933_v52  ;;  %v5809_v52 = vor.u32 %v7278_v46, %v5806_v49  ;;  %v5766_v54 = vld [vmem:[#allocation3 + $0x70] sm:$0xf0]  ;;  %v5765_v56 = vor.u32 %v7273_v51, %v5764_v50  ;;  %v7270_v58 = vld [vmem:[#allocation3 + $0x5c] sm:$0xf]  ;;  %v7265_v2 = vld [vmem:[#allocation3 + $0x2c] sm:$0xf0] }
  0x3c   :  { %891 = vmatpush.bf16.msrb.mxu3 %v5937_v57  ;;  %793 = vmatpush.bf16.msrb.mxu1 %v5929_v60  ;;  %v7274_v57 = vld [vmem:[#allocation3 + $0x74] sm:$0xf0]  ;;  %v5774_v59 = vld [vmem:[#allocation3 + $0x78] sm:$0xf0]  ;;  %v5769_v60 = vor.u32 %v7269_v53, %v5766_v54  ;;  %v7867_v0 = vld [vmem:[%s9110_s0 + $0x30] sm:$0xff] }
  0x3d   :  { %v5773_v62 = vor.u32 %v7274_v57, %v5772_v55  ;;  %v5777_v63 = vor.u32 %v7270_v58, %v5774_v59  ;;  %v7261_v3 = vld [vmem:[#allocation3 + $0x14] sm:$0xf]  ;;  %v7266_v7 = vld [vmem:[#allocation3 + $0x34] sm:$0xf0]  ;;  %v5742_v11 = vld [vmem:[#allocation3 + $0x38] sm:$0xf0] }
  0x3e   :  { %745 = vmatpush.bf16.msrb.mxu0 %v5893_v5  ;;  %v5734_v5 = vld [vmem:[#allocation3 + $0x30] sm:$0xf0] }
  0x3f   :  { %843 = vmatpush.bf16.msrb.mxu2 %v5901_v1  ;;  %v5732_v1 = vld [vmem:[#allocation3 + $0x10] sm:$0xf]  ;;  %v5737_v8 = vor.u32 %v7261_v3, %v5734_v5  ;;  %v7876_v13 = vld [vmem:[%s9110_s0 + $0x38] sm:$0xff] }
  0x40   :  { %892 = vmatpush.bf16.msrb.mxu3 %v5905_v6  ;;  %794 = vmatpush.bf16.msrb.mxu1 %v5897_v10  ;;  %v5733_v4 = vor.u32 %v7265_v2, %v5732_v1  ;;  %v5740_v6 = vld [vmem:[#allocation3 + $0x18] sm:$0xf]  ;;  %v7262_v10 = vld [vmem:[#allocation3 + $0x1c] sm:$0xf] }
  0x41   :  { %v5741_v9 = vor.u32 %v7266_v7, %v5740_v6  ;;  %v5745_v12 = vor.u32 %v7262_v10, %v5742_v11 }
  0x42   :  { %746 = vmatpush.bf16.msrb.mxu0 %v5861_v14  ;;  %v7885_v14 = vld [vmem:[%s9112_s2] sm:$0xff] }
  0x43   :  { %844 = vmatpush.bf16.msrb.mxu2 %v5869_v19  ;;  %v7888_v16 = vperm.slane %v7885_v14, 0  ;;  %v7900_v23 = vperm.slane %v7885_v14, 2  ;;  %v7903_v27 = vperm.slane %v7885_v14, 3 }
  0x44   :  { %893 = vmatpush.bf16.msrb.mxu3 %v5873_v21  ;;  %795 = vmatpush.bf16.msrb.mxu1 %v5865_v18  ;;  %v7891_v18 = vperm.slane %v7885_v14, 1 }
  0x45   :  { %560 = vmatmul.bf16.gmra.mxu0 %v7822_v34  ;;  %609 = vmatmul.bf16.gmra.mxu1 %v7822_v34 }
  0x46   :  { %658 = vmatmul.bf16.gmra.mxu2 %v7822_v34  ;;  %747 = vmatpush.bf16.msrb.mxu0 %v5829_v26 }
  0x47   :  { %707 = vmatmul.bf16.gmra.mxu3 %v7822_v34  ;;  %845 = vmatpush.bf16.msrb.mxu2 %v5837_v31 }
  0x48   :  { %796 = vmatpush.bf16.msrb.mxu1 %v5833_v30  ;;  %894 = vmatpush.bf16.msrb.mxu3 %v5841_v38 }
  0x4a   :  { %748 = vmatpush.bf16.msrb.mxu0 %v5797_v42 }
  0x4b   :  { %846 = vmatpush.bf16.msrb.mxu2 %v5805_v47 }
  0x4c   :  { %797 = vmatpush.bf16.msrb.mxu1 %v5801_v43  ;;  %895 = vmatpush.bf16.msrb.mxu3 %v5809_v52 }
  0x4e   :  { %749 = vmatpush.bf16.msrb.mxu0 %v5765_v56 }
  0x4f   :  { %847 = vmatpush.bf16.msrb.mxu2 %v5773_v62 }
  0x50   :  { %798 = vmatpush.bf16.msrb.mxu1 %v5769_v60  ;;  %896 = vmatpush.bf16.msrb.mxu3 %v5777_v63 }
  0x52   :  { %750 = vmatpush.bf16.msrb.mxu0 %v5733_v4 }
  0x53   :  { %848 = vmatpush.bf16.msrb.mxu2 %v5741_v9 }
  0x54   :  { %799 = vmatpush.bf16.msrb.mxu1 %v5737_v8  ;;  %897 = vmatpush.bf16.msrb.mxu3 %v5745_v12 }
  0x55   :  { %565 = vmatmul.bf16.gmra.mxu0 %v7831_v35  ;;  %614 = vmatmul.bf16.gmra.mxu1 %v7831_v35 }
  0x56   :  { %663 = vmatmul.bf16.gmra.mxu2 %v7831_v35 }
  0x57   :  { %712 = vmatmul.bf16.gmra.mxu3 %v7831_v35 }
  0x65   :  { %570 = vmatmul.bf16.gmra.mxu0 %v7840_v48  ;;  %619 = vmatmul.bf16.gmra.mxu1 %v7840_v48 }
  0x66   :  { %668 = vmatmul.bf16.gmra.mxu2 %v7840_v48 }
  0x67   :  { %717 = vmatmul.bf16.gmra.mxu3 %v7840_v48 }
  0x75   :  { %575 = vmatmul.bf16.gmra.mxu0 %v7849_v61  ;;  %624 = vmatmul.bf16.gmra.mxu1 %v7849_v61 }
  0x76   :  { %673 = vmatmul.bf16.gmra.mxu2 %v7849_v61 }
  0x77   :  { %722 = vmatmul.bf16.gmra.mxu3 %v7849_v61 }
  0x85   :  { %580 = vmatmul.bf16.gmra.mxu0 %v7858_v22  ;;  %629 = vmatmul.bf16.gmra.mxu1 %v7858_v22 }
  0x86   :  { %678 = vmatmul.bf16.gmra.mxu2 %v7858_v22 }
  0x87   :  { %727 = vmatmul.bf16.gmra.mxu3 %v7858_v22 }
  0x95   :  { %585 = vmatmul.bf16.gmra.mxu0 %v7867_v0  ;;  %634 = vmatmul.bf16.gmra.mxu1 %v7867_v0 }
  0x96   :  { %683 = vmatmul.bf16.gmra.mxu2 %v7867_v0 }
  0x97   :  { %732 = vmatmul.bf16.gmra.mxu3 %v7867_v0 }
  0xa5   :  { %590 = vmatmul.bf16.gmra.mxu0 %v7876_v13  ;;  %639 = vmatmul.bf16.gmra.mxu1 %v7876_v13 }
  0xa6   :  { %688 = vmatmul.bf16.gmra.mxu2 %v7876_v13 }
  0xa7   :  { %737 = vmatmul.bf16.gmra.mxu3 %v7876_v13 }
  0xb2   :  { %v556_v15 = vpop.f32.mrf.mxu0  ;;  %v605_v17 = vpop.f32.mrf.mxu1 }
  0xb3   :  { %v557_v19 = vadd.f32 %v556_v15, %v7888_v16  ;;  %v606_v20 = vadd.f32 %v605_v17, %v7891_v18 }
  0xb5   :  { %751 = vmatmul.bf16.vlgmr.msrb.gmra.mxu0 %v7813_v33  ;;  %800 = vmatmul.bf16.vlgmr.msrb.gmra.mxu1 %v7813_v33  ;;  %v1067_v26 = vmul.f32 0.25, %v557_v19  ;;  %vm939_vm0 = vcmp.gt.f32.partialorder %v557_v19, 0.0  ;;  %v1068_v30 = vmul.f32 0.25, %v606_v20  ;;  %vm940_vm1 = vcmp.gt.f32.partialorder %v606_v20, 0.0 }
  0xb6   :  { %849 = vmatmul.bf16.vlgmr.msrb.gmra.mxu2 %v7813_v33 }
  0xb7   :  { %898 = vmatmul.bf16.vlgmr.msrb.gmra.mxu3 %v7813_v33  ;;  %v1195_v37 = vsel %vm939_vm0, %v557_v19, %v1067_v26  ;;  %v1196_v40 = vsel %vm940_vm1, %v606_v20, %v1068_v30 }
  0xb9   :  { %v654_v21 = vpop.f32.mrf.mxu2 }
  0xba   :  { %v703_v24 = vpop.f32.mrf.mxu3  ;;  %v558_v25 = vpop.f32.mrf.mxu0  ;;  %v655_v32 = vadd.f32 %v654_v21, %v7900_v23 }
  0xbb   :  { %v559_v28 = vadd.f32 %v558_v25, %v7888_v16  ;;  %v607_v29 = vpop.f32.mrf.mxu1  ;;  %v704_v38 = vadd.f32 %v703_v24, %v7903_v27 }
  0xbc   :  { %v608_v31 = vadd.f32 %v607_v29, %v7891_v18  ;;  %v1069_v45 = vmul.f32 0.25, %v655_v32  ;;  %vm941_vm4 = vcmp.gt.f32.partialorder %v655_v32, 0.0 }
  0xbd   :  { %vm947_vm2 = vcmp.gt.f32.partialorder %v559_v28, 0.0  ;;  %v1075_v33 = vmul.f32 0.25, %v559_v28  ;;  %v1070_v50 = vmul.f32 0.25, %v704_v38  ;;  %vm942_vm5 = vcmp.gt.f32.partialorder %v704_v38, 0.0 }
  0xbe   :  { %vm948_vm3 = vcmp.gt.f32.partialorder %v608_v31, 0.0  ;;  %v1076_v36 = vmul.f32 0.25, %v608_v31  ;;  %v1197_v55 = vsel %vm941_vm4, %v655_v32, %v1069_v45 }
  0xbf   :  { %v1203_v39 = vsel %vm947_vm2, %v559_v28, %v1075_v33  ;;  %v1198_v57 = vsel %vm942_vm5, %v704_v38, %v1070_v50 }
  0xc0   :  { %v7909_v41 = vpack.c.bf16 %v1203_v39, %v1195_v37  ;;  %v1204_v42 = vsel %vm948_vm3, %v608_v31, %v1076_v36 }
  0xc1   :  { %v7911_v43 = vpack.c.bf16 %v1204_v42, %v1196_v40  ;;  %v656_v44 = vpop.f32.mrf.mxu2 }
  0xc2   :  { %v657_v46 = vadd.f32 %v656_v44, %v7900_v23  ;;  %v705_v47 = vpop.f32.mrf.mxu3  ;;  %v561_v49 = vpop.f32.mrf.mxu0 }
  0xc3   :  { %9227 = vst [vmem:[#allocation10_spill] sm:$0xff] %v7911_v43  ;;  %v706_v51 = vadd.f32 %v705_v47, %v7903_v27  ;;  %v610_v52 = vpop.f32.mrf.mxu1  ;;  %v562_v60 = vadd.f32 %v561_v49, %v7888_v16  ;;  %v6340_v47 = vld [vmem:[#allocation5 + $0x2e0] sm:$0xf]  ;;  %v7417_v49 = vld [vmem:[#allocation5 + $0x2ec] sm:$0xf0] }
  0xc4   :  { %vm949_vm6 = vcmp.gt.f32.partialorder %v657_v46, 0.0  ;;  %v1077_v53 = vmul.f32 0.25, %v657_v46  ;;  %v611_v63 = vadd.f32 %v610_v52, %v7891_v18 }
  0xc5   :  { %vm950_vm7 = vcmp.gt.f32.partialorder %v706_v51, 0.0  ;;  %v1078_v54 = vmul.f32 0.25, %v706_v51  ;;  %756 = vmatmul.bf16.gmra.mxu0 %v7822_v34  ;;  %805 = vmatmul.bf16.gmra.mxu1 %v7822_v34  ;;  %v1083_v4 = vmul.f32 0.25, %v562_v60  ;;  %vm955_vm8 = vcmp.gt.f32.partialorder %v562_v60, 0.0 }
  0xc6   :  { %v1205_v56 = vsel %vm949_vm6, %v657_v46, %v1077_v53  ;;  %854 = vmatmul.bf16.gmra.mxu2 %v7822_v34  ;;  %v1084_v7 = vmul.f32 0.25, %v611_v63  ;;  %vm956_vm9 = vcmp.gt.f32.partialorder %v611_v63, 0.0 }
  0xc7   :  { %v7918_v58 = vpack.c.bf16 %v1205_v56, %v1197_v55  ;;  %v1206_v59 = vsel %vm950_vm7, %v706_v51, %v1078_v54  ;;  %903 = vmatmul.bf16.gmra.mxu3 %v7822_v34  ;;  %v1211_v11 = vsel %vm955_vm8, %v562_v60, %v1083_v4  ;;  %v6341_v51 = vor.u32 %v7417_v49, %v6340_v47  ;;  %v6084_v4 = vld [vmem:[#allocation5 + $0xe0] sm:$0xf] }
  0xc8   :  { %v7922_v62 = vpack.c.bf16 %v1206_v59, %v1198_v57  ;;  %v1212_v17 = vsel %vm956_vm9, %v611_v63, %v1084_v7 }
  0xc9   :  { %9228 = vst [vmem:[#allocation11_spill] sm:$0xff] %v7918_v58  ;;  %v659_v1 = vpop.f32.mrf.mxu2  ;;  %3031 = vmatpush.bf16.msra.mxu2 %v6341_v51  ;;  %v7413_v51 = vld [vmem:[#allocation5 + $0x2cc] sm:$0xf0] }
  0xca   :  { %9229 = vst [vmem:[#allocation12_spill] sm:$0xff] %v7922_v62  ;;  %v708_v2 = vpop.f32.mrf.mxu3  ;;  %v563_v3 = vpop.f32.mrf.mxu0  ;;  %v660_v34 = vadd.f32 %v659_v1, %v7900_v23 }
  0xcb   :  { %v564_v5 = vadd.f32 %v563_v3, %v7888_v16  ;;  %v612_v6 = vpop.f32.mrf.mxu1  ;;  %v709_v12 = vadd.f32 %v708_v2, %v7903_v27 }
  0xcc   :  { %v613_v8 = vadd.f32 %v612_v6, %v7891_v18  ;;  %v1085_v25 = vmul.f32 0.25, %v660_v34  ;;  %vm957_vm12 = vcmp.gt.f32.partialorder %v660_v34, 0.0  ;;  %v6468_v6 = vld [vmem:[#allocation5 + $0x3e0] sm:$0xf] }
  0xcd   :  { %vm963_vm10 = vcmp.gt.f32.partialorder %v564_v5, 0.0  ;;  %v1091_v9 = vmul.f32 0.25, %v564_v5  ;;  %v1086_v30 = vmul.f32 0.25, %v709_v12  ;;  %vm958_vm13 = vcmp.gt.f32.partialorder %v709_v12, 0.0 }
  0xce   :  { %vm964_vm11 = vcmp.gt.f32.partialorder %v613_v8, 0.0  ;;  %v1092_v10 = vmul.f32 0.25, %v613_v8  ;;  %v1213_v37 = vsel %vm957_vm12, %v660_v34, %v1085_v25 }
  0xcf   :  { %v1219_v15 = vsel %vm963_vm10, %v564_v5, %v1091_v9  ;;  %v1214_v39 = vsel %vm958_vm13, %v709_v12, %v1086_v30  ;;  %v7353_v5 = vld [vmem:[#allocation5 + $0xec] sm:$0xf0] }
  0xd0   :  { %v7929_v19 = vpack.c.bf16 %v1219_v15, %v1211_v11  ;;  %v1220_v20 = vsel %vm964_vm11, %v613_v8, %v1092_v10  ;;  %v6085_v34 = vor.u32 %v7353_v5, %v6084_v4  ;;  %v7449_v10 = vld [vmem:[#allocation5 + $0x3ec] sm:$0xf0]  ;;  %v6068_v5 = vld [vmem:[#allocation5 + $0xc0] sm:$0xf] }
  0xd1   :  { %v7931_v21 = vpack.c.bf16 %v1220_v20, %v1212_v17  ;;  %v661_v24 = vpop.f32.mrf.mxu2  ;;  %v6469_v15 = vor.u32 %v7449_v10, %v6468_v6  ;;  %v6212_v17 = vld [vmem:[#allocation5 + $0x1e0] sm:$0xf]  ;;  %v7385_v20 = vld [vmem:[#allocation5 + $0x1ec] sm:$0xf0] }
  0xd2   :  { %9230 = vst [vmem:[#allocation13_spill] sm:$0xff] %v7929_v19  ;;  %v662_v26 = vadd.f32 %v661_v24, %v7900_v23  ;;  %v710_v28 = vpop.f32.mrf.mxu3  ;;  %v566_v29 = vpop.f32.mrf.mxu0  ;;  %2933 = vmatpush.bf16.msra.mxu0 %v6085_v34  ;;  %v7349_v6 = vld [vmem:[#allocation5 + $0xcc] sm:$0xf0] }
  0xd3   :  { %9231 = vst [vmem:[#allocation14_spill] sm:$0xff] %v7931_v21  ;;  %v711_v31 = vadd.f32 %v710_v28, %v7903_v27  ;;  %v615_v33 = vpop.f32.mrf.mxu1  ;;  %v567_v44 = vadd.f32 %v566_v29, %v7888_v16  ;;  %v6213_v29 = vor.u32 %v7385_v20, %v6212_v17  ;;  %3080 = vmatpush.bf16.msra.mxu3 %v6469_v15  ;;  %v7445_v15 = vld [vmem:[#allocation5 + $0x3cc] sm:$0xf0] }
  0xd4   :  { %vm965_vm14 = vcmp.gt.f32.partialorder %v662_v26, 0.0  ;;  %v1093_v32 = vmul.f32 0.25, %v662_v26  ;;  %v616_v46 = vadd.f32 %v615_v33, %v7891_v18 }
  0xd5   :  { %vm966_vm15 = vcmp.gt.f32.partialorder %v711_v31, 0.0  ;;  %v1094_v36 = vmul.f32 0.25, %v711_v31  ;;  %761 = vmatmul.bf16.gmra.mxu0 %v7831_v35  ;;  %810 = vmatmul.bf16.gmra.mxu1 %v7831_v35  ;;  %v1099_v54 = vmul.f32 0.25, %v567_v44  ;;  %vm971_vm0 = vcmp.gt.f32.partialorder %v567_v44, 0.0 }
  0xd6   :  { %v1221_v38 = vsel %vm965_vm14, %v662_v26, %v1093_v32  ;;  %859 = vmatmul.bf16.gmra.mxu2 %v7831_v35  ;;  %v1100_v57 = vmul.f32 0.25, %v616_v46  ;;  %vm972_vm1 = vcmp.gt.f32.partialorder %v616_v46, 0.0  ;;  %2982 = vmatpush.bf16.msra.mxu1 %v6213_v29 }
  0xd7   :  { %v7938_v40 = vpack.c.bf16 %v1221_v38, %v1213_v37  ;;  %v1222_v42 = vsel %vm966_vm15, %v711_v31, %v1094_v36  ;;  %908 = vmatmul.bf16.gmra.mxu3 %v7831_v35  ;;  %v1227_v1 = vsel %vm971_vm0, %v567_v44, %v1099_v54 }
  0xd8   :  { %v7942_v45 = vpack.c.bf16 %v1222_v42, %v1214_v39  ;;  %v1228_v7 = vsel %vm972_vm1, %v616_v46, %v1100_v57 }
  0xd9   :  { %9232 = vst [vmem:[#allocation15_spill] sm:$0xff] %v7938_v40  ;;  %v664_v50 = vpop.f32.mrf.mxu2 }
  0xda   :  { %9233 = vst [vmem:[#allocation16_spill] sm:$0xff] %v7942_v45  ;;  %v713_v52 = vpop.f32.mrf.mxu3  ;;  %v568_v53 = vpop.f32.mrf.mxu0  ;;  %v665_v60 = vadd.f32 %v664_v50, %v7900_v23  ;;  %v6324_v50 = vld [vmem:[#allocation5 + $0x2c0] sm:$0xf] }
  0xdb   :  { %v569_v55 = vadd.f32 %v568_v53, %v7888_v16  ;;  %v617_v56 = vpop.f32.mrf.mxu1  ;;  %v714_v2 = vadd.f32 %v713_v52, %v7903_v27  ;;  %v6325_v53 = vor.u32 %v7413_v51, %v6324_v50 }
  0xdc   :  { %v618_v59 = vadd.f32 %v617_v56, %v7891_v18  ;;  %v1101_v24 = vmul.f32 0.25, %v665_v60  ;;  %vm973_vm4 = vcmp.gt.f32.partialorder %v665_v60, 0.0 }
  0xdd   :  { %vm979_vm2 = vcmp.gt.f32.partialorder %v569_v55, 0.0  ;;  %v1107_v35 = vmul.f32 0.25, %v569_v55  ;;  %v1102_v30 = vmul.f32 0.25, %v714_v2  ;;  %vm974_vm5 = vcmp.gt.f32.partialorder %v714_v2, 0.0  ;;  %3032 = vmatpush.bf16.msra.mxu2 %v6325_v53 }
  0xde   :  { %vm980_vm3 = vcmp.gt.f32.partialorder %v618_v59, 0.0  ;;  %v1108_v63 = vmul.f32 0.25, %v618_v59  ;;  %v1229_v37 = vsel %vm973_vm4, %v665_v60, %v1101_v24 }
  0xdf   :  { %v1235_v3 = vsel %vm979_vm2, %v569_v55, %v1107_v35  ;;  %v1230_v39 = vsel %vm974_vm5, %v714_v2, %v1102_v30 }
  0xe0   :  { %v7949_v8 = vpack.c.bf16 %v1235_v3, %v1227_v1  ;;  %v1236_v9 = vsel %vm980_vm3, %v618_v59, %v1108_v63 }
  0xe1   :  { %v7951_v11 = vpack.c.bf16 %v1236_v9, %v1228_v7  ;;  %v666_v12 = vpop.f32.mrf.mxu2  ;;  %v6452_v7 = vld [vmem:[#allocation5 + $0x3c0] sm:$0xf] }
  0xe2   :  { %9234 = vst [vmem:[#allocation17_spill] sm:$0xff] %v7949_v8  ;;  %v667_v25 = vadd.f32 %v666_v12, %v7900_v23  ;;  %v715_v26 = vpop.f32.mrf.mxu3  ;;  %v571_v28 = vpop.f32.mrf.mxu0  ;;  %v6069_v12 = vor.u32 %v7349_v6, %v6068_v5  ;;  %v6453_v24 = vor.u32 %v7445_v15, %v6452_v7  ;;  %v6436_v15 = vld [vmem:[#allocation5 + $0x3a0] sm:$0xf] }
  0xe3   :  { %9235 = vst [vmem:[#allocation18_spill] sm:$0xff] %v7951_v11  ;;  %v716_v31 = vadd.f32 %v715_v26, %v7903_v27  ;;  %v620_v33 = vpop.f32.mrf.mxu1  ;;  %v572_v46 = vadd.f32 %v571_v28, %v7888_v16  ;;  %v7381_v26 = vld [vmem:[#allocation5 + $0x1cc] sm:$0xf0] }
  0xe4   :  { %vm981_vm6 = vcmp.gt.f32.partialorder %v667_v25, 0.0  ;;  %v1109_v32 = vmul.f32 0.25, %v667_v25  ;;  %v621_v49 = vadd.f32 %v620_v33, %v7891_v18  ;;  %2934 = vmatpush.bf16.msra.mxu0 %v6069_v12  ;;  %3081 = vmatpush.bf16.msra.mxu3 %v6453_v24  ;;  %v7345_v12 = vld [vmem:[#allocation5 + $0xac] sm:$0xf0] }
  0xe5   :  { %vm982_vm7 = vcmp.gt.f32.partialorder %v716_v31, 0.0  ;;  %v1110_v36 = vmul.f32 0.25, %v716_v31  ;;  %766 = vmatmul.bf16.gmra.mxu0 %v7840_v48  ;;  %815 = vmatmul.bf16.gmra.mxu1 %v7840_v48  ;;  %v1115_v56 = vmul.f32 0.25, %v572_v46  ;;  %vm987_vm8 = vcmp.gt.f32.partialorder %v572_v46, 0.0 }
  0xe6   :  { %v1237_v38 = vsel %vm981_vm6, %v667_v25, %v1109_v32  ;;  %864 = vmatmul.bf16.gmra.mxu2 %v7840_v48  ;;  %v1116_v35 = vmul.f32 0.25, %v621_v49  ;;  %vm988_vm9 = vcmp.gt.f32.partialorder %v621_v49, 0.0  ;;  %v6196_v25 = vld [vmem:[#allocation5 + $0x1c0] sm:$0xf] }
  0xe7   :  { %v7958_v42 = vpack.c.bf16 %v1237_v38, %v1229_v37  ;;  %v1238_v44 = vsel %vm982_vm7, %v716_v31, %v1110_v36  ;;  %913 = vmatmul.bf16.gmra.mxu3 %v7840_v48  ;;  %v1243_v2 = vsel %vm987_vm8, %v572_v46, %v1115_v56  ;;  %v6197_v33 = vor.u32 %v7381_v26, %v6196_v25  ;;  %v7409_v56 = vld [vmem:[#allocation5 + $0x2ac] sm:$0xf0] }
  0xe8   :  { %v7962_v47 = vpack.c.bf16 %v1238_v44, %v1230_v39  ;;  %v1244_v9 = vsel %vm988_vm9, %v621_v49, %v1116_v35 }
  0xe9   :  { %9236 = vst [vmem:[#allocation19_spill] sm:$0xff] %v7958_v42  ;;  %v669_v52 = vpop.f32.mrf.mxu2  ;;  %2983 = vmatpush.bf16.msra.mxu1 %v6197_v33 }
  0xea   :  { %9237 = vst [vmem:[#allocation20_spill] sm:$0xff] %v7962_v47  ;;  %v718_v54 = vpop.f32.mrf.mxu3  ;;  %v573_v55 = vpop.f32.mrf.mxu0  ;;  %v670_v63 = vadd.f32 %v669_v52, %v7900_v23 }
  0xeb   :  { %v574_v57 = vadd.f32 %v573_v55, %v7888_v16  ;;  %v622_v59 = vpop.f32.mrf.mxu1  ;;  %v719_v3 = vadd.f32 %v718_v54, %v7903_v27  ;;  %v6308_v55 = vld [vmem:[#allocation5 + $0x2a0] sm:$0xf] }
  0xec   :  { %v623_v60 = vadd.f32 %v622_v59, %v7891_v18  ;;  %v1117_v28 = vmul.f32 0.25, %v670_v63  ;;  %vm989_vm12 = vcmp.gt.f32.partialorder %v670_v63, 0.0  ;;  %v6309_v59 = vor.u32 %v7409_v56, %v6308_v55  ;;  %v6292_v55 = vld [vmem:[#allocation5 + $0x280] sm:$0xf]  ;;  %v7405_v56 = vld [vmem:[#allocation5 + $0x28c] sm:$0xf0] }
  0xed   :  { %vm995_vm10 = vcmp.gt.f32.partialorder %v574_v57, 0.0  ;;  %v1123_v48 = vmul.f32 0.25, %v574_v57  ;;  %v1118_v32 = vmul.f32 0.25, %v719_v3  ;;  %vm990_vm13 = vcmp.gt.f32.partialorder %v719_v3, 0.0 }
  0xee   :  { %vm996_vm11 = vcmp.gt.f32.partialorder %v623_v60, 0.0  ;;  %v1124_v1 = vmul.f32 0.25, %v623_v60  ;;  %v1245_v44 = vsel %vm989_vm12, %v670_v63, %v1117_v28  ;;  %3033 = vmatpush.bf16.msra.mxu2 %v6309_v59  ;;  %v7441_v28 = vld [vmem:[#allocation5 + $0x3ac] sm:$0xf0] }
  0xef   :  { %v1251_v4 = vsel %vm995_vm10, %v574_v57, %v1123_v48  ;;  %v1246_v50 = vsel %vm990_vm13, %v719_v3, %v1118_v32  ;;  %v6437_v32 = vor.u32 %v7441_v28, %v6436_v15 }
  0xf0   :  { %v7969_v34 = vpack.c.bf16 %v1251_v4, %v1243_v2  ;;  %v1252_v10 = vsel %vm996_vm11, %v623_v60, %v1124_v1 }
  0xf1   :  { %v7971_v17 = vpack.c.bf16 %v1252_v10, %v1244_v9  ;;  %v671_v20 = vpop.f32.mrf.mxu2  ;;  %v6052_v9 = vld [vmem:[#allocation5 + $0xa0] sm:$0xf]  ;;  %3082 = vmatpush.bf16.msra.mxu3 %v6437_v32 }
  0xf2   :  { %9238 = vst [vmem:[#allocation21_spill] sm:$0xff] %v7969_v34  ;;  %v672_v29 = vadd.f32 %v671_v20, %v7900_v23  ;;  %v720_v30 = vpop.f32.mrf.mxu3  ;;  %v576_v31 = vpop.f32.mrf.mxu0  ;;  %v6053_v26 = vor.u32 %v7345_v12, %v6052_v9  ;;  %v6404_v32 = vld [vmem:[#allocation5 + $0x360] sm:$0xf] }
  0xf3   :  { %9239 = vst [vmem:[#allocation22_spill] sm:$0xff] %v7971_v17  ;;  %v721_v36 = vadd.f32 %v720_v30, %v7903_v27  ;;  %v625_v37 = vpop.f32.mrf.mxu1  ;;  %v577_v49 = vadd.f32 %v576_v31, %v7888_v16  ;;  %v7377_v30 = vld [vmem:[#allocation5 + $0x1ac] sm:$0xf0] }
  0xf4   :  { %vm997_vm14 = vcmp.gt.f32.partialorder %v672_v29, 0.0  ;;  %v1125_v38 = vmul.f32 0.25, %v672_v29  ;;  %v626_v53 = vadd.f32 %v625_v37, %v7891_v18  ;;  %2935 = vmatpush.bf16.msra.mxu0 %v6053_v26 }
  0xf5   :  { %vm998_vm15 = vcmp.gt.f32.partialorder %v721_v36, 0.0  ;;  %v1126_v39 = vmul.f32 0.25, %v721_v36  ;;  %771 = vmatmul.bf16.gmra.mxu0 %v7849_v61  ;;  %820 = vmatmul.bf16.gmra.mxu1 %v7849_v61  ;;  %vm1003_vm0 = vcmp.gt.f32.partialorder %v577_v49, 0.0  ;;  %v1131_v63 = vmul.f32 0.25, %v577_v49 }
  0xf6   :  { %v1253_v46 = vsel %vm997_vm14, %v672_v29, %v1125_v38  ;;  %869 = vmatmul.bf16.gmra.mxu2 %v7849_v61  ;;  %v1132_v1 = vmul.f32 0.25, %v626_v53  ;;  %vm1004_vm1 = vcmp.gt.f32.partialorder %v626_v53, 0.0  ;;  %v6180_v29 = vld [vmem:[#allocation5 + $0x1a0] sm:$0xf] }
  0xf7   :  { %v7979_v51 = vpack.c.bf16 %v1253_v46, %v1245_v44  ;;  %v1254_v52 = vsel %vm998_vm15, %v721_v36, %v1126_v39  ;;  %918 = vmatmul.bf16.gmra.mxu3 %v7849_v61  ;;  %v1259_v20 = vsel %vm1003_vm0, %v577_v49, %v1131_v63  ;;  %v6181_v36 = vor.u32 %v7377_v30, %v6180_v29  ;;  %v6036_v39 = vld [vmem:[#allocation5 + $0x80] sm:$0xf]  ;;  %v7341_v44 = vld [vmem:[#allocation5 + $0x8c] sm:$0xf0] }
  0xf8   :  { %v7983_v54 = vpack.c.bf16 %v1254_v52, %v1246_v50  ;;  %v1260_v24 = vsel %vm1004_vm1, %v626_v53, %v1132_v1  ;;  %v6164_v46 = vld [vmem:[#allocation5 + $0x180] sm:$0xf]  ;;  %v7373_v53 = vld [vmem:[#allocation5 + $0x18c] sm:$0xf0]  ;;  %v6293_v63 = vor.u32 %v7405_v56, %v6292_v55 }
  0xf9   :  { %9240 = vst [vmem:[#allocation23_spill] sm:$0xff] %v7979_v51  ;;  %v674_v57 = vpop.f32.mrf.mxu2  ;;  %2984 = vmatpush.bf16.msra.mxu1 %v6181_v36  ;;  %v6420_v1 = vld [vmem:[#allocation5 + $0x380] sm:$0xf]  ;;  %v7369_v30 = vld [vmem:[#allocation5 + $0x16c] sm:$0xf0] }
  0xfa   :  { %9241 = vst [vmem:[#allocation24_spill] sm:$0xff] %v7983_v54  ;;  %v7986_v35 = vadd.f32 %v674_v57, %v7900_v23  ;;  %v723_v60 = vpop.f32.mrf.mxu3  ;;  %v578_v48 = vpop.f32.mrf.mxu0  ;;  %3034 = vmatpush.bf16.msra.mxu2 %v6293_v63  ;;  %v7433_v36 = vld [vmem:[#allocation5 + $0x36c] sm:$0xf0] }
  0xfb   :  { %v724_v2 = vadd.f32 %v723_v60, %v7903_v27  ;;  %v579_v3 = vadd.f32 %v578_v48, %v7888_v16  ;;  %v627_v4 = vpop.f32.mrf.mxu1  ;;  %v6037_v48 = vor.u32 %v7341_v44, %v6036_v39  ;;  %v7365_v56 = vld [vmem:[#allocation5 + $0x14c] sm:$0xf0] }
  0xfc   :  { %vm1005_vm2 = vcmp.gt.f32.partialorder %v7986_v35, 0.0  ;;  %v1133_v61 = vmul.f32 0.25, %v7986_v35  ;;  %v628_v5 = vadd.f32 %v627_v4, %v7891_v18 }
  0xfd   :  { %vm1006_vm3 = vcmp.gt.f32.partialorder %v724_v2, 0.0  ;;  %v1134_v6 = vmul.f32 0.25, %v724_v2  ;;  %vm1011_vm4 = vcmp.gt.f32.partialorder %v579_v3, 0.0  ;;  %v1139_v7 = vmul.f32 0.25, %v579_v3  ;;  %2936 = vmatpush.bf16.msra.mxu0 %v6037_v48 }
  0xfe   :  { %vm1012_vm5 = vcmp.gt.f32.partialorder %v628_v5, 0.0  ;;  %v1140_v10 = vmul.f32 0.25, %v628_v5  ;;  %v1261_v12 = vsel %vm1005_vm2, %v7986_v35, %v1133_v61  ;;  %v7401_v35 = vld [vmem:[#allocation5 + $0x26c] sm:$0xf0] }
  0xff   :  { %v1267_v25 = vsel %vm1011_vm4, %v579_v3, %v1139_v7  ;;  %v7437_v3 = vld [vmem:[#allocation5 + $0x38c] sm:$0xf0]  ;;  %v1262_v15 = vsel %vm1006_vm3, %v724_v2, %v1134_v6 }
 0x100   :  { %v7994_v31 = vpack.c.bf16 %v1267_v25, %v1259_v20  ;;  %v1268_v33 = vsel %vm1012_vm5, %v628_v5, %v1140_v10  ;;  %v6165_v5 = vor.u32 %v7373_v53, %v6164_v46  ;;  %v6421_v7 = vor.u32 %v7437_v3, %v6420_v1  ;;  %v6020_v10 = vld [vmem:[#allocation5 + $0x60] sm:$0xf] }
 0x101   :  { %v7996_v37 = vpack.c.bf16 %v1268_v33, %v1260_v24  ;;  %v676_v38 = vpop.f32.mrf.mxu2  ;;  %v7337_v24 = vld [vmem:[#allocation5 + $0x6c] sm:$0xf0]  ;;  %v6148_v25 = vld [vmem:[#allocation5 + $0x160] sm:$0xf]  ;;  %v6405_v46 = vor.u32 %v7433_v36, %v6404_v32 }
 0x102   :  { %9242 = vst [vmem:[#allocation25_spill] sm:$0xff] %v7994_v31  ;;  %v677_v49 = vadd.f32 %v676_v38, %v7900_v23  ;;  %v725_v50 = vpop.f32.mrf.mxu3  ;;  %v581_v52 = vpop.f32.mrf.mxu0  ;;  %v6276_v33 = vld [vmem:[#allocation5 + $0x260] sm:$0xf]  ;;  %2985 = vmatpush.bf16.msra.mxu1 %v6165_v5  ;;  %3083 = vmatpush.bf16.msra.mxu3 %v6421_v7  ;;  %v6021_v6 = vor.u32 %v7337_v24, %v6020_v10  ;;  %v7429_v7 = vld [vmem:[#allocation5 + $0x34c] sm:$0xf0] }
 0x103   :  { %9243 = vst [vmem:[#allocation26_spill] sm:$0xff] %v7996_v37  ;;  %v726_v57 = vadd.f32 %v725_v50, %v7903_v27  ;;  %v8001_v59 = vadd.f32 %v581_v52, %v7888_v16  ;;  %v630_v60 = vpop.f32.mrf.mxu1  ;;  %v6149_v39 = vor.u32 %v7369_v30, %v6148_v25  ;;  %v6277_v44 = vor.u32 %v7401_v35, %v6276_v33  ;;  %v6132_v50 = vld [vmem:[#allocation5 + $0x140] sm:$0xf]  ;;  %v7329_v33 = vld [vmem:[#allocation5 + $0x2c] sm:$0xf0] }
 0x104   :  { %vm1013_vm6 = vcmp.gt.f32.partialorder %v677_v49, 0.0  ;;  %v1141_v4 = vmul.f32 0.25, %v677_v49  ;;  %v631_v29 = vadd.f32 %v630_v60, %v7891_v18  ;;  %v7397_v60 = vld [vmem:[#allocation5 + $0x24c] sm:$0xf0]  ;;  %2937 = vmatpush.bf16.msra.mxu0 %v6021_v6  ;;  %v6388_v5 = vld [vmem:[#allocation5 + $0x340] sm:$0xf]  ;;  %v6133_v10 = vor.u32 %v7365_v56, %v6132_v50 }
 0x105   :  { %vm1014_vm7 = vcmp.gt.f32.partialorder %v726_v57, 0.0  ;;  %v1142_v9 = vmul.f32 0.25, %v726_v57  ;;  %776 = vmatmul.bf16.gmra.mxu0 %v7858_v22  ;;  %825 = vmatmul.bf16.gmra.mxu1 %v7858_v22  ;;  %vm1019_vm8 = vcmp.gt.f32.partialorder %v8001_v59, 0.0  ;;  %v1147_v2 = vmul.f32 0.25, %v8001_v59  ;;  %v5988_v24 = vld [vmem:[#allocation5 + $0x20] sm:$0xf] }
 0x106   :  { %v1269_v20 = vsel %vm1013_vm6, %v677_v49, %v1141_v4  ;;  %874 = vmatmul.bf16.gmra.mxu2 %v7858_v22  ;;  %v7333_v49 = vld [vmem:[#allocation5 + $0x4c] sm:$0xf0]  ;;  %v1148_v48 = vmul.f32 0.25, %v631_v29  ;;  %vm1020_vm9 = vcmp.gt.f32.partialorder %v631_v29, 0.0  ;;  %2986 = vmatpush.bf16.msra.mxu1 %v6149_v39  ;;  %v6389_v30 = vor.u32 %v7429_v7, %v6388_v5  ;;  %v6116_v35 = vld [vmem:[#allocation5 + $0x120] sm:$0xf] }
 0x107   :  { %v8010_v26 = vpack.c.bf16 %v1269_v20, %v1261_v12  ;;  %v1270_v28 = vsel %vm1014_vm7, %v726_v57, %v1142_v9  ;;  %923 = vmatmul.bf16.gmra.mxu3 %v7858_v22  ;;  %v6004_v22 = vld [vmem:[#allocation5 + $0x40] sm:$0xf]  ;;  %3035 = vmatpush.bf16.msra.mxu2 %v6277_v44  ;;  %v1275_v25 = vsel %vm1019_vm8, %v8001_v59, %v1147_v2  ;;  %v7393_v44 = vld [vmem:[#allocation5 + $0x22c] sm:$0xf0] }
 0x108   :  { %v8014_v61 = vpack.c.bf16 %v1270_v28, %v1262_v15  ;;  %v6260_v57 = vld [vmem:[#allocation5 + $0x240] sm:$0xf]  ;;  %v6005_v4 = vor.u32 %v7333_v49, %v6004_v22  ;;  %3084 = vmatpush.bf16.msra.mxu3 %v6405_v46  ;;  %v1276_v6 = vsel %vm1020_vm9, %v631_v29, %v1148_v48  ;;  %v5989_v36 = vor.u32 %v7329_v33, %v5988_v24  ;;  %v7425_v50 = vld [vmem:[#allocation5 + $0x32c] sm:$0xf0] }
 0x109   :  { %9244 = vst [vmem:[#allocation27_spill] sm:$0xff] %v8010_v26  ;;  %v679_v38 = vpop.f32.mrf.mxu2  ;;  %v6261_v12 = vor.u32 %v7397_v60, %v6260_v57  ;;  %v6244_v39 = vld [vmem:[#allocation5 + $0x220] sm:$0xf]  ;;  %v7325_v60 = vld [vmem:[#allocation5 + $0xc] sm:$0xf0] }
 0x10a   :  { %9245 = vst [vmem:[#allocation28_spill] sm:$0xff] %v8014_v61  ;;  %v8019_v52 = vadd.f32 %v679_v38, %v7900_v23  ;;  %v728_v53 = vpop.f32.mrf.mxu3  ;;  %v583_v55 = vpop.f32.mrf.mxu0  ;;  %2938 = vmatpush.bf16.msra.mxu0 %v6005_v4  ;;  %v7361_v38 = vld [vmem:[#allocation5 + $0x12c] sm:$0xf0]  ;;  %2987 = vmatpush.bf16.msra.mxu1 %v6133_v10  ;;  %v6372_v2 = vld [vmem:[#allocation5 + $0x320] sm:$0xf] }
 0x10b   :  { %v8022_v63 = vadd.f32 %v728_v53, %v7903_v27  ;;  %v584_v1 = vadd.f32 %v583_v55, %v7888_v16  ;;  %v632_v3 = vpop.f32.mrf.mxu1  ;;  %3036 = vmatpush.bf16.msra.mxu2 %v6261_v12  ;;  %v6117_v59 = vor.u32 %v7361_v38, %v6116_v35  ;;  %v6245_v55 = vor.u32 %v7393_v44, %v6244_v39  ;;  %v5972_v57 = vld [vmem:[#allocation5] sm:$0xf]  ;;  %v7357_v5 = vld [vmem:[#allocation5 + $0x10c] sm:$0xf0] }
 0x10c   :  { %v633_v9 = vadd.f32 %v632_v3, %v7891_v18  ;;  %v1149_v15 = vmul.f32 0.25, %v8019_v52  ;;  %3085 = vmatpush.bf16.msra.mxu3 %v6389_v30  ;;  %v6373_v56 = vor.u32 %v7425_v50, %v6372_v2  ;;  %v6100_v48 = vld [vmem:[#allocation5 + $0x100] sm:$0xf]  ;;  %vm1021_vm12 = vcmp.gt.f32.partialorder %v8019_v52, 0.0  ;;  %v7421_v35 = vld [vmem:[#allocation5 + $0x30c] sm:$0xf0] }
 0x10d   :  { %vm1027_vm10 = vcmp.gt.f32.partialorder %v584_v1, 0.0  ;;  %v1155_v20 = vmul.f32 0.25, %v584_v1  ;;  %v1150_v46 = vmul.f32 0.25, %v8022_v63  ;;  %v6228_v7 = vld [vmem:[#allocation5 + $0x200] sm:$0xf]  ;;  %vm1022_vm13 = vcmp.gt.f32.partialorder %v8022_v63, 0.0 }
 0x10e   :  { %vm1028_vm11 = vcmp.gt.f32.partialorder %v633_v9, 0.0  ;;  %v1156_v28 = vmul.f32 0.25, %v633_v9  ;;  %2939 = vmatpush.bf16.msra.mxu0 %v5989_v36  ;;  %2988 = vmatpush.bf16.msra.mxu1 %v6117_v59  ;;  %v6356_v33 = vld [vmem:[#allocation5 + $0x300] sm:$0xf] }
 0x10f   :  { %v1283_v32 = vsel %vm1027_vm10, %v584_v1, %v1155_v20  ;;  %3037 = vmatpush.bf16.msra.mxu2 %v6245_v55  ;;  %v5973_v20 = vor.u32 %v7325_v60, %v5972_v57 }
 0x110   :  { %v8032_v22 = vpack.c.bf16 %v1283_v32, %v1275_v25  ;;  %v1284_v49 = vsel %vm1028_vm11, %v633_v9, %v1156_v28  ;;  %v7389_v9 = vld [vmem:[#allocation5 + $0x20c] sm:$0xf0]  ;;  %3086 = vmatpush.bf16.msra.mxu3 %v6373_v56  ;;  %v6101_v25 = vor.u32 %v7357_v5, %v6100_v48  ;;  %v1278_v32 = vsel %vm1022_vm13, %v8022_v63, %v1150_v46 }
 0x111   :  { %v8034_v53 = vpack.c.bf16 %v1284_v49, %v1276_v6  ;;  %v681_v29 = vpop.f32.mrf.mxu2  ;;  %v6229_v28 = vor.u32 %v7389_v9, %v6228_v7  ;;  %v1277_v6 = vsel %vm1021_vm12, %v8019_v52, %v1149_v15  ;;  %v6357_v63 = vor.u32 %v7421_v35, %v6356_v33 }
 0x112   :  { %9246 = vst [vmem:[#allocation29_spill] sm:$0xff] %v8032_v22  ;;  %v682_v1 = vadd.f32 %v681_v29, %v7900_v23  ;;  %v730_v3 = vpop.f32.mrf.mxu3  ;;  %v586_v4 = vpop.f32.mrf.mxu0  ;;  %2940 = vmatpush.bf16.msra.mxu0 %v5973_v20  ;;  %2989 = vmatpush.bf16.msra.mxu1 %v6101_v25 }
 0x113   :  { %9247 = vst [vmem:[#allocation30_spill] sm:$0xff] %v8034_v53  ;;  %v731_v10 = vadd.f32 %v730_v3, %v7903_v27  ;;  %v635_v12 = vpop.f32.mrf.mxu1  ;;  %v587_v44 = vadd.f32 %v586_v4, %v7888_v16  ;;  %3038 = vmatpush.bf16.msra.mxu2 %v6229_v28 }
 0x114   :  { %vm1029_vm14 = vcmp.gt.f32.partialorder %v682_v1, 0.0  ;;  %v1157_v24 = vmul.f32 0.25, %v682_v1  ;;  %v636_v52 = vadd.f32 %v635_v12, %v7891_v18  ;;  %3087 = vmatpush.bf16.msra.mxu3 %v6357_v63 }
 0x115   :  { %vm1030_vm15 = vcmp.gt.f32.partialorder %v731_v10, 0.0  ;;  %v1158_v30 = vmul.f32 0.25, %v731_v10  ;;  %781 = vmatmul.bf16.gmra.mxu0 %v7867_v0  ;;  %830 = vmatmul.bf16.gmra.mxu1 %v7867_v0  ;;  %v1163_v2 = vmul.f32 0.25, %v587_v44  ;;  %vm1035_vm0 = vcmp.gt.f32.partialorder %v587_v44, 0.0 }
 0x116   :  { %v1285_v36 = vsel %vm1029_vm14, %v682_v1, %v1157_v24  ;;  %879 = vmatmul.bf16.gmra.mxu2 %v7867_v0  ;;  %v1164_v55 = vmul.f32 0.25, %v636_v52  ;;  %vm1036_vm1 = vcmp.gt.f32.partialorder %v636_v52, 0.0 }
 0x117   :  { %v8049_v38 = vpack.c.bf16 %v1285_v36, %v1277_v6  ;;  %v1286_v39 = vsel %vm1030_vm15, %v731_v10, %v1158_v30  ;;  %928 = vmatmul.bf16.gmra.mxu3 %v7867_v0  ;;  %v1291_v48 = vsel %vm1035_vm0, %v587_v44, %v1163_v2 }
 0x118   :  { %v8053_v49 = vpack.c.bf16 %v1286_v39, %v1278_v32  ;;  %v1292_v4 = vsel %vm1036_vm1, %v636_v52, %v1164_v55 }
 0x119   :  { %9248 = vst [vmem:[#allocation31_spill] sm:$0xff] %v8049_v38  ;;  %v684_v15 = vpop.f32.mrf.mxu2 }
 0x11a   :  { %9249 = vst [vmem:[#allocation32_spill] sm:$0xff] %v8053_v49  ;;  %v733_v46 = vpop.f32.mrf.mxu3  ;;  %v588_v59 = vpop.f32.mrf.mxu0  ;;  %v685_v57 = vadd.f32 %v684_v15, %v7900_v23 }
 0x11b   :  { %v589_v50 = vadd.f32 %v588_v59, %v7888_v16  ;;  %v637_v29 = vpop.f32.mrf.mxu1  ;;  %v734_v1 = vadd.f32 %v733_v46, %v7903_v27 }
 0x11c   :  { %v638_v0 = vadd.f32 %v637_v29, %v7891_v18  ;;  %v1165_v12 = vmul.f32 0.25, %v685_v57  ;;  %vm1037_vm4 = vcmp.gt.f32.partialorder %v685_v57, 0.0 }
 0x11d   :  { %vm1043_vm2 = vcmp.gt.f32.partialorder %v589_v50, 0.0  ;;  %v1171_v56 = vmul.f32 0.25, %v589_v50  ;;  %v1166_v28 = vmul.f32 0.25, %v734_v1  ;;  %vm1038_vm5 = vcmp.gt.f32.partialorder %v734_v1, 0.0 }
 0x11e   :  { %vm1044_vm3 = vcmp.gt.f32.partialorder %v638_v0, 0.0  ;;  %v1172_v60 = vmul.f32 0.25, %v638_v0  ;;  %v1293_v32 = vsel %vm1037_vm4, %v685_v57, %v1165_v12 }
 0x11f   :  { %v1299_v3 = vsel %vm1043_vm2, %v589_v50, %v1171_v56  ;;  %v1294_v39 = vsel %vm1038_vm5, %v734_v1, %v1166_v28 }
 0x120   :  { %v8060_v5 = vpack.c.bf16 %v1299_v3, %v1291_v48  ;;  %v1300_v7 = vsel %vm1044_vm3, %v638_v0, %v1172_v60 }
 0x121   :  { %v8062_v9 = vpack.c.bf16 %v1300_v7, %v1292_v4  ;;  %v686_v10 = vpop.f32.mrf.mxu2 }
 0x122   :  { %v687_v20 = vadd.f32 %v686_v10, %v7900_v23  ;;  %v735_v24 = vpop.f32.mrf.mxu3  ;;  %v591_v25 = vpop.f32.mrf.mxu0 }
 0x123   :  { %v736_v30 = vadd.f32 %v735_v24, %v7903_v27  ;;  %v640_v33 = vpop.f32.mrf.mxu1  ;;  %v592_v63 = vadd.f32 %v591_v25, %v7888_v16 }
 0x124   :  { %vm1045_vm6 = vcmp.gt.f32.partialorder %v687_v20, 0.0  ;;  %v1173_v35 = vmul.f32 0.25, %v687_v20  ;;  %v641_v46 = vadd.f32 %v640_v33, %v7891_v18 }
 0x125   :  { %vm1046_vm7 = vcmp.gt.f32.partialorder %v736_v30, 0.0  ;;  %v1174_v6 = vmul.f32 0.25, %v736_v30  ;;  %786 = vmatmul.bf16.gmra.mxu0 %v7876_v13  ;;  %835 = vmatmul.bf16.gmra.mxu1 %v7876_v13  ;;  %v1179_v29 = vmul.f32 0.25, %v592_v63  ;;  %vm1051_vm8 = vcmp.gt.f32.partialorder %v592_v63, 0.0 }
 0x126   :  { %v1301_v36 = vsel %vm1045_vm6, %v687_v20, %v1173_v35  ;;  %884 = vmatmul.bf16.gmra.mxu2 %v7876_v13  ;;  %v1180_v56 = vmul.f32 0.25, %v641_v46  ;;  %vm1052_vm9 = vcmp.gt.f32.partialorder %v641_v46, 0.0  ;;  %v8087_v35 = vperm.slane %v7885_v14, 4 }
 0x127   :  { %v8069_v44 = vpack.c.bf16 %v1301_v36, %v1293_v32  ;;  %v1302_v52 = vsel %vm1046_vm7, %v736_v30, %v1174_v6  ;;  %933 = vmatmul.bf16.gmra.mxu3 %v7876_v13  ;;  %v1307_v1 = vsel %vm1051_vm8, %v592_v63, %v1179_v29  ;;  %v7658_v36 = vld [vmem:[%s9112_s2] sm:$0xff] }
 0x128   :  { %v8073_v15 = vpack.c.bf16 %v1302_v52, %v1294_v39  ;;  %v1308_v7 = vsel %vm1052_vm9, %v641_v46, %v1180_v56  ;;  %v8092_v39 = vperm.slane %v7658_v36, 5 }
 0x129   :  { %v689_v59 = vpop.f32.mrf.mxu2 }
 0x12a   :  { %v738_v2 = vpop.f32.mrf.mxu3  ;;  %v593_v50 = vpop.f32.mrf.mxu0  ;;  %v690_v13 = vadd.f32 %v689_v59, %v7900_v23 }
 0x12b   :  { %v594_v55 = vadd.f32 %v593_v50, %v7888_v16  ;;  %v642_v0 = vpop.f32.mrf.mxu1  ;;  %v739_v3 = vadd.f32 %v738_v2, %v7903_v27 }
 0x12c   :  { %v643_v57 = vadd.f32 %v642_v0, %v7891_v18  ;;  %v1181_v24 = vmul.f32 0.25, %v690_v13  ;;  %vm1053_vm12 = vcmp.gt.f32.partialorder %v690_v13, 0.0 }
 0x12d   :  { %vm1059_vm10 = vcmp.gt.f32.partialorder %v594_v55, 0.0  ;;  %v1187_v60 = vmul.f32 0.25, %v594_v55  ;;  %v1182_v30 = vmul.f32 0.25, %v739_v3  ;;  %vm1054_vm13 = vcmp.gt.f32.partialorder %v739_v3, 0.0 }
 0x12e   :  { %vm1060_vm11 = vcmp.gt.f32.partialorder %v643_v57, 0.0  ;;  %v1188_v48 = vmul.f32 0.25, %v643_v57  ;;  %v1309_v52 = vsel %vm1053_vm12, %v690_v13, %v1181_v24 }
 0x12f   :  { %v1315_v4 = vsel %vm1059_vm10, %v594_v55, %v1187_v60  ;;  %v1310_v14 = vsel %vm1054_vm13, %v739_v3, %v1182_v30  ;;  %v8104_v55 = vperm.slane %v7658_v36, 6  ;;  %v8106_v60 = vperm.slane %v7658_v36, 7 }
 0x130   :  { %v8080_v10 = vpack.c.bf16 %v1315_v4, %v1307_v1  ;;  %v1316_v16 = vsel %vm1060_vm11, %v643_v57, %v1188_v48 }
 0x131   :  { %v8082_v12 = vpack.c.bf16 %v1316_v16, %v1308_v7  ;;  %v691_v20 = vpop.f32.mrf.mxu2 }
 0x132   :  { %v692_v18 = vadd.f32 %v691_v20, %v7900_v23  ;;  %v740_v25 = vpop.f32.mrf.mxu3  ;;  %v752_v28 = vpop.f32.mrf.mxu0 }
 0x133   :  { %v741_v33 = vadd.f32 %v740_v25, %v7903_v27  ;;  %v801_v6 = vpop.f32.mrf.mxu1  ;;  %v753_v59 = vadd.f32 %v752_v28, %v8087_v35 }
 0x134   :  { %vm1061_vm14 = vcmp.gt.f32.partialorder %v692_v18, 0.0  ;;  %v1189_v32 = vmul.f32 0.25, %v692_v18  ;;  %v802_v50 = vadd.f32 %v801_v6, %v8092_v39 }
 0x135   :  { %vm1062_vm15 = vcmp.gt.f32.partialorder %v741_v33, 0.0  ;;  %v1190_v23 = vmul.f32 0.25, %v741_v33  ;;  %2941 = vmatmul.bf16.vlgmr.msra.gmra.mxu0 %v7909_v41  ;;  %2990 = vmatmul.bf16.vlgmr.msra.gmra.mxu1 %v7911_v43  ;;  %v1071_v57 = vmul.f32 0.25, %v753_v59  ;;  %vm943_vm0 = vcmp.gt.f32.partialorder %v753_v59, 0.0  ;;  %v6676_v43 = vld [vmem:[#allocation5 + $0x580] sm:$0xf] }
 0x136   :  { %v1317_v63 = vsel %vm1061_vm14, %v692_v18, %v1189_v32  ;;  %3039 = vmatmul.bf16.vlgmr.msra.gmra.mxu2 %v7918_v58  ;;  %v1072_v1 = vmul.f32 0.25, %v802_v50  ;;  %vm944_vm1 = vcmp.gt.f32.partialorder %v802_v50, 0.0  ;;  %v7469_v58 = vld [vmem:[#allocation5 + $0x48c] sm:$0xf0] }
 0x137   :  { %v8097_v27 = vpack.c.bf16 %v1317_v63, %v1309_v52  ;;  %v1318_v46 = vsel %vm1062_vm15, %v741_v33, %v1190_v23  ;;  %3088 = vmatmul.bf16.vlgmr.msra.gmra.mxu3 %v7922_v62  ;;  %v1199_v20 = vsel %vm943_vm0, %v753_v59, %v1071_v57  ;;  %v6548_v62 = vld [vmem:[#allocation5 + $0x480] sm:$0xf] }
 0x138   :  { %v8101_v2 = vpack.c.bf16 %v1318_v46, %v1310_v14  ;;  %v1200_v25 = vsel %vm944_vm1, %v802_v50, %v1072_v1 }
 0x139   :  { %9250 = vst [vmem:[#allocation33_spill] sm:$0xff] %v8097_v27  ;;  %v850_v29 = vpop.f32.mrf.mxu2 }
 0x13a   :  { %9251 = vst [vmem:[#allocation34_spill] sm:$0xff] %v8101_v2  ;;  %v899_v0 = vpop.f32.mrf.mxu3  ;;  %v754_v56 = vpop.f32.mrf.mxu0  ;;  %v851_v7 = vadd.f32 %v850_v29, %v8104_v55 }
 0x13b   :  { %v755_v13 = vadd.f32 %v754_v56, %v8087_v35  ;;  %v803_v48 = vpop.f32.mrf.mxu1  ;;  %v900_v24 = vadd.f32 %v899_v0, %v8106_v60 }
 0x13c   :  { %v804_v3 = vadd.f32 %v803_v48, %v8092_v39  ;;  %v1073_v32 = vmul.f32 0.25, %v851_v7  ;;  %vm945_vm4 = vcmp.gt.f32.partialorder %v851_v7, 0.0 }
 0x13d   :  { %vm951_vm2 = vcmp.gt.f32.partialorder %v755_v13, 0.0  ;;  %v1079_v4 = vmul.f32 0.25, %v755_v13  ;;  %v1074_v63 = vmul.f32 0.25, %v900_v24  ;;  %vm946_vm5 = vcmp.gt.f32.partialorder %v900_v24, 0.0 }
 0x13e   :  { %vm952_vm3 = vcmp.gt.f32.partialorder %v804_v3, 0.0  ;;  %v1080_v16 = vmul.f32 0.25, %v804_v3  ;;  %v1201_v29 = vsel %vm945_vm4, %v851_v7, %v1073_v32 }
 0x13f   :  { %v1207_v18 = vsel %vm951_vm2, %v755_v13, %v1079_v4  ;;  %v1202_v56 = vsel %vm946_vm5, %v900_v24, %v1074_v63 }
 0x140   :  { %v8112_v28 = vpack.c.bf16 %v1207_v18, %v1199_v20  ;;  %v1208_v30 = vsel %vm952_vm3, %v804_v3, %v1080_v16 }
 0x141   :  { %v8114_v33 = vpack.c.bf16 %v1208_v30, %v1200_v25  ;;  %v852_v6 = vpop.f32.mrf.mxu2 }
 0x142   :  { %v853_v36 = vadd.f32 %v852_v6, %v8104_v55  ;;  %v901_v23 = vpop.f32.mrf.mxu3  ;;  %v757_v52 = vpop.f32.mrf.mxu0 }
 0x143   :  { %9252 = vst [vmem:[#allocation35_spill] sm:$0xff] %v8114_v33  ;;  %v902_v14 = vadd.f32 %v901_v23, %v8106_v60  ;;  %v806_v46 = vpop.f32.mrf.mxu1  ;;  %v758_v48 = vadd.f32 %v757_v52, %v8087_v35 }
 0x144   :  { %vm953_vm6 = vcmp.gt.f32.partialorder %v853_v36, 0.0  ;;  %v1081_v59 = vmul.f32 0.25, %v853_v36  ;;  %v807_v3 = vadd.f32 %v806_v46, %v8092_v39 }
 0x145   :  { %vm954_vm7 = vcmp.gt.f32.partialorder %v902_v14, 0.0  ;;  %v1082_v50 = vmul.f32 0.25, %v902_v14  ;;  %2946 = vmatmul.bf16.gmra.mxu0 %v7929_v19  ;;  %2995 = vmatmul.bf16.gmra.mxu1 %v7931_v21  ;;  %v1087_v20 = vmul.f32 0.25, %v758_v48  ;;  %vm959_vm8 = vcmp.gt.f32.partialorder %v758_v48, 0.0 }
 0x146   :  { %v1209_v0 = vsel %vm953_vm6, %v853_v36, %v1081_v59  ;;  %3044 = vmatmul.bf16.gmra.mxu2 %v7938_v40  ;;  %v1088_v24 = vmul.f32 0.25, %v807_v3  ;;  %vm960_vm9 = vcmp.gt.f32.partialorder %v807_v3, 0.0  ;;  %v7513_v40 = vld [vmem:[#allocation5 + $0x5ec] sm:$0xf0] }
 0x147   :  { %v8121_v57 = vpack.c.bf16 %v1209_v0, %v1201_v29  ;;  %v1210_v13 = vsel %vm954_vm7, %v902_v14, %v1082_v50  ;;  %3093 = vmatmul.bf16.gmra.mxu3 %v7942_v45  ;;  %v1215_v23 = vsel %vm959_vm8, %v758_v48, %v1087_v20 }
 0x148   :  { %v8125_v1 = vpack.c.bf16 %v1210_v13, %v1202_v56  ;;  %v1216_v14 = vsel %vm960_vm9, %v807_v3, %v1088_v24 }
 0x149   :  { %9253 = vst [vmem:[#allocation36_spill] sm:$0xff] %v8121_v57  ;;  %v855_v4 = vpop.f32.mrf.mxu2 }
 0x14a   :  { %9254 = vst [vmem:[#allocation37_spill] sm:$0xff] %v8125_v1  ;;  %v904_v16 = vpop.f32.mrf.mxu3  ;;  %v759_v7 = vpop.f32.mrf.mxu0  ;;  %v856_v32 = vadd.f32 %v855_v4, %v8104_v55 }
 0x14b   :  { %v760_v18 = vadd.f32 %v759_v7, %v8087_v35  ;;  %v808_v25 = vpop.f32.mrf.mxu1  ;;  %v905_v52 = vadd.f32 %v904_v16, %v8106_v60 }
 0x14c   :  { %v809_v30 = vadd.f32 %v808_v25, %v8092_v39  ;;  %v1089_v0 = vmul.f32 0.25, %v856_v32  ;;  %vm961_vm12 = vcmp.gt.f32.partialorder %v856_v32, 0.0 }
 0x14d   :  { %vm967_vm10 = vcmp.gt.f32.partialorder %v760_v18, 0.0  ;;  %v1095_v6 = vmul.f32 0.25, %v760_v18  ;;  %v1090_v4 = vmul.f32 0.25, %v905_v52  ;;  %vm962_vm13 = vcmp.gt.f32.partialorder %v905_v52, 0.0 }
 0x14e   :  { %vm968_vm11 = vcmp.gt.f32.partialorder %v809_v30, 0.0  ;;  %v1096_v36 = vmul.f32 0.25, %v809_v30  ;;  %v1217_v20 = vsel %vm961_vm12, %v856_v32, %v1089_v0 }
 0x14f   :  { %v1223_v63 = vsel %vm967_vm10, %v760_v18, %v1095_v6  ;;  %v1218_v24 = vsel %vm962_vm13, %v905_v52, %v1090_v4 }
 0x150   :  { %v8132_v46 = vpack.c.bf16 %v1223_v63, %v1215_v23  ;;  %v1224_v59 = vsel %vm968_vm11, %v809_v30, %v1096_v36 }
 0x151   :  { %v8134_v50 = vpack.c.bf16 %v1224_v59, %v1216_v14  ;;  %v857_v29 = vpop.f32.mrf.mxu2  ;;  %v6852_v14 = vld [vmem:[#allocation5 + $0x6e0] sm:$0xf]  ;;  %v7545_v59 = vld [vmem:[#allocation5 + $0x6ec] sm:$0xf0] }
 0x152   :  { %9255 = vst [vmem:[#allocation38_spill] sm:$0xff] %v8132_v46  ;;  %v858_v56 = vadd.f32 %v857_v29, %v8104_v55  ;;  %v906_v13 = vpop.f32.mrf.mxu3  ;;  %v762_v7 = vpop.f32.mrf.mxu0  ;;  %v6853_v29 = vor.u32 %v7545_v59, %v6852_v14  ;;  %v7481_v14 = vld [vmem:[#allocation5 + $0x4ec] sm:$0xf0]  ;;  %v6980_v59 = vld [vmem:[#allocation5 + $0x7e0] sm:$0xf] }
 0x153   :  { %9256 = vst [vmem:[#allocation39_spill] sm:$0xff] %v8134_v50  ;;  %v907_v25 = vadd.f32 %v906_v13, %v8106_v60  ;;  %v811_v48 = vpop.f32.mrf.mxu1  ;;  %v763_v36 = vadd.f32 %v762_v7, %v8087_v35 }
 0x154   :  { %vm969_vm14 = vcmp.gt.f32.partialorder %v858_v56, 0.0  ;;  %v1097_v16 = vmul.f32 0.25, %v858_v56  ;;  %v812_v63 = vadd.f32 %v811_v48, %v8092_v39  ;;  %3227 = vmatpush.bf16.msrb.mxu2 %v6853_v29 }
 0x155   :  { %vm970_vm15 = vcmp.gt.f32.partialorder %v907_v25, 0.0  ;;  %v1098_v3 = vmul.f32 0.25, %v907_v25  ;;  %2951 = vmatmul.bf16.gmra.mxu0 %v7949_v8  ;;  %3000 = vmatmul.bf16.gmra.mxu1 %v7951_v11  ;;  %v1103_v13 = vmul.f32 0.25, %v763_v36  ;;  %vm975_vm0 = vcmp.gt.f32.partialorder %v763_v36, 0.0 }
 0x156   :  { %v1225_v18 = vsel %vm969_vm14, %v858_v56, %v1097_v16  ;;  %3049 = vmatmul.bf16.gmra.mxu2 %v7958_v42  ;;  %vm976_vm1 = vcmp.gt.f32.partialorder %v812_v63, 0.0 }
 0x157   :  { %v8141_v30 = vpack.c.bf16 %v1225_v18, %v1217_v20  ;;  %v1226_v6 = vsel %vm970_vm15, %v907_v25, %v1098_v3  ;;  %3098 = vmatmul.bf16.gmra.mxu3 %v7962_v47  ;;  %v1104_v25 = vmul.f32 0.25, %v812_v63  ;;  %v1231_v20 = vsel %vm975_vm0, %v763_v36, %v1103_v13 }
 0x158   :  { %v8145_v23 = vpack.c.bf16 %v1226_v6, %v1218_v24  ;;  %v6596_v6 = vld [vmem:[#allocation5 + $0x4e0] sm:$0xf] }
 0x159   :  { %9257 = vst [vmem:[#allocation40_spill] sm:$0xff] %v8141_v30  ;;  %v860_v32 = vpop.f32.mrf.mxu2  ;;  %v6597_v42 = vor.u32 %v7481_v14, %v6596_v6  ;;  %v6836_v14 = vld [vmem:[#allocation5 + $0x6c0] sm:$0xf] }
 0x15a   :  { %9258 = vst [vmem:[#allocation41_spill] sm:$0xff] %v8145_v23  ;;  %v909_v0 = vpop.f32.mrf.mxu3  ;;  %v764_v56 = vpop.f32.mrf.mxu0  ;;  %v861_v48 = vadd.f32 %v860_v32, %v8104_v55  ;;  %v6724_v32 = vld [vmem:[#allocation5 + $0x5e0] sm:$0xf] }
 0x15b   :  { %v765_v52 = vadd.f32 %v764_v56, %v8087_v35  ;;  %v813_v4 = vpop.f32.mrf.mxu1  ;;  %v910_v18 = vadd.f32 %v909_v0, %v8106_v60  ;;  %v1232_v56 = vsel %vm976_vm1, %v812_v63, %v1104_v25  ;;  %3129 = vmatpush.bf16.msrb.mxu0 %v6597_v42 }
 0x15c   :  { %v814_v7 = vadd.f32 %v813_v4, %v8092_v39  ;;  %v7577_v4 = vld [vmem:[#allocation5 + $0x7ec] sm:$0xf0]  ;;  %v1105_v21 = vmul.f32 0.25, %v861_v48  ;;  %vm977_vm4 = vcmp.gt.f32.partialorder %v861_v48, 0.0 }
 0x15d   :  { %vm983_vm2 = vcmp.gt.f32.partialorder %v765_v52, 0.0  ;;  %v1111_v16 = vmul.f32 0.25, %v765_v52  ;;  %v6981_v45 = vor.u32 %v7577_v4, %v6980_v59  ;;  %v1106_v63 = vmul.f32 0.25, %v910_v18  ;;  %v7541_v59 = vld [vmem:[#allocation5 + $0x6cc] sm:$0xf0] }
 0x15e   :  { %vm984_vm3 = vcmp.gt.f32.partialorder %v814_v7, 0.0  ;;  %v1112_v3 = vmul.f32 0.25, %v814_v7  ;;  %vm978_vm5 = vcmp.gt.f32.partialorder %v910_v18, 0.0 }
 0x15f   :  { %v1239_v24 = vsel %vm983_vm2, %v765_v52, %v1111_v16  ;;  %v6725_v52 = vor.u32 %v7513_v40, %v6724_v32  ;;  %3276 = vmatpush.bf16.msrb.mxu3 %v6981_v45  ;;  %v1234_v40 = vsel %vm978_vm5, %v910_v18, %v1106_v63 }
 0x160   :  { %v8152_v29 = vpack.c.bf16 %v1239_v24, %v1231_v20  ;;  %v1240_v47 = vsel %vm984_vm3, %v814_v7, %v1112_v3  ;;  %v1233_v3 = vsel %vm977_vm4, %v861_v48, %v1105_v21  ;;  %v6837_v48 = vor.u32 %v7541_v59, %v6836_v14 }
 0x161   :  { %v8154_v11 = vpack.c.bf16 %v1240_v47, %v1232_v56  ;;  %v862_v8 = vpop.f32.mrf.mxu2  ;;  %3178 = vmatpush.bf16.msrb.mxu1 %v6725_v52 }
 0x162   :  { %9259 = vst [vmem:[#allocation42_spill] sm:$0xff] %v8152_v29  ;;  %v863_v36 = vadd.f32 %v862_v8, %v8104_v55  ;;  %v911_v0 = vpop.f32.mrf.mxu3  ;;  %v767_v13 = vpop.f32.mrf.mxu0  ;;  %3228 = vmatpush.bf16.msrb.mxu2 %v6837_v48 }
 0x163   :  { %9260 = vst [vmem:[#allocation43_spill] sm:$0xff] %v8154_v11  ;;  %v912_v25 = vadd.f32 %v911_v0, %v8106_v60  ;;  %v816_v7 = vpop.f32.mrf.mxu1  ;;  %v768_v45 = vadd.f32 %v767_v13, %v8087_v35 }
 0x164   :  { %vm985_vm6 = vcmp.gt.f32.partialorder %v863_v36, 0.0  ;;  %v1113_v47 = vmul.f32 0.25, %v863_v36  ;;  %v817_v6 = vadd.f32 %v816_v7, %v8092_v39 }
 0x165   :  { %vm986_vm7 = vcmp.gt.f32.partialorder %v912_v25, 0.0  ;;  %v1114_v16 = vmul.f32 0.25, %v912_v25  ;;  %2956 = vmatmul.bf16.gmra.mxu0 %v7969_v34  ;;  %3005 = vmatmul.bf16.gmra.mxu1 %v7971_v17  ;;  %v1119_v32 = vmul.f32 0.25, %v768_v45  ;;  %vm991_vm8 = vcmp.gt.f32.partialorder %v768_v45, 0.0  ;;  %v7509_v17 = vld [vmem:[#allocation5 + $0x5cc] sm:$0xf0] }
 0x166   :  { %v1241_v8 = vsel %vm985_vm6, %v863_v36, %v1113_v47  ;;  %3054 = vmatmul.bf16.gmra.mxu2 %v7979_v51  ;;  %v1120_v0 = vmul.f32 0.25, %v817_v6  ;;  %vm992_vm9 = vcmp.gt.f32.partialorder %v817_v6, 0.0 }
 0x167   :  { %v8161_v42 = vpack.c.bf16 %v1241_v8, %v1233_v3  ;;  %v1242_v20 = vsel %vm986_vm7, %v912_v25, %v1114_v16  ;;  %3103 = vmatmul.bf16.gmra.mxu3 %v7983_v54  ;;  %v1247_v7 = vsel %vm991_vm8, %v768_v45, %v1119_v32  ;;  %v6580_v3 = vld [vmem:[#allocation5 + $0x4c0] sm:$0xf]  ;;  %v7477_v8 = vld [vmem:[#allocation5 + $0x4cc] sm:$0xf0] }
 0x168   :  { %v8165_v24 = vpack.c.bf16 %v1242_v20, %v1234_v40  ;;  %v6964_v40 = vld [vmem:[#allocation5 + $0x7c0] sm:$0xf]  ;;  %v1248_v20 = vsel %vm992_vm9, %v817_v6, %v1120_v0  ;;  %v6581_v48 = vor.u32 %v7477_v8, %v6580_v3 }
 0x169   :  { %9261 = vst [vmem:[#allocation44_spill] sm:$0xff] %v8161_v42  ;;  %v865_v21 = vpop.f32.mrf.mxu2 }
 0x16a   :  { %9262 = vst [vmem:[#allocation45_spill] sm:$0xff] %v8165_v24  ;;  %v914_v56 = vpop.f32.mrf.mxu3  ;;  %v769_v4 = vpop.f32.mrf.mxu0  ;;  %v866_v63 = vadd.f32 %v865_v21, %v8104_v55  ;;  %v6708_v21 = vld [vmem:[#allocation5 + $0x5c0] sm:$0xf]  ;;  %3130 = vmatpush.bf16.msrb.mxu0 %v6581_v48 }
 0x16b   :  { %v770_v18 = vadd.f32 %v769_v4, %v8087_v35  ;;  %v818_v36 = vpop.f32.mrf.mxu1  ;;  %v915_v47 = vadd.f32 %v914_v56, %v8106_v60  ;;  %v7573_v4 = vld [vmem:[#allocation5 + $0x7cc] sm:$0xf0] }
 0x16c   :  { %v819_v13 = vadd.f32 %v818_v36, %v8092_v39  ;;  %v6965_v51 = vor.u32 %v7573_v4, %v6964_v40  ;;  %v1121_v34 = vmul.f32 0.25, %v866_v63  ;;  %vm993_vm12 = vcmp.gt.f32.partialorder %v866_v63, 0.0 }
 0x16d   :  { %vm999_vm10 = vcmp.gt.f32.partialorder %v770_v18, 0.0  ;;  %v1127_v52 = vmul.f32 0.25, %v770_v18  ;;  %v1122_v6 = vmul.f32 0.25, %v915_v47  ;;  %vm994_vm13 = vcmp.gt.f32.partialorder %v915_v47, 0.0 }
 0x16e   :  { %vm1000_vm11 = vcmp.gt.f32.partialorder %v819_v13, 0.0  ;;  %v1128_v25 = vmul.f32 0.25, %v819_v13  ;;  %3277 = vmatpush.bf16.msrb.mxu3 %v6965_v51 }
 0x16f   :  { %v1255_v16 = vsel %vm999_vm10, %v770_v18, %v1127_v52  ;;  %v6709_v18 = vor.u32 %v7509_v17, %v6708_v21  ;;  %v1250_v17 = vsel %vm994_vm13, %v915_v47, %v1122_v6 }
 0x170   :  { %v8172_v14 = vpack.c.bf16 %v1255_v16, %v1247_v7  ;;  %v1256_v59 = vsel %vm1000_vm11, %v819_v13, %v1128_v25  ;;  %v1249_v7 = vsel %vm993_vm12, %v866_v63, %v1121_v34 }
 0x171   :  { %v8174_v36 = vpack.c.bf16 %v1256_v59, %v1248_v20  ;;  %v867_v54 = vpop.f32.mrf.mxu2  ;;  %3179 = vmatpush.bf16.msrb.mxu1 %v6709_v18  ;;  %v6820_v20 = vld [vmem:[#allocation5 + $0x6a0] sm:$0xf]  ;;  %v7537_v59 = vld [vmem:[#allocation5 + $0x6ac] sm:$0xf0] }
 0x172   :  { %9263 = vst [vmem:[#allocation46_spill] sm:$0xff] %v8172_v14  ;;  %v868_v45 = vadd.f32 %v867_v54, %v8104_v55  ;;  %v916_v56 = vpop.f32.mrf.mxu3  ;;  %v772_v32 = vpop.f32.mrf.mxu0  ;;  %v6821_v63 = vor.u32 %v7537_v59, %v6820_v20 }
 0x173   :  { %9264 = vst [vmem:[#allocation47_spill] sm:$0xff] %v8174_v36  ;;  %v917_v0 = vadd.f32 %v916_v56, %v8106_v60  ;;  %v821_v13 = vpop.f32.mrf.mxu1  ;;  %v773_v16 = vadd.f32 %v772_v32, %v8087_v35 }
 0x174   :  { %vm1001_vm14 = vcmp.gt.f32.partialorder %v868_v45, 0.0  ;;  %v1129_v52 = vmul.f32 0.25, %v868_v45  ;;  %v822_v8 = vadd.f32 %v821_v13, %v8092_v39  ;;  %3229 = vmatpush.bf16.msrb.mxu2 %v6821_v63  ;;  %v7569_v63 = vld [vmem:[#allocation5 + $0x7ac] sm:$0xf0] }
 0x175   :  { %vm1002_vm15 = vcmp.gt.f32.partialorder %v917_v0, 0.0  ;;  %v1130_v25 = vmul.f32 0.25, %v917_v0  ;;  %2961 = vmatmul.bf16.gmra.mxu0 %v7994_v31  ;;  %3010 = vmatmul.bf16.gmra.mxu1 %v7996_v37  ;;  %vm1007_vm0 = vcmp.gt.f32.partialorder %v773_v16, 0.0  ;;  %v1135_v47 = vmul.f32 0.25, %v773_v16 }
 0x176   :  { %v1257_v54 = vsel %vm1001_vm14, %v868_v45, %v1129_v52  ;;  %3059 = vmatmul.bf16.gmra.mxu2 %v8010_v26  ;;  %v1136_v45 = vmul.f32 0.25, %v822_v8  ;;  %vm1008_vm1 = vcmp.gt.f32.partialorder %v822_v8, 0.0 }
 0x177   :  { %v8182_v3 = vpack.c.bf16 %v1257_v54, %v1249_v7  ;;  %v1258_v51 = vsel %vm1002_vm15, %v917_v0, %v1130_v25  ;;  %3108 = vmatmul.bf16.gmra.mxu3 %v8014_v61  ;;  %v6564_v25 = vld [vmem:[#allocation5 + $0x4a0] sm:$0xf]  ;;  %v7473_v54 = vld [vmem:[#allocation5 + $0x4ac] sm:$0xf0] }
 0x178   :  { %v8186_v40 = vpack.c.bf16 %v1258_v51, %v1250_v17  ;;  %v6948_v17 = vld [vmem:[#allocation5 + $0x7a0] sm:$0xf]  ;;  %v1263_v51 = vsel %vm1007_vm0, %v773_v16, %v1135_v47  ;;  %v1264_v20 = vsel %vm1008_vm1, %v822_v8, %v1136_v45  ;;  %v7501_v45 = vld [vmem:[#allocation5 + $0x58c] sm:$0xf0] }
 0x179   :  { %9265 = vst [vmem:[#allocation48_spill] sm:$0xff] %v8182_v3  ;;  %v870_v34 = vpop.f32.mrf.mxu2  ;;  %v6949_v26 = vor.u32 %v7569_v63, %v6948_v17 }
 0x17a   :  { %9266 = vst [vmem:[#allocation49_spill] sm:$0xff] %v8186_v40  ;;  %v8189_v48 = vadd.f32 %v870_v34, %v8104_v55  ;;  %v919_v4 = vpop.f32.mrf.mxu3  ;;  %v774_v21 = vpop.f32.mrf.mxu0  ;;  %v6565_v34 = vor.u32 %v7473_v54, %v6564_v25  ;;  %v6549_v54 = vor.u32 %v7469_v58, %v6548_v62  ;;  %v7465_v62 = vld [vmem:[#allocation5 + $0x46c] sm:$0xf0] }
 0x17b   :  { %v920_v56 = vadd.f32 %v919_v4, %v8106_v60  ;;  %v775_v32 = vadd.f32 %v774_v21, %v8087_v35  ;;  %v823_v18 = vpop.f32.mrf.mxu1  ;;  %v6692_v4 = vld [vmem:[#allocation5 + $0x5a0] sm:$0xf]  ;;  %v7505_v21 = vld [vmem:[#allocation5 + $0x5ac] sm:$0xf0]  ;;  %3278 = vmatpush.bf16.msrb.mxu3 %v6949_v26 }
 0x17c   :  { %vm1009_vm2 = vcmp.gt.f32.partialorder %v8189_v48, 0.0  ;;  %v1137_v6 = vmul.f32 0.25, %v8189_v48  ;;  %v824_v0 = vadd.f32 %v823_v18, %v8092_v39  ;;  %v6693_v37 = vor.u32 %v7505_v21, %v6692_v4  ;;  %3131 = vmatpush.bf16.msrb.mxu0 %v6565_v34 }
 0x17d   :  { %vm1010_vm3 = vcmp.gt.f32.partialorder %v920_v56, 0.0  ;;  %v1138_v13 = vmul.f32 0.25, %v920_v56  ;;  %vm1015_vm4 = vcmp.gt.f32.partialorder %v775_v32, 0.0  ;;  %v1143_v52 = vmul.f32 0.25, %v775_v32 }
 0x17e   :  { %vm1016_vm5 = vcmp.gt.f32.partialorder %v824_v0, 0.0  ;;  %v1144_v7 = vmul.f32 0.25, %v824_v0  ;;  %3180 = vmatpush.bf16.msrb.mxu1 %v6693_v37  ;;  %v6532_v37 = vld [vmem:[#allocation5 + $0x460] sm:$0xf]  ;;  %v1265_v63 = vsel %vm1009_vm2, %v8189_v48, %v1137_v6  ;;  %v7529_v48 = vld [vmem:[#allocation5 + $0x66c] sm:$0xf0] }
 0x17f   :  { %v1271_v59 = vsel %vm1015_vm4, %v775_v32, %v1143_v52  ;;  %v6804_v32 = vld [vmem:[#allocation5 + $0x680] sm:$0xf]  ;;  %v7533_v52 = vld [vmem:[#allocation5 + $0x68c] sm:$0xf0]  ;;  %v1266_v4 = vsel %vm1010_vm3, %v920_v56, %v1138_v13  ;;  %v6533_v13 = vor.u32 %v7465_v62, %v6532_v37 }
 0x180   :  { %v8197_v61 = vpack.c.bf16 %v1271_v59, %v1263_v51  ;;  %v1272_v18 = vsel %vm1016_vm5, %v824_v0, %v1144_v7  ;;  %v6805_v17 = vor.u32 %v7533_v52, %v6804_v32  ;;  %v6932_v51 = vld [vmem:[#allocation5 + $0x780] sm:$0xf]  ;;  %3132 = vmatpush.bf16.msrb.mxu0 %v6549_v54  ;;  %v7561_v32 = vld [vmem:[#allocation5 + $0x76c] sm:$0xf0] }
 0x181   :  { %v8199_v31 = vpack.c.bf16 %v1272_v18, %v1264_v20  ;;  %v872_v19 = vpop.f32.mrf.mxu2  ;;  %v7565_v20 = vld [vmem:[#allocation5 + $0x78c] sm:$0xf0]  ;;  %v6900_v62 = vld [vmem:[#allocation5 + $0x740] sm:$0xf] }
 0x182   :  { %9267 = vst [vmem:[#allocation50_spill] sm:$0xff] %v8197_v61  ;;  %v873_v16 = vadd.f32 %v872_v19, %v8104_v55  ;;  %v921_v8 = vpop.f32.mrf.mxu3  ;;  %v777_v47 = vpop.f32.mrf.mxu0  ;;  %v6677_v19 = vor.u32 %v7501_v45, %v6676_v43  ;;  %v6933_v34 = vor.u32 %v7565_v20, %v6932_v51  ;;  %3230 = vmatpush.bf16.msrb.mxu2 %v6805_v17  ;;  %v6660_v43 = vld [vmem:[#allocation5 + $0x560] sm:$0xf]  ;;  %v7461_v54 = vld [vmem:[#allocation5 + $0x44c] sm:$0xf0] }
 0x183   :  { %9268 = vst [vmem:[#allocation51_spill] sm:$0xff] %v8199_v31  ;;  %v922_v0 = vadd.f32 %v921_v8, %v8106_v60  ;;  %v8204_v25 = vadd.f32 %v777_v47, %v8087_v35  ;;  %v826_v7 = vpop.f32.mrf.mxu1  ;;  %v7497_v47 = vld [vmem:[#allocation5 + $0x56c] sm:$0xf0]  ;;  %v6788_v45 = vld [vmem:[#allocation5 + $0x660] sm:$0xf] }
 0x184   :  { %vm1017_vm6 = vcmp.gt.f32.partialorder %v873_v16, 0.0  ;;  %v1145_v59 = vmul.f32 0.25, %v873_v16  ;;  %v827_v8 = vadd.f32 %v826_v7, %v8092_v39  ;;  %3181 = vmatpush.bf16.msrb.mxu1 %v6677_v19  ;;  %3279 = vmatpush.bf16.msrb.mxu3 %v6933_v34  ;;  %v6789_v7 = vor.u32 %v7529_v48, %v6788_v45  ;;  %v6516_v51 = vld [vmem:[#allocation5 + $0x440] sm:$0xf] }
 0x185   :  { %vm1018_vm7 = vcmp.gt.f32.partialorder %v922_v0, 0.0  ;;  %v1146_v26 = vmul.f32 0.25, %v922_v0  ;;  %2966 = vmatmul.bf16.gmra.mxu0 %v8032_v22  ;;  %3015 = vmatmul.bf16.gmra.mxu1 %v8034_v53  ;;  %vm1023_vm8 = vcmp.gt.f32.partialorder %v8204_v25, 0.0  ;;  %v1151_v56 = vmul.f32 0.25, %v8204_v25  ;;  %v6644_v20 = vld [vmem:[#allocation5 + $0x540] sm:$0xf] }
 0x186   :  { %v1273_v58 = vsel %vm1017_vm6, %v873_v16, %v1145_v59  ;;  %3064 = vmatmul.bf16.gmra.mxu2 %v8049_v38  ;;  %v6916_v16 = vld [vmem:[#allocation5 + $0x760] sm:$0xf]  ;;  %3133 = vmatpush.bf16.msrb.mxu0 %v6533_v13  ;;  %v6517_v37 = vor.u32 %v7461_v54, %v6516_v51  ;;  %vm1024_vm9 = vcmp.gt.f32.partialorder %v827_v8, 0.0  ;;  %v7457_v54 = vld [vmem:[#allocation5 + $0x42c] sm:$0xf0] }
 0x187   :  { %v8213_v21 = vpack.c.bf16 %v1273_v58, %v1265_v63  ;;  %v1274_v18 = vsel %vm1018_vm7, %v922_v0, %v1146_v26  ;;  %3113 = vmatmul.bf16.gmra.mxu3 %v8053_v49  ;;  %v6661_v0 = vor.u32 %v7497_v47, %v6660_v43  ;;  %v6917_v17 = vor.u32 %v7561_v32, %v6916_v16  ;;  %v7493_v63 = vld [vmem:[#allocation5 + $0x54c] sm:$0xf0] }
 0x188   :  { %v8217_v6 = vpack.c.bf16 %v1274_v18, %v1266_v4  ;;  %v6772_v4 = vld [vmem:[#allocation5 + $0x640] sm:$0xf]  ;;  %v7525_v58 = vld [vmem:[#allocation5 + $0x64c] sm:$0xf0]  ;;  %v1152_v18 = vmul.f32 0.25, %v827_v8  ;;  %3231 = vmatpush.bf16.msrb.mxu2 %v6789_v7  ;;  %v6645_v45 = vor.u32 %v7493_v63, %v6644_v20  ;;  %v1279_v16 = vsel %vm1023_vm8, %v8204_v25, %v1151_v56 }
 0x189   :  { %9269 = vst [vmem:[#allocation52_spill] sm:$0xff] %v8213_v21  ;;  %v875_v52 = vpop.f32.mrf.mxu2  ;;  %v7557_v43 = vld [vmem:[#allocation5 + $0x74c] sm:$0xf0]  ;;  %3182 = vmatpush.bf16.msrb.mxu1 %v6661_v0  ;;  %3280 = vmatpush.bf16.msrb.mxu3 %v6917_v17  ;;  %v6773_v48 = vor.u32 %v7525_v58, %v6772_v4  ;;  %v6756_v63 = vld [vmem:[#allocation5 + $0x620] sm:$0xf] }
 0x18a   :  { %9270 = vst [vmem:[#allocation53_spill] sm:$0xff] %v8217_v6  ;;  %v924_v59 = vpop.f32.mrf.mxu3  ;;  %v779_v26 = vpop.f32.mrf.mxu0  ;;  %v8222_v49 = vadd.f32 %v875_v52, %v8104_v55  ;;  %v6500_v52 = vld [vmem:[#allocation5 + $0x420] sm:$0xf]  ;;  %v6901_v51 = vor.u32 %v7557_v43, %v6900_v62  ;;  %3134 = vmatpush.bf16.msrb.mxu0 %v6517_v37  ;;  %v7489_v20 = vld [vmem:[#allocation5 + $0x52c] sm:$0xf0] }
 0x18b   :  { %v780_v19 = vadd.f32 %v779_v26, %v8087_v35  ;;  %v828_v34 = vpop.f32.mrf.mxu1  ;;  %v925_v13 = vadd.f32 %v924_v59, %v8106_v60  ;;  %v6628_v26 = vld [vmem:[#allocation5 + $0x520] sm:$0xf]  ;;  %v6501_v17 = vor.u32 %v7457_v54, %v6500_v52  ;;  %v7521_v4 = vld [vmem:[#allocation5 + $0x62c] sm:$0xf0] }
 0x18c   :  { %v829_v47 = vadd.f32 %v828_v34, %v8092_v39  ;;  %v1280_v34 = vsel %vm1024_vm9, %v827_v8, %v1152_v18  ;;  %3232 = vmatpush.bf16.msrb.mxu2 %v6773_v48  ;;  %v1153_v25 = vmul.f32 0.25, %v8222_v49  ;;  %v6629_v59 = vor.u32 %v7489_v20, %v6628_v26  ;;  %v6884_v62 = vld [vmem:[#allocation5 + $0x720] sm:$0xf]  ;;  %v7553_v43 = vld [vmem:[#allocation5 + $0x72c] sm:$0xf0] }
 0x18d   :  { %vm1031_vm10 = vcmp.gt.f32.partialorder %v780_v19, 0.0  ;;  %v1159_v32 = vmul.f32 0.25, %v780_v19  ;;  %3183 = vmatpush.bf16.msrb.mxu1 %v6645_v45  ;;  %3281 = vmatpush.bf16.msrb.mxu3 %v6901_v51  ;;  %v6757_v18 = vor.u32 %v7521_v4, %v6756_v63  ;;  %v6484_v37 = vld [vmem:[#allocation5 + $0x400] sm:$0xf]  ;;  %v7453_v48 = vld [vmem:[#allocation5 + $0x40c] sm:$0xf0] }
 0x18e   :  { %vm1032_vm11 = vcmp.gt.f32.partialorder %v829_v47, 0.0  ;;  %v1160_v7 = vmul.f32 0.25, %v829_v47  ;;  %vm1025_vm12 = vcmp.gt.f32.partialorder %v8222_v49, 0.0  ;;  %v1154_v52 = vmul.f32 0.25, %v925_v13  ;;  %v7485_v45 = vld [vmem:[#allocation5 + $0x50c] sm:$0xf0]  ;;  %3135 = vmatpush.bf16.msrb.mxu0 %v6501_v17 }
 0x18f   :  { %v1287_v0 = vsel %vm1031_vm10, %v780_v19, %v1159_v32  ;;  %v6885_v19 = vor.u32 %v7553_v43, %v6884_v62  ;;  %v6612_v32 = vld [vmem:[#allocation5 + $0x500] sm:$0xf]  ;;  %vm1026_vm13 = vcmp.gt.f32.partialorder %v925_v13, 0.0  ;;  %v7549_v62 = vld [vmem:[#allocation5 + $0x70c] sm:$0xf0]  ;;  %v1281_v43 = vsel %vm1025_vm12, %v8222_v49, %v1153_v25 }
 0x190   :  { %v8232_v56 = vpack.c.bf16 %v1287_v0, %v1279_v16  ;;  %v1288_v58 = vsel %vm1032_vm11, %v829_v47, %v1160_v7  ;;  %v6740_v7 = vld [vmem:[#allocation5 + $0x600] sm:$0xf]  ;;  %3233 = vmatpush.bf16.msrb.mxu2 %v6757_v18  ;;  %v7517_v0 = vld [vmem:[#allocation5 + $0x60c] sm:$0xf0]  ;;  %v6613_v4 = vor.u32 %v7485_v45, %v6612_v32  ;;  %v1282_v17 = vsel %vm1026_vm13, %v925_v13, %v1154_v52 }
 0x191   :  { %v8234_v38 = vpack.c.bf16 %v1288_v58, %v1280_v34  ;;  %v877_v8 = vpop.f32.mrf.mxu2  ;;  %v6485_v34 = vor.u32 %v7453_v48, %v6484_v37  ;;  %v6868_v20 = vld [vmem:[#allocation5 + $0x700] sm:$0xf]  ;;  %3184 = vmatpush.bf16.msrb.mxu1 %v6629_v59  ;;  %3282 = vmatpush.bf16.msrb.mxu3 %v6885_v19  ;;  %v6741_v58 = vor.u32 %v7517_v0, %v6740_v7 }
 0x192   :  { %9271 = vst [vmem:[#allocation54_spill] sm:$0xff] %v8232_v56  ;;  %v878_v16 = vadd.f32 %v877_v8, %v8104_v55  ;;  %v926_v54 = vpop.f32.mrf.mxu3  ;;  %v782_v47 = vpop.f32.mrf.mxu0  ;;  %v6869_v59 = vor.u32 %v7549_v62, %v6868_v20 }
 0x193   :  { %9272 = vst [vmem:[#allocation55_spill] sm:$0xff] %v8234_v38  ;;  %v927_v51 = vadd.f32 %v926_v54, %v8106_v60  ;;  %v831_v26 = vpop.f32.mrf.mxu1  ;;  %v783_v48 = vadd.f32 %v782_v47, %v8087_v35  ;;  %3136 = vmatpush.bf16.msrb.mxu0 %v6485_v34 }
 0x194   :  { %vm1033_vm14 = vcmp.gt.f32.partialorder %v878_v16, 0.0  ;;  %v1161_v63 = vmul.f32 0.25, %v878_v16  ;;  %v832_v25 = vadd.f32 %v831_v26, %v8092_v39  ;;  %3234 = vmatpush.bf16.msrb.mxu2 %v6741_v58 }
 0x195   :  { %vm1034_vm15 = vcmp.gt.f32.partialorder %v927_v51, 0.0  ;;  %v1162_v8 = vmul.f32 0.25, %v927_v51  ;;  %2971 = vmatmul.bf16.gmra.mxu0 %v8060_v5  ;;  %3020 = vmatmul.bf16.gmra.mxu1 %v8062_v9  ;;  %vm1039_vm0 = vcmp.gt.f32.partialorder %v783_v48, 0.0 }
 0x196   :  { %v1289_v18 = vsel %vm1033_vm14, %v878_v16, %v1161_v63  ;;  %3069 = vmatmul.bf16.gmra.mxu2 %v8069_v44  ;;  %3185 = vmatpush.bf16.msrb.mxu1 %v6613_v4  ;;  %v1167_v16 = vmul.f32 0.25, %v783_v48  ;;  %v1168_v7 = vmul.f32 0.25, %v832_v25  ;;  %vm1040_vm1 = vcmp.gt.f32.partialorder %v832_v25, 0.0 }
 0x197   :  { %v8246_v19 = vpack.c.bf16 %v1289_v18, %v1281_v43  ;;  %v1290_v37 = vsel %vm1034_vm15, %v927_v51, %v1162_v8  ;;  %3118 = vmatmul.bf16.gmra.mxu3 %v8073_v15 }
 0x198   :  { %v8250_v49 = vpack.c.bf16 %v1290_v37, %v1282_v17  ;;  %3283 = vmatpush.bf16.msrb.mxu3 %v6869_v59  ;;  %v1295_v0 = vsel %vm1039_vm0, %v783_v48, %v1167_v16  ;;  %v1296_v4 = vsel %vm1040_vm1, %v832_v25, %v1168_v7 }
 0x199   :  { %9273 = vst [vmem:[#allocation56_spill] sm:$0xff] %v8246_v19  ;;  %v880_v13 = vpop.f32.mrf.mxu2 }
 0x19a   :  { %9274 = vst [vmem:[#allocation57_spill] sm:$0xff] %v8250_v49  ;;  %v929_v32 = vpop.f32.mrf.mxu3  ;;  %v784_v52 = vpop.f32.mrf.mxu0  ;;  %v881_v34 = vadd.f32 %v880_v13, %v8104_v55 }
 0x19b   :  { %v785_v54 = vadd.f32 %v784_v52, %v8087_v35  ;;  %v833_v45 = vpop.f32.mrf.mxu1  ;;  %v930_v20 = vadd.f32 %v929_v32, %v8106_v60 }
 0x19c   :  { %v834_v47 = vadd.f32 %v833_v45, %v8092_v39  ;;  %v1169_v17 = vmul.f32 0.25, %v881_v34  ;;  %vm1041_vm4 = vcmp.gt.f32.partialorder %v881_v34, 0.0 }
 0x19d   :  { %vm1047_vm2 = vcmp.gt.f32.partialorder %v785_v54, 0.0  ;;  %v1175_v51 = vmul.f32 0.25, %v785_v54  ;;  %v1170_v13 = vmul.f32 0.25, %v930_v20  ;;  %vm1042_vm5 = vcmp.gt.f32.partialorder %v930_v20, 0.0 }
 0x19e   :  { %vm1048_vm3 = vcmp.gt.f32.partialorder %v834_v47, 0.0  ;;  %v1176_v26 = vmul.f32 0.25, %v834_v47  ;;  %v1297_v16 = vsel %vm1041_vm4, %v881_v34, %v1169_v17 }
 0x19f   :  { %v1303_v63 = vsel %vm1047_vm2, %v785_v54, %v1175_v51  ;;  %v1298_v45 = vsel %vm1042_vm5, %v930_v20, %v1170_v13 }
 0x1a0   :  { %v8257_v58 = vpack.c.bf16 %v1303_v63, %v1295_v0  ;;  %v1304_v62 = vsel %vm1048_vm3, %v834_v47, %v1176_v26 }
 0x1a1   :  { %v8259_v43 = vpack.c.bf16 %v1304_v62, %v1296_v4  ;;  %v882_v8 = vpop.f32.mrf.mxu2 }
 0x1a2   :  { %v883_v18 = vadd.f32 %v882_v8, %v8104_v55  ;;  %v931_v59 = vpop.f32.mrf.mxu3  ;;  %v787_v37 = vpop.f32.mrf.mxu0 }
 0x1a3   :  { %v932_v52 = vadd.f32 %v931_v59, %v8106_v60  ;;  %v836_v48 = vpop.f32.mrf.mxu1  ;;  %v788_v51 = vadd.f32 %v787_v37, %v8087_v35  ;;  %v1643_v59 = vld [vmem:[%s9114_s4] sm:$0xf] }
 0x1a4   :  { %vm1049_vm6 = vcmp.gt.f32.partialorder %v883_v18, 0.0  ;;  %v1177_v32 = vmul.f32 0.25, %v883_v18  ;;  %v837_v0 = vadd.f32 %v836_v48, %v8092_v39 }
 0x1a5   :  { %vm1050_vm7 = vcmp.gt.f32.partialorder %v932_v52, 0.0  ;;  %v1178_v25 = vmul.f32 0.25, %v932_v52  ;;  %2976 = vmatmul.bf16.gmra.mxu0 %v8080_v10  ;;  %3025 = vmatmul.bf16.gmra.mxu1 %v8082_v12  ;;  %v1183_v62 = vmul.f32 0.25, %v788_v51  ;;  %vm1055_vm8 = vcmp.gt.f32.partialorder %v788_v51, 0.0 }
 0x1a6   :  { %v1305_v54 = vsel %vm1049_vm6, %v883_v18, %v1177_v32  ;;  %3074 = vmatmul.bf16.gmra.mxu2 %v8097_v27  ;;  %v1184_v20 = vmul.f32 0.25, %v837_v0  ;;  %vm1056_vm9 = vcmp.gt.f32.partialorder %v837_v0, 0.0 }
 0x1a7   :  { %v8266_v7 = vpack.c.bf16 %v1305_v54, %v1297_v16  ;;  %v1306_v47 = vsel %vm1050_vm7, %v932_v52, %v1178_v25  ;;  %3123 = vmatmul.bf16.gmra.mxu3 %v8101_v2  ;;  %v1311_v48 = vsel %vm1055_vm8, %v788_v51, %v1183_v62  ;;  %v8280_v25 = vperm.slane %v1643_v59, 0 }
 0x1a8   :  { %v8270_v26 = vpack.c.bf16 %v1306_v47, %v1298_v45  ;;  %v1312_v16 = vsel %vm1056_vm9, %v837_v0, %v1184_v20 }
 0x1a9   :  { %v885_v63 = vpop.f32.mrf.mxu2 }
 0x1aa   :  { %v934_v4 = vpop.f32.mrf.mxu3  ;;  %v789_v34 = vpop.f32.mrf.mxu0  ;;  %v886_v13 = vadd.f32 %v885_v63, %v8104_v55 }
 0x1ab   :  { %v790_v8 = vadd.f32 %v789_v34, %v8087_v35  ;;  %v838_v17 = vpop.f32.mrf.mxu1  ;;  %v935_v32 = vadd.f32 %v934_v4, %v8106_v60 }
 0x1ac   :  { %v839_v18 = vadd.f32 %v838_v17, %v8092_v39  ;;  %v1185_v34 = vmul.f32 0.25, %v886_v13  ;;  %vm1057_vm12 = vcmp.gt.f32.partialorder %v886_v13, 0.0 }
 0x1ad   :  { %vm1063_vm10 = vcmp.gt.f32.partialorder %v790_v8, 0.0  ;;  %v1191_v37 = vmul.f32 0.25, %v790_v8  ;;  %v1186_v27 = vmul.f32 0.25, %v935_v32  ;;  %vm1058_vm13 = vcmp.gt.f32.partialorder %v935_v32, 0.0 }
 0x1ae   :  { %vm1064_vm11 = vcmp.gt.f32.partialorder %v839_v18, 0.0  ;;  %v1192_v52 = vmul.f32 0.25, %v839_v18 }
 0x1af   :  { %v1319_v35 = vsel %vm1063_vm10, %v790_v8, %v1191_v37 }
 0x1b0   :  { %v8282_v54 = vpack.c.bf16 %v1319_v35, %v1311_v48  ;;  %v1320_v39 = vsel %vm1064_vm11, %v839_v18, %v1192_v52  ;;  %v1313_v18 = vsel %vm1057_vm12, %v886_v13, %v1185_v34 }
 0x1b1   :  { %v8284_v45 = vpack.c.bf16 %v1320_v39, %v1312_v16  ;;  %v887_v47 = vpop.f32.mrf.mxu2 }
 0x1b2   :  { %v888_v17 = vadd.f32 %v887_v47, %v8104_v55  ;;  %v936_v2 = vpop.f32.mrf.mxu3  ;;  %v2942_v63 = vpop.f32.mrf.mxu0  ;;  %v1314_v55 = vsel %vm1058_vm13, %v935_v32, %v1186_v27 }
 0x1b3   :  { %v937_v51 = vadd.f32 %v936_v2, %v8106_v60  ;;  %v2943_v4 = vadd.f32 %v2942_v63, %v8280_v25  ;;  %v2991_v62 = vpop.f32.mrf.mxu1 }
 0x1b4   :  { %vm1065_vm14 = vcmp.gt.f32.partialorder %v888_v17, 0.0  ;;  %v1193_v0 = vmul.f32 0.25, %v888_v17 }
 0x1b5   :  { %vm1066_vm15 = vcmp.gt.f32.partialorder %v937_v51, 0.0  ;;  %v1194_v8 = vmul.f32 0.25, %v937_v51  ;;  %v2992_v20 = vadd.f32 %v2991_v62, %v2943_v4  ;;  %3137 = vmatmul.bf16.vlgmr.msrb.gmra.mxu0 %v8112_v28  ;;  %3186 = vmatmul.bf16.vlgmr.msrb.gmra.mxu1 %v8114_v33 }
 0x1b6   :  { %v1321_v59 = vsel %vm1065_vm14, %v888_v17, %v1193_v0  ;;  %3235 = vmatmul.bf16.vlgmr.msrb.gmra.mxu2 %v8121_v57 }
 0x1b7   :  { %v8292_v37 = vpack.c.bf16 %v1321_v59, %v1313_v18  ;;  %v1322_v2 = vsel %vm1066_vm15, %v937_v51, %v1194_v8  ;;  %3284 = vmatmul.bf16.vlgmr.msrb.gmra.mxu3 %v8125_v1 }
 0x1b8   :  { %v8295_v60 = vpack.c.bf16 %v1322_v2, %v1314_v55 }
 0x1b9   :  { %v3040_v52 = vpop.f32.mrf.mxu2 }
 0x1ba   :  { %v3041_v48 = vadd.f32 %v3040_v52, %v2992_v20  ;;  %v3089_v35 = vpop.f32.mrf.mxu3  ;;  %v2944_v16 = vpop.f32.mrf.mxu0 }
 0x1bb   :  { %v2945_v39 = vadd.f32 %v2944_v16, %v8280_v25  ;;  %v2993_v13 = vpop.f32.mrf.mxu1 }
 0x1bc   :  { %v8298_v47 = vadd.f32 %v3089_v35, %v3041_v48 }
 0x1bd   :  { %v2994_v34 = vadd.f32 %v2993_v13, %v2945_v39 }
 0x1c1   :  { %v3042_v17 = vpop.f32.mrf.mxu2 }
 0x1c2   :  { %v3043_v63 = vadd.f32 %v3042_v17, %v2994_v34  ;;  %v3091_v27 = vpop.f32.mrf.mxu3  ;;  %v2947_v32 = vpop.f32.mrf.mxu0 }
 0x1c3   :  { %v2948_v51 = vadd.f32 %v2947_v32, %v8280_v25  ;;  %v2996_v4 = vpop.f32.mrf.mxu1  ;;  %v7415_v32 = vld [vmem:[#allocation5 + $0x2e4] sm:$0xf] }
 0x1c4   :  { %v8301_v62 = vadd.f32 %v3091_v27, %v3043_v63 }
 0x1c5   :  { %v2997_v0 = vadd.f32 %v2996_v4, %v2948_v51  ;;  %3142 = vmatmul.bf16.gmra.mxu0 %v8132_v46  ;;  %3191 = vmatmul.bf16.gmra.mxu1 %v8134_v50  ;;  %v6342_v51 = vld [vmem:[#allocation5 + $0x2f0] sm:$0xf0] }
 0x1c6   :  { %3240 = vmatmul.bf16.gmra.mxu2 %v8141_v30  ;;  %v6345_v4 = vor.u32 %v7415_v32, %v6342_v51 }
 0x1c7   :  { %3289 = vmatmul.bf16.gmra.mxu3 %v8145_v23 }
 0x1c8   :  { %3423 = vmatpush.bf16.msra.mxu2 %v6345_v4 }
 0x1c9   :  { %v3045_v8 = vpop.f32.mrf.mxu2 }
 0x1ca   :  { %v3046_v20 = vadd.f32 %v3045_v8, %v2997_v0  ;;  %v3094_v18 = vpop.f32.mrf.mxu3  ;;  %v2949_v59 = vpop.f32.mrf.mxu0 }
 0x1cb   :  { %v2950_v55 = vadd.f32 %v2949_v59, %v8280_v25  ;;  %v2998_v2 = vpop.f32.mrf.mxu1 }
 0x1cc   :  { %v8308_v52 = vadd.f32 %v3094_v18, %v3046_v20 }
 0x1cd   :  { %v2999_v48 = vadd.f32 %v2998_v2, %v2950_v55 }
 0x1d1   :  { %v3047_v35 = vpop.f32.mrf.mxu2 }
 0x1d2   :  { %v3048_v16 = vadd.f32 %v3047_v35, %v2999_v48  ;;  %v3096_v39 = vpop.f32.mrf.mxu3  ;;  %v2952_v13 = vpop.f32.mrf.mxu0  ;;  %v7351_v48 = vld [vmem:[#allocation5 + $0xe4] sm:$0xf]  ;;  %v6086_v35 = vld [vmem:[#allocation5 + $0xf0] sm:$0xf0] }
 0x1d3   :  { %v2953_v34 = vadd.f32 %v2952_v13, %v8280_v25  ;;  %v3001_v17 = vpop.f32.mrf.mxu1  ;;  %v6089_v13 = vor.u32 %v7351_v48, %v6086_v35 }
 0x1d4   :  { %v8311_v63 = vadd.f32 %v3096_v39, %v3048_v16  ;;  %v7447_v16 = vld [vmem:[#allocation5 + $0x3e4] sm:$0xf] }
 0x1d5   :  { %v3002_v27 = vadd.f32 %v3001_v17, %v2953_v34  ;;  %3147 = vmatmul.bf16.gmra.mxu0 %v8152_v29  ;;  %3196 = vmatmul.bf16.gmra.mxu1 %v8154_v11  ;;  %v6470_v34 = vld [vmem:[#allocation5 + $0x3f0] sm:$0xf0]  ;;  %v7383_v17 = vld [vmem:[#allocation5 + $0x1e4] sm:$0xf] }
 0x1d6   :  { %3245 = vmatmul.bf16.gmra.mxu2 %v8161_v42  ;;  %v6473_v42 = vor.u32 %v7447_v16, %v6470_v34  ;;  %3325 = vmatpush.bf16.msra.mxu0 %v6089_v13 }
 0x1d7   :  { %3294 = vmatmul.bf16.gmra.mxu3 %v8165_v24  ;;  %v6214_v24 = vld [vmem:[#allocation5 + $0x1f0] sm:$0xf0] }
 0x1d8   :  { %v6217_v32 = vor.u32 %v7383_v17, %v6214_v24  ;;  %3472 = vmatpush.bf16.msra.mxu3 %v6473_v42  ;;  %v7411_v42 = vld [vmem:[#allocation5 + $0x2c4] sm:$0xf]  ;;  %v6326_v24 = vld [vmem:[#allocation5 + $0x2d0] sm:$0xf0] }
 0x1d9   :  { %v3050_v0 = vpop.f32.mrf.mxu2  ;;  %v7347_v17 = vld [vmem:[#allocation5 + $0xc4] sm:$0xf] }
 0x1da   :  { %v3051_v8 = vadd.f32 %v3050_v0, %v3002_v27  ;;  %v3099_v20 = vpop.f32.mrf.mxu3  ;;  %v2954_v18 = vpop.f32.mrf.mxu0  ;;  %3374 = vmatpush.bf16.msra.mxu1 %v6217_v32  ;;  %v6070_v32 = vld [vmem:[#allocation5 + $0xd0] sm:$0xf0] }
 0x1db   :  { %v2955_v59 = vadd.f32 %v2954_v18, %v8280_v25  ;;  %v3003_v55 = vpop.f32.mrf.mxu1 }
 0x1dc   :  { %v8318_v2 = vadd.f32 %v3099_v20, %v3051_v8 }
 0x1dd   :  { %v3004_v39 = vadd.f32 %v3003_v55, %v2955_v59  ;;  %v6329_v59 = vor.u32 %v7411_v42, %v6326_v24 }
 0x1df   :  { %3424 = vmatpush.bf16.msra.mxu2 %v6329_v59 }
 0x1e1   :  { %v3052_v27 = vpop.f32.mrf.mxu2 }
 0x1e2   :  { %v3053_v51 = vadd.f32 %v3052_v27, %v3004_v39  ;;  %v3101_v4 = vpop.f32.mrf.mxu3  ;;  %v2957_v0 = vpop.f32.mrf.mxu0  ;;  %v7443_v27 = vld [vmem:[#allocation5 + $0x3c4] sm:$0xf] }
 0x1e3   :  { %v2958_v8 = vadd.f32 %v2957_v0, %v8280_v25  ;;  %v3006_v20 = vpop.f32.mrf.mxu1  ;;  %v6454_v0 = vld [vmem:[#allocation5 + $0x3d0] sm:$0xf0] }
 0x1e4   :  { %v8321_v18 = vadd.f32 %v3101_v4, %v3053_v51  ;;  %v6073_v4 = vor.u32 %v7347_v17, %v6070_v32 }
 0x1e5   :  { %v3007_v11 = vadd.f32 %v3006_v20, %v2958_v8  ;;  %3152 = vmatmul.bf16.gmra.mxu0 %v8172_v14  ;;  %3201 = vmatmul.bf16.gmra.mxu1 %v8174_v36  ;;  %v7379_v8 = vld [vmem:[#allocation5 + $0x1c4] sm:$0xf]  ;;  %v6198_v20 = vld [vmem:[#allocation5 + $0x1d0] sm:$0xf0] }
 0x1e6   :  { %3250 = vmatmul.bf16.gmra.mxu2 %v8182_v3  ;;  %v6201_v42 = vor.u32 %v7379_v8, %v6198_v20  ;;  %3326 = vmatpush.bf16.msra.mxu0 %v6073_v4  ;;  %v7343_v20 = vld [vmem:[#allocation5 + $0xa4] sm:$0xf] }
 0x1e7   :  { %3299 = vmatmul.bf16.gmra.mxu3 %v8186_v40  ;;  %v6457_v40 = vor.u32 %v7443_v27, %v6454_v0 }
 0x1e8   :  { %3375 = vmatpush.bf16.msra.mxu1 %v6201_v42  ;;  %v6054_v42 = vld [vmem:[#allocation5 + $0xb0] sm:$0xf0] }
 0x1e9   :  { %v3055_v55 = vpop.f32.mrf.mxu2  ;;  %3473 = vmatpush.bf16.msra.mxu3 %v6457_v40  ;;  %v7407_v40 = vld [vmem:[#allocation5 + $0x2a4] sm:$0xf] }
 0x1ea   :  { %v3056_v48 = vadd.f32 %v3055_v55, %v3007_v11  ;;  %v3104_v35 = vpop.f32.mrf.mxu3  ;;  %v2959_v16 = vpop.f32.mrf.mxu0 }
 0x1eb   :  { %v2960_v39 = vadd.f32 %v2959_v16, %v8280_v25  ;;  %v3008_v13 = vpop.f32.mrf.mxu1 }
 0x1ec   :  { %v8328_v34 = vadd.f32 %v3104_v35, %v3056_v48 }
 0x1ed   :  { %v3009_v51 = vadd.f32 %v3008_v13, %v2960_v39  ;;  %v6310_v39 = vld [vmem:[#allocation5 + $0x2b0] sm:$0xf0] }
 0x1ee   :  { %v6313_v13 = vor.u32 %v7407_v40, %v6310_v39  ;;  %v7339_v39 = vld [vmem:[#allocation5 + $0x84] sm:$0xf] }
 0x1f0   :  { %3425 = vmatpush.bf16.msra.mxu2 %v6313_v13  ;;  %v6038_v13 = vld [vmem:[#allocation5 + $0x90] sm:$0xf0] }
 0x1f1   :  { %v3057_v11 = vpop.f32.mrf.mxu2 }
 0x1f2   :  { %v3058_v24 = vadd.f32 %v3057_v11, %v3009_v51  ;;  %v3106_v59 = vpop.f32.mrf.mxu3  ;;  %v2962_v55 = vpop.f32.mrf.mxu0  ;;  %v7439_v11 = vld [vmem:[#allocation5 + $0x3a4] sm:$0xf] }
 0x1f3   :  { %v2963_v48 = vadd.f32 %v2962_v55, %v8280_v25  ;;  %v3011_v35 = vpop.f32.mrf.mxu1  ;;  %v6438_v55 = vld [vmem:[#allocation5 + $0x3b0] sm:$0xf0] }
 0x1f4   :  { %v8331_v16 = vadd.f32 %v3106_v59, %v3058_v24  ;;  %v6057_v59 = vor.u32 %v7343_v20, %v6054_v42 }
 0x1f5   :  { %v3012_v3 = vadd.f32 %v3011_v35, %v2963_v48  ;;  %3157 = vmatmul.bf16.gmra.mxu0 %v8197_v61  ;;  %3206 = vmatmul.bf16.gmra.mxu1 %v8199_v31  ;;  %v7375_v48 = vld [vmem:[#allocation5 + $0x1a4] sm:$0xf]  ;;  %v6182_v35 = vld [vmem:[#allocation5 + $0x1b0] sm:$0xf0] }
 0x1f6   :  { %3255 = vmatmul.bf16.gmra.mxu2 %v8213_v21  ;;  %v6185_v40 = vor.u32 %v7375_v48, %v6182_v35  ;;  %3327 = vmatpush.bf16.msra.mxu0 %v6057_v59  ;;  %v6041_v21 = vor.u32 %v7339_v39, %v6038_v13  ;;  %v6166_v31 = vld [vmem:[#allocation5 + $0x190] sm:$0xf0]  ;;  %v7403_v61 = vld [vmem:[#allocation5 + $0x284] sm:$0xf] }
 0x1f7   :  { %3304 = vmatmul.bf16.gmra.mxu3 %v8217_v6  ;;  %v6441_v6 = vor.u32 %v7439_v11, %v6438_v55  ;;  %v7435_v55 = vld [vmem:[#allocation5 + $0x384] sm:$0xf]  ;;  %v6422_v59 = vld [vmem:[#allocation5 + $0x390] sm:$0xf0] }
 0x1f8   :  { %3376 = vmatpush.bf16.msra.mxu1 %v6185_v40  ;;  %v6425_v48 = vor.u32 %v7435_v55, %v6422_v59  ;;  %v6022_v40 = vld [vmem:[#allocation5 + $0x70] sm:$0xf0] }
 0x1f9   :  { %v3060_v17 = vpop.f32.mrf.mxu2  ;;  %3474 = vmatpush.bf16.msra.mxu3 %v6441_v6  ;;  %v6278_v13 = vld [vmem:[#allocation5 + $0x270] sm:$0xf0] }
 0x1fa   :  { %v3061_v32 = vadd.f32 %v3060_v17, %v3012_v3  ;;  %v3109_v27 = vpop.f32.mrf.mxu3  ;;  %v2964_v51 = vpop.f32.mrf.mxu0  ;;  %v7371_v17 = vld [vmem:[#allocation5 + $0x184] sm:$0xf]  ;;  %3328 = vmatpush.bf16.msra.mxu0 %v6041_v21 }
 0x1fb   :  { %v2965_v4 = vadd.f32 %v2964_v51, %v8280_v25  ;;  %v3013_v0 = vpop.f32.mrf.mxu1  ;;  %v6169_v42 = vor.u32 %v7371_v17, %v6166_v31  ;;  %v6150_v31 = vld [vmem:[#allocation5 + $0x170] sm:$0xf0] }
 0x1fc   :  { %v8338_v8 = vadd.f32 %v3109_v27, %v3061_v32 }
 0x1fd   :  { %v3014_v24 = vadd.f32 %v3013_v0, %v2965_v4  ;;  %v6294_v4 = vld [vmem:[#allocation5 + $0x290] sm:$0xf0]  ;;  %3377 = vmatpush.bf16.msra.mxu1 %v6169_v42  ;;  %3475 = vmatpush.bf16.msra.mxu3 %v6425_v48  ;;  %v7363_v42 = vld [vmem:[#allocation5 + $0x144] sm:$0xf] }
 0x1fe   :  { %v6297_v11 = vor.u32 %v7403_v61, %v6294_v4  ;;  %v7399_v61 = vld [vmem:[#allocation5 + $0x264] sm:$0xf] }
 0x1ff   :  { %v6281_v17 = vor.u32 %v7399_v61, %v6278_v13  ;;  %v6390_v61 = vld [vmem:[#allocation5 + $0x350] sm:$0xf0] }
 0x200   :  { %3426 = vmatpush.bf16.msra.mxu2 %v6297_v11 }
 0x201   :  { %v3062_v3 = vpop.f32.mrf.mxu2 }
 0x202   :  { %v3063_v51 = vadd.f32 %v3062_v3, %v3014_v24  ;;  %v3111_v32 = vpop.f32.mrf.mxu3  ;;  %v2967_v27 = vpop.f32.mrf.mxu0  ;;  %v7335_v24 = vld [vmem:[#allocation5 + $0x64] sm:$0xf] }
 0x203   :  { %v2968_v0 = vadd.f32 %v2967_v27, %v8280_v25  ;;  %v3016_v20 = vpop.f32.mrf.mxu1  ;;  %v7367_v3 = vld [vmem:[#allocation5 + $0x164] sm:$0xf]  ;;  %v6025_v39 = vor.u32 %v7335_v24, %v6022_v40 }
 0x204   :  { %v8341_v6 = vadd.f32 %v3111_v32, %v3063_v51  ;;  %v6153_v21 = vor.u32 %v7367_v3, %v6150_v31  ;;  %v7431_v51 = vld [vmem:[#allocation5 + $0x364] sm:$0xf]  ;;  %v6406_v32 = vld [vmem:[#allocation5 + $0x370] sm:$0xf0]  ;;  %3427 = vmatpush.bf16.msra.mxu2 %v6281_v17 }
 0x205   :  { %v3017_v35 = vadd.f32 %v3016_v20, %v2968_v0  ;;  %3162 = vmatmul.bf16.gmra.mxu0 %v8232_v56  ;;  %3211 = vmatmul.bf16.gmra.mxu1 %v8234_v38  ;;  %v6409_v27 = vor.u32 %v7431_v51, %v6406_v32  ;;  %v7331_v0 = vld [vmem:[#allocation5 + $0x44] sm:$0xf]  ;;  %v6006_v20 = vld [vmem:[#allocation5 + $0x50] sm:$0xf0] }
 0x206   :  { %3260 = vmatmul.bf16.gmra.mxu2 %v8246_v19  ;;  %3329 = vmatpush.bf16.msra.mxu0 %v6025_v39  ;;  %v6009_v40 = vor.u32 %v7331_v0, %v6006_v20  ;;  %v6134_v19 = vld [vmem:[#allocation5 + $0x150] sm:$0xf0]  ;;  %v7395_v38 = vld [vmem:[#allocation5 + $0x244] sm:$0xf] }
 0x207   :  { %3309 = vmatmul.bf16.gmra.mxu3 %v8250_v49  ;;  %3378 = vmatpush.bf16.msra.mxu1 %v6153_v21  ;;  %v6262_v49 = vld [vmem:[#allocation5 + $0x250] sm:$0xf0]  ;;  %v6137_v31 = vor.u32 %v7363_v42, %v6134_v19  ;;  %v7427_v39 = vld [vmem:[#allocation5 + $0x344] sm:$0xf] }
 0x208   :  { %v6265_v48 = vor.u32 %v7395_v38, %v6262_v49  ;;  %3476 = vmatpush.bf16.msra.mxu3 %v6409_v27  ;;  %v6393_v21 = vor.u32 %v7427_v39, %v6390_v61  ;;  %v7327_v51 = vld [vmem:[#allocation5 + $0x24] sm:$0xf]  ;;  %v5990_v32 = vld [vmem:[#allocation5 + $0x30] sm:$0xf0] }
 0x209   :  { %v3065_v4 = vpop.f32.mrf.mxu2  ;;  %v5993_v0 = vor.u32 %v7327_v51, %v5990_v32  ;;  %v6118_v20 = vld [vmem:[#allocation5 + $0x130] sm:$0xf0]  ;;  %v7391_v56 = vld [vmem:[#allocation5 + $0x224] sm:$0xf] }
 0x20a   :  { %v3066_v55 = vadd.f32 %v3065_v4, %v3017_v35  ;;  %v3114_v59 = vpop.f32.mrf.mxu3  ;;  %v2969_v24 = vpop.f32.mrf.mxu0  ;;  %3330 = vmatpush.bf16.msra.mxu0 %v6009_v40  ;;  %v7359_v4 = vld [vmem:[#allocation5 + $0x124] sm:$0xf]  ;;  %3428 = vmatpush.bf16.msra.mxu2 %v6265_v48  ;;  %v6374_v49 = vld [vmem:[#allocation5 + $0x330] sm:$0xf0] }
 0x20b   :  { %v2970_v11 = vadd.f32 %v2969_v24, %v8280_v25  ;;  %v3018_v3 = vpop.f32.mrf.mxu1  ;;  %3379 = vmatpush.bf16.msra.mxu1 %v6137_v31  ;;  %v6246_v24 = vld [vmem:[#allocation5 + $0x230] sm:$0xf0]  ;;  %v6121_v17 = vor.u32 %v7359_v4, %v6118_v20  ;;  %v7423_v38 = vld [vmem:[#allocation5 + $0x324] sm:$0xf] }
 0x20c   :  { %v8348_v13 = vadd.f32 %v3114_v59, %v3066_v55  ;;  %v6249_v19 = vor.u32 %v7391_v56, %v6246_v24  ;;  %3477 = vmatpush.bf16.msra.mxu3 %v6393_v21  ;;  %v6377_v42 = vor.u32 %v7423_v38, %v6374_v49  ;;  %v7323_v55 = vld [vmem:[#allocation5 + $0x4] sm:$0xf]  ;;  %v5974_v59 = vld [vmem:[#allocation5 + $0x10] sm:$0xf0] }
 0x20d   :  { %v3019_v35 = vadd.f32 %v3018_v3, %v2970_v11  ;;  %v7355_v40 = vld [vmem:[#allocation5 + $0x104] sm:$0xf]  ;;  %v5977_v39 = vor.u32 %v7323_v55, %v5974_v59  ;;  %v6102_v61 = vld [vmem:[#allocation5 + $0x110] sm:$0xf0] }
 0x20e   :  { %3331 = vmatpush.bf16.msra.mxu0 %v5993_v0  ;;  %v7387_v51 = vld [vmem:[#allocation5 + $0x204] sm:$0xf]  ;;  %v6230_v32 = vld [vmem:[#allocation5 + $0x210] sm:$0xf0]  ;;  %3429 = vmatpush.bf16.msra.mxu2 %v6249_v19  ;;  %v6105_v4 = vor.u32 %v7355_v40, %v6102_v61 }
 0x20f   :  { %3380 = vmatpush.bf16.msra.mxu1 %v6121_v17  ;;  %v6233_v21 = vor.u32 %v7387_v51, %v6230_v32  ;;  %v7419_v0 = vld [vmem:[#allocation5 + $0x304] sm:$0xf]  ;;  %v6358_v20 = vld [vmem:[#allocation5 + $0x310] sm:$0xf0] }
 0x210   :  { %3478 = vmatpush.bf16.msra.mxu3 %v6377_v42  ;;  %v6361_v17 = vor.u32 %v7419_v0, %v6358_v20 }
 0x211   :  { %v3067_v27 = vpop.f32.mrf.mxu2 }
 0x212   :  { %v3068_v11 = vadd.f32 %v3067_v27, %v3019_v35  ;;  %v3116_v3 = vpop.f32.mrf.mxu3  ;;  %v2972_v31 = vpop.f32.mrf.mxu0  ;;  %3332 = vmatpush.bf16.msra.mxu0 %v5977_v39  ;;  %3430 = vmatpush.bf16.msra.mxu2 %v6233_v21 }
 0x213   :  { %v2973_v48 = vadd.f32 %v2972_v31, %v8280_v25  ;;  %v3021_v56 = vpop.f32.mrf.mxu1  ;;  %3381 = vmatpush.bf16.msra.mxu1 %v6105_v4 }
 0x214   :  { %v8351_v24 = vadd.f32 %v3116_v3, %v3068_v11  ;;  %3479 = vmatpush.bf16.msra.mxu3 %v6361_v17 }
 0x215   :  { %v3022_v35 = vadd.f32 %v3021_v56, %v2973_v48  ;;  %3167 = vmatmul.bf16.gmra.mxu0 %v8257_v58  ;;  %3216 = vmatmul.bf16.gmra.mxu1 %v8259_v43 }
 0x216   :  { %3265 = vmatmul.bf16.gmra.mxu2 %v8266_v7 }
 0x217   :  { %3314 = vmatmul.bf16.gmra.mxu3 %v8270_v26 }
 0x219   :  { %v3070_v19 = vpop.f32.mrf.mxu2 }
 0x21a   :  { %v3071_v38 = vadd.f32 %v3070_v19, %v3022_v35  ;;  %v3119_v49 = vpop.f32.mrf.mxu3  ;;  %v2974_v27 = vpop.f32.mrf.mxu0 }
 0x21b   :  { %v2975_v42 = vadd.f32 %v2974_v27, %v8280_v25  ;;  %v3023_v55 = vpop.f32.mrf.mxu1 }
 0x21c   :  { %v8358_v59 = vadd.f32 %v3119_v49, %v3071_v38 }
 0x21d   :  { %v3024_v40 = vadd.f32 %v3023_v55, %v2975_v42 }
 0x221   :  { %v3072_v11 = vpop.f32.mrf.mxu2 }
 0x222   :  { %v3073_v3 = vadd.f32 %v3072_v11, %v3024_v40  ;;  %v3121_v31 = vpop.f32.mrf.mxu3  ;;  %v2977_v39 = vpop.f32.mrf.mxu0 }
 0x223   :  { %v2978_v61 = vadd.f32 %v2977_v39, %v8280_v25  ;;  %v3026_v51 = vpop.f32.mrf.mxu1  ;;  %v9276_v39 = vld [vmem:[#allocation11_spill] sm:$0xff] }
 0x224   :  { %v8361_v32 = vadd.f32 %v3121_v31, %v3073_v3  ;;  %v9275_v31 = vld [vmem:[#allocation10_spill] sm:$0xff] }
 0x225   :  { %v3027_v48 = vadd.f32 %v3026_v51, %v2978_v61  ;;  %3172 = vmatmul.bf16.gmra.mxu0 %v8282_v54  ;;  %3221 = vmatmul.bf16.gmra.mxu1 %v8284_v45 }
 0x226   :  { %3270 = vmatmul.bf16.gmra.mxu2 %v8292_v37 }
 0x227   :  { %3319 = vmatmul.bf16.gmra.mxu3 %v8295_v60 }
 0x229   :  { %v3075_v56 = vpop.f32.mrf.mxu2 }
 0x22a   :  { %v3076_v4 = vadd.f32 %v3075_v56, %v3027_v48  ;;  %v3124_v21 = vpop.f32.mrf.mxu3  ;;  %v2979_v0 = vpop.f32.mrf.mxu0 }
 0x22b   :  { %v2980_v20 = vadd.f32 %v2979_v0, %v8280_v25  ;;  %v3028_v17 = vpop.f32.mrf.mxu1  ;;  %v9277_v25 = vld [vmem:[#allocation12_spill] sm:$0xff] }
 0x22c   :  { %v8368_v35 = vadd.f32 %v3124_v21, %v3076_v4 }
 0x22d   :  { %v3029_v19 = vadd.f32 %v3028_v17, %v2980_v20 }
 0x231   :  { %v3077_v38 = vpop.f32.mrf.mxu2 }
 0x232   :  { %v3078_v49 = vadd.f32 %v3077_v38, %v3029_v19  ;;  %v3126_v27 = vpop.f32.mrf.mxu3  ;;  %v3138_v42 = vpop.f32.mrf.mxu0 }
 0x233   :  { %v3139_v55 = vadd.f32 %v3138_v42, %v8298_v47  ;;  %v3187_v40 = vpop.f32.mrf.mxu1 }
 0x234   :  { %v8371_v11 = vadd.f32 %v3126_v27, %v3078_v49 }
 0x235   :  { %v3188_v3 = vadd.f32 %v3187_v40, %v3139_v55  ;;  %3333 = vmatmul.bf16.vlgmr.msra.gmra.mxu0 %v7909_v41  ;;  %3382 = vmatmul.bf16.vlgmr.msra.gmra.mxu1 %v9275_v31 }
 0x236   :  { %3431 = vmatmul.bf16.vlgmr.msra.gmra.mxu2 %v9276_v39 }
 0x237   :  { %3480 = vmatmul.bf16.vlgmr.msra.gmra.mxu3 %v9277_v25  ;;  %v9278_v25 = vld [vmem:[#allocation13_spill] sm:$0xff] }
 0x239   :  { %v3236_v61 = vpop.f32.mrf.mxu2 }
 0x23a   :  { %v3237_v51 = vadd.f32 %v3236_v61, %v3188_v3  ;;  %v3285_v48 = vpop.f32.mrf.mxu3  ;;  %v3140_v56 = vpop.f32.mrf.mxu0  ;;  %v9279_v61 = vld [vmem:[#allocation14_spill] sm:$0xff] }
 0x23b   :  { %v3141_v4 = vadd.f32 %v3140_v56, %v8301_v62  ;;  %v3189_v21 = vpop.f32.mrf.mxu1  ;;  %v9280_v62 = vld [vmem:[#allocation15_spill] sm:$0xff] }
 0x23c   :  { %v3286_v47 = vadd.f32 %v3285_v48, %v3237_v51  ;;  %v9281_v51 = vld [vmem:[#allocation16_spill] sm:$0xff] }
 0x23d   :  { %v3190_v0 = vadd.f32 %v3189_v21, %v3141_v4 }
 0x23e   :  { %v4565_v42 = vmul.f32 0.25, %v3286_v47  ;;  %vm4501_vm0 = vcmp.gt.f32.partialorder %v3286_v47, 0.0 }
 0x240   :  { %v4629_v48 = vsel %vm4501_vm0, %v3286_v47, %v4565_v42 }
 0x241   :  { %v3238_v20 = vpop.f32.mrf.mxu2 }
 0x242   :  { %v3239_v17 = vadd.f32 %v3238_v20, %v3190_v0  ;;  %v3287_v19 = vpop.f32.mrf.mxu3  ;;  %v3143_v38 = vpop.f32.mrf.mxu0 }
 0x243   :  { %v3144_v49 = vadd.f32 %v3143_v38, %v8308_v52  ;;  %v3192_v27 = vpop.f32.mrf.mxu1 }
 0x244   :  { %v3288_v55 = vadd.f32 %v3287_v19, %v3239_v17 }
 0x245   :  { %v3193_v40 = vadd.f32 %v3192_v27, %v3144_v49  ;;  %3338 = vmatmul.bf16.gmra.mxu0 %v9278_v25  ;;  %3387 = vmatmul.bf16.gmra.mxu1 %v9279_v61 }
 0x246   :  { %vm4505_vm1 = vcmp.gt.f32.partialorder %v3288_v55, 0.0  ;;  %v4569_v3 = vmul.f32 0.25, %v3288_v55  ;;  %3436 = vmatmul.bf16.gmra.mxu2 %v9280_v62 }
 0x247   :  { %3485 = vmatmul.bf16.gmra.mxu3 %v9281_v51 }
 0x248   :  { %v4633_v56 = vsel %vm4505_vm1, %v3288_v55, %v4569_v3  ;;  %v9283_v3 = vld [vmem:[#allocation17_spill] sm:$0xff] }
 0x249   :  { %v8383_v4 = vpack.c.bf16 %v4633_v56, %v4629_v48  ;;  %v3241_v52 = vpop.f32.mrf.mxu2  ;;  %v9284_v48 = vld [vmem:[#allocation18_spill] sm:$0xff]  ;;  %v9286_v56 = vld [vmem:[#allocation20_spill] sm:$0xff] }
 0x24a   :  { %v3242_v21 = vadd.f32 %v3241_v52, %v3193_v40  ;;  %v3290_v0 = vpop.f32.mrf.mxu3  ;;  %v3145_v20 = vpop.f32.mrf.mxu0  ;;  %v7543_v52 = vld [vmem:[#allocation5 + $0x6e4] sm:$0xf] }
 0x24b   :  { %9282 = vst [vmem:[#allocation10_spill] sm:$0xff] %v8383_v4  ;;  %v3146_v17 = vadd.f32 %v3145_v20, %v8311_v63  ;;  %v3194_v19 = vpop.f32.mrf.mxu1  ;;  %v9285_v63 = vld [vmem:[#allocation19_spill] sm:$0xff]  ;;  %v7479_v4 = vld [vmem:[#allocation5 + $0x4e4] sm:$0xf] }
 0x24c   :  { %v3291_v38 = vadd.f32 %v3290_v0, %v3242_v21  ;;  %v6854_v21 = vld [vmem:[#allocation5 + $0x6f0] sm:$0xf0] }
 0x24d   :  { %v3195_v49 = vadd.f32 %v3194_v19, %v3146_v17  ;;  %v6857_v0 = vor.u32 %v7543_v52, %v6854_v21  ;;  %v7511_v52 = vld [vmem:[#allocation5 + $0x5e4] sm:$0xf] }
 0x24e   :  { %v4573_v47 = vmul.f32 0.25, %v3291_v38  ;;  %vm4509_vm2 = vcmp.gt.f32.partialorder %v3291_v38, 0.0 }
 0x24f   :  { %3619 = vmatpush.bf16.msrb.mxu2 %v6857_v0 }
 0x250   :  { %v4637_v20 = vsel %vm4509_vm2, %v3291_v38, %v4573_v47  ;;  %v6726_v47 = vld [vmem:[#allocation5 + $0x5f0] sm:$0xf0] }
 0x251   :  { %v3243_v27 = vpop.f32.mrf.mxu2 }
 0x252   :  { %v3244_v25 = vadd.f32 %v3243_v27, %v3195_v49  ;;  %v3292_v61 = vpop.f32.mrf.mxu3  ;;  %v3148_v39 = vpop.f32.mrf.mxu0 }
 0x253   :  { %v3149_v62 = vadd.f32 %v3148_v39, %v8318_v2  ;;  %v3197_v51 = vpop.f32.mrf.mxu1 }
 0x254   :  { %v3293_v42 = vadd.f32 %v3292_v61, %v3244_v25 }
 0x255   :  { %v3198_v55 = vadd.f32 %v3197_v51, %v3149_v62  ;;  %3343 = vmatmul.bf16.gmra.mxu0 %v9283_v3  ;;  %3392 = vmatmul.bf16.gmra.mxu1 %v9284_v48  ;;  %v7575_v48 = vld [vmem:[#allocation5 + $0x7e4] sm:$0xf]  ;;  %v6982_v3 = vld [vmem:[#allocation5 + $0x7f0] sm:$0xf0] }
 0x256   :  { %vm4513_vm3 = vcmp.gt.f32.partialorder %v3293_v42, 0.0  ;;  %v4577_v40 = vmul.f32 0.25, %v3293_v42  ;;  %3441 = vmatmul.bf16.gmra.mxu2 %v9285_v63  ;;  %v6598_v63 = vld [vmem:[#allocation5 + $0x4f0] sm:$0xf0]  ;;  %v6985_v38 = vor.u32 %v7575_v48, %v6982_v3  ;;  %v9289_v48 = vld [vmem:[#allocation22_spill] sm:$0xff] }
 0x257   :  { %3490 = vmatmul.bf16.gmra.mxu3 %v9286_v56  ;;  %v6601_v56 = vor.u32 %v7479_v4, %v6598_v63  ;;  %v9288_v63 = vld [vmem:[#allocation21_spill] sm:$0xff] }
 0x258   :  { %v4641_v2 = vsel %vm4513_vm3, %v3293_v42, %v4577_v40  ;;  %v6729_v40 = vor.u32 %v7511_v52, %v6726_v47  ;;  %3668 = vmatpush.bf16.msrb.mxu3 %v6985_v38 }
 0x259   :  { %v3246_v39 = vpop.f32.mrf.mxu2  ;;  %v8391_v17 = vpack.c.bf16 %v4641_v2, %v4637_v20  ;;  %3521 = vmatpush.bf16.msrb.mxu0 %v6601_v56  ;;  %v9290_v56 = vld [vmem:[#allocation23_spill] sm:$0xff] }
 0x25a   :  { %v3247_v25 = vadd.f32 %v3246_v39, %v3198_v55  ;;  %v3295_v61 = vpop.f32.mrf.mxu3  ;;  %v3150_v62 = vpop.f32.mrf.mxu0  ;;  %3570 = vmatpush.bf16.msrb.mxu1 %v6729_v40 }
 0x25b   :  { %9287 = vst [vmem:[#allocation58_spill] sm:$0xff] %v8391_v17  ;;  %v3151_v51 = vadd.f32 %v3150_v62, %v8321_v18  ;;  %v3199_v19 = vpop.f32.mrf.mxu1  ;;  %v6838_v62 = vld [vmem:[#allocation5 + $0x6d0] sm:$0xf0] }
 0x25c   :  { %v3296_v49 = vadd.f32 %v3295_v61, %v3247_v25  ;;  %v9291_v25 = vld [vmem:[#allocation24_spill] sm:$0xff]  ;;  %v7539_v61 = vld [vmem:[#allocation5 + $0x6c4] sm:$0xf] }
 0x25d   :  { %v3200_v27 = vadd.f32 %v3199_v19, %v3151_v51  ;;  %v6841_v51 = vor.u32 %v7539_v61, %v6838_v62  ;;  %v7507_v61 = vld [vmem:[#allocation5 + $0x5c4] sm:$0xf] }
 0x25e   :  { %v4581_v2 = vmul.f32 0.25, %v3296_v49  ;;  %vm4517_vm4 = vcmp.gt.f32.partialorder %v3296_v49, 0.0 }
 0x25f   :  { %3620 = vmatpush.bf16.msrb.mxu2 %v6841_v51 }
 0x261   :  { %v3248_v42 = vpop.f32.mrf.mxu2 }
 0x262   :  { %v3249_v55 = vadd.f32 %v3248_v42, %v3200_v27  ;;  %v3297_v21 = vpop.f32.mrf.mxu3  ;;  %v3153_v20 = vpop.f32.mrf.mxu0 }
 0x263   :  { %v3154_v18 = vadd.f32 %v3153_v20, %v8328_v34  ;;  %v3202_v0 = vpop.f32.mrf.mxu1  ;;  %v4645_v34 = vsel %vm4517_vm4, %v3296_v49, %v4581_v2  ;;  %v6710_v2 = vld [vmem:[#allocation5 + $0x5d0] sm:$0xf0] }
 0x264   :  { %v3298_v39 = vadd.f32 %v3297_v21, %v3249_v55 }
 0x265   :  { %v3203_v4 = vadd.f32 %v3202_v0, %v3154_v18  ;;  %3348 = vmatmul.bf16.gmra.mxu0 %v9288_v63  ;;  %3397 = vmatmul.bf16.gmra.mxu1 %v9289_v48  ;;  %v7475_v18 = vld [vmem:[#allocation5 + $0x4c4] sm:$0xf]  ;;  %v6582_v0 = vld [vmem:[#allocation5 + $0x4d0] sm:$0xf0] }
 0x266   :  { %vm4521_vm5 = vcmp.gt.f32.partialorder %v3298_v39, 0.0  ;;  %v4585_v3 = vmul.f32 0.25, %v3298_v39  ;;  %3446 = vmatmul.bf16.gmra.mxu2 %v9290_v56  ;;  %v6585_v17 = vor.u32 %v7475_v18, %v6582_v0  ;;  %v6966_v56 = vld [vmem:[#allocation5 + $0x7d0] sm:$0xf0] }
 0x267   :  { %3495 = vmatmul.bf16.gmra.mxu3 %v9291_v25  ;;  %v7571_v25 = vld [vmem:[#allocation5 + $0x7c4] sm:$0xf] }
 0x268   :  { %v4649_v19 = vsel %vm4521_vm5, %v3298_v39, %v4585_v3  ;;  %v6969_v49 = vor.u32 %v7571_v25, %v6966_v56  ;;  %3522 = vmatpush.bf16.msrb.mxu0 %v6585_v17  ;;  %v6713_v3 = vor.u32 %v7507_v61, %v6710_v2  ;;  %v9294_v25 = vld [vmem:[#allocation26_spill] sm:$0xff]  ;;  %v9295_v17 = vld [vmem:[#allocation27_spill] sm:$0xff] }
 0x269   :  { %v3251_v27 = vpop.f32.mrf.mxu2  ;;  %v8399_v52 = vpack.c.bf16 %v4649_v19, %v4645_v34 }
 0x26a   :  { %v3252_v38 = vadd.f32 %v3251_v27, %v3203_v4  ;;  %v3300_v47 = vpop.f32.mrf.mxu3  ;;  %v3155_v42 = vpop.f32.mrf.mxu0  ;;  %3669 = vmatpush.bf16.msrb.mxu3 %v6969_v49  ;;  %3571 = vmatpush.bf16.msrb.mxu1 %v6713_v3 }
 0x26b   :  { %9292 = vst [vmem:[#allocation21_spill] sm:$0xff] %v8399_v52  ;;  %v3156_v40 = vadd.f32 %v3155_v42, %v8331_v16  ;;  %v3204_v55 = vpop.f32.mrf.mxu1  ;;  %v9296_v42 = vld [vmem:[#allocation28_spill] sm:$0xff]  ;;  %v7567_v52 = vld [vmem:[#allocation5 + $0x7a4] sm:$0xf] }
 0x26c   :  { %v3301_v21 = vadd.f32 %v3300_v47, %v3252_v38  ;;  %v9293_v47 = vld [vmem:[#allocation25_spill] sm:$0xff] }
 0x26d   :  { %v3205_v20 = vadd.f32 %v3204_v55, %v3156_v40  ;;  %v7535_v40 = vld [vmem:[#allocation5 + $0x6a4] sm:$0xf]  ;;  %v6822_v55 = vld [vmem:[#allocation5 + $0x6b0] sm:$0xf0] }
 0x26e   :  { %v4589_v19 = vmul.f32 0.25, %v3301_v21  ;;  %vm4525_vm6 = vcmp.gt.f32.partialorder %v3301_v21, 0.0 }
 0x271   :  { %v3253_v39 = vpop.f32.mrf.mxu2 }
 0x272   :  { %v3254_v4 = vadd.f32 %v3253_v39, %v3205_v20  ;;  %v3302_v62 = vpop.f32.mrf.mxu3  ;;  %v3158_v34 = vpop.f32.mrf.mxu0  ;;  %v6825_v20 = vor.u32 %v7535_v40, %v6822_v55  ;;  %v7503_v40 = vld [vmem:[#allocation5 + $0x5a4] sm:$0xf]  ;;  %v6550_v55 = vld [vmem:[#allocation5 + $0x490] sm:$0xf0] }
 0x273   :  { %v3159_v16 = vadd.f32 %v3158_v34, %v8338_v8  ;;  %v3207_v51 = vpop.f32.mrf.mxu1  ;;  %v4653_v8 = vsel %vm4525_vm6, %v3301_v21, %v4589_v19  ;;  %v6694_v19 = vld [vmem:[#allocation5 + $0x5b0] sm:$0xf0] }
 0x274   :  { %v3303_v27 = vadd.f32 %v3302_v62, %v3254_v4  ;;  %3621 = vmatpush.bf16.msrb.mxu2 %v6825_v20  ;;  %v7499_v20 = vld [vmem:[#allocation5 + $0x584] sm:$0xf] }
 0x275   :  { %v3208_v38 = vadd.f32 %v3207_v51, %v3159_v16  ;;  %3353 = vmatmul.bf16.gmra.mxu0 %v9293_v47  ;;  %3402 = vmatmul.bf16.gmra.mxu1 %v9294_v25  ;;  %v7471_v16 = vld [vmem:[#allocation5 + $0x4a4] sm:$0xf]  ;;  %v6566_v51 = vld [vmem:[#allocation5 + $0x4b0] sm:$0xf0] }
 0x276   :  { %vm4529_vm7 = vcmp.gt.f32.partialorder %v3303_v27, 0.0  ;;  %v4593_v56 = vmul.f32 0.25, %v3303_v27  ;;  %3451 = vmatmul.bf16.gmra.mxu2 %v9295_v17  ;;  %v6950_v17 = vld [vmem:[#allocation5 + $0x7b0] sm:$0xf0] }
 0x277   :  { %3500 = vmatmul.bf16.gmra.mxu3 %v9296_v42  ;;  %v6569_v42 = vor.u32 %v7471_v16, %v6566_v51  ;;  %v6953_v21 = vor.u32 %v7567_v52, %v6950_v17  ;;  %v7563_v16 = vld [vmem:[#allocation5 + $0x784] sm:$0xf]  ;;  %v6934_v51 = vld [vmem:[#allocation5 + $0x790] sm:$0xf0] }
 0x278   :  { %v4657_v18 = vsel %vm4529_vm7, %v3303_v27, %v4593_v56  ;;  %v6697_v27 = vor.u32 %v7503_v40, %v6694_v19  ;;  %v7463_v19 = vld [vmem:[#allocation5 + $0x464] sm:$0xf] }
 0x279   :  { %v3256_v0 = vpop.f32.mrf.mxu2  ;;  %v8407_v61 = vpack.c.bf16 %v4657_v18, %v4653_v8  ;;  %3523 = vmatpush.bf16.msrb.mxu0 %v6569_v42  ;;  %3670 = vmatpush.bf16.msrb.mxu3 %v6953_v21  ;;  %v6937_v21 = vor.u32 %v7563_v16, %v6934_v51  ;;  %v7459_v51 = vld [vmem:[#allocation5 + $0x444] sm:$0xf] }
 0x27a   :  { %v3257_v49 = vadd.f32 %v3256_v0, %v3208_v38  ;;  %v3305_v2 = vpop.f32.mrf.mxu3  ;;  %v3160_v39 = vpop.f32.mrf.mxu0  ;;  %v7467_v38 = vld [vmem:[#allocation5 + $0x484] sm:$0xf]  ;;  %3572 = vmatpush.bf16.msrb.mxu1 %v6697_v27  ;;  %v6534_v27 = vld [vmem:[#allocation5 + $0x470] sm:$0xf0] }
 0x27b   :  { %9297 = vst [vmem:[#allocation22_spill] sm:$0xff] %v8407_v61  ;;  %v3161_v3 = vadd.f32 %v3160_v39, %v8341_v6  ;;  %v3209_v4 = vpop.f32.mrf.mxu1  ;;  %v6553_v0 = vor.u32 %v7467_v38, %v6550_v55  ;;  %v6806_v39 = vld [vmem:[#allocation5 + $0x690] sm:$0xf0]  ;;  %v6537_v55 = vor.u32 %v7463_v19, %v6534_v27  ;;  %v7491_v27 = vld [vmem:[#allocation5 + $0x544] sm:$0xf] }
 0x27c   :  { %v3306_v62 = vadd.f32 %v3305_v2, %v3257_v49  ;;  %v6678_v49 = vld [vmem:[#allocation5 + $0x590] sm:$0xf0]  ;;  %v7531_v2 = vld [vmem:[#allocation5 + $0x684] sm:$0xf] }
 0x27d   :  { %v3210_v34 = vadd.f32 %v3209_v4, %v3161_v3  ;;  %v6681_v17 = vor.u32 %v7499_v20, %v6678_v49  ;;  %v6809_v42 = vor.u32 %v7531_v2, %v6806_v39  ;;  %3524 = vmatpush.bf16.msrb.mxu0 %v6553_v0  ;;  %v6662_v20 = vld [vmem:[#allocation5 + $0x570] sm:$0xf0]  ;;  %v7559_v0 = vld [vmem:[#allocation5 + $0x764] sm:$0xf]  ;;  %3671 = vmatpush.bf16.msrb.mxu3 %v6937_v21 }
 0x27e   :  { %v4597_v3 = vmul.f32 0.25, %v3306_v62  ;;  %vm4533_vm8 = vcmp.gt.f32.partialorder %v3306_v62, 0.0  ;;  %v9299_v49 = vld [vmem:[#allocation32_spill] sm:$0xff] }
 0x27f   :  { %3622 = vmatpush.bf16.msrb.mxu2 %v6809_v42  ;;  %3573 = vmatpush.bf16.msrb.mxu1 %v6681_v17  ;;  %v6918_v2 = vld [vmem:[#allocation5 + $0x770] sm:$0xf0] }
 0x280   :  { %v4661_v39 = vsel %vm4533_vm8, %v3306_v62, %v4597_v3  ;;  %v6518_v19 = vld [vmem:[#allocation5 + $0x450] sm:$0xf0] }
 0x281   :  { %v3258_v56 = vpop.f32.mrf.mxu2  ;;  %3525 = vmatpush.bf16.msrb.mxu0 %v6537_v55  ;;  %v6774_v62 = vld [vmem:[#allocation5 + $0x650] sm:$0xf0] }
 0x282   :  { %v3259_v8 = vadd.f32 %v3258_v56, %v3210_v34  ;;  %v3307_v6 = vpop.f32.mrf.mxu3  ;;  %v3163_v18 = vpop.f32.mrf.mxu0  ;;  %v7495_v56 = vld [vmem:[#allocation5 + $0x564] sm:$0xf] }
 0x283   :  { %v3164_v4 = vadd.f32 %v3163_v18, %v8348_v13  ;;  %v3212_v52 = vpop.f32.mrf.mxu1  ;;  %v9298_v13 = vld [vmem:[#allocation31_spill] sm:$0xff]  ;;  %v7527_v18 = vld [vmem:[#allocation5 + $0x664] sm:$0xf] }
 0x284   :  { %v3308_v40 = vadd.f32 %v3307_v6, %v3259_v8  ;;  %v6665_v8 = vor.u32 %v7495_v56, %v6662_v20  ;;  %v6790_v6 = vld [vmem:[#allocation5 + $0x670] sm:$0xf0]  ;;  %v6521_v20 = vor.u32 %v7459_v51, %v6518_v19  ;;  %v7519_v51 = vld [vmem:[#allocation5 + $0x624] sm:$0xf] }
 0x285   :  { %v3213_v34 = vadd.f32 %v3212_v52, %v3164_v4  ;;  %3358 = vmatmul.bf16.gmra.mxu0 %v8032_v22  ;;  %3407 = vmatmul.bf16.gmra.mxu1 %v8034_v53  ;;  %v6793_v4 = vor.u32 %v7527_v18, %v6790_v6  ;;  %v6921_v52 = vor.u32 %v7559_v0, %v6918_v2  ;;  %v7523_v53 = vld [vmem:[#allocation5 + $0x644] sm:$0xf]  ;;  %v6902_v18 = vld [vmem:[#allocation5 + $0x750] sm:$0xf0] }
 0x286   :  { %vm4537_vm9 = vcmp.gt.f32.partialorder %v3308_v40, 0.0  ;;  %v4601_v38 = vmul.f32 0.25, %v3308_v40  ;;  %3456 = vmatmul.bf16.gmra.mxu2 %v9298_v13  ;;  %v6646_v13 = vld [vmem:[#allocation5 + $0x550] sm:$0xf0]  ;;  %3574 = vmatpush.bf16.msrb.mxu1 %v6665_v8  ;;  %v7455_v2 = vld [vmem:[#allocation5 + $0x424] sm:$0xf] }
 0x287   :  { %3505 = vmatmul.bf16.gmra.mxu3 %v9299_v49  ;;  %3623 = vmatpush.bf16.msrb.mxu2 %v6793_v4  ;;  %v6649_v55 = vor.u32 %v7491_v27, %v6646_v13  ;;  %v7487_v4 = vld [vmem:[#allocation5 + $0x524] sm:$0xf]  ;;  %v6758_v19 = vld [vmem:[#allocation5 + $0x630] sm:$0xf0] }
 0x288   :  { %v4665_v42 = vsel %vm4537_vm9, %v3308_v40, %v4601_v38  ;;  %v6777_v40 = vor.u32 %v7523_v53, %v6774_v62  ;;  %v7555_v38 = vld [vmem:[#allocation5 + $0x744] sm:$0xf]  ;;  %3672 = vmatpush.bf16.msrb.mxu3 %v6921_v52  ;;  %3526 = vmatpush.bf16.msrb.mxu0 %v6521_v20  ;;  %v6886_v13 = vld [vmem:[#allocation5 + $0x730] sm:$0xf0]  ;;  %v6761_v53 = vor.u32 %v7519_v51, %v6758_v19 }
 0x289   :  { %v3261_v16 = vpop.f32.mrf.mxu2  ;;  %v8417_v61 = vpack.c.bf16 %v4665_v42, %v4661_v39  ;;  %v6905_v0 = vor.u32 %v7555_v38, %v6902_v18  ;;  %v6502_v39 = vld [vmem:[#allocation5 + $0x430] sm:$0xf0]  ;;  %v7551_v8 = vld [vmem:[#allocation5 + $0x724] sm:$0xf] }
 0x28a   :  { %v3262_v49 = vadd.f32 %v3261_v16, %v3213_v34  ;;  %v3310_v17 = vpop.f32.mrf.mxu3  ;;  %v3165_v56 = vpop.f32.mrf.mxu0  ;;  %v6505_v42 = vor.u32 %v7455_v2, %v6502_v39  ;;  %v6630_v16 = vld [vmem:[#allocation5 + $0x530] sm:$0xf0]  ;;  %3575 = vmatpush.bf16.msrb.mxu1 %v6649_v55  ;;  %v7451_v27 = vld [vmem:[#allocation5 + $0x404] sm:$0xf] }
 0x28b   :  { %9300 = vst [vmem:[#allocation25_spill] sm:$0xff] %v8417_v61  ;;  %v3166_v3 = vadd.f32 %v3165_v56, %v8351_v24  ;;  %v3214_v21 = vpop.f32.mrf.mxu1  ;;  %3624 = vmatpush.bf16.msrb.mxu2 %v6777_v40  ;;  %v6633_v24 = vor.u32 %v7487_v4, %v6630_v16  ;;  %v7483_v56 = vld [vmem:[#allocation5 + $0x504] sm:$0xf]  ;;  %v6614_v40 = vld [vmem:[#allocation5 + $0x510] sm:$0xf0] }
 0x28c   :  { %v3311_v6 = vadd.f32 %v3310_v17, %v3262_v49  ;;  %3673 = vmatpush.bf16.msrb.mxu3 %v6905_v0  ;;  %3527 = vmatpush.bf16.msrb.mxu0 %v6505_v42  ;;  %v6889_v49 = vor.u32 %v7551_v8, %v6886_v13  ;;  %v6486_v17 = vld [vmem:[#allocation5 + $0x410] sm:$0xf0]  ;;  %v7515_v38 = vld [vmem:[#allocation5 + $0x604] sm:$0xf]  ;;  %v6617_v0 = vor.u32 %v7483_v56, %v6614_v40  ;;  %v6204_v61 = vld [vmem:[#allocation5 + $0x1c8] sm:$0xf] }
 0x28d   :  { %v3215_v34 = vadd.f32 %v3214_v21, %v3166_v3  ;;  %v6489_v21 = vor.u32 %v7451_v27, %v6486_v17  ;;  %v6742_v55 = vld [vmem:[#allocation5 + $0x610] sm:$0xf0]  ;;  %v7547_v39 = vld [vmem:[#allocation5 + $0x704] sm:$0xf] }
 0x28e   :  { %3576 = vmatpush.bf16.msrb.mxu1 %v6633_v24  ;;  %v6870_v4 = vld [vmem:[#allocation5 + $0x710] sm:$0xf0]  ;;  %v4605_v42 = vmul.f32 0.25, %v3311_v6  ;;  %v6745_v51 = vor.u32 %v7515_v38, %v6742_v55  ;;  %vm4541_vm10 = vcmp.gt.f32.partialorder %v3311_v6, 0.0 }
 0x28f   :  { %3625 = vmatpush.bf16.msrb.mxu2 %v6761_v53 }
 0x290   :  { %3674 = vmatpush.bf16.msrb.mxu3 %v6889_v49  ;;  %3528 = vmatpush.bf16.msrb.mxu0 %v6489_v21 }
 0x291   :  { %v3263_v52 = vpop.f32.mrf.mxu2 }
 0x292   :  { %v3264_v20 = vadd.f32 %v3263_v52, %v3215_v34  ;;  %v3312_v62 = vpop.f32.mrf.mxu3  ;;  %v3168_v3 = vpop.f32.mrf.mxu0  ;;  %v6873_v34 = vor.u32 %v7547_v39, %v6870_v4  ;;  %3577 = vmatpush.bf16.msrb.mxu1 %v6617_v0  ;;  %v9303_v4 = vld [vmem:[#allocation34_spill] sm:$0xff] }
 0x293   :  { %v3169_v18 = vadd.f32 %v3168_v3, %v8358_v59  ;;  %v3217_v2 = vpop.f32.mrf.mxu1  ;;  %3626 = vmatpush.bf16.msrb.mxu2 %v6745_v51  ;;  %v4669_v59 = vsel %vm4541_vm10, %v3311_v6, %v4605_v42 }
 0x294   :  { %v3313_v16 = vadd.f32 %v3312_v62, %v3264_v20  ;;  %3675 = vmatpush.bf16.msrb.mxu3 %v6873_v34 }
 0x295   :  { %v3218_v19 = vadd.f32 %v3217_v2, %v3169_v18  ;;  %3363 = vmatmul.bf16.gmra.mxu0 %v8060_v5  ;;  %3412 = vmatmul.bf16.gmra.mxu1 %v8062_v9 }
 0x296   :  { %vm4545_vm11 = vcmp.gt.f32.partialorder %v3313_v16, 0.0  ;;  %v4609_v8 = vmul.f32 0.25, %v3313_v16  ;;  %3461 = vmatmul.bf16.gmra.mxu2 %v8069_v44 }
 0x297   :  { %3510 = vmatmul.bf16.gmra.mxu3 %v8073_v15 }
 0x298   :  { %v4673_v24 = vsel %vm4545_vm11, %v3313_v16, %v4609_v8 }
 0x299   :  { %v3266_v13 = vpop.f32.mrf.mxu2  ;;  %v8425_v53 = vpack.c.bf16 %v4673_v24, %v4669_v59 }
 0x29a   :  { %v3267_v49 = vadd.f32 %v3266_v13, %v3218_v19  ;;  %v3315_v52 = vpop.f32.mrf.mxu3  ;;  %v3170_v27 = vpop.f32.mrf.mxu0 }
 0x29b   :  { %9301 = vst [vmem:[#allocation26_spill] sm:$0xff] %v8425_v53  ;;  %v3171_v17 = vadd.f32 %v3170_v27, %v8361_v32  ;;  %v3219_v56 = vpop.f32.mrf.mxu1  ;;  %v9302_v32 = vld [vmem:[#allocation33_spill] sm:$0xff] }
 0x29c   :  { %v3316_v20 = vadd.f32 %v3315_v52, %v3267_v49  ;;  %v7659_v52 = vld [vmem:[%s9114_s4] sm:$0xf] }
 0x29d   :  { %v3220_v62 = vadd.f32 %v3219_v56, %v3171_v17  ;;  %v8439_v27 = vperm.slane %v7659_v52, 1 }
 0x29e   :  { %v4613_v6 = vmul.f32 0.25, %v3316_v20  ;;  %vm4549_vm12 = vcmp.gt.f32.partialorder %v3316_v20, 0.0 }
 0x2a0   :  { %v4677_v42 = vsel %vm4549_vm12, %v3316_v20, %v4613_v6 }
 0x2a1   :  { %v3268_v3 = vpop.f32.mrf.mxu2 }
 0x2a2   :  { %v3269_v21 = vadd.f32 %v3268_v3, %v3220_v62  ;;  %v3317_v40 = vpop.f32.mrf.mxu3  ;;  %v3173_v38 = vpop.f32.mrf.mxu0 }
 0x2a3   :  { %v3174_v55 = vadd.f32 %v3173_v38, %v8368_v35  ;;  %v3222_v18 = vpop.f32.mrf.mxu1 }
 0x2a4   :  { %v3318_v2 = vadd.f32 %v3317_v40, %v3269_v21 }
 0x2a5   :  { %v3223_v0 = vadd.f32 %v3222_v18, %v3174_v55  ;;  %3368 = vmatmul.bf16.gmra.mxu0 %v8080_v10  ;;  %3417 = vmatmul.bf16.gmra.mxu1 %v8082_v12 }
 0x2a6   :  { %vm4553_vm13 = vcmp.gt.f32.partialorder %v3318_v2, 0.0  ;;  %v4617_v39 = vmul.f32 0.25, %v3318_v2  ;;  %3466 = vmatmul.bf16.gmra.mxu2 %v9302_v32 }
 0x2a7   :  { %3515 = vmatmul.bf16.gmra.mxu3 %v9303_v4 }
 0x2a8   :  { %v4681_v16 = vsel %vm4553_vm13, %v3318_v2, %v4617_v39 }
 0x2a9   :  { %v3271_v51 = vpop.f32.mrf.mxu2  ;;  %v8433_v34 = vpack.c.bf16 %v4681_v16, %v4677_v42 }
 0x2aa   :  { %v3272_v35 = vadd.f32 %v3271_v51, %v3223_v0  ;;  %v3320_v19 = vpop.f32.mrf.mxu3  ;;  %v3175_v8 = vpop.f32.mrf.mxu0 }
 0x2ab   :  { %9304 = vst [vmem:[#allocation33_spill] sm:$0xff] %v8433_v34  ;;  %v3176_v59 = vadd.f32 %v3175_v8, %v8371_v11  ;;  %v3224_v24 = vpop.f32.mrf.mxu1 }
 0x2ac   :  { %v3321_v13 = vadd.f32 %v3320_v19, %v3272_v35 }
 0x2ad   :  { %v3225_v49 = vadd.f32 %v3224_v24, %v3176_v59 }
 0x2ae   :  { %v4621_v40 = vmul.f32 0.25, %v3321_v13  ;;  %vm4557_vm14 = vcmp.gt.f32.partialorder %v3321_v13, 0.0 }
 0x2b0   :  { %v4685_v18 = vsel %vm4557_vm14, %v3321_v13, %v4621_v40 }
 0x2b1   :  { %v3273_v17 = vpop.f32.mrf.mxu2 }
 0x2b2   :  { %v3274_v56 = vadd.f32 %v3273_v17, %v3225_v49  ;;  %v3322_v20 = vpop.f32.mrf.mxu3  ;;  %v3334_v62 = vpop.f32.mrf.mxu0 }
 0x2b3   :  { %v3335_v3 = vadd.f32 %v3334_v62, %v8439_v27  ;;  %v3383_v21 = vpop.f32.mrf.mxu1 }
 0x2b4   :  { %v3323_v38 = vadd.f32 %v3322_v20, %v3274_v56 }
 0x2b5   :  { %v3384_v11 = vadd.f32 %v3383_v21, %v3335_v3  ;;  %3529 = vmatmul.bf16.vlgmr.msrb.gmra.mxu0 %v8112_v28  ;;  %3578 = vmatmul.bf16.vlgmr.msrb.gmra.mxu1 %v8114_v33 }
 0x2b6   :  { %vm4561_vm15 = vcmp.gt.f32.partialorder %v3323_v38, 0.0  ;;  %v4625_v55 = vmul.f32 0.25, %v3323_v38  ;;  %3627 = vmatmul.bf16.vlgmr.msrb.gmra.mxu2 %v8121_v57 }
 0x2b7   :  { %3676 = vmatmul.bf16.vlgmr.msrb.gmra.mxu3 %v8125_v1 }
 0x2b8   :  { %v4689_v6 = vsel %vm4561_vm15, %v3323_v38, %v4625_v55 }
 0x2b9   :  { %v3432_v2 = vpop.f32.mrf.mxu2  ;;  %v8446_v0 = vpack.c.bf16 %v4689_v6, %v4685_v18 }
 0x2ba   :  { %v3433_v39 = vadd.f32 %v3432_v2, %v3384_v11  ;;  %v3481_v42 = vpop.f32.mrf.mxu3  ;;  %v3336_v16 = vpop.f32.mrf.mxu0 }
 0x2bb   :  { %9305 = vst [vmem:[#allocation34_spill] sm:$0xff] %v8446_v0  ;;  %v3337_v51 = vadd.f32 %v3336_v16, %v8439_v27  ;;  %v3385_v35 = vpop.f32.mrf.mxu1  ;;  %v7386_v0 = vld [vmem:[#allocation5 + $0x1f4] sm:$0xf0] }
 0x2bc   :  { %v8449_v19 = vadd.f32 %v3481_v42, %v3433_v39 }
 0x2bd   :  { %v3386_v8 = vadd.f32 %v3385_v35, %v3337_v51 }
 0x2c1   :  { %v3434_v59 = vpop.f32.mrf.mxu2 }
 0x2c2   :  { %v3435_v24 = vadd.f32 %v3434_v59, %v3386_v8  ;;  %v3483_v49 = vpop.f32.mrf.mxu3  ;;  %v3339_v52 = vpop.f32.mrf.mxu0  ;;  %v9306_v59 = vld [vmem:[#allocation43_spill] sm:$0xff] }
 0x2c3   :  { %v3340_v17 = vadd.f32 %v3339_v52, %v8439_v27  ;;  %v3388_v13 = vpop.f32.mrf.mxu1  ;;  %v6348_v52 = vld [vmem:[#allocation5 + $0x2e8] sm:$0xf] }
 0x2c4   :  { %v8452_v56 = vadd.f32 %v3483_v49, %v3435_v24  ;;  %v9307_v24 = vld [vmem:[#allocation44_spill] sm:$0xff]  ;;  %v9308_v49 = vld [vmem:[#allocation45_spill] sm:$0xff] }
 0x2c5   :  { %v3389_v20 = vadd.f32 %v3388_v13, %v3340_v17  ;;  %3534 = vmatmul.bf16.gmra.mxu0 %v8132_v46  ;;  %3583 = vmatmul.bf16.gmra.mxu1 %v8134_v50  ;;  %v7418_v17 = vld [vmem:[#allocation5 + $0x2f4] sm:$0xf0]  ;;  %v6252_v50 = vld [vmem:[#allocation5 + $0x228] sm:$0xf] }
 0x2c6   :  { %3632 = vmatmul.bf16.gmra.mxu2 %v8141_v30  ;;  %v6349_v13 = vor.u32 %v7418_v17, %v6348_v52  ;;  %v6268_v30 = vld [vmem:[#allocation5 + $0x248] sm:$0xf] }
 0x2c7   :  { %3681 = vmatmul.bf16.gmra.mxu3 %v8145_v23  ;;  %v7366_v23 = vld [vmem:[#allocation5 + $0x154] sm:$0xf0] }
 0x2c8   :  { %3815 = vmatpush.bf16.msra.mxu2 %v6349_v13 }
 0x2c9   :  { %v3437_v62 = vpop.f32.mrf.mxu2 }
 0x2ca   :  { %v3438_v3 = vadd.f32 %v3437_v62, %v3389_v20  ;;  %v3486_v21 = vpop.f32.mrf.mxu3  ;;  %v3341_v40 = vpop.f32.mrf.mxu0 }
 0x2cb   :  { %v3342_v38 = vadd.f32 %v3341_v40, %v8439_v27  ;;  %v3390_v11 = vpop.f32.mrf.mxu1 }
 0x2cc   :  { %v8459_v55 = vadd.f32 %v3486_v21, %v3438_v3 }
 0x2cd   :  { %v3391_v18 = vadd.f32 %v3390_v11, %v3342_v38 }
 0x2d1   :  { %v3439_v6 = vpop.f32.mrf.mxu2 }
 0x2d2   :  { %v3440_v2 = vadd.f32 %v3439_v6, %v3391_v18  ;;  %v3488_v39 = vpop.f32.mrf.mxu3  ;;  %v3344_v42 = vpop.f32.mrf.mxu0  ;;  %v6092_v18 = vld [vmem:[#allocation5 + $0xe8] sm:$0xf]  ;;  %v7354_v6 = vld [vmem:[#allocation5 + $0xf4] sm:$0xf0] }
 0x2d3   :  { %v3345_v16 = vadd.f32 %v3344_v42, %v8439_v27  ;;  %v3393_v51 = vpop.f32.mrf.mxu1  ;;  %v6093_v42 = vor.u32 %v7354_v6, %v6092_v18 }
 0x2d4   :  { %v8462_v35 = vadd.f32 %v3488_v39, %v3440_v2  ;;  %v6476_v2 = vld [vmem:[#allocation5 + $0x3e8] sm:$0xf] }
 0x2d5   :  { %v3394_v8 = vadd.f32 %v3393_v51, %v3345_v16  ;;  %3539 = vmatmul.bf16.gmra.mxu0 %v8152_v29  ;;  %3588 = vmatmul.bf16.gmra.mxu1 %v9306_v59  ;;  %v7450_v16 = vld [vmem:[#allocation5 + $0x3f4] sm:$0xf0]  ;;  %v6220_v51 = vld [vmem:[#allocation5 + $0x1e8] sm:$0xf]  ;;  %v9317_v29 = vld [vmem:[#allocation56_spill] sm:$0xff] }
 0x2d6   :  { %3637 = vmatmul.bf16.gmra.mxu2 %v9307_v24  ;;  %v6477_v34 = vor.u32 %v7450_v16, %v6476_v2  ;;  %v6221_v52 = vor.u32 %v7386_v0, %v6220_v51  ;;  %3717 = vmatpush.bf16.msra.mxu0 %v6093_v42  ;;  %v9310_v0 = vld [vmem:[#allocation49_spill] sm:$0xff]  ;;  %v6300_v59 = vld [vmem:[#allocation5 + $0x288] sm:$0xf] }
 0x2d7   :  { %3686 = vmatmul.bf16.gmra.mxu3 %v9308_v49  ;;  %v7374_v24 = vld [vmem:[#allocation5 + $0x194] sm:$0xf0] }
 0x2d8   :  { %3864 = vmatpush.bf16.msra.mxu3 %v6477_v34  ;;  %3766 = vmatpush.bf16.msra.mxu1 %v6221_v52  ;;  %v6332_v34 = vld [vmem:[#allocation5 + $0x2c8] sm:$0xf] }
 0x2d9   :  { %v3442_v20 = vpop.f32.mrf.mxu2 }
 0x2da   :  { %v3443_v62 = vadd.f32 %v3442_v20, %v3394_v8  ;;  %v3491_v3 = vpop.f32.mrf.mxu3  ;;  %v3346_v21 = vpop.f32.mrf.mxu0 }
 0x2db   :  { %v3347_v40 = vadd.f32 %v3346_v21, %v8439_v27  ;;  %v3395_v38 = vpop.f32.mrf.mxu1 }
 0x2dc   :  { %v8469_v11 = vadd.f32 %v3491_v3, %v3443_v62 }
 0x2dd   :  { %v3396_v39 = vadd.f32 %v3395_v38, %v3347_v40  ;;  %v9309_v40 = vld [vmem:[#allocation48_spill] sm:$0xff]  ;;  %v7414_v38 = vld [vmem:[#allocation5 + $0x2d4] sm:$0xf0] }
 0x2de   :  { %v6333_v18 = vor.u32 %v7414_v38, %v6332_v34 }
 0x2e0   :  { %3816 = vmatpush.bf16.msra.mxu2 %v6333_v18 }
 0x2e1   :  { %v3444_v8 = vpop.f32.mrf.mxu2 }
 0x2e2   :  { %v3445_v17 = vadd.f32 %v3444_v8, %v3396_v39  ;;  %v3493_v13 = vpop.f32.mrf.mxu3  ;;  %v3349_v20 = vpop.f32.mrf.mxu0  ;;  %v6076_v8 = vld [vmem:[#allocation5 + $0xc8] sm:$0xf] }
 0x2e3   :  { %v3350_v62 = vadd.f32 %v3349_v20, %v8439_v27  ;;  %v3398_v3 = vpop.f32.mrf.mxu1 }
 0x2e4   :  { %v8472_v21 = vadd.f32 %v3493_v13, %v3445_v17  ;;  %v7350_v17 = vld [vmem:[#allocation5 + $0xd4] sm:$0xf0]  ;;  %v6460_v13 = vld [vmem:[#allocation5 + $0x3c8] sm:$0xf] }
 0x2e5   :  { %v3399_v53 = vadd.f32 %v3398_v3, %v3350_v62  ;;  %3544 = vmatmul.bf16.gmra.mxu0 %v8172_v14  ;;  %3593 = vmatmul.bf16.gmra.mxu1 %v8174_v36  ;;  %v6077_v62 = vor.u32 %v7350_v17, %v6076_v8  ;;  %v7446_v3 = vld [vmem:[#allocation5 + $0x3d4] sm:$0xf0]  ;;  %v9313_v8 = vld [vmem:[#allocation52_spill] sm:$0xff] }
 0x2e6   :  { %3642 = vmatmul.bf16.gmra.mxu2 %v9309_v40  ;;  %v6461_v40 = vor.u32 %v7446_v3, %v6460_v13 }
 0x2e7   :  { %3691 = vmatmul.bf16.gmra.mxu3 %v9310_v0  ;;  %v7382_v0 = vld [vmem:[#allocation5 + $0x1d4] sm:$0xf0]  ;;  %3718 = vmatpush.bf16.msra.mxu0 %v6077_v62 }
 0x2e8   :  { %v6205_v34 = vor.u32 %v7382_v0, %v6204_v61  ;;  %3865 = vmatpush.bf16.msra.mxu3 %v6461_v40  ;;  %v9314_v61 = vld [vmem:[#allocation53_spill] sm:$0xff]  ;;  %v6316_v40 = vld [vmem:[#allocation5 + $0x2a8] sm:$0xf] }
 0x2e9   :  { %v3447_v6 = vpop.f32.mrf.mxu2  ;;  %v7410_v0 = vld [vmem:[#allocation5 + $0x2b4] sm:$0xf0] }
 0x2ea   :  { %v3448_v2 = vadd.f32 %v3447_v6, %v3399_v53  ;;  %v3496_v39 = vpop.f32.mrf.mxu3  ;;  %v3351_v42 = vpop.f32.mrf.mxu0  ;;  %3767 = vmatpush.bf16.msra.mxu1 %v6205_v34  ;;  %v6317_v17 = vor.u32 %v7410_v0, %v6316_v40  ;;  %v6044_v0 = vld [vmem:[#allocation5 + $0x88] sm:$0xf] }
 0x2eb   :  { %v3352_v16 = vadd.f32 %v3351_v42, %v8439_v27  ;;  %v3400_v51 = vpop.f32.mrf.mxu1 }
 0x2ec   :  { %v8479_v52 = vadd.f32 %v3496_v39, %v3448_v2  ;;  %3817 = vmatpush.bf16.msra.mxu2 %v6317_v17  ;;  %v7342_v17 = vld [vmem:[#allocation5 + $0x94] sm:$0xf0] }
 0x2ed   :  { %v3401_v20 = vadd.f32 %v3400_v51, %v3352_v16  ;;  %v9311_v16 = vld [vmem:[#allocation50_spill] sm:$0xff]  ;;  %v9312_v51 = vld [vmem:[#allocation51_spill] sm:$0xff]  ;;  %v6045_v49 = vor.u32 %v7342_v17, %v6044_v0 }
 0x2ee   :  { %v6156_v0 = vld [vmem:[#allocation5 + $0x168] sm:$0xf] }
 0x2ef   :  { %v9316_v17 = vld [vmem:[#allocation55_spill] sm:$0xff] }
 0x2f1   :  { %v3449_v53 = vpop.f32.mrf.mxu2 }
 0x2f2   :  { %v3450_v38 = vadd.f32 %v3449_v53, %v3401_v20  ;;  %v3498_v18 = vpop.f32.mrf.mxu3  ;;  %v3354_v6 = vpop.f32.mrf.mxu0 }
 0x2f3   :  { %v3355_v2 = vadd.f32 %v3354_v6, %v8439_v27  ;;  %v3403_v39 = vpop.f32.mrf.mxu1  ;;  %v7346_v6 = vld [vmem:[#allocation5 + $0xb4] sm:$0xf0] }
 0x2f4   :  { %v8482_v42 = vadd.f32 %v3498_v18, %v3450_v38  ;;  %v6060_v18 = vld [vmem:[#allocation5 + $0xa8] sm:$0xf] }
 0x2f5   :  { %v3404_v36 = vadd.f32 %v3403_v39, %v3355_v2  ;;  %3549 = vmatmul.bf16.gmra.mxu0 %v9311_v16  ;;  %3598 = vmatmul.bf16.gmra.mxu1 %v9312_v51  ;;  %v6444_v2 = vld [vmem:[#allocation5 + $0x3a8] sm:$0xf]  ;;  %v7442_v51 = vld [vmem:[#allocation5 + $0x3b4] sm:$0xf0] }
 0x2f6   :  { %3647 = vmatmul.bf16.gmra.mxu2 %v9313_v8  ;;  %v6061_v8 = vor.u32 %v7346_v6, %v6060_v18  ;;  %v7378_v16 = vld [vmem:[#allocation5 + $0x1b4] sm:$0xf0]  ;;  %v6445_v14 = vor.u32 %v7442_v51, %v6444_v2 }
 0x2f7   :  { %3696 = vmatmul.bf16.gmra.mxu3 %v9314_v61  ;;  %v6188_v61 = vld [vmem:[#allocation5 + $0x1a8] sm:$0xf] }
 0x2f8   :  { %v6189_v40 = vor.u32 %v7378_v16, %v6188_v61  ;;  %3719 = vmatpush.bf16.msra.mxu0 %v6061_v8  ;;  %3866 = vmatpush.bf16.msra.mxu3 %v6445_v14  ;;  %v6428_v16 = vld [vmem:[#allocation5 + $0x388] sm:$0xf]  ;;  %v7438_v8 = vld [vmem:[#allocation5 + $0x394] sm:$0xf0] }
 0x2f9   :  { %v3452_v13 = vpop.f32.mrf.mxu2  ;;  %v6429_v61 = vor.u32 %v7438_v8, %v6428_v16  ;;  %v6012_v16 = vld [vmem:[#allocation5 + $0x48] sm:$0xf]  ;;  %v7334_v8 = vld [vmem:[#allocation5 + $0x54] sm:$0xf0] }
 0x2fa   :  { %v3453_v20 = vadd.f32 %v3452_v13, %v3404_v36  ;;  %v3501_v62 = vpop.f32.mrf.mxu3  ;;  %v3356_v3 = vpop.f32.mrf.mxu0  ;;  %3768 = vmatpush.bf16.msra.mxu1 %v6189_v40  ;;  %v6172_v13 = vld [vmem:[#allocation5 + $0x188] sm:$0xf]  ;;  %v9315_v40 = vld [vmem:[#allocation54_spill] sm:$0xff] }
 0x2fb   :  { %v3357_v34 = vadd.f32 %v3356_v3, %v8439_v27  ;;  %v3405_v53 = vpop.f32.mrf.mxu1  ;;  %v6173_v6 = vor.u32 %v7374_v24, %v6172_v13  ;;  %v7370_v24 = vld [vmem:[#allocation5 + $0x174] sm:$0xf0] }
 0x2fc   :  { %v8489_v38 = vadd.f32 %v3501_v62, %v3453_v20  ;;  %3720 = vmatpush.bf16.msra.mxu0 %v6045_v49  ;;  %v7402_v13 = vld [vmem:[#allocation5 + $0x274] sm:$0xf0]  ;;  %v6157_v49 = vor.u32 %v7370_v24, %v6156_v0  ;;  %3867 = vmatpush.bf16.msra.mxu3 %v6429_v61 }
 0x2fd   :  { %v3406_v39 = vadd.f32 %v3405_v53, %v3357_v34  ;;  %v7406_v34 = vld [vmem:[#allocation5 + $0x294] sm:$0xf0] }
 0x2fe   :  { %v6301_v51 = vor.u32 %v7406_v34, %v6300_v59  ;;  %3769 = vmatpush.bf16.msra.mxu1 %v6173_v6  ;;  %v6284_v59 = vld [vmem:[#allocation5 + $0x268] sm:$0xf]  ;;  %v9318_v34 = vld [vmem:[#allocation57_spill] sm:$0xff] }
 0x300   :  { %3818 = vmatpush.bf16.msra.mxu2 %v6301_v51 }
 0x301   :  { %v3454_v36 = vpop.f32.mrf.mxu2 }
 0x302   :  { %v3455_v3 = vadd.f32 %v3454_v36, %v3406_v39  ;;  %v3503_v20 = vpop.f32.mrf.mxu3  ;;  %v3359_v62 = vpop.f32.mrf.mxu0  ;;  %v6028_v39 = vld [vmem:[#allocation5 + $0x68] sm:$0xf]  ;;  %v7338_v36 = vld [vmem:[#allocation5 + $0x74] sm:$0xf0]  ;;  %3770 = vmatpush.bf16.msra.mxu1 %v6157_v49 }
 0x303   :  { %v3360_v53 = vadd.f32 %v3359_v62, %v8439_v27  ;;  %v3408_v18 = vpop.f32.mrf.mxu1  ;;  %v6029_v62 = vor.u32 %v7338_v36, %v6028_v39 }
 0x304   :  { %v8492_v14 = vadd.f32 %v3503_v20, %v3455_v3  ;;  %v6285_v3 = vor.u32 %v7402_v13, %v6284_v59  ;;  %v6412_v20 = vld [vmem:[#allocation5 + $0x368] sm:$0xf]  ;;  %v7430_v59 = vld [vmem:[#allocation5 + $0x354] sm:$0xf0] }
 0x305   :  { %v3409_v2 = vadd.f32 %v3408_v18, %v3360_v53  ;;  %3554 = vmatmul.bf16.gmra.mxu0 %v9315_v40  ;;  %3603 = vmatmul.bf16.gmra.mxu1 %v9316_v17  ;;  %v7434_v53 = vld [vmem:[#allocation5 + $0x374] sm:$0xf0]  ;;  %v6140_v17 = vld [vmem:[#allocation5 + $0x148] sm:$0xf]  ;;  %v6013_v40 = vor.u32 %v7334_v8, %v6012_v16 }
 0x306   :  { %3652 = vmatmul.bf16.gmra.mxu2 %v9317_v29  ;;  %3721 = vmatpush.bf16.msra.mxu0 %v6029_v62  ;;  %v6413_v18 = vor.u32 %v7434_v53, %v6412_v20  ;;  %v6141_v24 = vor.u32 %v7366_v23, %v6140_v17  ;;  %v6396_v62 = vld [vmem:[#allocation5 + $0x348] sm:$0xf]  ;;  %v7330_v53 = vld [vmem:[#allocation5 + $0x34] sm:$0xf0] }
 0x307   :  { %3701 = vmatmul.bf16.gmra.mxu3 %v9318_v34  ;;  %v7398_v34 = vld [vmem:[#allocation5 + $0x254] sm:$0xf0]  ;;  %3819 = vmatpush.bf16.msra.mxu2 %v6285_v3  ;;  %v6397_v49 = vor.u32 %v7430_v59, %v6396_v62  ;;  %v5996_v20 = vld [vmem:[#allocation5 + $0x28] sm:$0xf] }
 0x308   :  { %v6269_v61 = vor.u32 %v7398_v34, %v6268_v30  ;;  %3868 = vmatpush.bf16.msra.mxu3 %v6413_v18  ;;  %3771 = vmatpush.bf16.msra.mxu1 %v6141_v24  ;;  %v5997_v16 = vor.u32 %v7330_v53, %v5996_v20  ;;  %v7362_v8 = vld [vmem:[#allocation5 + $0x134] sm:$0xf0]  ;;  %v6380_v30 = vld [vmem:[#allocation5 + $0x328] sm:$0xf] }
 0x309   :  { %v3457_v6 = vpop.f32.mrf.mxu2  ;;  %v7426_v17 = vld [vmem:[#allocation5 + $0x334] sm:$0xf0]  ;;  %v6236_v20 = vld [vmem:[#allocation5 + $0x208] sm:$0xf] }
 0x30a   :  { %v3458_v29 = vadd.f32 %v3457_v6, %v3409_v2  ;;  %v3506_v39 = vpop.f32.mrf.mxu3  ;;  %v3361_v36 = vpop.f32.mrf.mxu0  ;;  %3722 = vmatpush.bf16.msra.mxu0 %v6013_v40  ;;  %v6124_v6 = vld [vmem:[#allocation5 + $0x128] sm:$0xf]  ;;  %v7326_v18 = vld [vmem:[#allocation5 + $0x14] sm:$0xf0] }
 0x30b   :  { %v3362_v51 = vadd.f32 %v3361_v36, %v8439_v27  ;;  %v3410_v0 = vpop.f32.mrf.mxu1  ;;  %v7394_v36 = vld [vmem:[#allocation5 + $0x234] sm:$0xf0]  ;;  %3820 = vmatpush.bf16.msra.mxu2 %v6269_v61  ;;  %v6125_v3 = vor.u32 %v7362_v8, %v6124_v6  ;;  %v5980_v40 = vld [vmem:[#allocation5 + $0x8] sm:$0xf] }
 0x30c   :  { %v8499_v13 = vadd.f32 %v3506_v39, %v3458_v29  ;;  %v6253_v23 = vor.u32 %v7394_v36, %v6252_v50  ;;  %3869 = vmatpush.bf16.msra.mxu3 %v6397_v49  ;;  %v6381_v29 = vor.u32 %v7426_v17, %v6380_v30  ;;  %v6108_v39 = vld [vmem:[#allocation5 + $0x108] sm:$0xf]  ;;  %v5981_v62 = vor.u32 %v7326_v18, %v5980_v40  ;;  %v7358_v59 = vld [vmem:[#allocation5 + $0x114] sm:$0xf0] }
 0x30d   :  { %v3411_v2 = vadd.f32 %v3410_v0, %v3362_v51  ;;  %3772 = vmatpush.bf16.msra.mxu1 %v6125_v3  ;;  %v7390_v53 = vld [vmem:[#allocation5 + $0x214] sm:$0xf0]  ;;  %v6109_v6 = vor.u32 %v7358_v59, %v6108_v39 }
 0x30e   :  { %3723 = vmatpush.bf16.msra.mxu0 %v5997_v16  ;;  %v6237_v49 = vor.u32 %v7390_v53, %v6236_v20  ;;  %v6364_v16 = vld [vmem:[#allocation5 + $0x308] sm:$0xf]  ;;  %v7422_v8 = vld [vmem:[#allocation5 + $0x314] sm:$0xf0] }
 0x30f   :  { %3821 = vmatpush.bf16.msra.mxu2 %v6253_v23  ;;  %v6365_v3 = vor.u32 %v7422_v8, %v6364_v16 }
 0x310   :  { %3870 = vmatpush.bf16.msra.mxu3 %v6381_v29 }
 0x311   :  { %v3459_v34 = vpop.f32.mrf.mxu2  ;;  %3773 = vmatpush.bf16.msra.mxu1 %v6109_v6 }
 0x312   :  { %v3460_v51 = vadd.f32 %v3459_v34, %v3411_v2  ;;  %v3508_v0 = vpop.f32.mrf.mxu3  ;;  %v3364_v24 = vpop.f32.mrf.mxu0  ;;  %3724 = vmatpush.bf16.msra.mxu0 %v5981_v62 }
 0x313   :  { %v3365_v61 = vadd.f32 %v3364_v24, %v8439_v27  ;;  %v3413_v50 = vpop.f32.mrf.mxu1  ;;  %3822 = vmatpush.bf16.msra.mxu2 %v6237_v49 }
 0x314   :  { %v8502_v36 = vadd.f32 %v3508_v0, %v3460_v51  ;;  %3871 = vmatpush.bf16.msra.mxu3 %v6365_v3 }
 0x315   :  { %v3414_v2 = vadd.f32 %v3413_v50, %v3365_v61  ;;  %3559 = vmatmul.bf16.gmra.mxu0 %v8257_v58  ;;  %3608 = vmatmul.bf16.gmra.mxu1 %v8259_v43 }
 0x316   :  { %3657 = vmatmul.bf16.gmra.mxu2 %v8266_v7 }
 0x317   :  { %3706 = vmatmul.bf16.gmra.mxu3 %v8270_v26 }
 0x319   :  { %v3462_v23 = vpop.f32.mrf.mxu2 }
 0x31a   :  { %v3463_v30 = vadd.f32 %v3462_v23, %v3414_v2  ;;  %v3511_v17 = vpop.f32.mrf.mxu3  ;;  %v3366_v34 = vpop.f32.mrf.mxu0 }
 0x31b   :  { %v3367_v29 = vadd.f32 %v3366_v34, %v8439_v27  ;;  %v3415_v40 = vpop.f32.mrf.mxu1 }
 0x31c   :  { %v8509_v18 = vadd.f32 %v3511_v17, %v3463_v30 }
 0x31d   :  { %v3416_v39 = vadd.f32 %v3415_v40, %v3367_v29 }
 0x321   :  { %v3464_v51 = vpop.f32.mrf.mxu2 }
 0x322   :  { %v3465_v0 = vadd.f32 %v3464_v51, %v3416_v39  ;;  %v3513_v24 = vpop.f32.mrf.mxu3  ;;  %v3369_v62 = vpop.f32.mrf.mxu0 }
 0x323   :  { %v3370_v59 = vadd.f32 %v3369_v62, %v8439_v27  ;;  %v3418_v20 = vpop.f32.mrf.mxu1 }
 0x324   :  { %v8512_v53 = vadd.f32 %v3513_v24, %v3465_v0  ;;  %v9319_v24 = vld [vmem:[#allocation11_spill] sm:$0xff] }
 0x325   :  { %v3419_v61 = vadd.f32 %v3418_v20, %v3370_v59  ;;  %3564 = vmatmul.bf16.gmra.mxu0 %v8282_v54  ;;  %3613 = vmatmul.bf16.gmra.mxu1 %v8284_v45 }
 0x326   :  { %3662 = vmatmul.bf16.gmra.mxu2 %v8292_v37 }
 0x327   :  { %3711 = vmatmul.bf16.gmra.mxu3 %v8295_v60 }
 0x329   :  { %v3467_v50 = vpop.f32.mrf.mxu2 }
 0x32a   :  { %v3468_v6 = vadd.f32 %v3467_v50, %v3419_v61  ;;  %v3516_v49 = vpop.f32.mrf.mxu3  ;;  %v3371_v16 = vpop.f32.mrf.mxu0 }
 0x32b   :  { %v3372_v8 = vadd.f32 %v3371_v16, %v8439_v27  ;;  %v3420_v3 = vpop.f32.mrf.mxu1  ;;  %v9320_v27 = vld [vmem:[#allocation12_spill] sm:$0xff] }
 0x32c   :  { %v8519_v2 = vadd.f32 %v3516_v49, %v3468_v6 }
 0x32d   :  { %v3421_v23 = vadd.f32 %v3420_v3, %v3372_v8 }
 0x331   :  { %v3469_v30 = vpop.f32.mrf.mxu2 }
 0x332   :  { %v3470_v17 = vadd.f32 %v3469_v30, %v3421_v23  ;;  %v3518_v34 = vpop.f32.mrf.mxu3  ;;  %v3530_v29 = vpop.f32.mrf.mxu0 }
 0x333   :  { %v3531_v40 = vadd.f32 %v3530_v29, %v8449_v19  ;;  %v3579_v39 = vpop.f32.mrf.mxu1 }
 0x334   :  { %v8522_v51 = vadd.f32 %v3518_v34, %v3470_v17 }
 0x335   :  { %v3580_v0 = vadd.f32 %v3579_v39, %v3531_v40  ;;  %3725 = vmatmul.bf16.vlgmr.msra.gmra.mxu0 %v7909_v41  ;;  %3774 = vmatmul.bf16.vlgmr.msra.gmra.mxu1 %v9275_v31  ;;  %v9321_v39 = vld [vmem:[#allocation13_spill] sm:$0xff] }
 0x336   :  { %3823 = vmatmul.bf16.vlgmr.msra.gmra.mxu2 %v9319_v24 }
 0x337   :  { %3872 = vmatmul.bf16.vlgmr.msra.gmra.mxu3 %v9320_v27 }
 0x339   :  { %v3628_v62 = vpop.f32.mrf.mxu2 }
 0x33a   :  { %v3629_v59 = vadd.f32 %v3628_v62, %v3580_v0  ;;  %v3677_v20 = vpop.f32.mrf.mxu3  ;;  %v3532_v61 = vpop.f32.mrf.mxu0  ;;  %v9322_v62 = vld [vmem:[#allocation14_spill] sm:$0xff] }
 0x33b   :  { %v3533_v50 = vadd.f32 %v3532_v61, %v8452_v56  ;;  %v3581_v6 = vpop.f32.mrf.mxu1  ;;  %v9323_v56 = vld [vmem:[#allocation15_spill] sm:$0xff] }
 0x33c   :  { %v3678_v19 = vadd.f32 %v3677_v20, %v3629_v59  ;;  %v9324_v59 = vld [vmem:[#allocation16_spill] sm:$0xff] }
 0x33d   :  { %v3582_v49 = vadd.f32 %v3581_v6, %v3533_v50 }
 0x33e   :  { %v4566_v34 = vmul.f32 0.25, %v3678_v19  ;;  %vm4502_vm0 = vcmp.gt.f32.partialorder %v3678_v19, 0.0 }
 0x340   :  { %v4630_v20 = vsel %vm4502_vm0, %v3678_v19, %v4566_v34 }
 0x341   :  { %v3630_v16 = vpop.f32.mrf.mxu2 }
 0x342   :  { %v3631_v8 = vadd.f32 %v3630_v16, %v3582_v49  ;;  %v3679_v3 = vpop.f32.mrf.mxu3  ;;  %v3535_v23 = vpop.f32.mrf.mxu0 }
 0x343   :  { %v3536_v30 = vadd.f32 %v3535_v23, %v8459_v55  ;;  %v3584_v17 = vpop.f32.mrf.mxu1 }
 0x344   :  { %v3680_v29 = vadd.f32 %v3679_v3, %v3631_v8 }
 0x345   :  { %v3585_v40 = vadd.f32 %v3584_v17, %v3536_v30  ;;  %3730 = vmatmul.bf16.gmra.mxu0 %v9321_v39  ;;  %3779 = vmatmul.bf16.gmra.mxu1 %v9322_v62 }
 0x346   :  { %vm4506_vm1 = vcmp.gt.f32.partialorder %v3680_v29, 0.0  ;;  %v4570_v0 = vmul.f32 0.25, %v3680_v29  ;;  %3828 = vmatmul.bf16.gmra.mxu2 %v9323_v56 }
 0x347   :  { %3877 = vmatmul.bf16.gmra.mxu3 %v9324_v59 }
 0x348   :  { %v4634_v61 = vsel %vm4506_vm1, %v3680_v29, %v4570_v0  ;;  %v9326_v0 = vld [vmem:[#allocation17_spill] sm:$0xff] }
 0x349   :  { %v8534_v50 = vpack.c.bf16 %v4634_v61, %v4630_v20  ;;  %v3633_v55 = vpop.f32.mrf.mxu2  ;;  %v9327_v20 = vld [vmem:[#allocation18_spill] sm:$0xff]  ;;  %v9329_v61 = vld [vmem:[#allocation20_spill] sm:$0xff] }
 0x34a   :  { %v3634_v6 = vadd.f32 %v3633_v55, %v3585_v40  ;;  %v3682_v49 = vpop.f32.mrf.mxu3  ;;  %v3537_v16 = vpop.f32.mrf.mxu0  ;;  %v6860_v55 = vld [vmem:[#allocation5 + $0x6e8] sm:$0xf] }
 0x34b   :  { %9325 = vst [vmem:[#allocation11_spill] sm:$0xff] %v8534_v50  ;;  %v3538_v8 = vadd.f32 %v3537_v16, %v8462_v35  ;;  %v3586_v3 = vpop.f32.mrf.mxu1  ;;  %v9328_v35 = vld [vmem:[#allocation19_spill] sm:$0xff] }
 0x34c   :  { %v3683_v23 = vadd.f32 %v3682_v49, %v3634_v6  ;;  %v7546_v6 = vld [vmem:[#allocation5 + $0x6f4] sm:$0xf0]  ;;  %v6604_v50 = vld [vmem:[#allocation5 + $0x4e8] sm:$0xf] }
 0x34d   :  { %v3587_v30 = vadd.f32 %v3586_v3, %v3538_v8  ;;  %v6861_v49 = vor.u32 %v7546_v6, %v6860_v55  ;;  %v6732_v55 = vld [vmem:[#allocation5 + $0x5e8] sm:$0xf] }
 0x34e   :  { %v4574_v19 = vmul.f32 0.25, %v3683_v23  ;;  %vm4510_vm2 = vcmp.gt.f32.partialorder %v3683_v23, 0.0 }
 0x34f   :  { %4011 = vmatpush.bf16.msrb.mxu2 %v6861_v49 }
 0x350   :  { %v4638_v16 = vsel %vm4510_vm2, %v3683_v23, %v4574_v19  ;;  %v7514_v19 = vld [vmem:[#allocation5 + $0x5f4] sm:$0xf0] }
 0x351   :  { %v3635_v17 = vpop.f32.mrf.mxu2 }
 0x352   :  { %v3636_v39 = vadd.f32 %v3635_v17, %v3587_v30  ;;  %v3684_v62 = vpop.f32.mrf.mxu3  ;;  %v3540_v27 = vpop.f32.mrf.mxu0 }
 0x353   :  { %v3541_v56 = vadd.f32 %v3540_v27, %v8469_v11  ;;  %v3589_v59 = vpop.f32.mrf.mxu1 }
 0x354   :  { %v3685_v34 = vadd.f32 %v3684_v62, %v3636_v39 }
 0x355   :  { %v3590_v29 = vadd.f32 %v3589_v59, %v3541_v56  ;;  %3735 = vmatmul.bf16.gmra.mxu0 %v9326_v0  ;;  %3784 = vmatmul.bf16.gmra.mxu1 %v9327_v20  ;;  %v6988_v20 = vld [vmem:[#allocation5 + $0x7e8] sm:$0xf]  ;;  %v7578_v0 = vld [vmem:[#allocation5 + $0x7f4] sm:$0xf0] }
 0x356   :  { %vm4514_vm3 = vcmp.gt.f32.partialorder %v3685_v34, 0.0  ;;  %v4578_v40 = vmul.f32 0.25, %v3685_v34  ;;  %3833 = vmatmul.bf16.gmra.mxu2 %v9328_v35  ;;  %v7482_v35 = vld [vmem:[#allocation5 + $0x4f4] sm:$0xf0]  ;;  %v6989_v23 = vor.u32 %v7578_v0, %v6988_v20  ;;  %v9331_v20 = vld [vmem:[#allocation23_spill] sm:$0xff] }
 0x357   :  { %3882 = vmatmul.bf16.gmra.mxu3 %v9329_v61  ;;  %v6605_v61 = vor.u32 %v7482_v35, %v6604_v50  ;;  %v9332_v35 = vld [vmem:[#allocation24_spill] sm:$0xff] }
 0x358   :  { %v4642_v11 = vsel %vm4514_vm3, %v3685_v34, %v4578_v40  ;;  %v6733_v40 = vor.u32 %v7514_v19, %v6732_v55  ;;  %4060 = vmatpush.bf16.msrb.mxu3 %v6989_v23 }
 0x359   :  { %v3638_v27 = vpop.f32.mrf.mxu2  ;;  %v8542_v8 = vpack.c.bf16 %v4642_v11, %v4638_v16  ;;  %3913 = vmatpush.bf16.msrb.mxu0 %v6605_v61  ;;  %v6844_v61 = vld [vmem:[#allocation5 + $0x6c8] sm:$0xf] }
 0x35a   :  { %v3639_v39 = vadd.f32 %v3638_v27, %v3590_v29  ;;  %v3687_v62 = vpop.f32.mrf.mxu3  ;;  %v3542_v56 = vpop.f32.mrf.mxu0  ;;  %3962 = vmatpush.bf16.msrb.mxu1 %v6733_v40 }
 0x35b   :  { %9330 = vst [vmem:[#allocation59_spill] sm:$0xff] %v8542_v8  ;;  %v3543_v59 = vadd.f32 %v3542_v56, %v8472_v21  ;;  %v3591_v3 = vpop.f32.mrf.mxu1  ;;  %v7574_v8 = vld [vmem:[#allocation5 + $0x7d4] sm:$0xf0] }
 0x35c   :  { %v3688_v30 = vadd.f32 %v3687_v62, %v3639_v39  ;;  %v7542_v39 = vld [vmem:[#allocation5 + $0x6d4] sm:$0xf0] }
 0x35d   :  { %v3592_v17 = vadd.f32 %v3591_v3, %v3543_v59  ;;  %v6845_v62 = vor.u32 %v7542_v39, %v6844_v61  ;;  %v6716_v61 = vld [vmem:[#allocation5 + $0x5c8] sm:$0xf] }
 0x35e   :  { %v4582_v11 = vmul.f32 0.25, %v3688_v30  ;;  %vm4518_vm4 = vcmp.gt.f32.partialorder %v3688_v30, 0.0 }
 0x35f   :  { %4012 = vmatpush.bf16.msrb.mxu2 %v6845_v62 }
 0x361   :  { %v3640_v34 = vpop.f32.mrf.mxu2 }
 0x362   :  { %v3641_v29 = vadd.f32 %v3640_v34, %v3592_v17  ;;  %v3689_v6 = vpop.f32.mrf.mxu3  ;;  %v3545_v16 = vpop.f32.mrf.mxu0 }
 0x363   :  { %v3546_v21 = vadd.f32 %v3545_v16, %v8479_v52  ;;  %v3594_v49 = vpop.f32.mrf.mxu1  ;;  %v4646_v52 = vsel %vm4518_vm4, %v3688_v30, %v4582_v11  ;;  %v7478_v16 = vld [vmem:[#allocation5 + $0x4d4] sm:$0xf0] }
 0x364   :  { %v3690_v27 = vadd.f32 %v3689_v6, %v3641_v29  ;;  %v6588_v6 = vld [vmem:[#allocation5 + $0x4c8] sm:$0xf]  ;;  %v7510_v11 = vld [vmem:[#allocation5 + $0x5d4] sm:$0xf0] }
 0x365   :  { %v3595_v50 = vadd.f32 %v3594_v49, %v3546_v21  ;;  %3740 = vmatmul.bf16.gmra.mxu0 %v9288_v63  ;;  %3789 = vmatmul.bf16.gmra.mxu1 %v9289_v48  ;;  %v6589_v21 = vor.u32 %v7478_v16, %v6588_v6  ;;  %v6972_v49 = vld [vmem:[#allocation5 + $0x7c8] sm:$0xf] }
 0x366   :  { %vm4522_vm5 = vcmp.gt.f32.partialorder %v3690_v27, 0.0  ;;  %v4586_v0 = vmul.f32 0.25, %v3690_v27  ;;  %3838 = vmatmul.bf16.gmra.mxu2 %v9331_v20  ;;  %v6973_v30 = vor.u32 %v7574_v8, %v6972_v49 }
 0x367   :  { %3887 = vmatmul.bf16.gmra.mxu3 %v9332_v35  ;;  %3914 = vmatpush.bf16.msrb.mxu0 %v6589_v21 }
 0x368   :  { %v4650_v56 = vsel %vm4522_vm5, %v3690_v27, %v4586_v0  ;;  %v6717_v0 = vor.u32 %v7510_v11, %v6716_v61  ;;  %4061 = vmatpush.bf16.msrb.mxu3 %v6973_v30 }
 0x369   :  { %v3643_v59 = vpop.f32.mrf.mxu2  ;;  %v8550_v3 = vpack.c.bf16 %v4650_v56, %v4646_v52 }
 0x36a   :  { %v3644_v17 = vadd.f32 %v3643_v59, %v3595_v50  ;;  %v3692_v55 = vpop.f32.mrf.mxu3  ;;  %v3547_v23 = vpop.f32.mrf.mxu0  ;;  %3963 = vmatpush.bf16.msrb.mxu1 %v6717_v0 }
 0x36b   :  { %9333 = vst [vmem:[#allocation23_spill] sm:$0xff] %v8550_v3  ;;  %v3548_v19 = vadd.f32 %v3547_v23, %v8482_v42  ;;  %v3596_v34 = vpop.f32.mrf.mxu1  ;;  %v9335_v23 = vld [vmem:[#allocation28_spill] sm:$0xff]  ;;  %v7570_v3 = vld [vmem:[#allocation5 + $0x7b4] sm:$0xf0] }
 0x36c   :  { %v3693_v40 = vadd.f32 %v3692_v55, %v3644_v17  ;;  %v9334_v55 = vld [vmem:[#allocation27_spill] sm:$0xff] }
 0x36d   :  { %v3597_v29 = vadd.f32 %v3596_v34, %v3548_v19  ;;  %v6828_v19 = vld [vmem:[#allocation5 + $0x6a8] sm:$0xf]  ;;  %v7538_v34 = vld [vmem:[#allocation5 + $0x6b4] sm:$0xf0] }
 0x36e   :  { %v4590_v56 = vmul.f32 0.25, %v3693_v40  ;;  %vm4526_vm6 = vcmp.gt.f32.partialorder %v3693_v40, 0.0 }
 0x371   :  { %v3645_v27 = vpop.f32.mrf.mxu2 }
 0x372   :  { %v3646_v50 = vadd.f32 %v3645_v27, %v3597_v29  ;;  %v3694_v39 = vpop.f32.mrf.mxu3  ;;  %v3550_v52 = vpop.f32.mrf.mxu0  ;;  %v6829_v29 = vor.u32 %v7538_v34, %v6828_v19  ;;  %v6700_v19 = vld [vmem:[#allocation5 + $0x5a8] sm:$0xf]  ;;  %v7470_v34 = vld [vmem:[#allocation5 + $0x494] sm:$0xf0] }
 0x373   :  { %v3551_v42 = vadd.f32 %v3550_v52, %v8489_v38  ;;  %v3599_v62 = vpop.f32.mrf.mxu1  ;;  %v4654_v38 = vsel %vm4526_vm6, %v3693_v40, %v4590_v56  ;;  %v7474_v52 = vld [vmem:[#allocation5 + $0x4b4] sm:$0xf0] }
 0x374   :  { %v3695_v59 = vadd.f32 %v3694_v39, %v3646_v50  ;;  %4013 = vmatpush.bf16.msrb.mxu2 %v6829_v29  ;;  %v6572_v39 = vld [vmem:[#allocation5 + $0x4a8] sm:$0xf]  ;;  %v7506_v56 = vld [vmem:[#allocation5 + $0x5b4] sm:$0xf0] }
 0x375   :  { %v3600_v17 = vadd.f32 %v3599_v62, %v3551_v42  ;;  %3745 = vmatmul.bf16.gmra.mxu0 %v9293_v47  ;;  %3794 = vmatmul.bf16.gmra.mxu1 %v9294_v25  ;;  %v6956_v42 = vld [vmem:[#allocation5 + $0x7a8] sm:$0xf]  ;;  %v6573_v62 = vor.u32 %v7474_v52, %v6572_v39 }
 0x376   :  { %vm4530_vm7 = vcmp.gt.f32.partialorder %v3695_v59, 0.0  ;;  %v4594_v8 = vmul.f32 0.25, %v3695_v59  ;;  %3843 = vmatmul.bf16.gmra.mxu2 %v9334_v55  ;;  %v6957_v40 = vor.u32 %v7570_v3, %v6956_v42  ;;  %v6684_v29 = vld [vmem:[#allocation5 + $0x588] sm:$0xf] }
 0x377   :  { %3892 = vmatmul.bf16.gmra.mxu3 %v9335_v23  ;;  %3915 = vmatpush.bf16.msrb.mxu0 %v6573_v62  ;;  %v6940_v42 = vld [vmem:[#allocation5 + $0x788] sm:$0xf]  ;;  %v7566_v62 = vld [vmem:[#allocation5 + $0x794] sm:$0xf0] }
 0x378   :  { %v4658_v6 = vsel %vm4530_vm7, %v3695_v59, %v4594_v8  ;;  %v6701_v59 = vor.u32 %v7506_v56, %v6700_v19  ;;  %4062 = vmatpush.bf16.msrb.mxu3 %v6957_v40  ;;  %v6941_v40 = vor.u32 %v7566_v62, %v6940_v42  ;;  %v6540_v56 = vld [vmem:[#allocation5 + $0x468] sm:$0xf] }
 0x379   :  { %v3648_v16 = vpop.f32.mrf.mxu2  ;;  %v8558_v21 = vpack.c.bf16 %v4658_v6, %v4654_v38 }
 0x37a   :  { %v3649_v49 = vadd.f32 %v3648_v16, %v3600_v17  ;;  %v3697_v61 = vpop.f32.mrf.mxu3  ;;  %v3552_v30 = vpop.f32.mrf.mxu0  ;;  %v6556_v17 = vld [vmem:[#allocation5 + $0x488] sm:$0xf]  ;;  %3964 = vmatpush.bf16.msrb.mxu1 %v6701_v59  ;;  %v7466_v59 = vld [vmem:[#allocation5 + $0x474] sm:$0xf0] }
 0x37b   :  { %9336 = vst [vmem:[#allocation24_spill] sm:$0xff] %v8558_v21  ;;  %v3553_v11 = vadd.f32 %v3552_v30, %v8492_v14  ;;  %v3601_v27 = vpop.f32.mrf.mxu1  ;;  %v6557_v16 = vor.u32 %v7470_v34, %v6556_v17  ;;  %v7534_v30 = vld [vmem:[#allocation5 + $0x694] sm:$0xf0]  ;;  %v9337_v34 = vld [vmem:[#allocation30_spill] sm:$0xff]  ;;  %v6524_v21 = vld [vmem:[#allocation5 + $0x448] sm:$0xf] }
 0x37c   :  { %v3698_v0 = vadd.f32 %v3697_v61, %v3649_v49  ;;  %v7502_v49 = vld [vmem:[#allocation5 + $0x594] sm:$0xf0]  ;;  %v6812_v61 = vld [vmem:[#allocation5 + $0x688] sm:$0xf]  ;;  %4063 = vmatpush.bf16.msrb.mxu3 %v6941_v40 }
 0x37d   :  { %v3602_v50 = vadd.f32 %v3601_v27, %v3553_v11  ;;  %v6685_v39 = vor.u32 %v7502_v49, %v6684_v29  ;;  %v6813_v52 = vor.u32 %v7534_v30, %v6812_v61  ;;  %3916 = vmatpush.bf16.msrb.mxu0 %v6557_v16  ;;  %v6541_v29 = vor.u32 %v7466_v59, %v6540_v56  ;;  %v6796_v49 = vld [vmem:[#allocation5 + $0x668] sm:$0xf]  ;;  %v9339_v61 = vld [vmem:[#allocation32_spill] sm:$0xff]  ;;  %v7562_v30 = vld [vmem:[#allocation5 + $0x774] sm:$0xf0] }
 0x37e   :  { %v4598_v11 = vmul.f32 0.25, %v3698_v0  ;;  %vm4534_vm8 = vcmp.gt.f32.partialorder %v3698_v0, 0.0  ;;  %v6924_v16 = vld [vmem:[#allocation5 + $0x768] sm:$0xf]  ;;  %v7462_v56 = vld [vmem:[#allocation5 + $0x454] sm:$0xf0] }
 0x37f   :  { %4014 = vmatpush.bf16.msrb.mxu2 %v6813_v52  ;;  %3965 = vmatpush.bf16.msrb.mxu1 %v6685_v39  ;;  %v6925_v52 = vor.u32 %v7562_v30, %v6924_v16  ;;  %v6652_v59 = vld [vmem:[#allocation5 + $0x548] sm:$0xf] }
 0x380   :  { %v6508_v30 = vld [vmem:[#allocation5 + $0x428] sm:$0xf] }
 0x381   :  { %v3650_v8 = vpop.f32.mrf.mxu2  ;;  %3917 = vmatpush.bf16.msrb.mxu0 %v6541_v29  ;;  %4064 = vmatpush.bf16.msrb.mxu3 %v6925_v52 }
 0x382   :  { %v3651_v38 = vadd.f32 %v3650_v8, %v3602_v50  ;;  %v3699_v14 = vpop.f32.mrf.mxu3  ;;  %v3555_v6 = vpop.f32.mrf.mxu0  ;;  %v6668_v8 = vld [vmem:[#allocation5 + $0x568] sm:$0xf] }
 0x383   :  { %v3556_v27 = vadd.f32 %v3555_v6, %v8499_v13  ;;  %v3604_v3 = vpop.f32.mrf.mxu1  ;;  %v9338_v13 = vld [vmem:[#allocation31_spill] sm:$0xff]  ;;  %v7498_v6 = vld [vmem:[#allocation5 + $0x574] sm:$0xf0] }
 0x384   :  { %v3700_v19 = vadd.f32 %v3699_v14, %v3651_v38  ;;  %v6669_v38 = vor.u32 %v7498_v6, %v6668_v8  ;;  %v7530_v14 = vld [vmem:[#allocation5 + $0x674] sm:$0xf0]  ;;  %v6525_v6 = vor.u32 %v7462_v56, %v6524_v21 }
 0x385   :  { %v3605_v50 = vadd.f32 %v3604_v3, %v3556_v27  ;;  %3750 = vmatmul.bf16.gmra.mxu0 %v8032_v22  ;;  %3799 = vmatmul.bf16.gmra.mxu1 %v9337_v34  ;;  %v4662_v27 = vsel %vm4534_vm8, %v3698_v0, %v4598_v11  ;;  %v6797_v3 = vor.u32 %v7530_v14, %v6796_v49  ;;  %v7494_v34 = vld [vmem:[#allocation5 + $0x554] sm:$0xf0]  ;;  %v6780_v22 = vld [vmem:[#allocation5 + $0x648] sm:$0xf] }
 0x386   :  { %vm4538_vm9 = vcmp.gt.f32.partialorder %v3700_v19, 0.0  ;;  %v4602_v17 = vmul.f32 0.25, %v3700_v19  ;;  %3848 = vmatmul.bf16.gmra.mxu2 %v9338_v13  ;;  %v7526_v0 = vld [vmem:[#allocation5 + $0x654] sm:$0xf0]  ;;  %3966 = vmatpush.bf16.msrb.mxu1 %v6669_v38  ;;  %v6653_v29 = vor.u32 %v7494_v34, %v6652_v59  ;;  %v6892_v38 = vld [vmem:[#allocation5 + $0x728] sm:$0xf] }
 0x387   :  { %3897 = vmatmul.bf16.gmra.mxu3 %v9339_v61  ;;  %4015 = vmatpush.bf16.msrb.mxu2 %v6797_v3  ;;  %v7558_v49 = vld [vmem:[#allocation5 + $0x754] sm:$0xf0]  ;;  %v6636_v3 = vld [vmem:[#allocation5 + $0x528] sm:$0xf] }
 0x388   :  { %v4666_v42 = vsel %vm4538_vm9, %v3700_v19, %v4602_v17  ;;  %v6781_v19 = vor.u32 %v7526_v0, %v6780_v22  ;;  %v6908_v17 = vld [vmem:[#allocation5 + $0x748] sm:$0xf]  ;;  %3918 = vmatpush.bf16.msrb.mxu0 %v6525_v6  ;;  %v7522_v56 = vld [vmem:[#allocation5 + $0x634] sm:$0xf0] }
 0x389   :  { %v3653_v62 = vpop.f32.mrf.mxu2  ;;  %v8568_v13 = vpack.c.bf16 %v4666_v42, %v4662_v27  ;;  %v6909_v16 = vor.u32 %v7558_v49, %v6908_v17  ;;  %v7458_v27 = vld [vmem:[#allocation5 + $0x434] sm:$0xf0]  ;;  %v6492_v59 = vld [vmem:[#allocation5 + $0x408] sm:$0xf] }
 0x38a   :  { %v3654_v61 = vadd.f32 %v3653_v62, %v3605_v50  ;;  %v3702_v39 = vpop.f32.mrf.mxu3  ;;  %v3557_v8 = vpop.f32.mrf.mxu0  ;;  %v6509_v21 = vor.u32 %v7458_v27, %v6508_v30  ;;  %v7490_v42 = vld [vmem:[#allocation5 + $0x534] sm:$0xf0]  ;;  %v6764_v62 = vld [vmem:[#allocation5 + $0x628] sm:$0xf]  ;;  %3967 = vmatpush.bf16.msrb.mxu1 %v6653_v29 }
 0x38b   :  { %9340 = vst [vmem:[#allocation27_spill] sm:$0xff] %v8568_v13  ;;  %v3558_v11 = vadd.f32 %v3557_v8, %v8502_v36  ;;  %v3606_v40 = vpop.f32.mrf.mxu1  ;;  %4016 = vmatpush.bf16.msrb.mxu2 %v6781_v19  ;;  %v6637_v36 = vor.u32 %v7490_v42, %v6636_v3  ;;  %v7554_v34 = vld [vmem:[#allocation5 + $0x734] sm:$0xf0]  ;;  %4065 = vmatpush.bf16.msrb.mxu3 %v6909_v16  ;;  %v6620_v8 = vld [vmem:[#allocation5 + $0x508] sm:$0xf] }
 0x38c   :  { %v3703_v14 = vadd.f32 %v3702_v39, %v3654_v61  ;;  %3919 = vmatpush.bf16.msrb.mxu0 %v6509_v21  ;;  %v6765_v22 = vor.u32 %v7522_v56, %v6764_v62  ;;  %v6893_v61 = vor.u32 %v7554_v34, %v6892_v38  ;;  %v7454_v39 = vld [vmem:[#allocation5 + $0x414] sm:$0xf0]  ;;  %v6748_v17 = vld [vmem:[#allocation5 + $0x608] sm:$0xf] }
 0x38d   :  { %v3607_v50 = vadd.f32 %v3606_v40, %v3558_v11  ;;  %v6493_v40 = vor.u32 %v7454_v39, %v6492_v59  ;;  %v7486_v19 = vld [vmem:[#allocation5 + $0x514] sm:$0xf0]  ;;  %v6876_v27 = vld [vmem:[#allocation5 + $0x708] sm:$0xf] }
 0x38e   :  { %v7518_v29 = vld [vmem:[#allocation5 + $0x614] sm:$0xf0]  ;;  %3968 = vmatpush.bf16.msrb.mxu1 %v6637_v36  ;;  %v6621_v16 = vor.u32 %v7486_v19, %v6620_v8  ;;  %v4606_v21 = vmul.f32 0.25, %v3703_v14  ;;  %vm4542_vm10 = vcmp.gt.f32.partialorder %v3703_v14, 0.0 }
 0x38f   :  { %4017 = vmatpush.bf16.msrb.mxu2 %v6765_v22  ;;  %v7550_v3 = vld [vmem:[#allocation5 + $0x714] sm:$0xf0]  ;;  %4066 = vmatpush.bf16.msrb.mxu3 %v6893_v61  ;;  %v6749_v62 = vor.u32 %v7518_v29, %v6748_v17 }
 0x390   :  { %3920 = vmatpush.bf16.msrb.mxu0 %v6493_v40 }
 0x391   :  { %v3655_v52 = vpop.f32.mrf.mxu2 }
 0x392   :  { %v3656_v6 = vadd.f32 %v3655_v52, %v3607_v50  ;;  %v3704_v0 = vpop.f32.mrf.mxu3  ;;  %v3560_v11 = vpop.f32.mrf.mxu0  ;;  %v6877_v50 = vor.u32 %v7550_v3, %v6876_v27  ;;  %3969 = vmatpush.bf16.msrb.mxu1 %v6621_v16 }
 0x393   :  { %v3561_v49 = vadd.f32 %v3560_v11, %v8509_v18  ;;  %v3609_v30 = vpop.f32.mrf.mxu1  ;;  %4018 = vmatpush.bf16.msrb.mxu2 %v6749_v62  ;;  %v4670_v18 = vsel %vm4542_vm10, %v3703_v14, %v4606_v21 }
 0x394   :  { %v3705_v42 = vadd.f32 %v3704_v0, %v3656_v6  ;;  %4067 = vmatpush.bf16.msrb.mxu3 %v6877_v50 }
 0x395   :  { %v3610_v56 = vadd.f32 %v3609_v30, %v3561_v49  ;;  %3755 = vmatmul.bf16.gmra.mxu0 %v8060_v5  ;;  %3804 = vmatmul.bf16.gmra.mxu1 %v8062_v9 }
 0x396   :  { %vm4546_vm11 = vcmp.gt.f32.partialorder %v3705_v42, 0.0  ;;  %v4610_v38 = vmul.f32 0.25, %v3705_v42  ;;  %3853 = vmatmul.bf16.gmra.mxu2 %v8069_v44 }
 0x397   :  { %3902 = vmatmul.bf16.gmra.mxu3 %v8073_v15 }
 0x398   :  { %v4674_v36 = vsel %vm4546_vm11, %v3705_v42, %v4610_v38 }
 0x399   :  { %v3658_v34 = vpop.f32.mrf.mxu2  ;;  %v8576_v22 = vpack.c.bf16 %v4674_v36, %v4670_v18 }
 0x39a   :  { %v3659_v61 = vadd.f32 %v3658_v34, %v3610_v56  ;;  %v3707_v52 = vpop.f32.mrf.mxu3  ;;  %v3562_v59 = vpop.f32.mrf.mxu0  ;;  %v7660_v34 = vld [vmem:[%s9114_s4] sm:$0xf] }
 0x39b   :  { %9341 = vst [vmem:[#allocation28_spill] sm:$0xff] %v8576_v22  ;;  %v3563_v39 = vadd.f32 %v3562_v59, %v8512_v53  ;;  %v3611_v8 = vpop.f32.mrf.mxu1  ;;  %v6222_v22 = vld [vmem:[#allocation5 + $0x1f8] sm:$0xf0] }
 0x39c   :  { %v3708_v6 = vadd.f32 %v3707_v52, %v3659_v61  ;;  %v8590_v61 = vperm.slane %v7660_v34, 2 }
 0x39d   :  { %v3612_v0 = vadd.f32 %v3611_v8, %v3563_v39 }
 0x39e   :  { %v4614_v14 = vmul.f32 0.25, %v3708_v6  ;;  %vm4550_vm12 = vcmp.gt.f32.partialorder %v3708_v6, 0.0 }
 0x3a0   :  { %v4678_v53 = vsel %vm4550_vm12, %v3708_v6, %v4614_v14 }
 0x3a1   :  { %v3660_v11 = vpop.f32.mrf.mxu2 }
 0x3a2   :  { %v3661_v40 = vadd.f32 %v3660_v11, %v3612_v0  ;;  %v3709_v19 = vpop.f32.mrf.mxu3  ;;  %v3565_v17 = vpop.f32.mrf.mxu0 }
 0x3a3   :  { %v3566_v29 = vadd.f32 %v3565_v17, %v8519_v2  ;;  %v3614_v49 = vpop.f32.mrf.mxu1 }
 0x3a4   :  { %v3710_v30 = vadd.f32 %v3709_v19, %v3661_v40 }
 0x3a5   :  { %v3615_v16 = vadd.f32 %v3614_v49, %v3566_v29  ;;  %3760 = vmatmul.bf16.gmra.mxu0 %v8080_v10  ;;  %3809 = vmatmul.bf16.gmra.mxu1 %v8082_v12 }
 0x3a6   :  { %vm4554_vm13 = vcmp.gt.f32.partialorder %v3710_v30, 0.0  ;;  %v4618_v27 = vmul.f32 0.25, %v3710_v30  ;;  %3858 = vmatmul.bf16.gmra.mxu2 %v9302_v32 }
 0x3a7   :  { %3907 = vmatmul.bf16.gmra.mxu3 %v9303_v4 }
 0x3a8   :  { %v4682_v3 = vsel %vm4554_vm13, %v3710_v30, %v4618_v27 }
 0x3a9   :  { %v3663_v21 = vpop.f32.mrf.mxu2  ;;  %v8584_v42 = vpack.c.bf16 %v4682_v3, %v4678_v53 }
 0x3aa   :  { %v3664_v2 = vadd.f32 %v3663_v21, %v3615_v16  ;;  %v3712_v62 = vpop.f32.mrf.mxu3  ;;  %v3567_v50 = vpop.f32.mrf.mxu0 }
 0x3ab   :  { %9342 = vst [vmem:[#allocation60_spill] sm:$0xff] %v8584_v42  ;;  %v3568_v56 = vadd.f32 %v3567_v50, %v8522_v51  ;;  %v3616_v38 = vpop.f32.mrf.mxu1  ;;  %v7384_v42 = vld [vmem:[#allocation5 + $0x1ec] sm:$0xf] }
 0x3ac   :  { %v3713_v18 = vadd.f32 %v3712_v62, %v3664_v2 }
 0x3ad   :  { %v3617_v36 = vadd.f32 %v3616_v38, %v3568_v56 }
 0x3ae   :  { %v4622_v11 = vmul.f32 0.25, %v3713_v18  ;;  %vm4558_vm14 = vcmp.gt.f32.partialorder %v3713_v18, 0.0 }
 0x3b0   :  { %v4686_v17 = vsel %vm4558_vm14, %v3713_v18, %v4622_v11 }
 0x3b1   :  { %v3665_v52 = vpop.f32.mrf.mxu2 }
 0x3b2   :  { %v3666_v59 = vadd.f32 %v3665_v52, %v3617_v36  ;;  %v3714_v39 = vpop.f32.mrf.mxu3  ;;  %v3726_v8 = vpop.f32.mrf.mxu0 }
 0x3b3   :  { %v3727_v6 = vadd.f32 %v3726_v8, %v8590_v61  ;;  %v3775_v0 = vpop.f32.mrf.mxu1  ;;  %v9346_v8 = vld [vmem:[#allocation41_spill] sm:$0xff] }
 0x3b4   :  { %v3715_v40 = vadd.f32 %v3714_v39, %v3666_v59  ;;  %v9344_v59 = vld [vmem:[#allocation39_spill] sm:$0xff]  ;;  %v9345_v39 = vld [vmem:[#allocation40_spill] sm:$0xff] }
 0x3b5   :  { %v3776_v51 = vadd.f32 %v3775_v0, %v3727_v6  ;;  %3921 = vmatmul.bf16.vlgmr.msrb.gmra.mxu0 %v8112_v28  ;;  %3970 = vmatmul.bf16.vlgmr.msrb.gmra.mxu1 %v8114_v33  ;;  %v7392_v33 = vld [vmem:[#allocation5 + $0x22c] sm:$0xf] }
 0x3b6   :  { %vm4562_vm15 = vcmp.gt.f32.partialorder %v3715_v40, 0.0  ;;  %v4626_v19 = vmul.f32 0.25, %v3715_v40  ;;  %4019 = vmatmul.bf16.vlgmr.msrb.gmra.mxu2 %v8121_v57  ;;  %v7396_v57 = vld [vmem:[#allocation5 + $0x24c] sm:$0xf] }
 0x3b7   :  { %4068 = vmatmul.bf16.vlgmr.msrb.gmra.mxu3 %v8125_v1  ;;  %v6142_v1 = vld [vmem:[#allocation5 + $0x158] sm:$0xf0] }
 0x3b8   :  { %v4690_v29 = vsel %vm4562_vm15, %v3715_v40, %v4626_v19 }
 0x3b9   :  { %v3824_v49 = vpop.f32.mrf.mxu2  ;;  %v8597_v14 = vpack.c.bf16 %v4690_v29, %v4686_v17 }
 0x3ba   :  { %v3825_v30 = vadd.f32 %v3824_v49, %v3776_v51  ;;  %v3873_v16 = vpop.f32.mrf.mxu3  ;;  %v3728_v27 = vpop.f32.mrf.mxu0 }
 0x3bb   :  { %9343 = vst [vmem:[#allocation61_spill] sm:$0xff] %v8597_v14  ;;  %v3729_v53 = vadd.f32 %v3728_v27, %v8590_v61  ;;  %v3777_v3 = vpop.f32.mrf.mxu1  ;;  %v6478_v14 = vld [vmem:[#allocation5 + $0x3f8] sm:$0xf0] }
 0x3bc   :  { %v8600_v21 = vadd.f32 %v3873_v16, %v3825_v30 }
 0x3bd   :  { %v3778_v2 = vadd.f32 %v3777_v3, %v3729_v53 }
 0x3c1   :  { %v3826_v62 = vpop.f32.mrf.mxu2 }
 0x3c2   :  { %v3827_v50 = vadd.f32 %v3826_v62, %v3778_v2  ;;  %v3875_v56 = vpop.f32.mrf.mxu3  ;;  %v3731_v38 = vpop.f32.mrf.mxu0 }
 0x3c3   :  { %v3732_v36 = vadd.f32 %v3731_v38, %v8590_v61  ;;  %v3780_v18 = vpop.f32.mrf.mxu1  ;;  %v9349_v38 = vld [vmem:[#allocation44_spill] sm:$0xff] }
 0x3c4   :  { %v8603_v34 = vadd.f32 %v3875_v56, %v3827_v50  ;;  %v9347_v50 = vld [vmem:[#allocation42_spill] sm:$0xff]  ;;  %v9348_v56 = vld [vmem:[#allocation43_spill] sm:$0xff] }
 0x3c5   :  { %v3781_v52 = vadd.f32 %v3780_v18, %v3732_v36  ;;  %3926 = vmatmul.bf16.gmra.mxu0 %v8132_v46  ;;  %3975 = vmatmul.bf16.gmra.mxu1 %v9344_v59  ;;  %v9350_v36 = vld [vmem:[#allocation45_spill] sm:$0xff]  ;;  %v7416_v18 = vld [vmem:[#allocation5 + $0x2ec] sm:$0xf]  ;;  %v9361_v46 = vld [vmem:[#allocation56_spill] sm:$0xff] }
 0x3c6   :  { %4024 = vmatmul.bf16.gmra.mxu2 %v9345_v39  ;;  %v6174_v39 = vld [vmem:[#allocation5 + $0x198] sm:$0xf0]  ;;  %v7404_v59 = vld [vmem:[#allocation5 + $0x28c] sm:$0xf] }
 0x3c7   :  { %4073 = vmatmul.bf16.gmra.mxu3 %v9346_v8 }
 0x3c9   :  { %v3829_v6 = vpop.f32.mrf.mxu2 }
 0x3ca   :  { %v3830_v0 = vadd.f32 %v3829_v6, %v3781_v52  ;;  %v3878_v11 = vpop.f32.mrf.mxu3  ;;  %v3733_v40 = vpop.f32.mrf.mxu0  ;;  %v6350_v52 = vld [vmem:[#allocation5 + $0x2f8] sm:$0xf0] }
 0x3cb   :  { %v3734_v51 = vadd.f32 %v3733_v40, %v8590_v61  ;;  %v3782_v19 = vpop.f32.mrf.mxu1  ;;  %v6353_v6 = vor.u32 %v7416_v18, %v6350_v52  ;;  %v6225_v18 = vor.u32 %v7384_v42, %v6222_v22  ;;  %v9354_v22 = vld [vmem:[#allocation49_spill] sm:$0xff] }
 0x3cc   :  { %v8610_v17 = vadd.f32 %v3878_v11, %v3830_v0  ;;  %v6334_v42 = vld [vmem:[#allocation5 + $0x2d8] sm:$0xf0] }
 0x3cd   :  { %v3783_v29 = vadd.f32 %v3782_v19, %v3734_v51  ;;  %4207 = vmatpush.bf16.msra.mxu2 %v6353_v6  ;;  %4158 = vmatpush.bf16.msra.mxu1 %v6225_v18 }
 0x3d1   :  { %v3831_v49 = vpop.f32.mrf.mxu2 }
 0x3d2   :  { %v3832_v30 = vadd.f32 %v3831_v49, %v3783_v29  ;;  %v3880_v16 = vpop.f32.mrf.mxu3  ;;  %v3736_v27 = vpop.f32.mrf.mxu0 }
 0x3d3   :  { %v3737_v53 = vadd.f32 %v3736_v27, %v8590_v61  ;;  %v3785_v3 = vpop.f32.mrf.mxu1  ;;  %v7448_v27 = vld [vmem:[#allocation5 + $0x3ec] sm:$0xf] }
 0x3d4   :  { %v8613_v2 = vadd.f32 %v3880_v16, %v3832_v30  ;;  %v7352_v30 = vld [vmem:[#allocation5 + $0xec] sm:$0xf]  ;;  %v6094_v16 = vld [vmem:[#allocation5 + $0xf8] sm:$0xf0]  ;;  %v6481_v13 = vor.u32 %v7448_v27, %v6478_v14 }
 0x3d5   :  { %v3786_v62 = vadd.f32 %v3785_v3, %v3737_v53  ;;  %3931 = vmatmul.bf16.gmra.mxu0 %v9347_v50  ;;  %3980 = vmatmul.bf16.gmra.mxu1 %v9348_v56  ;;  %v6097_v3 = vor.u32 %v7352_v30, %v6094_v16  ;;  %v9353_v30 = vld [vmem:[#allocation48_spill] sm:$0xff] }
 0x3d6   :  { %4029 = vmatmul.bf16.gmra.mxu2 %v9349_v38  ;;  %4256 = vmatpush.bf16.msra.mxu3 %v6481_v13  ;;  %v7412_v13 = vld [vmem:[#allocation5 + $0x2cc] sm:$0xf] }
 0x3d7   :  { %4078 = vmatmul.bf16.gmra.mxu3 %v9350_v36  ;;  %4109 = vmatpush.bf16.msra.mxu0 %v6097_v3  ;;  %v6337_v14 = vor.u32 %v7412_v13, %v6334_v42 }
 0x3d9   :  { %v3834_v0 = vpop.f32.mrf.mxu2  ;;  %4208 = vmatpush.bf16.msra.mxu2 %v6337_v14 }
 0x3da   :  { %v3835_v11 = vadd.f32 %v3834_v0, %v3786_v62  ;;  %v3883_v40 = vpop.f32.mrf.mxu3  ;;  %v3738_v51 = vpop.f32.mrf.mxu0 }
 0x3db   :  { %v3739_v19 = vadd.f32 %v3738_v51, %v8590_v61  ;;  %v3787_v29 = vpop.f32.mrf.mxu1 }
 0x3dc   :  { %v8620_v49 = vadd.f32 %v3883_v40, %v3835_v11 }
 0x3dd   :  { %v3788_v53 = vadd.f32 %v3787_v29, %v3739_v19  ;;  %v9351_v19 = vld [vmem:[#allocation46_spill] sm:$0xff]  ;;  %v9352_v29 = vld [vmem:[#allocation47_spill] sm:$0xff] }
 0x3e1   :  { %v3836_v62 = vpop.f32.mrf.mxu2 }
 0x3e2   :  { %v3837_v52 = vadd.f32 %v3836_v62, %v3788_v53  ;;  %v3885_v6 = vpop.f32.mrf.mxu3  ;;  %v3741_v0 = vpop.f32.mrf.mxu0 }
 0x3e3   :  { %v3742_v11 = vadd.f32 %v3741_v0, %v8590_v61  ;;  %v3790_v40 = vpop.f32.mrf.mxu1  ;;  %v6078_v0 = vld [vmem:[#allocation5 + $0xd8] sm:$0xf0] }
 0x3e4   :  { %v8623_v51 = vadd.f32 %v3885_v6, %v3837_v52  ;;  %v7348_v6 = vld [vmem:[#allocation5 + $0xcc] sm:$0xf] }
 0x3e5   :  { %v3791_v36 = vadd.f32 %v3790_v40, %v3742_v11  ;;  %3936 = vmatmul.bf16.gmra.mxu0 %v9351_v19  ;;  %3985 = vmatmul.bf16.gmra.mxu1 %v9352_v29  ;;  %v7444_v11 = vld [vmem:[#allocation5 + $0x3cc] sm:$0xf]  ;;  %v6462_v29 = vld [vmem:[#allocation5 + $0x3d8] sm:$0xf0] }
 0x3e6   :  { %4034 = vmatmul.bf16.gmra.mxu2 %v9353_v30  ;;  %v6081_v30 = vor.u32 %v7348_v6, %v6078_v0  ;;  %v6206_v19 = vld [vmem:[#allocation5 + $0x1d8] sm:$0xf0]  ;;  %v6465_v38 = vor.u32 %v7444_v11, %v6462_v29  ;;  %v9357_v6 = vld [vmem:[#allocation52_spill] sm:$0xff] }
 0x3e7   :  { %4083 = vmatmul.bf16.gmra.mxu3 %v9354_v22  ;;  %v7380_v22 = vld [vmem:[#allocation5 + $0x1cc] sm:$0xf]  ;;  %v6318_v29 = vld [vmem:[#allocation5 + $0x2b8] sm:$0xf0] }
 0x3e8   :  { %v6209_v13 = vor.u32 %v7380_v22, %v6206_v19  ;;  %4110 = vmatpush.bf16.msra.mxu0 %v6081_v30  ;;  %4257 = vmatpush.bf16.msra.mxu3 %v6465_v38  ;;  %v9358_v19 = vld [vmem:[#allocation53_spill] sm:$0xff]  ;;  %v7408_v38 = vld [vmem:[#allocation5 + $0x2ac] sm:$0xf] }
 0x3e9   :  { %v3839_v16 = vpop.f32.mrf.mxu2  ;;  %v6321_v30 = vor.u32 %v7408_v38, %v6318_v29  ;;  %v7340_v29 = vld [vmem:[#allocation5 + $0x8c] sm:$0xf] }
 0x3ea   :  { %v3840_v27 = vadd.f32 %v3839_v16, %v3791_v36  ;;  %v3888_v53 = vpop.f32.mrf.mxu3  ;;  %v3743_v3 = vpop.f32.mrf.mxu0  ;;  %4159 = vmatpush.bf16.msra.mxu1 %v6209_v13 }
 0x3eb   :  { %v3744_v18 = vadd.f32 %v3743_v3, %v8590_v61  ;;  %v3792_v62 = vpop.f32.mrf.mxu1  ;;  %4209 = vmatpush.bf16.msra.mxu2 %v6321_v30  ;;  %v6046_v30 = vld [vmem:[#allocation5 + $0x98] sm:$0xf0] }
 0x3ec   :  { %v8630_v52 = vadd.f32 %v3888_v53, %v3840_v27  ;;  %v6049_v8 = vor.u32 %v7340_v29, %v6046_v30  ;;  %v7368_v29 = vld [vmem:[#allocation5 + $0x16c] sm:$0xf] }
 0x3ed   :  { %v3793_v40 = vadd.f32 %v3792_v62, %v3744_v18  ;;  %v9355_v18 = vld [vmem:[#allocation50_spill] sm:$0xff]  ;;  %v9356_v62 = vld [vmem:[#allocation51_spill] sm:$0xff] }
 0x3ee   :  { %v9360_v30 = vld [vmem:[#allocation55_spill] sm:$0xff] }
 0x3f1   :  { %v3841_v36 = vpop.f32.mrf.mxu2 }
 0x3f2   :  { %v3842_v42 = vadd.f32 %v3841_v36, %v3793_v40  ;;  %v3890_v14 = vpop.f32.mrf.mxu3  ;;  %v3746_v16 = vpop.f32.mrf.mxu0 }
 0x3f3   :  { %v3747_v27 = vadd.f32 %v3746_v16, %v8590_v61  ;;  %v3795_v53 = vpop.f32.mrf.mxu1  ;;  %v6062_v16 = vld [vmem:[#allocation5 + $0xb8] sm:$0xf0] }
 0x3f4   :  { %v8633_v3 = vadd.f32 %v3890_v14, %v3842_v42  ;;  %v7344_v14 = vld [vmem:[#allocation5 + $0xac] sm:$0xf] }
 0x3f5   :  { %v3796_v56 = vadd.f32 %v3795_v53, %v3747_v27  ;;  %3941 = vmatmul.bf16.gmra.mxu0 %v9355_v18  ;;  %3990 = vmatmul.bf16.gmra.mxu1 %v9356_v62  ;;  %v7440_v27 = vld [vmem:[#allocation5 + $0x3ac] sm:$0xf]  ;;  %v6446_v62 = vld [vmem:[#allocation5 + $0x3b8] sm:$0xf0] }
 0x3f6   :  { %4039 = vmatmul.bf16.gmra.mxu2 %v9357_v6  ;;  %v6065_v6 = vor.u32 %v7344_v14, %v6062_v16  ;;  %v6190_v18 = vld [vmem:[#allocation5 + $0x1b8] sm:$0xf0]  ;;  %v6449_v50 = vor.u32 %v7440_v27, %v6446_v62 }
 0x3f7   :  { %4088 = vmatmul.bf16.gmra.mxu3 %v9358_v19  ;;  %v7376_v19 = vld [vmem:[#allocation5 + $0x1ac] sm:$0xf] }
 0x3f8   :  { %v6193_v38 = vor.u32 %v7376_v19, %v6190_v18  ;;  %4111 = vmatpush.bf16.msra.mxu0 %v6065_v6  ;;  %4258 = vmatpush.bf16.msra.mxu3 %v6449_v50  ;;  %v7436_v18 = vld [vmem:[#allocation5 + $0x38c] sm:$0xf]  ;;  %v6430_v6 = vld [vmem:[#allocation5 + $0x398] sm:$0xf0] }
 0x3f9   :  { %v3844_v22 = vpop.f32.mrf.mxu2  ;;  %v6433_v19 = vor.u32 %v7436_v18, %v6430_v6  ;;  %v7332_v18 = vld [vmem:[#allocation5 + $0x4c] sm:$0xf]  ;;  %v6014_v6 = vld [vmem:[#allocation5 + $0x58] sm:$0xf0] }
 0x3fa   :  { %v3845_v0 = vadd.f32 %v3844_v22, %v3796_v56  ;;  %v3893_v11 = vpop.f32.mrf.mxu3  ;;  %v3748_v40 = vpop.f32.mrf.mxu0  ;;  %4160 = vmatpush.bf16.msra.mxu1 %v6193_v38  ;;  %v7372_v22 = vld [vmem:[#allocation5 + $0x18c] sm:$0xf]  ;;  %v9359_v38 = vld [vmem:[#allocation54_spill] sm:$0xff] }
 0x3fb   :  { %v3749_v13 = vadd.f32 %v3748_v40, %v8590_v61  ;;  %v3797_v36 = vpop.f32.mrf.mxu1  ;;  %v6177_v16 = vor.u32 %v7372_v22, %v6174_v39  ;;  %v6158_v39 = vld [vmem:[#allocation5 + $0x178] sm:$0xf0] }
 0x3fc   :  { %v8640_v42 = vadd.f32 %v3893_v11, %v3845_v0  ;;  %4112 = vmatpush.bf16.msra.mxu0 %v6049_v8  ;;  %v6286_v22 = vld [vmem:[#allocation5 + $0x278] sm:$0xf0]  ;;  %v6161_v8 = vor.u32 %v7368_v29, %v6158_v39  ;;  %4259 = vmatpush.bf16.msra.mxu3 %v6433_v19 }
 0x3fd   :  { %v3798_v53 = vadd.f32 %v3797_v36, %v3749_v13  ;;  %v6302_v13 = vld [vmem:[#allocation5 + $0x298] sm:$0xf0] }
 0x3fe   :  { %v6305_v62 = vor.u32 %v7404_v59, %v6302_v13  ;;  %4161 = vmatpush.bf16.msra.mxu1 %v6177_v16  ;;  %v7400_v59 = vld [vmem:[#allocation5 + $0x26c] sm:$0xf]  ;;  %v9362_v13 = vld [vmem:[#allocation57_spill] sm:$0xff] }
 0x400   :  { %4210 = vmatpush.bf16.msra.mxu2 %v6305_v62 }
 0x401   :  { %v3846_v56 = vpop.f32.mrf.mxu2 }
 0x402   :  { %v3847_v40 = vadd.f32 %v3846_v56, %v3798_v53  ;;  %v3895_v0 = vpop.f32.mrf.mxu3  ;;  %v3751_v11 = vpop.f32.mrf.mxu0  ;;  %v7336_v53 = vld [vmem:[#allocation5 + $0x6c] sm:$0xf]  ;;  %v6030_v56 = vld [vmem:[#allocation5 + $0x78] sm:$0xf0]  ;;  %4162 = vmatpush.bf16.msra.mxu1 %v6161_v8 }
 0x403   :  { %v3752_v36 = vadd.f32 %v3751_v11, %v8590_v61  ;;  %v3800_v14 = vpop.f32.mrf.mxu1  ;;  %v6033_v11 = vor.u32 %v7336_v53, %v6030_v56 }
 0x404   :  { %v8643_v50 = vadd.f32 %v3895_v0, %v3847_v40  ;;  %v6289_v40 = vor.u32 %v7400_v59, %v6286_v22  ;;  %v7432_v0 = vld [vmem:[#allocation5 + $0x36c] sm:$0xf]  ;;  %v6398_v59 = vld [vmem:[#allocation5 + $0x358] sm:$0xf0] }
 0x405   :  { %v3801_v27 = vadd.f32 %v3800_v14, %v3752_v36  ;;  %3946 = vmatmul.bf16.gmra.mxu0 %v9359_v38  ;;  %3995 = vmatmul.bf16.gmra.mxu1 %v9360_v30  ;;  %v6414_v36 = vld [vmem:[#allocation5 + $0x378] sm:$0xf0]  ;;  %v7364_v30 = vld [vmem:[#allocation5 + $0x14c] sm:$0xf]  ;;  %v6017_v38 = vor.u32 %v7332_v18, %v6014_v6 }
 0x406   :  { %4044 = vmatmul.bf16.gmra.mxu2 %v9361_v46  ;;  %4113 = vmatpush.bf16.msra.mxu0 %v6033_v11  ;;  %v6417_v14 = vor.u32 %v7432_v0, %v6414_v36  ;;  %v6145_v39 = vor.u32 %v7364_v30, %v6142_v1  ;;  %v7428_v11 = vld [vmem:[#allocation5 + $0x34c] sm:$0xf]  ;;  %v5998_v36 = vld [vmem:[#allocation5 + $0x38] sm:$0xf0] }
 0x407   :  { %4093 = vmatmul.bf16.gmra.mxu3 %v9362_v13  ;;  %v6270_v13 = vld [vmem:[#allocation5 + $0x258] sm:$0xf0]  ;;  %4211 = vmatpush.bf16.msra.mxu2 %v6289_v40  ;;  %v6401_v8 = vor.u32 %v7428_v11, %v6398_v59  ;;  %v7328_v0 = vld [vmem:[#allocation5 + $0x2c] sm:$0xf] }
 0x408   :  { %v6273_v19 = vor.u32 %v7396_v57, %v6270_v13  ;;  %4260 = vmatpush.bf16.msra.mxu3 %v6417_v14  ;;  %4163 = vmatpush.bf16.msra.mxu1 %v6145_v39  ;;  %v6001_v18 = vor.u32 %v7328_v0, %v5998_v36  ;;  %v6126_v6 = vld [vmem:[#allocation5 + $0x138] sm:$0xf0]  ;;  %v7424_v57 = vld [vmem:[#allocation5 + $0x32c] sm:$0xf] }
 0x409   :  { %v3849_v16 = vpop.f32.mrf.mxu2  ;;  %v6382_v30 = vld [vmem:[#allocation5 + $0x338] sm:$0xf0]  ;;  %v7388_v0 = vld [vmem:[#allocation5 + $0x20c] sm:$0xf] }
 0x40a   :  { %v3850_v46 = vadd.f32 %v3849_v16, %v3801_v27  ;;  %v3898_v53 = vpop.f32.mrf.mxu3  ;;  %v3753_v56 = vpop.f32.mrf.mxu0  ;;  %4114 = vmatpush.bf16.msra.mxu0 %v6017_v38  ;;  %v7360_v16 = vld [vmem:[#allocation5 + $0x12c] sm:$0xf]  ;;  %v5982_v14 = vld [vmem:[#allocation5 + $0x18] sm:$0xf0] }
 0x40b   :  { %v3754_v62 = vadd.f32 %v3753_v56, %v8590_v61  ;;  %v3802_v29 = vpop.f32.mrf.mxu1  ;;  %v6254_v56 = vld [vmem:[#allocation5 + $0x238] sm:$0xf0]  ;;  %4212 = vmatpush.bf16.msra.mxu2 %v6273_v19  ;;  %v6129_v40 = vor.u32 %v7360_v16, %v6126_v6  ;;  %v7324_v38 = vld [vmem:[#allocation5 + $0xc] sm:$0xf] }
 0x40c   :  { %v8650_v22 = vadd.f32 %v3898_v53, %v3850_v46  ;;  %v6257_v1 = vor.u32 %v7392_v33, %v6254_v56  ;;  %4261 = vmatpush.bf16.msra.mxu3 %v6401_v8  ;;  %v6385_v46 = vor.u32 %v7424_v57, %v6382_v30  ;;  %v7356_v53 = vld [vmem:[#allocation5 + $0x10c] sm:$0xf]  ;;  %v5985_v11 = vor.u32 %v7324_v38, %v5982_v14  ;;  %v6110_v59 = vld [vmem:[#allocation5 + $0x118] sm:$0xf0] }
 0x40d   :  { %v3803_v27 = vadd.f32 %v3802_v29, %v3754_v62  ;;  %4164 = vmatpush.bf16.msra.mxu1 %v6129_v40  ;;  %v6238_v36 = vld [vmem:[#allocation5 + $0x218] sm:$0xf0]  ;;  %v6113_v16 = vor.u32 %v7356_v53, %v6110_v59 }
 0x40e   :  { %4115 = vmatpush.bf16.msra.mxu0 %v6001_v18  ;;  %v6241_v8 = vor.u32 %v7388_v0, %v6238_v36  ;;  %v7420_v18 = vld [vmem:[#allocation5 + $0x30c] sm:$0xf]  ;;  %v6366_v6 = vld [vmem:[#allocation5 + $0x318] sm:$0xf0] }
 0x40f   :  { %4213 = vmatpush.bf16.msra.mxu2 %v6257_v1  ;;  %v6369_v40 = vor.u32 %v7420_v18, %v6366_v6 }
 0x410   :  { %4262 = vmatpush.bf16.msra.mxu3 %v6385_v46 }
 0x411   :  { %v3851_v13 = vpop.f32.mrf.mxu2  ;;  %4165 = vmatpush.bf16.msra.mxu1 %v6113_v16 }
 0x412   :  { %v3852_v62 = vadd.f32 %v3851_v13, %v3803_v27  ;;  %v3900_v29 = vpop.f32.mrf.mxu3  ;;  %v3756_v39 = vpop.f32.mrf.mxu0  ;;  %4116 = vmatpush.bf16.msra.mxu0 %v5985_v11 }
 0x413   :  { %v3757_v19 = vadd.f32 %v3756_v39, %v8590_v61  ;;  %v3805_v33 = vpop.f32.mrf.mxu1  ;;  %4214 = vmatpush.bf16.msra.mxu2 %v6241_v8 }
 0x414   :  { %v8653_v56 = vadd.f32 %v3900_v29, %v3852_v62  ;;  %4263 = vmatpush.bf16.msra.mxu3 %v6369_v40 }
 0x415   :  { %v3806_v27 = vadd.f32 %v3805_v33, %v3757_v19  ;;  %3951 = vmatmul.bf16.gmra.mxu0 %v8257_v58  ;;  %4000 = vmatmul.bf16.gmra.mxu1 %v8259_v43 }
 0x416   :  { %4049 = vmatmul.bf16.gmra.mxu2 %v8266_v7 }
 0x417   :  { %4098 = vmatmul.bf16.gmra.mxu3 %v8270_v26 }
 0x419   :  { %v3854_v1 = vpop.f32.mrf.mxu2 }
 0x41a   :  { %v3855_v57 = vadd.f32 %v3854_v1, %v3806_v27  ;;  %v3903_v30 = vpop.f32.mrf.mxu3  ;;  %v3758_v13 = vpop.f32.mrf.mxu0 }
 0x41b   :  { %v3759_v46 = vadd.f32 %v3758_v13, %v8590_v61  ;;  %v3807_v38 = vpop.f32.mrf.mxu1 }
 0x41c   :  { %v8660_v14 = vadd.f32 %v3903_v30, %v3855_v57 }
 0x41d   :  { %v3808_v53 = vadd.f32 %v3807_v38, %v3759_v46 }
 0x421   :  { %v3856_v62 = vpop.f32.mrf.mxu2 }
 0x422   :  { %v3857_v29 = vadd.f32 %v3856_v62, %v3808_v53  ;;  %v3905_v39 = vpop.f32.mrf.mxu3  ;;  %v3761_v11 = vpop.f32.mrf.mxu0 }
 0x423   :  { %v3762_v59 = vadd.f32 %v3761_v11, %v8590_v61  ;;  %v3810_v0 = vpop.f32.mrf.mxu1 }
 0x424   :  { %v8663_v36 = vadd.f32 %v3905_v39, %v3857_v29 }
 0x425   :  { %v3811_v19 = vadd.f32 %v3810_v0, %v3762_v59  ;;  %3956 = vmatmul.bf16.gmra.mxu0 %v8282_v54  ;;  %4005 = vmatmul.bf16.gmra.mxu1 %v8284_v45 }
 0x426   :  { %4054 = vmatmul.bf16.gmra.mxu2 %v8292_v37 }
 0x427   :  { %4103 = vmatmul.bf16.gmra.mxu3 %v8295_v60 }
 0x429   :  { %v3859_v33 = vpop.f32.mrf.mxu2 }
 0x42a   :  { %v3860_v16 = vadd.f32 %v3859_v33, %v3811_v19  ;;  %v3908_v8 = vpop.f32.mrf.mxu3  ;;  %v3763_v18 = vpop.f32.mrf.mxu0 }
 0x42b   :  { %v3764_v6 = vadd.f32 %v3763_v18, %v8590_v61  ;;  %v3812_v40 = vpop.f32.mrf.mxu1  ;;  %v9363_v61 = vld [vmem:[#allocation12_spill] sm:$0xff] }
 0x42c   :  { %v8670_v27 = vadd.f32 %v3908_v8, %v3860_v16 }
 0x42d   :  { %v3813_v1 = vadd.f32 %v3812_v40, %v3764_v6 }
 0x431   :  { %v3861_v57 = vpop.f32.mrf.mxu2 }
 0x432   :  { %v3862_v30 = vadd.f32 %v3861_v57, %v3813_v1  ;;  %v3910_v13 = vpop.f32.mrf.mxu3  ;;  %v3922_v46 = vpop.f32.mrf.mxu0 }
 0x433   :  { %v3923_v38 = vadd.f32 %v3922_v46, %v8600_v21  ;;  %v3971_v53 = vpop.f32.mrf.mxu1  ;;  %v9365_v46 = vld [vmem:[#allocation14_spill] sm:$0xff] }
 0x434   :  { %v8673_v62 = vadd.f32 %v3910_v13, %v3862_v30  ;;  %v9364_v30 = vld [vmem:[#allocation13_spill] sm:$0xff] }
 0x435   :  { %v3972_v29 = vadd.f32 %v3971_v53, %v3923_v38  ;;  %4117 = vmatmul.bf16.vlgmr.msra.gmra.mxu0 %v7909_v41  ;;  %4166 = vmatmul.bf16.vlgmr.msra.gmra.mxu1 %v9275_v31  ;;  %v9367_v38 = vld [vmem:[#allocation16_spill] sm:$0xff] }
 0x436   :  { %4215 = vmatmul.bf16.vlgmr.msra.gmra.mxu2 %v9319_v24 }
 0x437   :  { %4264 = vmatmul.bf16.vlgmr.msra.gmra.mxu3 %v9363_v61 }
 0x439   :  { %v4020_v39 = vpop.f32.mrf.mxu2 }
 0x43a   :  { %v4021_v11 = vadd.f32 %v4020_v39, %v3972_v29  ;;  %v4069_v59 = vpop.f32.mrf.mxu3  ;;  %v3924_v0 = vpop.f32.mrf.mxu0 }
 0x43b   :  { %v3925_v19 = vadd.f32 %v3924_v0, %v8603_v34  ;;  %v3973_v33 = vpop.f32.mrf.mxu1  ;;  %v9366_v34 = vld [vmem:[#allocation15_spill] sm:$0xff] }
 0x43c   :  { %v4070_v21 = vadd.f32 %v4069_v59, %v4021_v11 }
 0x43d   :  { %v3974_v16 = vadd.f32 %v3973_v33, %v3925_v19 }
 0x43e   :  { %v4567_v1 = vmul.f32 0.25, %v4070_v21  ;;  %vm4503_vm0 = vcmp.gt.f32.partialorder %v4070_v21, 0.0 }
 0x440   :  { %v4631_v53 = vsel %vm4503_vm0, %v4070_v21, %v4567_v1 }
 0x441   :  { %v4022_v8 = vpop.f32.mrf.mxu2 }
 0x442   :  { %v4023_v18 = vadd.f32 %v4022_v8, %v3974_v16  ;;  %v4071_v6 = vpop.f32.mrf.mxu3  ;;  %v3927_v40 = vpop.f32.mrf.mxu0 }
 0x443   :  { %v3928_v41 = vadd.f32 %v3927_v40, %v8610_v17  ;;  %v3976_v31 = vpop.f32.mrf.mxu1 }
 0x444   :  { %v4072_v24 = vadd.f32 %v4071_v6, %v4023_v18 }
 0x445   :  { %v3977_v57 = vadd.f32 %v3976_v31, %v3928_v41  ;;  %4122 = vmatmul.bf16.gmra.mxu0 %v9364_v30  ;;  %4171 = vmatmul.bf16.gmra.mxu1 %v9365_v46  ;;  %v9368_v30 = vld [vmem:[#allocation17_spill] sm:$0xff]  ;;  %v9371_v46 = vld [vmem:[#allocation20_spill] sm:$0xff] }
 0x446   :  { %vm4507_vm1 = vcmp.gt.f32.partialorder %v4072_v24, 0.0  ;;  %v4571_v13 = vmul.f32 0.25, %v4072_v24  ;;  %4220 = vmatmul.bf16.gmra.mxu2 %v9366_v34  ;;  %v7544_v34 = vld [vmem:[#allocation5 + $0x6ec] sm:$0xf] }
 0x447   :  { %4269 = vmatmul.bf16.gmra.mxu3 %v9367_v38  ;;  %v6862_v38 = vld [vmem:[#allocation5 + $0x6f8] sm:$0xf0] }
 0x448   :  { %v4635_v29 = vsel %vm4507_vm1, %v4072_v24, %v4571_v13  ;;  %v9369_v13 = vld [vmem:[#allocation18_spill] sm:$0xff] }
 0x449   :  { %v8685_v61 = vpack.c.bf16 %v4635_v29, %v4631_v53  ;;  %v4025_v17 = vpop.f32.mrf.mxu2  ;;  %v6865_v53 = vor.u32 %v7544_v34, %v6862_v38 }
 0x44a   :  { %v4026_v39 = vadd.f32 %v4025_v17, %v3977_v57  ;;  %v4074_v11 = vpop.f32.mrf.mxu3  ;;  %v3929_v59 = vpop.f32.mrf.mxu0 }
 0x44b   :  { %v3930_v0 = vadd.f32 %v3929_v59, %v8613_v2  ;;  %v3978_v19 = vpop.f32.mrf.mxu1  ;;  %v9370_v2 = vld [vmem:[#allocation19_spill] sm:$0xff]  ;;  %4403 = vmatpush.bf16.msrb.mxu2 %v6865_v53 }
 0x44c   :  { %v4075_v33 = vadd.f32 %v4074_v11, %v4026_v39 }
 0x44d   :  { %v3979_v16 = vadd.f32 %v3978_v19, %v3930_v0 }
 0x44e   :  { %v4575_v21 = vmul.f32 0.25, %v4075_v33  ;;  %vm4511_vm2 = vcmp.gt.f32.partialorder %v4075_v33, 0.0 }
 0x450   :  { %v4639_v29 = vsel %vm4511_vm2, %v4075_v33, %v4575_v21  ;;  %v6734_v21 = vld [vmem:[#allocation5 + $0x5f8] sm:$0xf0] }
 0x451   :  { %v4027_v8 = vpop.f32.mrf.mxu2 }
 0x452   :  { %v4028_v18 = vadd.f32 %v4027_v8, %v3979_v16  ;;  %v4076_v6 = vpop.f32.mrf.mxu3  ;;  %v3932_v40 = vpop.f32.mrf.mxu0 }
 0x453   :  { %v3933_v41 = vadd.f32 %v3932_v40, %v8620_v49  ;;  %v3981_v31 = vpop.f32.mrf.mxu1  ;;  %v6606_v40 = vld [vmem:[#allocation5 + $0x4f8] sm:$0xf0] }
 0x454   :  { %v4077_v1 = vadd.f32 %v4076_v6, %v4028_v18  ;;  %v7480_v6 = vld [vmem:[#allocation5 + $0x4ec] sm:$0xf] }
 0x455   :  { %v3982_v24 = vadd.f32 %v3981_v31, %v3933_v41  ;;  %4127 = vmatmul.bf16.gmra.mxu0 %v9368_v30  ;;  %4176 = vmatmul.bf16.gmra.mxu1 %v9369_v13  ;;  %v6609_v41 = vor.u32 %v7480_v6, %v6606_v40  ;;  %v7576_v31 = vld [vmem:[#allocation5 + $0x7ec] sm:$0xf]  ;;  %v6990_v30 = vld [vmem:[#allocation5 + $0x7f8] sm:$0xf0] }
 0x456   :  { %vm4515_vm3 = vcmp.gt.f32.partialorder %v4077_v1, 0.0  ;;  %v4579_v57 = vmul.f32 0.25, %v4077_v1  ;;  %4225 = vmatmul.bf16.gmra.mxu2 %v9370_v2  ;;  %v7512_v13 = vld [vmem:[#allocation5 + $0x5ec] sm:$0xf]  ;;  %v6993_v33 = vor.u32 %v7576_v31, %v6990_v30  ;;  %v6590_v30 = vld [vmem:[#allocation5 + $0x4d8] sm:$0xf0] }
 0x457   :  { %4274 = vmatmul.bf16.gmra.mxu3 %v9371_v46  ;;  %4305 = vmatpush.bf16.msrb.mxu0 %v6609_v41 }
 0x458   :  { %v4643_v49 = vsel %vm4515_vm3, %v4077_v1, %v4579_v57  ;;  %v6737_v57 = vor.u32 %v7512_v13, %v6734_v21  ;;  %4452 = vmatpush.bf16.msrb.mxu3 %v6993_v33  ;;  %v7572_v13 = vld [vmem:[#allocation5 + $0x7cc] sm:$0xf]  ;;  %v6974_v33 = vld [vmem:[#allocation5 + $0x7d8] sm:$0xf0] }
 0x459   :  { %v4030_v17 = vpop.f32.mrf.mxu2  ;;  %v8693_v39 = vpack.c.bf16 %v4643_v49, %v4639_v29  ;;  %v7508_v21 = vld [vmem:[#allocation5 + $0x5cc] sm:$0xf] }
 0x45a   :  { %v4031_v11 = vadd.f32 %v4030_v17, %v3982_v24  ;;  %v4079_v59 = vpop.f32.mrf.mxu3  ;;  %v3934_v0 = vpop.f32.mrf.mxu0  ;;  %4354 = vmatpush.bf16.msrb.mxu1 %v6737_v57  ;;  %v7540_v17 = vld [vmem:[#allocation5 + $0x6cc] sm:$0xf] }
 0x45b   :  { %v3935_v19 = vadd.f32 %v3934_v0, %v8623_v51  ;;  %v3983_v16 = vpop.f32.mrf.mxu1 }
 0x45c   :  { %v4080_v8 = vadd.f32 %v4079_v59, %v4031_v11  ;;  %v6846_v11 = vld [vmem:[#allocation5 + $0x6d8] sm:$0xf0] }
 0x45d   :  { %v3984_v18 = vadd.f32 %v3983_v16, %v3935_v19  ;;  %v6849_v59 = vor.u32 %v7540_v17, %v6846_v11  ;;  %v7536_v17 = vld [vmem:[#allocation5 + $0x6ac] sm:$0xf]  ;;  %v6830_v11 = vld [vmem:[#allocation5 + $0x6b8] sm:$0xf0] }
 0x45e   :  { %v4583_v38 = vmul.f32 0.25, %v4080_v8  ;;  %vm4519_vm4 = vcmp.gt.f32.partialorder %v4080_v8, 0.0 }
 0x45f   :  { %4404 = vmatpush.bf16.msrb.mxu2 %v6849_v59  ;;  %v6833_v59 = vor.u32 %v7536_v17, %v6830_v11  ;;  %v7564_v11 = vld [vmem:[#allocation5 + $0x78c] sm:$0xf] }
 0x461   :  { %v4032_v1 = vpop.f32.mrf.mxu2 }
 0x462   :  { %v4033_v24 = vadd.f32 %v4032_v1, %v3984_v18  ;;  %v4081_v2 = vpop.f32.mrf.mxu3  ;;  %v3937_v46 = vpop.f32.mrf.mxu0  ;;  %v6718_v1 = vld [vmem:[#allocation5 + $0x5d8] sm:$0xf0] }
 0x463   :  { %v3938_v51 = vadd.f32 %v3937_v46, %v8630_v52  ;;  %v3986_v34 = vpop.f32.mrf.mxu1  ;;  %v4647_v52 = vsel %vm4519_vm4, %v4080_v8, %v4583_v38  ;;  %v6977_v8 = vor.u32 %v7572_v13, %v6974_v33  ;;  %4405 = vmatpush.bf16.msrb.mxu2 %v6833_v59  ;;  %v6702_v13 = vld [vmem:[#allocation5 + $0x5b8] sm:$0xf0] }
 0x464   :  { %v4082_v53 = vadd.f32 %v4081_v2, %v4033_v24  ;;  %v6721_v24 = vor.u32 %v7508_v21, %v6718_v1  ;;  %v6558_v1 = vld [vmem:[#allocation5 + $0x498] sm:$0xf0] }
 0x465   :  { %v3987_v29 = vadd.f32 %v3986_v34, %v3938_v51  ;;  %4132 = vmatmul.bf16.gmra.mxu0 %v9288_v63  ;;  %4181 = vmatmul.bf16.gmra.mxu1 %v9289_v48  ;;  %v6942_v59 = vld [vmem:[#allocation5 + $0x798] sm:$0xf0] }
 0x466   :  { %vm4523_vm5 = vcmp.gt.f32.partialorder %v4082_v53, 0.0  ;;  %v4587_v49 = vmul.f32 0.25, %v4082_v53  ;;  %4230 = vmatmul.bf16.gmra.mxu2 %v9331_v20  ;;  %v7476_v20 = vld [vmem:[#allocation5 + $0x4cc] sm:$0xf]  ;;  %4453 = vmatpush.bf16.msrb.mxu3 %v6977_v8 }
 0x467   :  { %4279 = vmatmul.bf16.gmra.mxu3 %v9332_v35  ;;  %v6593_v35 = vor.u32 %v7476_v20, %v6590_v30  ;;  %4355 = vmatpush.bf16.msrb.mxu1 %v6721_v24  ;;  %v6958_v30 = vld [vmem:[#allocation5 + $0x7b8] sm:$0xf0]  ;;  %v7468_v8 = vld [vmem:[#allocation5 + $0x48c] sm:$0xf] }
 0x468   :  { %v4651_v0 = vsel %vm4523_vm5, %v4082_v53, %v4587_v49 }
 0x469   :  { %v4035_v19 = vpop.f32.mrf.mxu2  ;;  %v8701_v16 = vpack.c.bf16 %v4651_v0, %v4647_v52  ;;  %4306 = vmatpush.bf16.msrb.mxu0 %v6593_v35  ;;  %v7504_v35 = vld [vmem:[#allocation5 + $0x5ac] sm:$0xf] }
 0x46a   :  { %v4036_v18 = vadd.f32 %v4035_v19, %v3987_v29  ;;  %v4084_v6 = vpop.f32.mrf.mxu3  ;;  %v3939_v40 = vpop.f32.mrf.mxu0  ;;  %v6705_v33 = vor.u32 %v7504_v35, %v6702_v13  ;;  %v6798_v35 = vld [vmem:[#allocation5 + $0x678] sm:$0xf0] }
 0x46b   :  { %v3940_v63 = vadd.f32 %v3939_v40, %v8633_v3  ;;  %v3988_v41 = vpop.f32.mrf.mxu1  ;;  %v6926_v13 = vld [vmem:[#allocation5 + $0x778] sm:$0xf0] }
 0x46c   :  { %v4085_v48 = vadd.f32 %v4084_v6, %v4036_v18  ;;  %4356 = vmatpush.bf16.msrb.mxu1 %v6705_v33 }
 0x46d   :  { %v3989_v31 = vadd.f32 %v3988_v41, %v3940_v63 }
 0x46e   :  { %v4591_v38 = vmul.f32 0.25, %v4085_v48  ;;  %vm4527_vm6 = vcmp.gt.f32.partialorder %v4085_v48, 0.0 }
 0x471   :  { %v4037_v57 = vpop.f32.mrf.mxu2 }
 0x472   :  { %v4038_v2 = vadd.f32 %v4037_v57, %v3989_v31  ;;  %v4086_v46 = vpop.f32.mrf.mxu3  ;;  %v3942_v51 = vpop.f32.mrf.mxu0  ;;  %v6574_v31 = vld [vmem:[#allocation5 + $0x4b8] sm:$0xf0]  ;;  %v7500_v57 = vld [vmem:[#allocation5 + $0x58c] sm:$0xf] }
 0x473   :  { %v3943_v3 = vadd.f32 %v3942_v51, %v8640_v42  ;;  %v3991_v34 = vpop.f32.mrf.mxu1  ;;  %v4655_v42 = vsel %vm4527_vm6, %v4085_v48, %v4591_v38  ;;  %v6686_v51 = vld [vmem:[#allocation5 + $0x598] sm:$0xf0] }
 0x474   :  { %v4087_v53 = vadd.f32 %v4086_v46, %v4038_v2  ;;  %v6561_v46 = vor.u32 %v7468_v8, %v6558_v1 }
 0x475   :  { %v3992_v29 = vadd.f32 %v3991_v34, %v3943_v3  ;;  %4137 = vmatmul.bf16.gmra.mxu0 %v9293_v47  ;;  %4186 = vmatmul.bf16.gmra.mxu1 %v9294_v25  ;;  %v7532_v3 = vld [vmem:[#allocation5 + $0x68c] sm:$0xf]  ;;  %v6814_v34 = vld [vmem:[#allocation5 + $0x698] sm:$0xf0] }
 0x476   :  { %vm4531_vm7 = vcmp.gt.f32.partialorder %v4087_v53, 0.0  ;;  %v4595_v49 = vmul.f32 0.25, %v4087_v53  ;;  %4235 = vmatmul.bf16.gmra.mxu2 %v9334_v55  ;;  %v7472_v55 = vld [vmem:[#allocation5 + $0x4ac] sm:$0xf]  ;;  %v6817_v17 = vor.u32 %v7532_v3, %v6814_v34 }
 0x477   :  { %4284 = vmatmul.bf16.gmra.mxu3 %v9335_v23  ;;  %v7568_v23 = vld [vmem:[#allocation5 + $0x7ac] sm:$0xf]  ;;  %v6577_v20 = vor.u32 %v7472_v55, %v6574_v31  ;;  %v6670_v31 = vld [vmem:[#allocation5 + $0x578] sm:$0xf0] }
 0x478   :  { %v4659_v52 = vsel %vm4531_vm7, %v4087_v53, %v4595_v49  ;;  %v6961_v48 = vor.u32 %v7568_v23, %v6958_v30  ;;  %v6689_v49 = vor.u32 %v7500_v57, %v6686_v51  ;;  %4406 = vmatpush.bf16.msrb.mxu2 %v6817_v17  ;;  %v7528_v23 = vld [vmem:[#allocation5 + $0x66c] sm:$0xf] }
 0x479   :  { %v4040_v0 = vpop.f32.mrf.mxu2  ;;  %v8709_v19 = vpack.c.bf16 %v4659_v52, %v4655_v42  ;;  %4307 = vmatpush.bf16.msrb.mxu0 %v6577_v20  ;;  %v6945_v52 = vor.u32 %v7564_v11, %v6942_v59  ;;  %v9375_v20 = vld [vmem:[#allocation32_spill] sm:$0xff] }
 0x47a   :  { %v4041_v18 = vadd.f32 %v4040_v0, %v3992_v29  ;;  %v4089_v6 = vpop.f32.mrf.mxu3  ;;  %v3944_v40 = vpop.f32.mrf.mxu0  ;;  %4454 = vmatpush.bf16.msrb.mxu3 %v6961_v48  ;;  %4357 = vmatpush.bf16.msrb.mxu1 %v6689_v49  ;;  %v7560_v48 = vld [vmem:[#allocation5 + $0x76c] sm:$0xf] }
 0x47b   :  { %v3945_v47 = vadd.f32 %v3944_v40, %v8643_v50  ;;  %v3993_v63 = vpop.f32.mrf.mxu1  ;;  %v6542_v40 = vld [vmem:[#allocation5 + $0x478] sm:$0xf0]  ;;  %v6929_v8 = vor.u32 %v7560_v48, %v6926_v13  ;;  %v7524_v49 = vld [vmem:[#allocation5 + $0x64c] sm:$0xf] }
 0x47c   :  { %v4090_v25 = vadd.f32 %v4089_v6, %v4041_v18  ;;  %v9372_v18 = vld [vmem:[#allocation29_spill] sm:$0xff]  ;;  %v7464_v6 = vld [vmem:[#allocation5 + $0x46c] sm:$0xf] }
 0x47d   :  { %v3994_v41 = vadd.f32 %v3993_v63, %v3945_v47  ;;  %4308 = vmatpush.bf16.msrb.mxu0 %v6561_v46  ;;  %v7496_v47 = vld [vmem:[#allocation5 + $0x56c] sm:$0xf]  ;;  %v6545_v55 = vor.u32 %v7464_v6, %v6542_v40 }
 0x47e   :  { %v4599_v38 = vmul.f32 0.25, %v4090_v25  ;;  %vm4535_vm8 = vcmp.gt.f32.partialorder %v4090_v25, 0.0  ;;  %v6673_v30 = vor.u32 %v7496_v47, %v6670_v31  ;;  %4455 = vmatpush.bf16.msrb.mxu3 %v6945_v52  ;;  %v6910_v52 = vld [vmem:[#allocation5 + $0x758] sm:$0xf0]  ;;  %v7456_v40 = vld [vmem:[#allocation5 + $0x42c] sm:$0xf] }
 0x47f   :  { %v6510_v47 = vld [vmem:[#allocation5 + $0x438] sm:$0xf0]  ;;  %v7452_v13 = vld [vmem:[#allocation5 + $0x40c] sm:$0xf] }
 0x480   :  { %v4663_v33 = vsel %vm4535_vm8, %v4090_v25, %v4599_v38  ;;  %v6782_v25 = vld [vmem:[#allocation5 + $0x658] sm:$0xf0]  ;;  %4358 = vmatpush.bf16.msrb.mxu1 %v6673_v30 }
 0x481   :  { %v4042_v21 = vpop.f32.mrf.mxu2  ;;  %4309 = vmatpush.bf16.msrb.mxu0 %v6545_v55  ;;  %v6785_v59 = vor.u32 %v7524_v49, %v6782_v25  ;;  %v7520_v55 = vld [vmem:[#allocation5 + $0x62c] sm:$0xf]  ;;  %v6766_v31 = vld [vmem:[#allocation5 + $0x638] sm:$0xf0] }
 0x482   :  { %v4043_v24 = vadd.f32 %v4042_v21, %v3994_v41  ;;  %v4091_v50 = vpop.f32.mrf.mxu3  ;;  %v3947_v2 = vpop.f32.mrf.mxu0  ;;  %v9373_v41 = vld [vmem:[#allocation30_spill] sm:$0xff]  ;;  %v6801_v21 = vor.u32 %v7528_v23, %v6798_v35  ;;  %4456 = vmatpush.bf16.msrb.mxu3 %v6929_v8  ;;  %v7552_v23 = vld [vmem:[#allocation5 + $0x72c] sm:$0xf]  ;;  %v6769_v30 = vor.u32 %v7520_v55, %v6766_v31  ;;  %v6878_v49 = vld [vmem:[#allocation5 + $0x718] sm:$0xf0] }
 0x483   :  { %v3948_v53 = vadd.f32 %v3947_v2, %v8650_v22  ;;  %v3996_v29 = vpop.f32.mrf.mxu1  ;;  %v9374_v22 = vld [vmem:[#allocation31_spill] sm:$0xff] }
 0x484   :  { %v4092_v42 = vadd.f32 %v4091_v50, %v4043_v24  ;;  %v7460_v24 = vld [vmem:[#allocation5 + $0x44c] sm:$0xf]  ;;  %v6526_v50 = vld [vmem:[#allocation5 + $0x458] sm:$0xf0]  ;;  %4407 = vmatpush.bf16.msrb.mxu2 %v6801_v21 }
 0x485   :  { %v3997_v0 = vadd.f32 %v3996_v29, %v3948_v53  ;;  %4142 = vmatmul.bf16.gmra.mxu0 %v9372_v18  ;;  %4191 = vmatmul.bf16.gmra.mxu1 %v9373_v41  ;;  %v7492_v2 = vld [vmem:[#allocation5 + $0x54c] sm:$0xf]  ;;  %v6529_v53 = vor.u32 %v7460_v24, %v6526_v50  ;;  %v6654_v29 = vld [vmem:[#allocation5 + $0x558] sm:$0xf0]  ;;  %v6513_v41 = vor.u32 %v7456_v40, %v6510_v47 }
 0x486   :  { %vm4539_vm9 = vcmp.gt.f32.partialorder %v4092_v42, 0.0  ;;  %v4603_v63 = vmul.f32 0.25, %v4092_v42  ;;  %4240 = vmatmul.bf16.gmra.mxu2 %v9374_v22  ;;  %v6657_v11 = vor.u32 %v7492_v2, %v6654_v29  ;;  %v6638_v22 = vld [vmem:[#allocation5 + $0x538] sm:$0xf0]  ;;  %v7484_v21 = vld [vmem:[#allocation5 + $0x50c] sm:$0xf] }
 0x487   :  { %4289 = vmatmul.bf16.gmra.mxu3 %v9375_v20  ;;  %4310 = vmatpush.bf16.msrb.mxu0 %v6529_v53  ;;  %v6894_v20 = vld [vmem:[#allocation5 + $0x738] sm:$0xf0]  ;;  %v7516_v2 = vld [vmem:[#allocation5 + $0x60c] sm:$0xf] }
 0x488   :  { %v4667_v1 = vsel %vm4539_vm9, %v4092_v42, %v4603_v63  ;;  %v7556_v42 = vld [vmem:[#allocation5 + $0x74c] sm:$0xf]  ;;  %4408 = vmatpush.bf16.msrb.mxu2 %v6785_v59  ;;  %4359 = vmatpush.bf16.msrb.mxu1 %v6657_v11  ;;  %v6897_v35 = vor.u32 %v7552_v23, %v6894_v20  ;;  %v6622_v50 = vld [vmem:[#allocation5 + $0x518] sm:$0xf0] }
 0x489   :  { %v4045_v57 = vpop.f32.mrf.mxu2  ;;  %v8719_v46 = vpack.c.bf16 %v4667_v1, %v4663_v33  ;;  %v6913_v6 = vor.u32 %v7556_v42, %v6910_v52  ;;  %v7488_v63 = vld [vmem:[#allocation5 + $0x52c] sm:$0xf]  ;;  %v6494_v33 = vld [vmem:[#allocation5 + $0x418] sm:$0xf0]  ;;  %v6625_v53 = vor.u32 %v7484_v21, %v6622_v50 }
 0x48a   :  { %v4046_v51 = vadd.f32 %v4045_v57, %v3997_v0  ;;  %v4094_v3 = vpop.f32.mrf.mxu3  ;;  %v3949_v34 = vpop.f32.mrf.mxu0  ;;  %v6497_v24 = vor.u32 %v7452_v13, %v6494_v33  ;;  %v7548_v29 = vld [vmem:[#allocation5 + $0x70c] sm:$0xf] }
 0x48b   :  { %v3950_v38 = vadd.f32 %v3949_v34, %v8653_v56  ;;  %v3998_v17 = vpop.f32.mrf.mxu1  ;;  %v6641_v56 = vor.u32 %v7488_v63, %v6638_v22  ;;  %4457 = vmatpush.bf16.msrb.mxu3 %v6913_v6  ;;  %4311 = vmatpush.bf16.msrb.mxu0 %v6513_v41  ;;  %v6881_v11 = vor.u32 %v7548_v29, %v6878_v49 }
 0x48c   :  { %v4095_v18 = vadd.f32 %v4094_v3, %v4046_v51  ;;  %4409 = vmatpush.bf16.msrb.mxu2 %v6769_v30  ;;  %v6750_v51 = vld [vmem:[#allocation5 + $0x618] sm:$0xf0] }
 0x48d   :  { %v3999_v0 = vadd.f32 %v3998_v17, %v3950_v38  ;;  %4360 = vmatpush.bf16.msrb.mxu1 %v6641_v56  ;;  %v6753_v17 = vor.u32 %v7516_v2, %v6750_v51 }
 0x48e   :  { %v4607_v25 = vmul.f32 0.25, %v4095_v18  ;;  %vm4543_vm10 = vcmp.gt.f32.partialorder %v4095_v18, 0.0 }
 0x48f   :  { %4458 = vmatpush.bf16.msrb.mxu3 %v6897_v35  ;;  %4312 = vmatpush.bf16.msrb.mxu0 %v6497_v24 }
 0x490   :  { %4410 = vmatpush.bf16.msrb.mxu2 %v6753_v17  ;;  %v9378_v17 = vld [vmem:[#allocation37_spill] sm:$0xff] }
 0x491   :  { %v4047_v48 = vpop.f32.mrf.mxu2  ;;  %4361 = vmatpush.bf16.msrb.mxu1 %v6625_v53 }
 0x492   :  { %v4048_v8 = vadd.f32 %v4047_v48, %v3999_v0  ;;  %v4096_v1 = vpop.f32.mrf.mxu3  ;;  %v3952_v57 = vpop.f32.mrf.mxu0 }
 0x493   :  { %v3953_v3 = vadd.f32 %v3952_v57, %v8660_v14  ;;  %v4001_v34 = vpop.f32.mrf.mxu1  ;;  %4459 = vmatpush.bf16.msrb.mxu3 %v6881_v11  ;;  %v4671_v14 = vsel %vm4543_vm10, %v4095_v18, %v4607_v25  ;;  %v9376_v25 = vld [vmem:[#allocation35_spill] sm:$0xff] }
 0x494   :  { %v4097_v38 = vadd.f32 %v4096_v1, %v4048_v8 }
 0x495   :  { %v4002_v59 = vadd.f32 %v4001_v34, %v3953_v3  ;;  %4147 = vmatmul.bf16.gmra.mxu0 %v8060_v5  ;;  %4196 = vmatmul.bf16.gmra.mxu1 %v8062_v9 }
 0x496   :  { %vm4547_vm11 = vcmp.gt.f32.partialorder %v4097_v38, 0.0  ;;  %v4611_v42 = vmul.f32 0.25, %v4097_v38  ;;  %4245 = vmatmul.bf16.gmra.mxu2 %v8069_v44 }
 0x497   :  { %4294 = vmatmul.bf16.gmra.mxu3 %v8073_v15 }
 0x498   :  { %v4675_v52 = vsel %vm4547_vm11, %v4097_v38, %v4611_v42  ;;  %v9377_v38 = vld [vmem:[#allocation36_spill] sm:$0xff] }
 0x499   :  { %v4050_v6 = vpop.f32.mrf.mxu2  ;;  %v8727_v0 = vpack.c.bf16 %v4675_v52, %v4671_v14 }
 0x49a   :  { %v4051_v40 = vadd.f32 %v4050_v6, %v4002_v59  ;;  %v4099_v47 = vpop.f32.mrf.mxu3  ;;  %v3954_v63 = vpop.f32.mrf.mxu0 }
 0x49b   :  { %v3955_v5 = vadd.f32 %v3954_v63, %v8663_v36  ;;  %v4003_v41 = vpop.f32.mrf.mxu1 }
 0x49c   :  { %v4100_v22 = vadd.f32 %v4099_v47, %v4051_v40 }
 0x49d   :  { %v4004_v9 = vadd.f32 %v4003_v41, %v3955_v5 }
 0x49e   :  { %v4615_v18 = vmul.f32 0.25, %v4100_v22  ;;  %vm4551_vm12 = vcmp.gt.f32.partialorder %v4100_v22, 0.0 }
 0x4a0   :  { %v4679_v36 = vsel %vm4551_vm12, %v4100_v22, %v4615_v18  ;;  %v9380_v18 = vld [vmem:[#allocation39_spill] sm:$0xff] }
 0x4a1   :  { %v4052_v55 = vpop.f32.mrf.mxu2 }
 0x4a2   :  { %v4053_v44 = vadd.f32 %v4052_v55, %v4004_v9  ;;  %v4101_v56 = vpop.f32.mrf.mxu3  ;;  %v3957_v15 = vpop.f32.mrf.mxu0 }
 0x4a3   :  { %v3958_v31 = vadd.f32 %v3957_v15, %v8670_v27  ;;  %v4006_v23 = vpop.f32.mrf.mxu1 }
 0x4a4   :  { %v4102_v20 = vadd.f32 %v4101_v56, %v4053_v44 }
 0x4a5   :  { %v4007_v30 = vadd.f32 %v4006_v23, %v3958_v31  ;;  %4152 = vmatmul.bf16.gmra.mxu0 %v8080_v10  ;;  %4201 = vmatmul.bf16.gmra.mxu1 %v8082_v12  ;;  %v7661_v12 = vld [vmem:[%s9114_s4] sm:$0xf] }
 0x4a6   :  { %vm4555_vm13 = vcmp.gt.f32.partialorder %v4102_v20, 0.0  ;;  %v4619_v35 = vmul.f32 0.25, %v4102_v20  ;;  %4250 = vmatmul.bf16.gmra.mxu2 %v9302_v32  ;;  %v8741_v32 = vperm.slane %v7661_v12, 3  ;;  %v9379_v23 = vld [vmem:[#allocation38_spill] sm:$0xff] }
 0x4a7   :  { %4299 = vmatmul.bf16.gmra.mxu3 %v9303_v4 }
 0x4a8   :  { %v4683_v48 = vsel %vm4555_vm13, %v4102_v20, %v4619_v35  ;;  %v9381_v20 = vld [vmem:[#allocation40_spill] sm:$0xff] }
 0x4a9   :  { %v4055_v13 = vpop.f32.mrf.mxu2  ;;  %v8735_v33 = vpack.c.bf16 %v4683_v48, %v4679_v36 }
 0x4aa   :  { %v4056_v27 = vadd.f32 %v4055_v13, %v4007_v30  ;;  %v4104_v21 = vpop.f32.mrf.mxu3  ;;  %v3959_v8 = vpop.f32.mrf.mxu0  ;;  %v9382_v30 = vld [vmem:[#allocation41_spill] sm:$0xff] }
 0x4ab   :  { %v3960_v1 = vadd.f32 %v3959_v8, %v8673_v62  ;;  %v4008_v57 = vpop.f32.mrf.mxu1 }
 0x4ac   :  { %v4105_v10 = vadd.f32 %v4104_v21, %v4056_v27 }
 0x4ad   :  { %v4009_v24 = vadd.f32 %v4008_v57, %v3960_v1 }
 0x4ae   :  { %v4623_v53 = vmul.f32 0.25, %v4105_v10  ;;  %vm4559_vm14 = vcmp.gt.f32.partialorder %v4105_v10, 0.0 }
 0x4b0   :  { %v4687_v11 = vsel %vm4559_vm14, %v4105_v10, %v4623_v53  ;;  %v9385_v53 = vld [vmem:[#allocation44_spill] sm:$0xff] }
 0x4b1   :  { %v4057_v4 = vpop.f32.mrf.mxu2 }
 0x4b2   :  { %v4058_v50 = vadd.f32 %v4057_v4, %v4009_v24  ;;  %v4106_v2 = vpop.f32.mrf.mxu3  ;;  %v4118_v51 = vpop.f32.mrf.mxu0 }
 0x4b3   :  { %v4119_v3 = vadd.f32 %v4118_v51, %v8741_v32  ;;  %v4167_v34 = vpop.f32.mrf.mxu1 }
 0x4b4   :  { %v4107_v29 = vadd.f32 %v4106_v2, %v4058_v50 }
 0x4b5   :  { %v4168_v62 = vadd.f32 %v4167_v34, %v4119_v3  ;;  %4313 = vmatmul.bf16.vlgmr.msrb.gmra.mxu0 %v8112_v28  ;;  %4362 = vmatmul.bf16.vlgmr.msrb.gmra.mxu1 %v9376_v25  ;;  %v9383_v3 = vld [vmem:[#allocation42_spill] sm:$0xff]  ;;  %v9384_v34 = vld [vmem:[#allocation43_spill] sm:$0xff] }
 0x4b6   :  { %vm4563_vm15 = vcmp.gt.f32.partialorder %v4107_v29, 0.0  ;;  %v4627_v49 = vmul.f32 0.25, %v4107_v29  ;;  %4411 = vmatmul.bf16.vlgmr.msrb.gmra.mxu2 %v9377_v38 }
 0x4b7   :  { %4460 = vmatmul.bf16.vlgmr.msrb.gmra.mxu3 %v9378_v17 }
 0x4b8   :  { %v4691_v59 = vsel %vm4563_vm15, %v4107_v29, %v4627_v49  ;;  %v9386_v29 = vld [vmem:[#allocation45_spill] sm:$0xff] }
 0x4b9   :  { %v4216_v42 = vpop.f32.mrf.mxu2  ;;  %v8748_v14 = vpack.c.bf16 %v4691_v59, %v4687_v11 }
 0x4ba   :  { %v4217_v52 = vadd.f32 %v4216_v42, %v4168_v62  ;;  %v4265_v6 = vpop.f32.mrf.mxu3  ;;  %v4120_v40 = vpop.f32.mrf.mxu0 }
 0x4bb   :  { %v4121_v47 = vadd.f32 %v4120_v40, %v8741_v32  ;;  %v4169_v63 = vpop.f32.mrf.mxu1 }
 0x4bc   :  { %v8751_v28 = vadd.f32 %v4265_v6, %v4217_v52 }
 0x4bd   :  { %v4170_v5 = vadd.f32 %v4169_v63, %v4121_v47 }
 0x4c1   :  { %v4218_v41 = vpop.f32.mrf.mxu2 }
 0x4c2   :  { %v4219_v22 = vadd.f32 %v4218_v41, %v4170_v5  ;;  %v4267_v9 = vpop.f32.mrf.mxu3  ;;  %v4123_v55 = vpop.f32.mrf.mxu0 }
 0x4c3   :  { %v4124_v44 = vadd.f32 %v4123_v55, %v8741_v32  ;;  %v4172_v56 = vpop.f32.mrf.mxu1  ;;  %v9388_v55 = vld [vmem:[#allocation47_spill] sm:$0xff] }
 0x4c4   :  { %v8754_v15 = vadd.f32 %v4267_v9, %v4219_v22  ;;  %v9387_v9 = vld [vmem:[#allocation46_spill] sm:$0xff] }
 0x4c5   :  { %v4173_v31 = vadd.f32 %v4172_v56, %v4124_v44  ;;  %4318 = vmatmul.bf16.gmra.mxu0 %v9379_v23  ;;  %4367 = vmatmul.bf16.gmra.mxu1 %v9380_v18  ;;  %v9389_v44 = vld [vmem:[#allocation48_spill] sm:$0xff]  ;;  %v9390_v56 = vld [vmem:[#allocation49_spill] sm:$0xff] }
 0x4c6   :  { %4416 = vmatmul.bf16.gmra.mxu2 %v9381_v20 }
 0x4c7   :  { %4465 = vmatmul.bf16.gmra.mxu3 %v9382_v30 }
 0x4c9   :  { %v4221_v35 = vpop.f32.mrf.mxu2 }
 0x4ca   :  { %v4222_v36 = vadd.f32 %v4221_v35, %v4173_v31  ;;  %v4270_v48 = vpop.f32.mrf.mxu3  ;;  %v4125_v13 = vpop.f32.mrf.mxu0 }
 0x4cb   :  { %v4126_v27 = vadd.f32 %v4125_v13, %v8741_v32  ;;  %v4174_v21 = vpop.f32.mrf.mxu1  ;;  %v7626_v13 = vld [vmem:[#allocation7 + $0x174] sm:$0xf0] }
 0x4cc   :  { %v8761_v8 = vadd.f32 %v4270_v48, %v4222_v36  ;;  %v7180_v48 = vld [vmem:[#allocation7 + $0x170] sm:$0xf] }
 0x4cd   :  { %v4175_v1 = vadd.f32 %v4174_v21, %v4126_v27  ;;  %v7181_v21 = vor.u32 %v7626_v13, %v7180_v48 }
 0x4cf   :  { %5213 = vmatpush.bf16.msra.mxu2 %v7181_v21  ;;  %v7640_v21 = vld [vmem:[#allocation7 + $0x1e4] sm:$0xf0] }
 0x4d1   :  { %v4223_v57 = vpop.f32.mrf.mxu2 }
 0x4d2   :  { %v4224_v10 = vadd.f32 %v4223_v57, %v4175_v1  ;;  %v4272_v24 = vpop.f32.mrf.mxu3  ;;  %v4128_v12 = vpop.f32.mrf.mxu0  ;;  %v7052_v1 = vld [vmem:[#allocation7 + $0x70] sm:$0xf]  ;;  %v7594_v57 = vld [vmem:[#allocation7 + $0x74] sm:$0xf0] }
 0x4d3   :  { %v4129_v4 = vadd.f32 %v4128_v12, %v8741_v32  ;;  %v4177_v50 = vpop.f32.mrf.mxu1  ;;  %v7642_v12 = vld [vmem:[#allocation7 + $0x1f4] sm:$0xf0] }
 0x4d4   :  { %v8764_v2 = vadd.f32 %v4272_v24, %v4224_v10  ;;  %v7244_v10 = vld [vmem:[#allocation7 + $0x1f0] sm:$0xf]  ;;  %v7053_v24 = vor.u32 %v7594_v57, %v7052_v1 }
 0x4d5   :  { %v4178_v51 = vadd.f32 %v4177_v50, %v4129_v4  ;;  %4323 = vmatmul.bf16.gmra.mxu0 %v9383_v3  ;;  %4372 = vmatmul.bf16.gmra.mxu1 %v9384_v34  ;;  %v7116_v4 = vld [vmem:[#allocation7 + $0xf0] sm:$0xf]  ;;  %v7610_v50 = vld [vmem:[#allocation7 + $0xf4] sm:$0xf0] }
 0x4d6   :  { %4421 = vmatmul.bf16.gmra.mxu2 %v9385_v53  ;;  %v7117_v3 = vor.u32 %v7610_v50, %v7116_v4  ;;  %5115 = vmatpush.bf16.msra.mxu0 %v7053_v24  ;;  %v7036_v1 = vld [vmem:[#allocation7 + $0x50] sm:$0xf] }
 0x4d7   :  { %4470 = vmatmul.bf16.gmra.mxu3 %v9386_v29  ;;  %v7100_v24 = vld [vmem:[#allocation7 + $0xd0] sm:$0xf] }
 0x4d8   :  { %5164 = vmatpush.bf16.msra.mxu1 %v7117_v3  ;;  %v7622_v3 = vld [vmem:[#allocation7 + $0x154] sm:$0xf0] }
 0x4d9   :  { %v4226_v62 = vpop.f32.mrf.mxu2 }
 0x4da   :  { %v4227_v49 = vadd.f32 %v4226_v62, %v4178_v51  ;;  %v4275_v25 = vpop.f32.mrf.mxu3  ;;  %v4130_v38 = vpop.f32.mrf.mxu0  ;;  %v7245_v51 = vor.u32 %v7642_v12, %v7244_v10  ;;  %v7590_v10 = vld [vmem:[#allocation7 + $0x54] sm:$0xf0] }
 0x4db   :  { %v4131_v17 = vadd.f32 %v4130_v38, %v8741_v32  ;;  %v4179_v11 = vpop.f32.mrf.mxu1  ;;  %v7606_v12 = vld [vmem:[#allocation7 + $0xd4] sm:$0xf0]  ;;  %v7037_v4 = vor.u32 %v7590_v10, %v7036_v1  ;;  %v7012_v10 = vld [vmem:[#allocation7 + $0x20] sm:$0xf] }
 0x4dc   :  { %v8771_v59 = vadd.f32 %v4275_v25, %v4227_v49  ;;  %5262 = vmatpush.bf16.msra.mxu3 %v7245_v51  ;;  %v7101_v50 = vor.u32 %v7606_v12, %v7100_v24  ;;  %v7164_v51 = vld [vmem:[#allocation7 + $0x150] sm:$0xf]  ;;  %v7584_v24 = vld [vmem:[#allocation7 + $0x24] sm:$0xf0]  ;;  %v7076_v12 = vld [vmem:[#allocation7 + $0xa0] sm:$0xf] }
 0x4dd   :  { %v4180_v42 = vadd.f32 %v4179_v11, %v4131_v17  ;;  %v9391_v11 = vld [vmem:[#allocation50_spill] sm:$0xff] }
 0x4e1   :  { %v4228_v52 = vpop.f32.mrf.mxu2 }
 0x4e2   :  { %v4229_v6 = vadd.f32 %v4228_v52, %v4180_v42  ;;  %v4277_v40 = vpop.f32.mrf.mxu3  ;;  %v4133_v47 = vpop.f32.mrf.mxu0  ;;  %v9392_v42 = vld [vmem:[#allocation51_spill] sm:$0xff]  ;;  %v9393_v52 = vld [vmem:[#allocation52_spill] sm:$0xff] }
 0x4e3   :  { %v4134_v63 = vadd.f32 %v4133_v47, %v8741_v32  ;;  %v4182_v5 = vpop.f32.mrf.mxu1  ;;  %v7172_v47 = vld [vmem:[#allocation7 + $0x160] sm:$0xf] }
 0x4e4   :  { %v8774_v41 = vadd.f32 %v4277_v40, %v4229_v6  ;;  %v9394_v6 = vld [vmem:[#allocation53_spill] sm:$0xff] }
 0x4e5   :  { %v4183_v22 = vadd.f32 %v4182_v5, %v4134_v63  ;;  %4328 = vmatmul.bf16.gmra.mxu0 %v9387_v9  ;;  %4377 = vmatmul.bf16.gmra.mxu1 %v9388_v55  ;;  %v7624_v63 = vld [vmem:[#allocation7 + $0x164] sm:$0xf0]  ;;  %v7044_v5 = vld [vmem:[#allocation7 + $0x60] sm:$0xf] }
 0x4e6   :  { %4426 = vmatmul.bf16.gmra.mxu2 %v9389_v44  ;;  %v7173_v44 = vor.u32 %v7624_v63, %v7172_v47 }
 0x4e7   :  { %4475 = vmatmul.bf16.gmra.mxu3 %v9390_v56  ;;  %v7592_v56 = vld [vmem:[#allocation7 + $0x64] sm:$0xf0] }
 0x4e8   :  { %5214 = vmatpush.bf16.msra.mxu2 %v7173_v44  ;;  %v7020_v44 = vld [vmem:[#allocation7 + $0x30] sm:$0xf] }
 0x4e9   :  { %v4231_v31 = vpop.f32.mrf.mxu2 }
 0x4ea   :  { %v4232_v23 = vadd.f32 %v4231_v31, %v4183_v22  ;;  %v4280_v18 = vpop.f32.mrf.mxu3  ;;  %v4135_v20 = vpop.f32.mrf.mxu0  ;;  %v7108_v31 = vld [vmem:[#allocation7 + $0xe0] sm:$0xf] }
 0x4eb   :  { %v4136_v30 = vadd.f32 %v4135_v20, %v8741_v32  ;;  %v4184_v35 = vpop.f32.mrf.mxu1 }
 0x4ec   :  { %v8781_v36 = vadd.f32 %v4280_v18, %v4232_v23  ;;  %v7608_v23 = vld [vmem:[#allocation7 + $0xe4] sm:$0xf0] }
 0x4ed   :  { %v4185_v27 = vadd.f32 %v4184_v35, %v4136_v30  ;;  %v7045_v30 = vor.u32 %v7592_v56, %v7044_v5  ;;  %v7109_v35 = vor.u32 %v7608_v23, %v7108_v31  ;;  %v7586_v56 = vld [vmem:[#allocation7 + $0x34] sm:$0xf0]  ;;  %v7084_v31 = vld [vmem:[#allocation7 + $0xb0] sm:$0xf]  ;;  %v9396_v23 = vld [vmem:[#allocation55_spill] sm:$0xff] }
 0x4ef   :  { %5116 = vmatpush.bf16.msra.mxu0 %v7045_v30  ;;  %5165 = vmatpush.bf16.msra.mxu1 %v7109_v35  ;;  %v7148_v30 = vld [vmem:[#allocation7 + $0x130] sm:$0xf]  ;;  %v7618_v35 = vld [vmem:[#allocation7 + $0x134] sm:$0xf0] }
 0x4f0   :  { %v7149_v1 = vor.u32 %v7618_v35, %v7148_v30  ;;  %v6996_v30 = vld [vmem:[#allocation7] sm:$0xf]  ;;  %v7580_v35 = vld [vmem:[#allocation7 + $0x4] sm:$0xf0] }
 0x4f1   :  { %v4233_v34 = vpop.f32.mrf.mxu2 }
 0x4f2   :  { %v4234_v53 = vadd.f32 %v4233_v34, %v4185_v27  ;;  %v4282_v29 = vpop.f32.mrf.mxu3  ;;  %v4138_v62 = vpop.f32.mrf.mxu0  ;;  %v7236_v27 = vld [vmem:[#allocation7 + $0x1e0] sm:$0xf]  ;;  %v7165_v34 = vor.u32 %v7622_v3, %v7164_v51  ;;  %v7600_v3 = vld [vmem:[#allocation7 + $0xa4] sm:$0xf0] }
 0x4f3   :  { %v4139_v49 = vadd.f32 %v4138_v62, %v8741_v32  ;;  %v4187_v25 = vpop.f32.mrf.mxu1  ;;  %v7237_v57 = vor.u32 %v7640_v21, %v7236_v27  ;;  %5117 = vmatpush.bf16.msra.mxu0 %v7037_v4  ;;  %5166 = vmatpush.bf16.msra.mxu1 %v7101_v50  ;;  %v7588_v62 = vld [vmem:[#allocation7 + $0x44] sm:$0xf0]  ;;  %v7021_v27 = vor.u32 %v7586_v56, %v7020_v44 }
 0x4f4   :  { %v8784_v38 = vadd.f32 %v4282_v29, %v4234_v53  ;;  %v7028_v29 = vld [vmem:[#allocation7 + $0x40] sm:$0xf]  ;;  %5215 = vmatpush.bf16.msra.mxu2 %v7165_v34 }
 0x4f5   :  { %v4188_v17 = vadd.f32 %v4187_v25, %v4139_v49  ;;  %4333 = vmatmul.bf16.gmra.mxu0 %v9391_v11  ;;  %4382 = vmatmul.bf16.gmra.mxu1 %v9392_v42  ;;  %v7092_v49 = vld [vmem:[#allocation7 + $0xc0] sm:$0xf]  ;;  %v7604_v42 = vld [vmem:[#allocation7 + $0xc4] sm:$0xf0]  ;;  %v7029_v63 = vor.u32 %v7588_v62, %v7028_v29 }
 0x4f6   :  { %4431 = vmatmul.bf16.gmra.mxu2 %v9393_v52  ;;  %5263 = vmatpush.bf16.msra.mxu3 %v7237_v57  ;;  %v7156_v52 = vld [vmem:[#allocation7 + $0x140] sm:$0xf]  ;;  %v7093_v5 = vor.u32 %v7604_v42, %v7092_v49  ;;  %v7013_v49 = vor.u32 %v7584_v24, %v7012_v10  ;;  %v7612_v24 = vld [vmem:[#allocation7 + $0x104] sm:$0xf0] }
 0x4f7   :  { %4480 = vmatmul.bf16.gmra.mxu3 %v9394_v6  ;;  %v7620_v6 = vld [vmem:[#allocation7 + $0x144] sm:$0xf0]  ;;  %5118 = vmatpush.bf16.msra.mxu0 %v7029_v63  ;;  %v7140_v34 = vld [vmem:[#allocation7 + $0x120] sm:$0xf]  ;;  %v7004_v63 = vld [vmem:[#allocation7 + $0x10] sm:$0xf] }
 0x4f8   :  { %5167 = vmatpush.bf16.msra.mxu1 %v7093_v5  ;;  %v7124_v10 = vld [vmem:[#allocation7 + $0x100] sm:$0xf] }
 0x4f9   :  { %v4236_v40 = vpop.f32.mrf.mxu2 }
 0x4fa   :  { %v4237_v22 = vadd.f32 %v4236_v40, %v4188_v17  ;;  %v4285_v9 = vpop.f32.mrf.mxu3  ;;  %v4140_v55 = vpop.f32.mrf.mxu0 }
 0x4fb   :  { %v4141_v18 = vadd.f32 %v4140_v55, %v8741_v32  ;;  %v4189_v20 = vpop.f32.mrf.mxu1  ;;  %v9395_v55 = vld [vmem:[#allocation54_spill] sm:$0xff]  ;;  %5119 = vmatpush.bf16.msra.mxu0 %v7021_v27 }
 0x4fc   :  { %v8791_v48 = vadd.f32 %v4285_v9, %v4237_v22  ;;  %v7157_v22 = vor.u32 %v7620_v6, %v7156_v52 }
 0x4fd   :  { %v4190_v13 = vadd.f32 %v4189_v20, %v4141_v18  ;;  %v9397_v18 = vld [vmem:[#allocation56_spill] sm:$0xff]  ;;  %v7602_v20 = vld [vmem:[#allocation7 + $0xb4] sm:$0xf0] }
 0x4fe   :  { %v7085_v21 = vor.u32 %v7602_v20, %v7084_v31  ;;  %5216 = vmatpush.bf16.msra.mxu2 %v7157_v22  ;;  %v7582_v22 = vld [vmem:[#allocation7 + $0x14] sm:$0xf0]  ;;  %v7132_v31 = vld [vmem:[#allocation7 + $0x110] sm:$0xf] }
 0x4ff   :  { %5120 = vmatpush.bf16.msra.mxu0 %v7013_v49  ;;  %v7005_v44 = vor.u32 %v7582_v22, %v7004_v63  ;;  %v7204_v22 = vld [vmem:[#allocation7 + $0x1a0] sm:$0xf] }
 0x500   :  { %5168 = vmatpush.bf16.msra.mxu1 %v7085_v21 }
 0x501   :  { %v4238_v53 = vpop.f32.mrf.mxu2 }
 0x502   :  { %v8793_v25 = vadd.f32 %v4238_v53, %v4190_v13  ;;  %v8795_v17 = vpop.f32.mrf.mxu3  ;;  %v4143_v11 = vpop.f32.mrf.mxu0  ;;  %v9398_v13 = vld [vmem:[#allocation57_spill] sm:$0xff]  ;;  %v7616_v53 = vld [vmem:[#allocation7 + $0x124] sm:$0xf0]  ;;  %5217 = vmatpush.bf16.msra.mxu2 %v7149_v1 }
 0x503   :  { %v4144_v40 = vadd.f32 %v4143_v11, %v8741_v32  ;;  %v4192_v47 = vpop.f32.mrf.mxu1  ;;  %v7077_v11 = vor.u32 %v7600_v3, %v7076_v12  ;;  %v7141_v52 = vor.u32 %v7616_v53, %v7140_v34  ;;  %5121 = vmatpush.bf16.msra.mxu0 %v7005_v44  ;;  %v7125_v3 = vor.u32 %v7612_v24, %v7124_v10  ;;  %v7220_v53 = vld [vmem:[#allocation7 + $0x1c0] sm:$0xf] }
 0x505   :  { %v4193_v9 = vadd.f32 %v4192_v47, %v4144_v40  ;;  %4338 = vmatmul.bf16.gmra.mxu0 %v9395_v55  ;;  %4387 = vmatmul.bf16.gmra.mxu1 %v9396_v23  ;;  %v7228_v40 = vld [vmem:[#allocation7 + $0x1d0] sm:$0xf]  ;;  %v7638_v47 = vld [vmem:[#allocation7 + $0x1d4] sm:$0xf0] }
 0x506   :  { %4436 = vmatmul.bf16.gmra.mxu2 %v9397_v18  ;;  %5169 = vmatpush.bf16.msra.mxu1 %v7077_v11  ;;  %v7229_v5 = vor.u32 %v7638_v47, %v7228_v40  ;;  %v7598_v55 = vld [vmem:[#allocation7 + $0x94] sm:$0xf0]  ;;  %v7212_v40 = vld [vmem:[#allocation7 + $0x1b0] sm:$0xf] }
 0x507   :  { %4485 = vmatmul.bf16.gmra.mxu3 %v9398_v13  ;;  %v7614_v23 = vld [vmem:[#allocation7 + $0x114] sm:$0xf0]  ;;  %5218 = vmatpush.bf16.msra.mxu2 %v7141_v52  ;;  %v7060_v13 = vld [vmem:[#allocation7 + $0x80] sm:$0xf] }
 0x508   :  { %5264 = vmatpush.bf16.msra.mxu3 %v7229_v5  ;;  %v7133_v18 = vor.u32 %v7614_v23, %v7132_v31  ;;  %v7634_v47 = vld [vmem:[#allocation7 + $0x1b4] sm:$0xf0]  ;;  %v7196_v23 = vld [vmem:[#allocation7 + $0x190] sm:$0xf] }
 0x509   :  { %v4241_v57 = vpop.f32.mrf.mxu2 }
 0x50a   :  { %v4242_v4 = vadd.f32 %v4241_v57, %v4193_v9  ;;  %v4290_v50 = vpop.f32.mrf.mxu3  ;;  %v4145_v51 = vpop.f32.mrf.mxu0  ;;  %v7068_v9 = vld [vmem:[#allocation7 + $0x90] sm:$0xf]  ;;  %v7596_v57 = vld [vmem:[#allocation7 + $0x84] sm:$0xf0] }
 0x50b   :  { %v4146_v29 = vadd.f32 %v4145_v51, %v8741_v32  ;;  %v4194_v62 = vpop.f32.mrf.mxu1  ;;  %v7069_v56 = vor.u32 %v7598_v55, %v7068_v9  ;;  %v7061_v51 = vor.u32 %v7596_v57, %v7060_v13  ;;  %5219 = vmatpush.bf16.msra.mxu2 %v7133_v18  ;;  %v7630_v18 = vld [vmem:[#allocation7 + $0x194] sm:$0xf0]  ;;  %v7628_v57 = vld [vmem:[#allocation7 + $0x184] sm:$0xf0] }
 0x50c   :  { %v8803_v42 = vadd.f32 %v4290_v50, %v4242_v4  ;;  %v6997_v50 = vor.u32 %v7580_v35, %v6996_v30  ;;  %v7197_v35 = vor.u32 %v7630_v18, %v7196_v23  ;;  %v9401_v18 = vld [vmem:[#allocation58_spill] sm:$0xff] }
 0x50d   :  { %v4195_v6 = vadd.f32 %v4194_v62, %v4146_v29  ;;  %5170 = vmatpush.bf16.msra.mxu1 %v7069_v56  ;;  %v7636_v29 = vld [vmem:[#allocation7 + $0x1c4] sm:$0xf0] }
 0x50e   :  { %5122 = vmatpush.bf16.msra.mxu0 %v6997_v50  ;;  %v7221_v62 = vor.u32 %v7636_v29, %v7220_v53 }
 0x50f   :  { %5220 = vmatpush.bf16.msra.mxu2 %v7125_v3 }
 0x510   :  { %5265 = vmatpush.bf16.msra.mxu3 %v7221_v62 }
 0x511   :  { %v4243_v20 = vpop.f32.mrf.mxu2  ;;  %5171 = vmatpush.bf16.msra.mxu1 %v7061_v51 }
 0x512   :  { %v8805_v27 = vadd.f32 %v4243_v20, %v4195_v6  ;;  %v8807_v21 = vpop.f32.mrf.mxu3  ;;  %v4148_v1 = vpop.f32.mrf.mxu0 }
 0x513   :  { %v4149_v12 = vadd.f32 %v4148_v1, %v8741_v32  ;;  %v4197_v4 = vpop.f32.mrf.mxu1  ;;  %v7188_v1 = vld [vmem:[#allocation7 + $0x180] sm:$0xf] }
 0x514   :  { %v7189_v10 = vor.u32 %v7628_v57, %v7188_v1 }
 0x515   :  { %v4198_v34 = vadd.f32 %v4197_v4, %v4149_v12  ;;  %4343 = vmatmul.bf16.gmra.mxu0 %v8257_v58  ;;  %4392 = vmatmul.bf16.gmra.mxu1 %v8259_v43  ;;  %v7213_v43 = vor.u32 %v7634_v47, %v7212_v40 }
 0x516   :  { %4441 = vmatmul.bf16.gmra.mxu2 %v8266_v7 }
 0x517   :  { %4490 = vmatmul.bf16.gmra.mxu3 %v8270_v26  ;;  %v7632_v26 = vld [vmem:[#allocation7 + $0x1a4] sm:$0xf0] }
 0x518   :  { %5266 = vmatpush.bf16.msra.mxu3 %v7213_v43  ;;  %v7205_v9 = vor.u32 %v7632_v26, %v7204_v22 }
 0x519   :  { %v4246_v49 = vpop.f32.mrf.mxu2 }
 0x51a   :  { %v4247_v11 = vadd.f32 %v4246_v49, %v4198_v34  ;;  %v4295_v52 = vpop.f32.mrf.mxu3  ;;  %v4150_v6 = vpop.f32.mrf.mxu0 }
 0x51b   :  { %v4151_v58 = vadd.f32 %v4150_v6, %v8741_v32  ;;  %v4199_v63 = vpop.f32.mrf.mxu1 }
 0x51c   :  { %v8815_v5 = vadd.f32 %v4295_v52, %v4247_v11  ;;  %5267 = vmatpush.bf16.msra.mxu3 %v7205_v9  ;;  %v9400_v11 = vld [vmem:[#allocation11_spill] sm:$0xff] }
 0x51d   :  { %v4200_v7 = vadd.f32 %v4199_v63, %v4151_v58 }
 0x520   :  { %5268 = vmatpush.bf16.msra.mxu3 %v7197_v35  ;;  %v9402_v35 = vld [vmem:[#allocation59_spill] sm:$0xff] }
 0x521   :  { %v4248_v55 = vpop.f32.mrf.mxu2 }
 0x522   :  { %v8817_v44 = vadd.f32 %v4248_v55, %v4200_v7  ;;  %v8819_v56 = vpop.f32.mrf.mxu3  ;;  %v4153_v31 = vpop.f32.mrf.mxu0 }
 0x523   :  { %v4154_v20 = vadd.f32 %v4153_v31, %v8741_v32  ;;  %v4202_v30 = vpop.f32.mrf.mxu1 }
 0x524   :  { %5269 = vmatpush.bf16.msra.mxu3 %v7189_v10 }
 0x525   :  { %v4203_v13 = vadd.f32 %v4202_v30, %v4154_v20  ;;  %4348 = vmatmul.bf16.gmra.mxu0 %v8282_v54  ;;  %4397 = vmatmul.bf16.gmra.mxu1 %v8284_v45 }
 0x526   :  { %4446 = vmatmul.bf16.gmra.mxu2 %v8292_v37 }
 0x527   :  { %4495 = vmatmul.bf16.gmra.mxu3 %v8295_v60  ;;  %v9399_v60 = vld [vmem:[#allocation10_spill] sm:$0xff] }
 0x529   :  { %v4251_v24 = vpop.f32.mrf.mxu2 }
 0x52a   :  { %v4252_v12 = vadd.f32 %v4251_v24, %v4203_v13  ;;  %v4300_v4 = vpop.f32.mrf.mxu3  ;;  %v4155_v50 = vpop.f32.mrf.mxu0 }
 0x52b   :  { %v4156_v51 = vadd.f32 %v4155_v50, %v8741_v32  ;;  %v4204_v3 = vpop.f32.mrf.mxu1 }
 0x52c   :  { %v8827_v34 = vadd.f32 %v4300_v4, %v4252_v12 }
 0x52d   :  { %v4205_v54 = vadd.f32 %v4204_v3, %v4156_v51 }
 0x531   :  { %v4253_v53 = vpop.f32.mrf.mxu2 }
 0x532   :  { %v8829_v45 = vadd.f32 %v4253_v53, %v4205_v54  ;;  %v8831_v37 = vpop.f32.mrf.mxu3  ;;  %v4314_v29 = vpop.f32.mrf.mxu0 }
 0x533   :  { %v4363_v62 = vpop.f32.mrf.mxu1  ;;  %v4315_v49 = vadd.f32 %v4314_v29, %v8751_v28 }
 0x535   :  { %5123 = vmatmul.bf16.vlgmr.msra.gmra.mxu0 %v9399_v60  ;;  %5172 = vmatmul.bf16.vlgmr.msra.gmra.mxu1 %v9400_v11  ;;  %v4364_v52 = vadd.f32 %v4363_v62, %v4315_v49 }
 0x536   :  { %5221 = vmatmul.bf16.vlgmr.msra.gmra.mxu2 %v8685_v61 }
 0x539   :  { %v4412_v32 = vpop.f32.mrf.mxu2 }
 0x53a   :  { %v4461_v6 = vpop.f32.mrf.mxu3  ;;  %v4316_v40 = vpop.f32.mrf.mxu0  ;;  %v4413_v58 = vadd.f32 %v4412_v32, %v4364_v52 }
 0x53b   :  { %v4365_v47 = vpop.f32.mrf.mxu1  ;;  %v4317_v63 = vadd.f32 %v4316_v40, %v8754_v15 }
 0x53c   :  { %v4462_v43 = vadd.f32 %v4461_v6, %v4413_v58  ;;  %v9403_v6 = vld [vmem:[#allocation21_spill] sm:$0xff]  ;;  %v9404_v58 = vld [vmem:[#allocation23_spill] sm:$0xff] }
 0x53d   :  { %v4366_v7 = vadd.f32 %v4365_v47, %v4317_v63 }
 0x53e   :  { %v4568_v28 = vmul.f32 0.25, %v4462_v43  ;;  %vm4504_vm0 = vcmp.gt.f32.partialorder %v4462_v43, 0.0 }
 0x540   :  { %v4632_v15 = vsel %vm4504_vm0, %v4462_v43, %v4568_v28 }
 0x541   :  { %v4414_v22 = vpop.f32.mrf.mxu2 }
 0x542   :  { %v4415_v26 = vadd.f32 %v4414_v22, %v4366_v7  ;;  %v4463_v9 = vpop.f32.mrf.mxu3  ;;  %v4319_v55 = vpop.f32.mrf.mxu0 }
 0x543   :  { %v4368_v31 = vpop.f32.mrf.mxu1  ;;  %v4320_v30 = vadd.f32 %v4319_v55, %v8761_v8 }
 0x544   :  { %v4464_v23 = vadd.f32 %v4463_v9, %v4415_v26 }
 0x545   :  { %5128 = vmatmul.bf16.gmra.mxu0 %v9401_v18  ;;  %5177 = vmatmul.bf16.gmra.mxu1 %v9402_v35  ;;  %v4369_v10 = vadd.f32 %v4368_v31, %v4320_v30 }
 0x546   :  { %vm4508_vm1 = vcmp.gt.f32.partialorder %v4464_v23, 0.0  ;;  %v4572_v20 = vmul.f32 0.25, %v4464_v23  ;;  %5226 = vmatmul.bf16.gmra.mxu2 %v8693_v39 }
 0x548   :  { %v4636_v13 = vsel %vm4508_vm1, %v4464_v23, %v4572_v20 }
 0x549   :  { %v8842_v1 = vpack.c.bf16 %v4636_v13, %v4632_v15  ;;  %v4417_v57 = vpop.f32.mrf.mxu2 }
 0x54a   :  { %v4466_v24 = vpop.f32.mrf.mxu3  ;;  %v4321_v12 = vpop.f32.mrf.mxu0  ;;  %v4418_v50 = vadd.f32 %v4417_v57, %v4369_v10 }
 0x54b   :  { %v4370_v4 = vpop.f32.mrf.mxu1  ;;  %5270 = vmatmul.bf16.vlgmr.msra.gmra.mxu3 %v8842_v1  ;;  %v4322_v51 = vadd.f32 %v4321_v12, %v8764_v2  ;;  %v9405_v12 = vld [vmem:[#allocation22_spill] sm:$0xff] }
 0x54c   :  { %v4467_v3 = vadd.f32 %v4466_v24, %v4418_v50 }
 0x54d   :  { %v4371_v8 = vadd.f32 %v4370_v4, %v4322_v51  ;;  %v9406_v51 = vld [vmem:[#allocation24_spill] sm:$0xff] }
 0x54e   :  { %v4576_v32 = vmul.f32 0.25, %v4467_v3  ;;  %vm4512_vm2 = vcmp.gt.f32.partialorder %v4467_v3, 0.0 }
 0x550   :  { %v4640_v2 = vsel %vm4512_vm2, %v4467_v3, %v4576_v32 }
 0x551   :  { %v4419_v54 = vpop.f32.mrf.mxu2 }
 0x552   :  { %v4420_v53 = vadd.f32 %v4419_v54, %v4371_v8  ;;  %v4468_v29 = vpop.f32.mrf.mxu3  ;;  %v4324_v62 = vpop.f32.mrf.mxu0 }
 0x553   :  { %v4373_v49 = vpop.f32.mrf.mxu1  ;;  %v4325_v47 = vadd.f32 %v4324_v62, %v8771_v59 }
 0x554   :  { %v4469_v52 = vadd.f32 %v4468_v29, %v4420_v53 }
 0x555   :  { %5133 = vmatmul.bf16.gmra.mxu0 %v9403_v6  ;;  %5182 = vmatmul.bf16.gmra.mxu1 %v9404_v58  ;;  %v4374_v22 = vadd.f32 %v4373_v49, %v4325_v47 }
 0x556   :  { %vm4516_vm3 = vcmp.gt.f32.partialorder %v4469_v52, 0.0  ;;  %v4580_v40 = vmul.f32 0.25, %v4469_v52  ;;  %5231 = vmatmul.bf16.gmra.mxu2 %v8701_v16 }
 0x558   :  { %v4644_v63 = vsel %vm4516_vm3, %v4469_v52, %v4580_v40  ;;  %v7625_v40 = vld [vmem:[#allocation7 + $0x174] sm:$0xf] }
 0x559   :  { %v4422_v43 = vpop.f32.mrf.mxu2  ;;  %v8850_v7 = vpack.c.bf16 %v4644_v63, %v4640_v2  ;;  %v7593_v2 = vld [vmem:[#allocation7 + $0x74] sm:$0xf]  ;;  %v7054_v63 = vld [vmem:[#allocation7 + $0x78] sm:$0xf0] }
 0x55a   :  { %v4471_v26 = vpop.f32.mrf.mxu3  ;;  %v4326_v9 = vpop.f32.mrf.mxu0  ;;  %v4423_v31 = vadd.f32 %v4422_v43, %v4374_v22  ;;  %v7641_v43 = vld [vmem:[#allocation7 + $0x1f4] sm:$0xf] }
 0x55b   :  { %v4375_v55 = vpop.f32.mrf.mxu1  ;;  %5275 = vmatmul.bf16.gmra.mxu3 %v8850_v7  ;;  %v4327_v28 = vadd.f32 %v4326_v9, %v8774_v41  ;;  %v7057_v9 = vor.u32 %v7593_v2, %v7054_v63  ;;  %v7607_v63 = vld [vmem:[#allocation7 + $0xe4] sm:$0xf] }
 0x55c   :  { %v4472_v23 = vadd.f32 %v4471_v26, %v4423_v31  ;;  %v7609_v31 = vld [vmem:[#allocation7 + $0xf4] sm:$0xf] }
 0x55d   :  { %v4376_v59 = vadd.f32 %v4375_v55, %v4327_v28  ;;  %v7246_v55 = vld [vmem:[#allocation7 + $0x1f8] sm:$0xf0]  ;;  %5311 = vmatpush.bf16.msrb.mxu0 %v7057_v9 }
 0x55e   :  { %v4584_v10 = vmul.f32 0.25, %v4472_v23  ;;  %vm4520_vm4 = vcmp.gt.f32.partialorder %v4472_v23, 0.0  ;;  %v7118_v28 = vld [vmem:[#allocation7 + $0xf8] sm:$0xf0] }
 0x560   :  { %v4648_v41 = vsel %vm4520_vm4, %v4472_v23, %v4584_v10 }
 0x561   :  { %v4424_v20 = vpop.f32.mrf.mxu2 }
 0x562   :  { %v4425_v30 = vadd.f32 %v4424_v20, %v4376_v59  ;;  %v4473_v15 = vpop.f32.mrf.mxu3  ;;  %v4329_v13 = vpop.f32.mrf.mxu0  ;;  %v7249_v59 = vor.u32 %v7641_v43, %v7246_v55  ;;  %v7121_v20 = vor.u32 %v7609_v31, %v7118_v28  ;;  %v7110_v43 = vld [vmem:[#allocation7 + $0xe8] sm:$0xf0]  ;;  %v7589_v28 = vld [vmem:[#allocation7 + $0x54] sm:$0xf] }
 0x563   :  { %v4378_v57 = vpop.f32.mrf.mxu1  ;;  %v4330_v50 = vadd.f32 %v4329_v13, %v8781_v36  ;;  %v7182_v36 = vld [vmem:[#allocation7 + $0x178] sm:$0xf0]  ;;  %v7113_v9 = vor.u32 %v7607_v63, %v7110_v43 }
 0x564   :  { %v4474_v24 = vadd.f32 %v4473_v15, %v4425_v30  ;;  %v7185_v47 = vor.u32 %v7625_v40, %v7182_v36  ;;  %5458 = vmatpush.bf16.msrb.mxu3 %v7249_v59  ;;  %5360 = vmatpush.bf16.msrb.mxu1 %v7121_v20  ;;  %v7238_v59 = vld [vmem:[#allocation7 + $0x1e8] sm:$0xf0] }
 0x565   :  { %5138 = vmatmul.bf16.gmra.mxu0 %v9405_v12  ;;  %5187 = vmatmul.bf16.gmra.mxu1 %v9406_v51  ;;  %v4379_v53 = vadd.f32 %v4378_v57, %v4330_v50 }
 0x566   :  { %vm4524_vm5 = vcmp.gt.f32.partialorder %v4474_v24, 0.0  ;;  %v4588_v4 = vmul.f32 0.25, %v4474_v24  ;;  %5236 = vmatmul.bf16.gmra.mxu2 %v8709_v19 }
 0x567   :  { %5409 = vmatpush.bf16.msrb.mxu2 %v7185_v47 }
 0x568   :  { %v4652_v3 = vsel %vm4524_vm5, %v4474_v24, %v4588_v4  ;;  %v9407_v24 = vld [vmem:[#allocation25_spill] sm:$0xff]  ;;  %5361 = vmatpush.bf16.msrb.mxu1 %v7113_v9 }
 0x569   :  { %v4427_v8 = vpop.f32.mrf.mxu2  ;;  %v8858_v54 = vpack.c.bf16 %v4652_v3, %v4648_v41  ;;  %v9408_v41 = vld [vmem:[#allocation27_spill] sm:$0xff] }
 0x56a   :  { %v4476_v29 = vpop.f32.mrf.mxu3  ;;  %v4331_v62 = vpop.f32.mrf.mxu0  ;;  %v4428_v32 = vadd.f32 %v4427_v8, %v4379_v53 }
 0x56b   :  { %v4380_v49 = vpop.f32.mrf.mxu1  ;;  %5280 = vmatmul.bf16.gmra.mxu3 %v8858_v54  ;;  %v4332_v52 = vadd.f32 %v4331_v62, %v8784_v38  ;;  %v7623_v62 = vld [vmem:[#allocation7 + $0x164] sm:$0xf] }
 0x56c   :  { %v4477_v22 = vadd.f32 %v4476_v29, %v4428_v32  ;;  %v7591_v32 = vld [vmem:[#allocation7 + $0x64] sm:$0xf] }
 0x56d   :  { %v4381_v26 = vadd.f32 %v4380_v49, %v4332_v52  ;;  %v7174_v49 = vld [vmem:[#allocation7 + $0x168] sm:$0xf0]  ;;  %v4288_v52 = vadd.f32 %v8795_v17, %v8793_v25  ;;  %v7605_v25 = vld [vmem:[#allocation7 + $0xd4] sm:$0xf]  ;;  %v7639_v17 = vld [vmem:[#allocation7 + $0x1e4] sm:$0xf] }
 0x56e   :  { %v4592_v57 = vmul.f32 0.25, %v4477_v22  ;;  %vm4528_vm6 = vcmp.gt.f32.partialorder %v4477_v22, 0.0  ;;  %v7177_v2 = vor.u32 %v7623_v62, %v7174_v49  ;;  %v7603_v62 = vld [vmem:[#allocation7 + $0xc4] sm:$0xf] }
 0x570   :  { %v4656_v3 = vsel %vm4528_vm6, %v4477_v22, %v4592_v57  ;;  %5410 = vmatpush.bf16.msrb.mxu2 %v7177_v2  ;;  %v7158_v2 = vld [vmem:[#allocation7 + $0x148] sm:$0xf0] }
 0x571   :  { %v4429_v23 = vpop.f32.mrf.mxu2 }
 0x572   :  { %v4430_v30 = vadd.f32 %v4429_v23, %v4381_v26  ;;  %v4478_v15 = vpop.f32.mrf.mxu3  ;;  %v4334_v13 = vpop.f32.mrf.mxu0  ;;  %v7038_v23 = vld [vmem:[#allocation7 + $0x58] sm:$0xf0] }
 0x573   :  { %v4383_v38 = vpop.f32.mrf.mxu1  ;;  %v4335_v50 = vadd.f32 %v4334_v13, %v8791_v48  ;;  %v7046_v48 = vld [vmem:[#allocation7 + $0x68] sm:$0xf0]  ;;  %v7041_v20 = vor.u32 %v7589_v28, %v7038_v23  ;;  %v7621_v13 = vld [vmem:[#allocation7 + $0x154] sm:$0xf]  ;;  %v7022_v28 = vld [vmem:[#allocation7 + $0x38] sm:$0xf0] }
 0x574   :  { %v4479_v10 = vadd.f32 %v4478_v15, %v4430_v30  ;;  %v7049_v22 = vor.u32 %v7591_v32, %v7046_v48  ;;  %v7241_v30 = vor.u32 %v7639_v17, %v7238_v59  ;;  %v7102_v15 = vld [vmem:[#allocation7 + $0xd8] sm:$0xf0]  ;;  %v7601_v23 = vld [vmem:[#allocation7 + $0xb4] sm:$0xf] }
 0x575   :  { %5143 = vmatmul.bf16.gmra.mxu0 %v9407_v24  ;;  %5192 = vmatmul.bf16.gmra.mxu1 %v9408_v41  ;;  %v4384_v40 = vadd.f32 %v4383_v38, %v4335_v50  ;;  %v7166_v38 = vld [vmem:[#allocation7 + $0x158] sm:$0xf0]  ;;  %v9410_v17 = vld [vmem:[#allocation28_spill] sm:$0xff] }
 0x576   :  { %vm4532_vm7 = vcmp.gt.f32.partialorder %v4479_v10, 0.0  ;;  %v4596_v4 = vmul.f32 0.25, %v4479_v10  ;;  %5241 = vmatmul.bf16.gmra.mxu2 %v8719_v46  ;;  %5312 = vmatpush.bf16.msrb.mxu0 %v7049_v22  ;;  %v7169_v50 = vor.u32 %v7621_v13, %v7166_v38  ;;  %v7086_v59 = vld [vmem:[#allocation7 + $0xb8] sm:$0xf0] }
 0x577   :  { %5459 = vmatpush.bf16.msrb.mxu3 %v7241_v30  ;;  %v7089_v38 = vor.u32 %v7601_v23, %v7086_v59  ;;  %v7070_v59 = vld [vmem:[#allocation7 + $0x98] sm:$0xf0] }
 0x578   :  { %v4660_v8 = vsel %vm4532_vm7, %v4479_v10, %v4596_v4  ;;  %v7105_v4 = vor.u32 %v7605_v25, %v7102_v15  ;;  %5411 = vmatpush.bf16.msrb.mxu2 %v7169_v50  ;;  %v7150_v15 = vld [vmem:[#allocation7 + $0x138] sm:$0xf0] }
 0x579   :  { %v4432_v53 = vpop.f32.mrf.mxu2  ;;  %v8866_v29 = vpack.c.bf16 %v4660_v8, %v4656_v3  ;;  %v7587_v8 = vld [vmem:[#allocation7 + $0x44] sm:$0xf] }
 0x57a   :  { %v4481_v36 = vpop.f32.mrf.mxu3  ;;  %v4336_v47 = vpop.f32.mrf.mxu0  ;;  %v4433_v55 = vadd.f32 %v4432_v53, %v4384_v40  ;;  %5313 = vmatpush.bf16.msrb.mxu0 %v7041_v20  ;;  %v7030_v53 = vld [vmem:[#allocation7 + $0x48] sm:$0xf0]  ;;  %5362 = vmatpush.bf16.msrb.mxu1 %v7105_v4  ;;  %v7617_v20 = vld [vmem:[#allocation7 + $0x134] sm:$0xf] }
 0x57b   :  { %v4385_v26 = vpop.f32.mrf.mxu1  ;;  %5285 = vmatmul.bf16.gmra.mxu3 %v8866_v29  ;;  %v4337_v31 = vadd.f32 %v4336_v47, %v4288_v52  ;;  %v7094_v40 = vld [vmem:[#allocation7 + $0xc8] sm:$0xf0]  ;;  %v7619_v47 = vld [vmem:[#allocation7 + $0x144] sm:$0xf]  ;;  %v7033_v63 = vor.u32 %v7587_v8, %v7030_v53 }
 0x57c   :  { %v4482_v57 = vadd.f32 %v4481_v36, %v4433_v55  ;;  %v7097_v36 = vor.u32 %v7603_v62, %v7094_v40  ;;  %v7161_v22 = vor.u32 %v7619_v47, %v7158_v2  ;;  %v9409_v55 = vld [vmem:[#allocation26_spill] sm:$0xff]  ;;  %v7014_v53 = vld [vmem:[#allocation7 + $0x28] sm:$0xf0] }
 0x57d   :  { %v4386_v10 = vadd.f32 %v4385_v26, %v4337_v31  ;;  %v7585_v31 = vld [vmem:[#allocation7 + $0x34] sm:$0xf]  ;;  %v7583_v8 = vld [vmem:[#allocation7 + $0x24] sm:$0xf]  ;;  %v7078_v40 = vld [vmem:[#allocation7 + $0xa8] sm:$0xf0] }
 0x57e   :  { %vm4536_vm8 = vcmp.gt.f32.partialorder %v4482_v57, 0.0  ;;  %v4600_v43 = vmul.f32 0.25, %v4482_v57  ;;  %5314 = vmatpush.bf16.msrb.mxu0 %v7033_v63  ;;  %5363 = vmatpush.bf16.msrb.mxu1 %v7097_v36  ;;  %v7025_v30 = vor.u32 %v7585_v31, %v7022_v28  ;;  %v7599_v62 = vld [vmem:[#allocation7 + $0xa4] sm:$0xf]  ;;  %v7142_v2 = vld [vmem:[#allocation7 + $0x128] sm:$0xf0] }
 0x57f   :  { %5412 = vmatpush.bf16.msrb.mxu2 %v7161_v22  ;;  %v7615_v47 = vld [vmem:[#allocation7 + $0x124] sm:$0xf]  ;;  %v7581_v22 = vld [vmem:[#allocation7 + $0x14] sm:$0xf] }
 0x580   :  { %v4664_v13 = vsel %vm4536_vm8, %v4482_v57, %v4600_v43  ;;  %v7081_v43 = vor.u32 %v7599_v62, %v7078_v40  ;;  %v7597_v31 = vld [vmem:[#allocation7 + $0x94] sm:$0xf] }
 0x581   :  { %v4434_v3 = vpop.f32.mrf.mxu2 }
 0x582   :  { %v4435_v49 = vadd.f32 %v4434_v3, %v4386_v10  ;;  %v4483_v32 = vpop.f32.mrf.mxu3  ;;  %v4339_v52 = vpop.f32.mrf.mxu0  ;;  %v7153_v10 = vor.u32 %v7617_v20, %v7150_v15  ;;  %5315 = vmatpush.bf16.msrb.mxu0 %v7025_v30  ;;  %5364 = vmatpush.bf16.msrb.mxu1 %v7089_v38  ;;  %v7613_v20 = vld [vmem:[#allocation7 + $0x114] sm:$0xf]  ;;  %v7134_v15 = vld [vmem:[#allocation7 + $0x118] sm:$0xf0]  ;;  %v7073_v30 = vor.u32 %v7597_v31, %v7070_v59  ;;  %v7222_v31 = vld [vmem:[#allocation7 + $0x1c8] sm:$0xf0] }
 0x583   :  { %v4388_v48 = vpop.f32.mrf.mxu1  ;;  %v4340_v9 = vadd.f32 %v4339_v52, %v8803_v42 }
 0x584   :  { %v4484_v26 = vadd.f32 %v4483_v32, %v4435_v49  ;;  %v4293_v49 = vadd.f32 %v8807_v21, %v8805_v27  ;;  %5413 = vmatpush.bf16.msrb.mxu2 %v7153_v10  ;;  %v7637_v27 = vld [vmem:[#allocation7 + $0x1d4] sm:$0xf]  ;;  %v7230_v21 = vld [vmem:[#allocation7 + $0x1d8] sm:$0xf0]  ;;  %v7579_v10 = vld [vmem:[#allocation7 + $0x4] sm:$0xf] }
 0x585   :  { %5148 = vmatmul.bf16.gmra.mxu0 %v9409_v55  ;;  %5197 = vmatmul.bf16.gmra.mxu1 %v9410_v17  ;;  %v4389_v4 = vadd.f32 %v4388_v48, %v4340_v9  ;;  %v7017_v48 = vor.u32 %v7583_v8, %v7014_v53  ;;  %v7006_v9 = vld [vmem:[#allocation7 + $0x18] sm:$0xf0]  ;;  %v7233_v23 = vor.u32 %v7637_v27, %v7230_v21 }
 0x586   :  { %vm4540_vm9 = vcmp.gt.f32.partialorder %v4484_v26, 0.0  ;;  %v4604_v25 = vmul.f32 0.25, %v4484_v26  ;;  %5246 = vmatmul.bf16.gmra.mxu2 %v8727_v0  ;;  %5365 = vmatpush.bf16.msrb.mxu1 %v7081_v43 }
 0x587   :  { %5316 = vmatpush.bf16.msrb.mxu0 %v7017_v48  ;;  %5460 = vmatpush.bf16.msrb.mxu3 %v7233_v23 }
 0x588   :  { %v4668_v42 = vsel %vm4540_vm9, %v4484_v26, %v4604_v25  ;;  %v7145_v26 = vor.u32 %v7615_v47, %v7142_v2  ;;  %v7009_v25 = vor.u32 %v7581_v22, %v7006_v9  ;;  %v7126_v47 = vld [vmem:[#allocation7 + $0x108] sm:$0xf0]  ;;  %v9412_v22 = vld [vmem:[#allocation60_spill] sm:$0xff]  ;;  %v7635_v9 = vld [vmem:[#allocation7 + $0x1c4] sm:$0xf] }
 0x589   :  { %v4437_v50 = vpop.f32.mrf.mxu2  ;;  %v8876_v3 = vpack.c.bf16 %v4668_v42, %v4664_v13  ;;  %v7137_v42 = vor.u32 %v7613_v20, %v7134_v15  ;;  %v7225_v27 = vor.u32 %v7635_v9, %v7222_v31  ;;  %v4298_v20 = vadd.f32 %v8819_v56, %v8817_v44  ;;  %v9414_v31 = vld [vmem:[#allocation61_spill] sm:$0xff] }
 0x58a   :  { %v4486_v32 = vpop.f32.mrf.mxu3  ;;  %v4341_v52 = vpop.f32.mrf.mxu0  ;;  %v4438_v57 = vadd.f32 %v4437_v50, %v4389_v4  ;;  %5414 = vmatpush.bf16.msrb.mxu2 %v7145_v26  ;;  %v6998_v4 = vld [vmem:[#allocation7 + $0x8] sm:$0xf0]  ;;  %v7595_v50 = vld [vmem:[#allocation7 + $0x84] sm:$0xf]  ;;  %5366 = vmatpush.bf16.msrb.mxu1 %v7073_v30  ;;  %v7633_v30 = vld [vmem:[#allocation7 + $0x1b4] sm:$0xf] }
 0x58b   :  { %v4390_v63 = vpop.f32.mrf.mxu1  ;;  %5290 = vmatmul.bf16.gmra.mxu3 %v8876_v3  ;;  %v4342_v36 = vadd.f32 %v4341_v52, %v4293_v49  ;;  %v7062_v49 = vld [vmem:[#allocation7 + $0x88] sm:$0xf0]  ;;  %5317 = vmatpush.bf16.msrb.mxu0 %v7009_v25  ;;  %v7001_v40 = vor.u32 %v7579_v10, %v6998_v4 }
 0x58c   :  { %v4487_v28 = vadd.f32 %v4486_v32, %v4438_v57  ;;  %v7611_v32 = vld [vmem:[#allocation7 + $0x104] sm:$0xf]  ;;  %5461 = vmatpush.bf16.msrb.mxu3 %v7225_v27 }
 0x58d   :  { %v4391_v13 = vadd.f32 %v4390_v63, %v4342_v36  ;;  %v7065_v63 = vor.u32 %v7595_v50, %v7062_v49  ;;  %v7129_v48 = vor.u32 %v7611_v32, %v7126_v47  ;;  %v9411_v36 = vld [vmem:[#allocation33_spill] sm:$0xff]  ;;  %v7631_v50 = vld [vmem:[#allocation7 + $0x1a4] sm:$0xf] }
 0x58e   :  { %v4608_v2 = vmul.f32 0.25, %v4487_v28  ;;  %5415 = vmatpush.bf16.msrb.mxu2 %v7137_v42  ;;  %vm4544_vm10 = vcmp.gt.f32.partialorder %v4487_v28, 0.0  ;;  %v7214_v42 = vld [vmem:[#allocation7 + $0x1b8] sm:$0xf0]  ;;  %v7627_v27 = vld [vmem:[#allocation7 + $0x184] sm:$0xf] }
 0x58f   :  { %5318 = vmatpush.bf16.msrb.mxu0 %v7001_v40  ;;  %5367 = vmatpush.bf16.msrb.mxu1 %v7065_v63  ;;  %v7217_v10 = vor.u32 %v7633_v30, %v7214_v42  ;;  %v7629_v40 = vld [vmem:[#allocation7 + $0x194] sm:$0xf]  ;;  %v7198_v47 = vld [vmem:[#allocation7 + $0x198] sm:$0xf0] }
 0x590   :  { %v4672_v21 = vsel %vm4544_vm10, %v4487_v28, %v4608_v2 }
 0x591   :  { %v4439_v38 = vpop.f32.mrf.mxu2  ;;  %5462 = vmatpush.bf16.msrb.mxu3 %v7217_v10 }
 0x592   :  { %v4440_v8 = vadd.f32 %v4439_v38, %v4391_v13  ;;  %v4488_v53 = vpop.f32.mrf.mxu3  ;;  %v4344_v62 = vpop.f32.mrf.mxu0  ;;  %5416 = vmatpush.bf16.msrb.mxu2 %v7129_v48 }
 0x593   :  { %v4393_v52 = vpop.f32.mrf.mxu1  ;;  %v4345_v26 = vadd.f32 %v4344_v62, %v8815_v5 }
 0x594   :  { %v4489_v57 = vadd.f32 %v4488_v53, %v4440_v8  ;;  %v7206_v8 = vld [vmem:[#allocation7 + $0x1a8] sm:$0xf0] }
 0x595   :  { %5153 = vmatmul.bf16.gmra.mxu0 %v9411_v36  ;;  %5202 = vmatmul.bf16.gmra.mxu1 %v9412_v22  ;;  %v4394_v5 = vadd.f32 %v4393_v52, %v4345_v26  ;;  %v7209_v53 = vor.u32 %v7631_v50, %v7206_v8 }
 0x596   :  { %vm4548_vm11 = vcmp.gt.f32.partialorder %v4489_v57, 0.0  ;;  %v4612_v43 = vmul.f32 0.25, %v4489_v57  ;;  %5251 = vmatmul.bf16.gmra.mxu2 %v8735_v33 }
 0x597   :  { %5463 = vmatpush.bf16.msrb.mxu3 %v7209_v53 }
 0x598   :  { %v4676_v23 = vsel %vm4548_vm11, %v4489_v57, %v4612_v43  ;;  %v7201_v57 = vor.u32 %v7629_v40, %v7198_v47  ;;  %v9413_v43 = vld [vmem:[#allocation34_spill] sm:$0xff] }
 0x599   :  { %v4442_v25 = vpop.f32.mrf.mxu2  ;;  %v8885_v59 = vpack.c.bf16 %v4676_v23, %v4672_v21  ;;  %v7190_v21 = vld [vmem:[#allocation7 + $0x188] sm:$0xf0] }
 0x59a   :  { %v4491_v15 = vpop.f32.mrf.mxu3  ;;  %v4346_v13 = vpop.f32.mrf.mxu0  ;;  %v4443_v28 = vadd.f32 %v4442_v25, %v4394_v5  ;;  %v7193_v23 = vor.u32 %v7627_v27, %v7190_v21 }
 0x59b   :  { %v4395_v38 = vpop.f32.mrf.mxu1  ;;  %5295 = vmatmul.bf16.gmra.mxu3 %v8885_v59  ;;  %v4347_v4 = vadd.f32 %v4346_v13, %v4298_v20  ;;  %v4303_v13 = vadd.f32 %v8831_v37, %v8829_v45 }
 0x59c   :  { %v4492_v62 = vadd.f32 %v4491_v15, %v4443_v28  ;;  %5464 = vmatpush.bf16.msrb.mxu3 %v7201_v57 }
 0x59d   :  { %v4396_v49 = vadd.f32 %v4395_v38, %v4347_v4  ;;  %v8902_v4 = vld [vmem:[%s9116_s6] sm:$0x3] }
 0x59e   :  { %v4616_v63 = vmul.f32 0.25, %v4492_v62  ;;  %vm4552_vm12 = vcmp.gt.f32.partialorder %v4492_v62, 0.0  ;;  %v8905_v50 = vperm.slane %v8902_v4, 0 }
 0x5a0   :  { %v4680_v25 = vsel %vm4552_vm12, %v4492_v62, %v4616_v63  ;;  %5465 = vmatpush.bf16.msrb.mxu3 %v7193_v23 }
 0x5a1   :  { %v4444_v32 = vpop.f32.mrf.mxu2 }
 0x5a2   :  { %v4445_v44 = vadd.f32 %v4444_v32, %v4396_v49  ;;  %v4493_v56 = vpop.f32.mrf.mxu3  ;;  %v4349_v52 = vpop.f32.mrf.mxu0 }
 0x5a3   :  { %v4398_v2 = vpop.f32.mrf.mxu1  ;;  %v4350_v9 = vadd.f32 %v4349_v52, %v8827_v34 }
 0x5a4   :  { %v4494_v48 = vadd.f32 %v4493_v56, %v4445_v44 }
 0x5a5   :  { %5158 = vmatmul.bf16.gmra.mxu0 %v9413_v43  ;;  %5207 = vmatmul.bf16.gmra.mxu1 %v9414_v31  ;;  %v4399_v30 = vadd.f32 %v4398_v2, %v4350_v9 }
 0x5a6   :  { %vm4556_vm13 = vcmp.gt.f32.partialorder %v4494_v48, 0.0  ;;  %v4620_v26 = vmul.f32 0.25, %v4494_v48  ;;  %5256 = vmatmul.bf16.gmra.mxu2 %v8748_v14 }
 0x5a8   :  { %v4684_v20 = vsel %vm4556_vm13, %v4494_v48, %v4620_v26 }
 0x5a9   :  { %v4447_v5 = vpop.f32.mrf.mxu2  ;;  %v8894_v15 = vpack.c.bf16 %v4684_v20, %v4680_v25 }
 0x5aa   :  { %v4496_v42 = vpop.f32.mrf.mxu3  ;;  %v4351_v38 = vpop.f32.mrf.mxu0  ;;  %v4448_v10 = vadd.f32 %v4447_v5, %v4399_v30 }
 0x5ab   :  { %v4400_v34 = vpop.f32.mrf.mxu1  ;;  %5300 = vmatmul.bf16.gmra.mxu3 %v8894_v15  ;;  %v4352_v28 = vadd.f32 %v4351_v38, %v4303_v13 }
 0x5ac   :  { %v4497_v8 = vadd.f32 %v4496_v42, %v4448_v10 }
 0x5ad   :  { %v4401_v53 = vadd.f32 %v4400_v34, %v4352_v28 }
 0x5ae   :  { %v4624_v56 = vmul.f32 0.25, %v4497_v8  ;;  %vm4560_vm14 = vcmp.gt.f32.partialorder %v4497_v8, 0.0 }
 0x5b0   :  { %v4688_v2 = vsel %vm4560_vm14, %v4497_v8, %v4624_v56 }
 0x5b1   :  { %v4449_v62 = vpop.f32.mrf.mxu2 }
 0x5b2   :  { %v4450_v45 = vadd.f32 %v4449_v62, %v4401_v53  ;;  %v5124_v37 = vpop.f32.mrf.mxu0  ;;  %v4498_v49 = vpop.f32.mrf.mxu3 }
 0x5b3   :  { %v5125_v32 = vadd.f32 %v5124_v37, %v8905_v50  ;;  %v5173_v44 = vpop.f32.mrf.mxu1 }
 0x5b4   :  { %v4499_v52 = vadd.f32 %v4498_v49, %v4450_v45 }
 0x5b5   :  { %v5174_v40 = vadd.f32 %v5173_v44, %v5125_v32  ;;  %5319 = vmatmul.bf16.vlgmr.msrb.gmra.mxu0 %v9399_v60  ;;  %5368 = vmatmul.bf16.vlgmr.msrb.gmra.mxu1 %v9400_v11 }
 0x5b6   :  { %vm4564_vm15 = vcmp.gt.f32.partialorder %v4499_v52, 0.0  ;;  %v4628_v47 = vmul.f32 0.25, %v4499_v52  ;;  %5417 = vmatmul.bf16.vlgmr.msrb.gmra.mxu2 %v8685_v61 }
 0x5b8   :  { %v4692_v57 = vsel %vm4564_vm15, %v4499_v52, %v4628_v47 }
 0x5b9   :  { %v5222_v63 = vpop.f32.mrf.mxu2  ;;  %v8911_v48 = vpack.c.bf16 %v4692_v57, %v4688_v2 }
 0x5ba   :  { %v5223_v26 = vadd.f32 %v5222_v63, %v5174_v40  ;;  %v5126_v9 = vpop.f32.mrf.mxu0 }
 0x5bb   :  { %v5127_v27 = vadd.f32 %v5126_v9, %v8905_v50  ;;  %v5175_v21 = vpop.f32.mrf.mxu1  ;;  %5305 = vmatmul.bf16.gmra.mxu3 %v8911_v48 }
 0x5bd   :  { %v5176_v23 = vadd.f32 %v5175_v21, %v5127_v27 }
 0x5c1   :  { %v5224_v60 = vpop.f32.mrf.mxu2 }
 0x5c2   :  { %v5225_v25 = vadd.f32 %v5224_v60, %v5176_v23  ;;  %v5129_v20 = vpop.f32.mrf.mxu0 }
 0x5c3   :  { %v5130_v11 = vadd.f32 %v5129_v20, %v8905_v50  ;;  %v5178_v5 = vpop.f32.mrf.mxu1 }
 0x5c5   :  { %v5179_v61 = vadd.f32 %v5178_v5, %v5130_v11  ;;  %5324 = vmatmul.bf16.gmra.mxu0 %v9401_v18  ;;  %5373 = vmatmul.bf16.gmra.mxu1 %v9402_v35 }
 0x5c6   :  { %5422 = vmatmul.bf16.gmra.mxu2 %v8693_v39 }
 0x5c9   :  { %v5227_v13 = vpop.f32.mrf.mxu2 }
 0x5ca   :  { %v5228_v30 = vadd.f32 %v5227_v13, %v5179_v61  ;;  %v5131_v42 = vpop.f32.mrf.mxu0 }
 0x5cb   :  { %v5132_v38 = vadd.f32 %v5131_v42, %v8905_v50  ;;  %v5180_v34 = vpop.f32.mrf.mxu1  ;;  %5466 = vmatmul.bf16.vlgmr.msrb.gmra.mxu3 %v8842_v1 }
 0x5cd   :  { %v5181_v10 = vadd.f32 %v5180_v34, %v5132_v38 }
 0x5ce   :  { %v5271_v28 = vpop.f32.mrf.mxu3 }
 0x5cf   :  { %v8921_v8 = vadd.f32 %v5271_v28, %v5223_v26 }
 0x5d1   :  { %v5229_v53 = vpop.f32.mrf.mxu2  ;;  %vm5507_vm15 = vcmp.gt.f32.partialorder %v8921_v8, 0.0 }
 0x5d2   :  { %v5230_v62 = vadd.f32 %v5229_v53, %v5181_v10  ;;  %v5134_v45 = vpop.f32.mrf.mxu0 }
 0x5d3   :  { %v5135_v18 = vadd.f32 %v5134_v45, %v8905_v50  ;;  %v5183_v35 = vpop.f32.mrf.mxu1 }
 0x5d5   :  { %v5184_v37 = vadd.f32 %v5183_v35, %v5135_v18  ;;  %5329 = vmatmul.bf16.gmra.mxu0 %v9403_v6  ;;  %5378 = vmatmul.bf16.gmra.mxu1 %v9404_v58 }
 0x5d6   :  { %v5273_v39 = vpop.f32.mrf.mxu3  ;;  %5427 = vmatmul.bf16.gmra.mxu2 %v8701_v16 }
 0x5d7   :  { %v8927_v49 = vadd.f32 %v5273_v39, %v5225_v25 }
 0x5d9   :  { %v5232_v1 = vpop.f32.mrf.mxu2  ;;  %vm5509_vm14 = vcmp.gt.f32.partialorder %v8927_v49, 0.0 }
 0x5da   :  { %v5233_v32 = vadd.f32 %v5232_v1, %v5184_v37  ;;  %v5136_v44 = vpop.f32.mrf.mxu0 }
 0x5db   :  { %v5137_v56 = vadd.f32 %v5136_v44, %v8905_v50  ;;  %v5185_v52 = vpop.f32.mrf.mxu1  ;;  %5471 = vmatmul.bf16.gmra.mxu3 %v8850_v7 }
 0x5dd   :  { %v5186_v40 = vadd.f32 %v5185_v52, %v5137_v56 }
 0x5de   :  { %v5276_v47 = vpop.f32.mrf.mxu3 }
 0x5df   :  { %v8931_v2 = vadd.f32 %v5276_v47, %v5228_v30 }
 0x5e1   :  { %v5234_v6 = vpop.f32.mrf.mxu2  ;;  %vm5511_vm13 = vcmp.gt.f32.partialorder %v8931_v2, 0.0 }
 0x5e2   :  { %v5235_v57 = vadd.f32 %v5234_v6, %v5186_v40  ;;  %v5139_v63 = vpop.f32.mrf.mxu0 }
 0x5e3   :  { %v5140_v58 = vadd.f32 %v5139_v63, %v8905_v50  ;;  %v5188_v16 = vpop.f32.mrf.mxu1 }
 0x5e5   :  { %v5189_v26 = vadd.f32 %v5188_v16, %v5140_v58  ;;  %5334 = vmatmul.bf16.gmra.mxu0 %v9405_v12  ;;  %5383 = vmatmul.bf16.gmra.mxu1 %v9406_v51 }
 0x5e6   :  { %v5278_v9 = vpop.f32.mrf.mxu3  ;;  %5432 = vmatmul.bf16.gmra.mxu2 %v8709_v19 }
 0x5e7   :  { %v8937_v27 = vadd.f32 %v5278_v9, %v5230_v62 }
 0x5e9   :  { %v5237_v7 = vpop.f32.mrf.mxu2  ;;  %vm5513_vm12 = vcmp.gt.f32.partialorder %v8937_v27, 0.0 }
 0x5ea   :  { %v5238_v21 = vadd.f32 %v5237_v7, %v5189_v26  ;;  %v5141_v23 = vpop.f32.mrf.mxu0 }
 0x5eb   :  { %v5142_v60 = vadd.f32 %v5141_v23, %v8905_v50  ;;  %v5190_v25 = vpop.f32.mrf.mxu1  ;;  %5476 = vmatmul.bf16.gmra.mxu3 %v8858_v54 }
 0x5ed   :  { %v5191_v20 = vadd.f32 %v5190_v25, %v5142_v60 }
 0x5ee   :  { %v5281_v11 = vpop.f32.mrf.mxu3 }
 0x5ef   :  { %v8941_v5 = vadd.f32 %v5281_v11, %v5233_v32 }
 0x5f1   :  { %v5239_v12 = vpop.f32.mrf.mxu2  ;;  %vm5515_vm11 = vcmp.gt.f32.partialorder %v8941_v5, 0.0 }
 0x5f2   :  { %v5240_v61 = vadd.f32 %v5239_v12, %v5191_v20  ;;  %v5144_v13 = vpop.f32.mrf.mxu0 }
 0x5f3   :  { %v5193_v51 = vpop.f32.mrf.mxu1  ;;  %v5145_v18 = vadd.f32 %v5144_v13, %v8905_v50 }
 0x5f5   :  { %5339 = vmatmul.bf16.gmra.mxu0 %v9407_v24  ;;  %5388 = vmatmul.bf16.gmra.mxu1 %v9408_v41  ;;  %v5194_v39 = vadd.f32 %v5193_v51, %v5145_v18 }
 0x5f6   :  { %v5283_v19 = vpop.f32.mrf.mxu3  ;;  %5437 = vmatmul.bf16.gmra.mxu2 %v8719_v46 }
 0x5f7   :  { %v8946_v30 = vadd.f32 %v5283_v19, %v5235_v57 }
 0x5f9   :  { %v5242_v42 = vpop.f32.mrf.mxu2  ;;  %vm5517_vm10 = vcmp.gt.f32.partialorder %v8946_v30, 0.0 }
 0x5fa   :  { %v5146_v38 = vpop.f32.mrf.mxu0  ;;  %v5243_v32 = vadd.f32 %v5242_v42, %v5194_v39 }
 0x5fb   :  { %v5147_v54 = vadd.f32 %v5146_v38, %v8905_v50  ;;  %v5195_v34 = vpop.f32.mrf.mxu1  ;;  %5481 = vmatmul.bf16.gmra.mxu3 %v8866_v29 }
 0x5fd   :  { %v5196_v10 = vadd.f32 %v5195_v34, %v5147_v54 }
 0x5fe   :  { %v5286_v28 = vpop.f32.mrf.mxu3 }
 0x5ff   :  { %v8950_v53 = vadd.f32 %v5286_v28, %v5238_v21 }
 0x601   :  { %v5244_v62 = vpop.f32.mrf.mxu2  ;;  %vm5519_vm9 = vcmp.gt.f32.partialorder %v8950_v53, 0.0 }
 0x602   :  { %v5245_v24 = vadd.f32 %v5244_v62, %v5196_v10  ;;  %v8952_v45 = vpop.f32.mrf.mxu0 }
 0x603   :  { %v8954_v41 = vpop.f32.mrf.mxu1 }
 0x605   :  { %5344 = vmatmul.bf16.gmra.mxu0 %v9409_v55  ;;  %5393 = vmatmul.bf16.gmra.mxu1 %v9410_v17 }
 0x606   :  { %v5288_v46 = vpop.f32.mrf.mxu3  ;;  %5442 = vmatmul.bf16.gmra.mxu2 %v8727_v0 }
 0x607   :  { %v8960_v29 = vadd.f32 %v5288_v46, %v5240_v61 }
 0x609   :  { %v8962_v35 = vpop.f32.mrf.mxu2  ;;  %vm5521_vm8 = vcmp.gt.f32.partialorder %v8960_v29, 0.0 }
 0x60a   :  { %v8964_v37 = vpop.f32.mrf.mxu0 }
 0x60b   :  { %v8966_v1 = vpop.f32.mrf.mxu1  ;;  %5486 = vmatmul.bf16.gmra.mxu3 %v8876_v3 }
 0x60e   :  { %v5291_v55 = vpop.f32.mrf.mxu3 }
 0x60f   :  { %v8969_v44 = vadd.f32 %v5291_v55, %v5243_v32 }
 0x611   :  { %v8971_v17 = vpop.f32.mrf.mxu2  ;;  %vm5523_vm7 = vcmp.gt.f32.partialorder %v8969_v44, 0.0 }
 0x612   :  { %v5154_v0 = vpop.f32.mrf.mxu0 }
 0x613   :  { %v5203_v56 = vpop.f32.mrf.mxu1 }
 0x615   :  { %5349 = vmatmul.bf16.gmra.mxu0 %v9411_v36  ;;  %5398 = vmatmul.bf16.gmra.mxu1 %v9412_v22 }
 0x616   :  { %v5293_v52 = vpop.f32.mrf.mxu3  ;;  %5447 = vmatmul.bf16.gmra.mxu2 %v8735_v33 }
 0x617   :  { %v8976_v40 = vadd.f32 %v5293_v52, %v5245_v24 }
 0x619   :  { %v8978_v47 = vpop.f32.mrf.mxu2  ;;  %vm5525_vm6 = vcmp.gt.f32.partialorder %v8976_v40, 0.0 }
 0x61a   :  { %v5156_v3 = vpop.f32.mrf.mxu0 }
 0x61b   :  { %v5205_v6 = vpop.f32.mrf.mxu1  ;;  %5491 = vmatmul.bf16.gmra.mxu3 %v8885_v59  ;;  %v8990_v59 = vperm.slane %v8902_v4, 1  ;;  %v5157_v38 = vadd.f32 %v5156_v3, %v8905_v50  ;;  %v5152_v3 = vadd.f32 %v8964_v37, %v8905_v50 }
 0x61d   :  { %v5206_v39 = vadd.f32 %v5205_v6, %v5157_v38 }
 0x61e   :  { %v8981_v57 = vpop.f32.mrf.mxu3 }
 0x621   :  { %v5254_v63 = vpop.f32.mrf.mxu2 }
 0x622   :  { %v5159_v58 = vpop.f32.mrf.mxu0  ;;  %v5255_v52 = vadd.f32 %v5254_v63, %v5206_v39 }
 0x623   :  { %v5208_v16 = vpop.f32.mrf.mxu1  ;;  %v5160_v4 = vadd.f32 %v5159_v58, %v8905_v50 }
 0x625   :  { %5354 = vmatmul.bf16.gmra.mxu0 %v9413_v43  ;;  %5403 = vmatmul.bf16.gmra.mxu1 %v9414_v31  ;;  %v5209_v54 = vadd.f32 %v5208_v16, %v5160_v4 }
 0x626   :  { %v8984_v36 = vpop.f32.mrf.mxu3  ;;  %5452 = vmatmul.bf16.gmra.mxu2 %v8748_v14 }
 0x629   :  { %v5257_v33 = vpop.f32.mrf.mxu2 }
 0x62a   :  { %v5161_v22 = vpop.f32.mrf.mxu0  ;;  %v5258_v62 = vadd.f32 %v5257_v33, %v5209_v54 }
 0x62b   :  { %v5210_v26 = vpop.f32.mrf.mxu1  ;;  %5496 = vmatmul.bf16.gmra.mxu3 %v8894_v15  ;;  %v5162_v13 = vadd.f32 %v5161_v22, %v8905_v50 }
 0x62d   :  { %v5211_v34 = vadd.f32 %v5210_v26, %v5162_v13 }
 0x62e   :  { %v5301_v9 = vpop.f32.mrf.mxu3 }
 0x631   :  { %v5259_v7 = vpop.f32.mrf.mxu2 }
 0x632   :  { %v5320_v21 = vpop.f32.mrf.mxu0  ;;  %v5260_v24 = vadd.f32 %v5259_v7, %v5211_v34 }
 0x633   :  { %v5321_v23 = vadd.f32 %v5320_v21, %v8990_v59  ;;  %v5369_v43 = vpop.f32.mrf.mxu1 }
 0x635   :  { %v5370_v60 = vadd.f32 %v5369_v43, %v5321_v23 }
 0x636   :  { %v5303_v25 = vpop.f32.mrf.mxu3 }
 0x637   :  { %v5304_v23 = vadd.f32 %v5303_v25, %v5255_v52  ;;  %v5555_v52 = vmul.f32 0.25, %v8969_v44 }
 0x639   :  { %v5418_v20 = vpop.f32.mrf.mxu2  ;;  %vm5533_vm2 = vcmp.gt.f32.partialorder %v5304_v23, 0.0 }
 0x63a   :  { %v5419_v31 = vadd.f32 %v5418_v20, %v5370_v60  ;;  %v5322_v11 = vpop.f32.mrf.mxu0  ;;  %v5150_v60 = vadd.f32 %v8952_v45, %v8905_v50  ;;  %v5201_v20 = vadd.f32 %v8966_v1, %v5152_v3 }
 0x63b   :  { %v5323_v14 = vadd.f32 %v5322_v11, %v8990_v59  ;;  %v5371_v12 = vpop.f32.mrf.mxu1  ;;  %5501 = vmatmul.bf16.gmra.mxu3 %v8911_v48  ;;  %v5155_v48 = vadd.f32 %v5154_v0, %v8905_v50  ;;  %v5565_v11 = vmul.f32 0.25, %v5304_v23 }
 0x63d   :  { %v5372_v15 = vadd.f32 %v5371_v12, %v5323_v14  ;;  %v5204_v16 = vadd.f32 %v5203_v56, %v5155_v48  ;;  %v5250_v12 = vadd.f32 %v8971_v17, %v5201_v20 }
 0x63e   :  { %v5306_v61 = vpop.f32.mrf.mxu3 }
 0x63f   :  { %v5307_v32 = vadd.f32 %v5306_v61, %v5258_v62  ;;  %v5253_v6 = vadd.f32 %v8978_v47, %v5204_v16  ;;  %v5199_v61 = vadd.f32 %v8954_v41, %v5150_v60  ;;  %v5299_v13 = vadd.f32 %v8984_v36, %v5250_v12 }
 0x641   :  { %v5420_v51 = vpop.f32.mrf.mxu2  ;;  %v5567_v33 = vmul.f32 0.25, %v5307_v32  ;;  %vm5535_vm1 = vcmp.gt.f32.partialorder %v5307_v32, 0.0  ;;  %v5302_v56 = vadd.f32 %v5301_v9, %v5253_v6  ;;  %v5597_v9 = vsel %vm5533_vm2, %v5304_v23, %v5565_v11 }
 0x642   :  { %v5421_v19 = vadd.f32 %v5420_v51, %v5372_v15  ;;  %v5325_v42 = vpop.f32.mrf.mxu0  ;;  %v5561_v38 = vmul.f32 0.25, %v5299_v13  ;;  %vm5529_vm4 = vcmp.gt.f32.partialorder %v5299_v13, 0.0  ;;  %v5587_v23 = vsel %vm5523_vm7, %v8969_v44, %v5555_v52 }
 0x643   :  { %v5326_v10 = vadd.f32 %v5325_v42, %v8990_v59  ;;  %v5374_v28 = vpop.f32.mrf.mxu1  ;;  %v5599_v25 = vsel %vm5535_vm1, %v5307_v32, %v5567_v33  ;;  %v5563_v50 = vmul.f32 0.25, %v5302_v56  ;;  %vm5531_vm3 = vcmp.gt.f32.partialorder %v5302_v56, 0.0 }
 0x644   :  { %v5553_v33 = vmul.f32 0.25, %v8960_v29  ;;  %v5551_v6 = vmul.f32 0.25, %v8950_v53  ;;  %v5549_v11 = vmul.f32 0.25, %v8946_v30 }
 0x645   :  { %v5375_v46 = vadd.f32 %v5374_v28, %v5326_v10  ;;  %v5595_v41 = vsel %vm5531_vm3, %v5302_v56, %v5563_v50 }
 0x646   :  { %v5308_v18 = vpop.f32.mrf.mxu3  ;;  %v5585_v60 = vsel %vm5521_vm8, %v8960_v29, %v5553_v33  ;;  %v5583_v56 = vsel %vm5519_vm9, %v8950_v53, %v5551_v6 }
 0x647   :  { %v5309_v55 = vadd.f32 %v5308_v18, %v5260_v24 }
 0x649   :  { %vm5537_vm0 = vcmp.gt.f32.partialorder %v5309_v55, 0.0  ;;  %v5569_v58 = vmul.f32 0.25, %v5309_v55  ;;  %v5423_v22 = vpop.f32.mrf.mxu2 }
 0x64a   :  { %v5424_v26 = vadd.f32 %v5423_v22, %v5375_v46  ;;  %v5327_v21 = vpop.f32.mrf.mxu0  ;;  %v5593_v46 = vsel %vm5529_vm4, %v5299_v13, %v5561_v38 }
 0x64b   :  { %v5328_v7 = vadd.f32 %v5327_v21, %v8990_v59  ;;  %v5376_v43 = vpop.f32.mrf.mxu1  ;;  %v5601_v0 = vsel %vm5537_vm0, %v5309_v55, %v5569_v58 }
 0x64c   :  { %5616 = vmatpush.xpose.msra.mxu0 %v5601_v0 }
 0x64d   :  { %v5377_v63 = vadd.f32 %v5376_v43, %v5328_v7 }
 0x64e   :  { %v5467_v37 = vpop.f32.mrf.mxu3 }
 0x64f   :  { %v9007_v14 = vadd.f32 %v5467_v37, %v5419_v31  ;;  %v5248_v31 = vadd.f32 %v8962_v35, %v5199_v61  ;;  %v5547_v61 = vmul.f32 0.25, %v8941_v5 }
 0x650   :  { %5617 = vmatpush.xpose.msra.mxu0 %v5599_v25 }
 0x651   :  { %v5425_v15 = vpop.f32.mrf.mxu2  ;;  %v5297_v17 = vadd.f32 %v8981_v57, %v5248_v31  ;;  %v5557_v57 = vmul.f32 0.25, %v8976_v40 }
 0x652   :  { %v5426_v47 = vadd.f32 %v5425_v15, %v5377_v63  ;;  %v5330_v4 = vpop.f32.mrf.mxu0 }
 0x653   :  { %v5331_v45 = vadd.f32 %v5330_v4, %v8990_v59  ;;  %v5379_v1 = vpop.f32.mrf.mxu1  ;;  %v5559_v28 = vmul.f32 0.25, %v5297_v17  ;;  %vm5527_vm5 = vcmp.gt.f32.partialorder %v5297_v17, 0.0  ;;  %v5589_v3 = vsel %vm5525_vm6, %v8976_v40, %v5557_v57 }
 0x654   :  { %5618 = vmatpush.xpose.msra.mxu0 %v5597_v9  ;;  %v5581_v4 = vsel %vm5517_vm10, %v8946_v30, %v5549_v11 }
 0x655   :  { %v5380_v51 = vadd.f32 %v5379_v1, %v5331_v45  ;;  %v5579_v45 = vsel %vm5515_vm11, %v8941_v5, %v5547_v61  ;;  %v5545_v1 = vmul.f32 0.25, %v8937_v27 }
 0x656   :  { %v5469_v42 = vpop.f32.mrf.mxu3 }
 0x657   :  { %v9015_v54 = vadd.f32 %v5469_v42, %v5421_v19  ;;  %v5591_v19 = vsel %vm5527_vm5, %v5297_v17, %v5559_v28  ;;  %v5543_v42 = vmul.f32 0.25, %v8931_v2  ;;  %v5577_v17 = vsel %vm5513_vm12, %v8937_v27, %v5545_v1 }
 0x658   :  { %5619 = vmatpush.xpose.msra.mxu0 %v5595_v41 }
 0x659   :  { %v5428_v36 = vpop.f32.mrf.mxu2 }
 0x65a   :  { %v5429_v34 = vadd.f32 %v5428_v36, %v5380_v51  ;;  %v5332_v10 = vpop.f32.mrf.mxu0 }
 0x65b   :  { %v5333_v62 = vadd.f32 %v5332_v10, %v8990_v59  ;;  %v5381_v24 = vpop.f32.mrf.mxu1  ;;  %v5541_v10 = vmul.f32 0.25, %v8927_v49 }
 0x65c   :  { %5620 = vmatpush.xpose.msra.mxu0 %v5593_v46 }
 0x65d   :  { %v5382_v35 = vadd.f32 %v5381_v24, %v5333_v62  ;;  %v5539_v24 = vmul.f32 0.25, %v8921_v8  ;;  %v5573_v27 = vsel %vm5509_vm14, %v8927_v49, %v5541_v10  ;;  %vm5510_vm14 = vcmp.gt.f32.partialorder %v9015_v54, 0.0 }
 0x65e   :  { %v5472_v48 = vpop.f32.mrf.mxu3 }
 0x65f   :  { %v9019_v18 = vadd.f32 %v5472_v48, %v5424_v26  ;;  %v5571_v48 = vsel %vm5507_vm15, %v8921_v8, %v5539_v24  ;;  %vm5508_vm15 = vcmp.gt.f32.partialorder %v9007_v14, 0.0 }
 0x660   :  { %5621 = vmatpush.xpose.msra.mxu0 %v5591_v19 }
 0x661   :  { %v5430_v39 = vpop.f32.mrf.mxu2 }
 0x662   :  { %v5431_v32 = vadd.f32 %v5430_v39, %v5382_v35  ;;  %v5335_v55 = vpop.f32.mrf.mxu0 }
 0x663   :  { %v5336_v58 = vadd.f32 %v5335_v55, %v8990_v59  ;;  %v5384_v22 = vpop.f32.mrf.mxu1 }
 0x664   :  { %5622 = vmatpush.xpose.msra.mxu0 %v5589_v3 }
 0x665   :  { %v5385_v16 = vadd.f32 %v5384_v22, %v5336_v58 }
 0x666   :  { %v5474_v26 = vpop.f32.mrf.mxu3 }
 0x667   :  { %v9026_v21 = vadd.f32 %v5474_v26, %v5426_v47 }
 0x668   :  { %5623 = vmatpush.xpose.msra.mxu0 %v5587_v23 }
 0x669   :  { %v5433_v7 = vpop.f32.mrf.mxu2  ;;  %vm5514_vm12 = vcmp.gt.f32.partialorder %v9026_v21, 0.0 }
 0x66a   :  { %v5434_v43 = vadd.f32 %v5433_v7, %v5385_v16  ;;  %v5337_v0 = vpop.f32.mrf.mxu0 }
 0x66b   :  { %v5338_v40 = vadd.f32 %v5337_v0, %v8990_v59  ;;  %v5386_v63 = vpop.f32.mrf.mxu1 }
 0x66c   :  { %5624 = vmatpush.xpose.msra.mxu0 %v5585_v60 }
 0x66d   :  { %v5387_v20 = vadd.f32 %v5386_v63, %v5338_v40 }
 0x66e   :  { %v5477_v44 = vpop.f32.mrf.mxu3 }
 0x66f   :  { %v9035_v37 = vadd.f32 %v5477_v44, %v5429_v34  ;;  %v5575_v34 = vsel %vm5511_vm13, %v8931_v2, %v5543_v42  ;;  %vm5512_vm13 = vcmp.gt.f32.partialorder %v9019_v18, 0.0 }
 0x670   :  { %5625 = vmatpush.xpose.msra.mxu0 %v5583_v56 }
 0x671   :  { %v5435_v25 = vpop.f32.mrf.mxu2  ;;  %vm5516_vm11 = vcmp.gt.f32.partialorder %v9035_v37, 0.0 }
 0x672   :  { %v5436_v12 = vadd.f32 %v5435_v25, %v5387_v20  ;;  %v5340_v15 = vpop.f32.mrf.mxu0 }
 0x673   :  { %v5341_v29 = vadd.f32 %v5340_v15, %v8990_v59  ;;  %v5389_v47 = vpop.f32.mrf.mxu1 }
 0x674   :  { %5626 = vmatpush.xpose.msra.mxu0 %v5581_v4 }
 0x675   :  { %v5390_v13 = vadd.f32 %v5389_v47, %v5341_v29 }
 0x676   :  { %v5479_v53 = vpop.f32.mrf.mxu3 }
 0x677   :  { %v9044_v50 = vadd.f32 %v5479_v53, %v5431_v32 }
 0x678   :  { %5627 = vmatpush.xpose.msra.mxu0 %v5579_v45 }
 0x679   :  { %v5438_v9 = vpop.f32.mrf.mxu2  ;;  %vm5518_vm10 = vcmp.gt.f32.partialorder %v9044_v50, 0.0 }
 0x67a   :  { %v5439_v31 = vadd.f32 %v5438_v9, %v5390_v13  ;;  %v5342_v51 = vpop.f32.mrf.mxu0 }
 0x67b   :  { %v5343_v30 = vadd.f32 %v5342_v51, %v8990_v59  ;;  %v5391_v38 = vpop.f32.mrf.mxu1 }
 0x67c   :  { %5628 = vmatpush.xpose.msra.mxu0 %v5577_v17 }
 0x67d   :  { %v5392_v41 = vadd.f32 %v5391_v38, %v5343_v30 }
 0x67e   :  { %v5482_v5 = vpop.f32.mrf.mxu3 }
 0x67f   :  { %v9053_v36 = vadd.f32 %v5482_v5, %v5434_v43 }
 0x680   :  { %5629 = vmatpush.xpose.msra.mxu0 %v5575_v34 }
 0x681   :  { %v5440_v28 = vpop.f32.mrf.mxu2  ;;  %vm5520_vm9 = vcmp.gt.f32.partialorder %v9053_v36, 0.0 }
 0x682   :  { %v5441_v62 = vadd.f32 %v5440_v28, %v5392_v41  ;;  %v5345_v2 = vpop.f32.mrf.mxu0 }
 0x683   :  { %v5394_v19 = vpop.f32.mrf.mxu1  ;;  %v5346_v34 = vadd.f32 %v5345_v2, %v8990_v59 }
 0x684   :  { %5630 = vmatpush.xpose.msra.mxu0 %v5573_v27 }
 0x686   :  { %v5484_v46 = vpop.f32.mrf.mxu3 }
 0x687   :  { %v9061_v35 = vadd.f32 %v5484_v46, %v5436_v12  ;;  %v5395_v46 = vadd.f32 %v5394_v19, %v5346_v34 }
 0x688   :  { %5631 = vmatpush.xpose.msra.mxu0 %v5571_v48 }
 0x689   :  { %v5443_v32 = vpop.f32.mrf.mxu2  ;;  %vm5522_vm8 = vcmp.gt.f32.partialorder %v9061_v35, 0.0 }
 0x68a   :  { %v5347_v55 = vpop.f32.mrf.mxu0 }
 0x68b   :  { %v5396_v49 = vpop.f32.mrf.mxu1  ;;  %v5348_v42 = vadd.f32 %v5347_v55, %v8990_v59 }
 0x68d   :  { %v5397_v10 = vadd.f32 %v5396_v49, %v5348_v42 }
 0x68e   :  { %v5487_v57 = vpop.f32.mrf.mxu3 }
 0x68f   :  { %v9064_v39 = vadd.f32 %v5487_v57, %v5439_v31 }
 0x691   :  { %v5445_v22 = vpop.f32.mrf.mxu2  ;;  %v5556_v19 = vmul.f32 0.25, %v9064_v39  ;;  %vm5524_vm7 = vcmp.gt.f32.partialorder %v9064_v39, 0.0 }
 0x692   :  { %v5350_v3 = vpop.f32.mrf.mxu0  ;;  %v5446_v27 = vadd.f32 %v5445_v22, %v5397_v10 }
 0x693   :  { %v5399_v26 = vpop.f32.mrf.mxu1  ;;  %v5351_v53 = vadd.f32 %v5350_v3, %v8990_v59 }
 0x695   :  { %v5400_v30 = vadd.f32 %v5399_v26, %v5351_v53 }
 0x696   :  { %v5489_v52 = vpop.f32.mrf.mxu3 }
 0x697   :  { %v9066_v58 = vadd.f32 %v5489_v52, %v5441_v62  ;;  %v5444_v52 = vadd.f32 %v5443_v32, %v5395_v46  ;;  %v5554_v32 = vmul.f32 0.25, %v9061_v35 }
 0x699   :  { %v5448_v23 = vpop.f32.mrf.mxu2  ;;  %v5558_v49 = vmul.f32 0.25, %v9066_v58  ;;  %vm5526_vm6 = vcmp.gt.f32.partialorder %v9066_v58, 0.0 }
 0x69a   :  { %v5352_v7 = vpop.f32.mrf.mxu0  ;;  %v5449_v5 = vadd.f32 %v5448_v23, %v5400_v30 }
 0x69b   :  { %v5401_v8 = vpop.f32.mrf.mxu1  ;;  %v5353_v15 = vadd.f32 %v5352_v7, %v8990_v59  ;;  %v5590_v22 = vsel %vm5526_vm6, %v9066_v58, %v5558_v49  ;;  %v5586_v58 = vsel %vm5522_vm8, %v9061_v35, %v5554_v32  ;;  %v5546_v35 = vmul.f32 0.25, %v9026_v21 }
 0x69d   :  { %v5402_v45 = vadd.f32 %v5401_v8, %v5353_v15 }
 0x69e   :  { %v5492_v16 = vpop.f32.mrf.mxu3 }
 0x69f   :  { %v5493_v3 = vadd.f32 %v5492_v16, %v5444_v52  ;;  %v5588_v16 = vsel %vm5524_vm7, %v9064_v39, %v5556_v19  ;;  %v5550_v39 = vmul.f32 0.25, %v9044_v50 }
 0x6a1   :  { %v5450_v43 = vpop.f32.mrf.mxu2  ;;  %vm5528_vm5 = vcmp.gt.f32.partialorder %v5493_v3, 0.0 }
 0x6a2   :  { %v5355_v6 = vpop.f32.mrf.mxu0  ;;  %v5451_v31 = vadd.f32 %v5450_v43, %v5402_v45  ;;  %v5552_v43 = vmul.f32 0.25, %v9053_v36 }
 0x6a3   :  { %v5404_v63 = vpop.f32.mrf.mxu1  ;;  %v5356_v56 = vadd.f32 %v5355_v6, %v8990_v59  ;;  %v7747_v6 = vmov 0  }
 0x6a4   :  { %7653 = vset.pattern.permute.xlu0 %v7747_v6 }
 0x6a5   :  { %v5405_v61 = vadd.f32 %v5404_v63, %v5356_v56  ;;  %v5548_v63 = vmul.f32 0.25, %v9035_v37  ;;  %v5542_v56 = vmul.f32 0.25, %v9015_v54 }
 0x6a6   :  { %v5494_v33 = vpop.f32.mrf.mxu3 }
 0x6a7   :  { %v5495_v48 = vadd.f32 %v5494_v33, %v5446_v27  ;;  %v5603_v33 = vld [vmem:[%s9117_s7] sm:$0x3] }
 0x6a8   :  { %v5612_v8 = vperm.slane %v5603_v33, 0 }
 0x6a9   :  { %v5453_v60 = vpop.f32.mrf.mxu2  ;;  %v5562_v26 = vmul.f32 0.25, %v5495_v48  ;;  %vm5530_vm4 = vcmp.gt.f32.partialorder %v5495_v48, 0.0 }
 0x6aa   :  { %v5357_v20 = vpop.f32.mrf.mxu0  ;;  %v5454_v47 = vadd.f32 %v5453_v60, %v5405_v61  ;;  %5632 = vmatmul.f32.vlgmr.msra.gmra.mxu0 %v5612_v8  ;;  %v5582_v60 = vsel %vm5518_vm10, %v9044_v50, %v5550_v39 }
 0x6ab   :  { %v5358_v11 = vadd.f32 %v5357_v20, %v8990_v59  ;;  %v5406_v25 = vpop.f32.mrf.mxu1  ;;  %v5560_v59 = vmul.f32 0.25, %v5493_v3  ;;  %v5594_v2 = vsel %vm5530_vm4, %v5495_v48, %v5562_v26  ;;  %v5580_v20 = vsel %vm5516_vm11, %v9035_v37, %v5548_v63 }
 0x6ac   :  { %v5574_v37 = vsel %vm5510_vm14, %v9015_v54, %v5542_v56 }
 0x6ad   :  { %v5407_v29 = vadd.f32 %v5406_v25, %v5358_v11  ;;  %v5592_v23 = vsel %vm5528_vm5, %v5493_v3, %v5560_v59  ;;  %v5540_v11 = vmul.f32 0.25, %v9007_v14 }
 0x6ae   :  { %v5497_v0 = vpop.f32.mrf.mxu3 }
 0x6af   :  { %v5498_v28 = vadd.f32 %v5497_v0, %v5449_v5  ;;  %v5604_v0 = vld [vmem:[#allocation2] sm:$0x1]  ;;  %v5572_v25 = vsel %vm5508_vm15, %v9007_v14, %v5540_v11 }
 0x6b0   :  { %5607 = vperm.xlu0 %7653, %v5604_v0  }
 0x6b1   :  { %v5455_v12 = vpop.f32.mrf.mxu2  ;;  %v5564_v57 = vmul.f32 0.25, %v5498_v28  ;;  %vm5532_vm3 = vcmp.gt.f32.partialorder %v5498_v28, 0.0 }
 0x6b2   :  { %v5456_v4 = vadd.f32 %v5455_v12, %v5407_v29 }
 0x6b3   :  { %v5596_v7 = vsel %vm5532_vm3, %v5498_v28, %v5564_v57 }
 0x6b6   :  { %v5499_v40 = vpop.f32.mrf.mxu3 }
 0x6b7   :  { %v5500_v17 = vadd.f32 %v5499_v40, %v5451_v31  ;;  %v5584_v40 = vsel %vm5520_vm9, %v9053_v36, %v5552_v43  ;;  %v5578_v36 = vsel %vm5514_vm12, %v9026_v21, %v5546_v35  ;;  %v5613_v21 = vperm.slane %v5603_v33, 1 }
 0x6b9   :  { %v5566_v62 = vmul.f32 0.25, %v5500_v17  ;;  %vm5534_vm2 = vcmp.gt.f32.partialorder %v5500_v17, 0.0 }
 0x6bb   :  { %v5598_v55 = vsel %vm5534_vm2, %v5500_v17, %v5566_v62 }
 0x6be   :  { %v5502_v44 = vpop.f32.mrf.mxu3 }
 0x6bf   :  { %v5503_v1 = vadd.f32 %v5502_v44, %v5454_v47  ;;  %v5544_v44 = vmul.f32 0.25, %v9019_v18 }
 0x6c1   :  { %v5568_v38 = vmul.f32 0.25, %v5503_v1  ;;  %vm5536_vm1 = vcmp.gt.f32.partialorder %v5503_v1, 0.0  ;;  %v5576_v50 = vsel %vm5512_vm13, %v9019_v18, %v5544_v44 }
 0x6c3   :  { %v5600_v24 = vsel %vm5536_vm1, %v5503_v1, %v5568_v38 }
 0x6c6   :  { %v5504_v13 = vpop.f32.mrf.mxu3 }
 0x6c7   :  { %v5505_v9 = vadd.f32 %v5504_v13, %v5456_v4 }
 0x6c9   :  { %vm5538_vm0 = vcmp.gt.f32.partialorder %v5505_v9, 0.0  ;;  %v5570_v51 = vmul.f32 0.25, %v5505_v9 }
 0x6cb   :  { %v5602_v41 = vsel %vm5538_vm0, %v5505_v9, %v5570_v51 }
 0x6cc   :  { %5636 = vmatpush.xpose.msra.mxu1 %v5602_v41 }
 0x6d0   :  { %5637 = vmatpush.xpose.msra.mxu1 %v5600_v24 }
 0x6d4   :  { %5638 = vmatpush.xpose.msra.mxu1 %v5598_v55 }
 0x6d8   :  { %5639 = vmatpush.xpose.msra.mxu1 %v5596_v7 }
 0x6dc   :  { %5640 = vmatpush.xpose.msra.mxu1 %v5594_v2 }
 0x6e0   :  { %5641 = vmatpush.xpose.msra.mxu1 %v5592_v23 }
 0x6e4   :  { %5642 = vmatpush.xpose.msra.mxu1 %v5590_v22 }
 0x6e8   :  { %5643 = vmatpush.xpose.msra.mxu1 %v5588_v16 }
 0x6ec   :  { %5644 = vmatpush.xpose.msra.mxu1 %v5586_v58 }
 0x6f0   :  { %5645 = vmatpush.xpose.msra.mxu1 %v5584_v40 }
 0x6f4   :  { %5646 = vmatpush.xpose.msra.mxu1 %v5582_v60 }
 0x6f8   :  { %5647 = vmatpush.xpose.msra.mxu1 %v5580_v20 }
 0x6fc   :  { %5648 = vmatpush.xpose.msra.mxu1 %v5578_v36 }
 0x700   :  { %5649 = vmatpush.xpose.msra.mxu1 %v5576_v50 }
 0x704   :  { %5650 = vmatpush.xpose.msra.mxu1 %v5574_v37 }
 0x708   :  { %5651 = vmatpush.xpose.msra.mxu1 %v5572_v25 }
 0x70b   :  { %5652 = vmatmul.f32.vlgmr.msra.gmra.mxu1 %v5613_v21 }
 0x722   :  { %v5608_v12 = vpop.permute.xlu0 %5607 }
 0x723   :  { %v5610_v15 = vperm.slane %v5608_v12, 0 }
 0x727   :  { %v5633_v61 = vpop.f32.mrf.mxu0 }
 0x728   :  { %v5634_v29 = vadd.f32 %v5633_v61, %v5610_v15 }
 0x788   :  { %v5653_v18 = vpop.f32.mrf.mxu1 }
 0x789   :  { %v5654_v47 = vadd.f32 %v5653_v18, %v5634_v29 }
 0x78b   :  { %v7250_v4 = vmul.f32 -1.442695, %v5654_v47 }
 0x78d   :  { %7654 = vpow2.f32 %v7250_v4 }
 0x793   :  { %v7655_v13 = vpop.eup %7654 }
 0x794   :  { %v5659_v53 = vadd.f32 1.0, %v7655_v13 }
 0x796   :  { %7656 = vrcp.f32 %v5659_v53  ;;  %v5671_v9 = vand.u32 2147483648, %v5659_v53  ;;  %v5669_v14 = vand.u32 2147483647, %v5659_v53  ;;  %vm5665_vm1 = vweird.f32 %v5659_v53 }
 0x798   :  { %v5672_v42 = vor.u32 1.1754944e-38, %v5671_v9  ;;  %vm5670_vm3 = vcmp.eq.f32.partialorder %v5669_v14, 8.507059e+37 }
 0x79c   :  { %v7657_v54 = vpop.eup %7656 }
 0x79d   :  { %v5661_v45 = vmul.f32 %v7657_v54, %v5659_v53  ;;  %vm5666_vm0 = vweird.f32 %v7657_v54 }
 0x79e   :  { %vm5667_vm2 = vmor %vm5665_vm1, %vm5666_vm0 }
 0x79f   :  { %v5662_v1 = vsub.f32 1.0, %v5661_v45 }
 0x7a1   :  { %v5663_v31 = vmul.f32 %v7657_v54, %v5662_v1 }
 0x7a3   :  { %v5664_v51 = vadd.f32 %v7657_v54, %v5663_v31 }
 0x7a5   :  { %v5668_v30 = vsel %vm5667_vm2, %v7657_v54, %v5664_v51 }
 0x7a6   :  { %v5673_v17 = vsel %vm5670_vm3, %v5672_v42, %v5668_v30 }
 0x7a7   :  { %5675 = vst [vmem:[%s9119_s9] sm:$0x1] %v5673_v17 }
 0x7a8   :  { %5680 = vsyncpa [#allocation4], 1 }
 0x7a9   :  { %5681 = vsyncpa [#allocation6], 1 }

</bundles_post_ra>
